<compile_context>
chip_gen: v5e
topology: v5e:2x2
jax: 0.10.0
libtpu: 0.0.40
codegen_flags: <defaults>
</compile_context>

<pallas_src>
import math
import functools

import jax
import jax.numpy as jnp
from jax.experimental import pallas as pl
from jax.experimental.pallas import tpu as pltpu


PROJ_NAMES = ("Wq", "Wk", "Wv", "W1", "W2", "W3", "W4", "W5", "W6")


# ----------------------------------------------------------------------------
# Pallas kernel: Bt batch elements per grid step, all heads fused
# ----------------------------------------------------------------------------
def _hmha_kernel(h_ref, wbig_ref, wout_ref, o_ref, *, A, P, H, dk, head_stride):
    """Heterogeneous MHA for a tile of Bt batch elements.

    h_ref   : (Bt, G, E)              node embeddings
    wbig_ref: (E, H*head_stride) bf16 head-major [Wq|Wk|Wv|W1..W6|pad] per head,
                                      1/sqrt(dk) already folded into query weights
    wout_ref: (H*dk, E)          bf16 output projection (head-major rows)
    o_ref   : (Bt, G, E)              attention output (f32)
    """
    Bt, G, E = h_ref.shape
    HD = H * dk
    f32 = jnp.float32
    bf16 = jnp.bfloat16
    NEG = jnp.float32(-1e30)  # stands in for -inf: exp(NEG - m) == 0 exactly in f32

    # --- one shared projection matmul for all 9 weights x all heads x Bt elems
    x = h_ref[...].astype(bf16).reshape(Bt * G, E)
    proj = jnp.dot(x, wbig_ref[...], preferred_element_type=f32)       # (Bt*G, H*hs)
    proj = proj.reshape(Bt, G, H * head_stride)

    # --- row-type masks (static; hoisted out of the per-head loop) ------------
    row = jax.lax.broadcasted_iota(jnp.int32, (G, 1), 0)
    is_agent = row < A                                                 # (G, 1)
    is_pick = (row >= A) & (row < A + P)                               # (G, 1)

    # pair scatter mask: pick row i pairs with column i+P (a delivery key/value),
    # delivery row i pairs with column i-P (a pickup key/value); no agent rows.
    row_gg = jax.lax.broadcasted_iota(jnp.int32, (G, G), 0)
    col_gg = jax.lax.broadcasted_iota(jnp.int32, (G, G), 1)
    partner = jnp.where(row_gg < A + P, row_gg + P, row_gg - P)
    pair_mask = (col_gg == partner) & (row_gg >= A)                    # (G, G)

    def sl(hh, idx):  # static lane slice of one projection of one head
        s = hh * head_stride + idx * dk
        return proj[:, :, s:s + dk]                                    # (Bt, G, dk) f32

    head_outs = []
    for hh in range(H):                                                # static unroll, H small
        Q, K, V = sl(hh, 0), sl(hh, 1), sl(hh, 2)
        Q1, Q2, Q3 = sl(hh, 3), sl(hh, 4), sl(hh, 5)
        Q4, Q5, Q6 = sl(hh, 6), sl(hh, 7), sl(hh, 8)

        Qb, Kb, Vb = Q.astype(bf16), K.astype(bf16), V.astype(bf16)
        K_pick_b, K_dlv_b = Kb[:, A:A + P, :], Kb[:, A + P:, :]

        # ----- logits (norm factor already folded into query weights) --------
        comp = jnp.einsum('bqd,bkd->bqk', Qb, Kb,
                          preferred_element_type=f32)                  # (Bt, G, G)

        # Paired pick<->delivery logit as a row-wise dot (f32 VPU + lane reduce).
        # Agent rows get filler keys; they are masked to NEG below.
        K_paired = jnp.concatenate(
            [K[:, :A, :], K[:, A + P:, :], K[:, A:A + P, :]], axis=1)  # (Bt, G, dk)
        Q_pair = jnp.where(is_pick, Q1, Q4)                            # pick: W1, dlv: W4
        e_pair = jnp.where(
            is_agent, NEG,
            jnp.sum(Q_pair * K_paired, axis=-1, keepdims=True))        # (Bt, G, 1)

        # Pick rows query all-picks with W2 / all-deliveries with W3;
        # delivery rows with W6 / W5.  Row sets are disjoint -> merge queries.
        Q_to_pick = jnp.where(is_pick, Q2, Q6).astype(bf16)
        Q_to_dlv = jnp.where(is_pick, Q3, Q5).astype(bf16)
        e_to_pick = jnp.where(
            is_agent, NEG,
            jnp.einsum('bqd,bkd->bqk', Q_to_pick, K_pick_b,
                       preferred_element_type=f32))                    # (Bt, G, P)
        e_to_dlv = jnp.where(
            is_agent, NEG,
            jnp.einsum('bqd,bkd->bqk', Q_to_dlv, K_dlv_b,
                       preferred_element_type=f32))                    # (Bt, G, P)

        # ----- joint softmax over [comp | pair | to_pick | to_dlv] -----------
        m = jnp.max(comp, axis=-1, keepdims=True)
        m = jnp.maximum(m, e_pair)
        m = jnp.maximum(m, jnp.max(e_to_pick, axis=-1, keepdims=True))
        m = jnp.maximum(m, jnp.max(e_to_dlv, axis=-1, keepdims=True))

        x_comp = jnp.exp(comp - m)
        x_pair = jnp.exp(e_pair - m)                                   # 0 on agent rows
        x_tp = jnp.exp(e_to_pick - m)
        x_td = jnp.exp(e_to_dlv - m)

        # Fold the paired weight into the (G) block via the static scatter mask,
        # so the value aggregation is a single matmul.
        w_comp = x_comp + jnp.where(pair_mask, x_pair, 0.0)            # (Bt, G, G)
        X_all = jnp.concatenate([w_comp, x_tp, x_td], axis=-1)         # (Bt, G, G+2P)

        denom = jnp.sum(X_all, axis=-1, keepdims=True)
        inv = pl.reciprocal(denom, approx=True)                        # EUP slot

        V_cat = jnp.concatenate(
            [Vb, Vb[:, A:A + P, :], Vb[:, A + P:, :]], axis=1)         # (Bt, G+2P, dk)
        hd = jnp.einsum('bqk,bkd->bqd', X_all.astype(bf16), V_cat,
                        preferred_element_type=f32)                    # (Bt, G, dk)
        head_outs.append(hd * inv)

    # ----- single merged output projection over all heads --------------------
    hd_all = jnp.concatenate(head_outs, axis=-1)                       # (Bt, G, H*dk)
    out = jnp.dot(hd_all.astype(bf16).reshape(Bt * G, HD), wout_ref[...],
                  preferred_element_type=f32)                          # (Bt*G, E)
    o_ref[...] = out.reshape(Bt, G, E)                                 # single store


# ----------------------------------------------------------------------------
# Weight packing (do ONCE at setup, not per forward call)
# ----------------------------------------------------------------------------
def pack_mha_params(params, dtype=jnp.bfloat16):
    """Pack the 9 per-head projections into one lane-dense, head-major slab.

    Each head's [Wq|Wk|Wv|W1..W6] occupies a 128-aligned lane group; the
    1/sqrt(dk) norm factor is folded into the query-side weights.
    Returns (w_big, w_out, meta).
    """
    H, E, dk = params["Wq"].shape
    nf = 1.0 / math.sqrt(dk)
    head_w = 9 * dk
    head_stride = ((head_w + 127) // 128) * 128
    blocks = []
    for h in range(H):
        cols = []
        for name in PROJ_NAMES:
            w = params[name][h]
            if name not in ("Wk", "Wv"):          # fold norm factor into query side
                w = w * nf
            cols.append(w)
        blk = jnp.concatenate(cols, axis=1)       # (E, 9*dk)
        if head_stride > head_w:
            blk = jnp.pad(blk, ((0, 0), (0, head_stride - head_w)))
        blocks.append(blk)
    w_big = jnp.concatenate(blocks, axis=1).astype(dtype)   # (E, H*head_stride)
    w_out = params["Wout"].reshape(H * dk, E).astype(dtype) # (H*dk, E)
    meta = dict(n_heads=H, key_dim=dk, embed_dim=E, head_stride=head_stride)
    return w_big, w_out, meta


def _pick_batch_tile(B, target=16):
    """Largest divisor of B <= target, preferring >=2 grid steps (v7x megacore)."""
    divs = [d for d in range(1, B + 1) if B % d == 0 and d <= target]
    multi = [d for d in divs if B // d >= 2]
    return max(multi) if multi else max(divs)


# ----------------------------------------------------------------------------
# Wrappers
# ----------------------------------------------------------------------------
def hetero_mha_packed(h, w_big, w_out, *, num_agents, n_heads, key_dim,
                      head_stride, batch_tile=None):
    """HeterogeneousMHA forward with q == h (encoder self-attention), no mask."""
    # TODO(synk): optional attention mask and distinct q/h inputs are not
    # implemented (the HAM encoder always calls this with q=h, mask=None).
    B, G, E = h.shape
    A = num_agents
    assert (G - A) % 2 == 0, "graph_size - num_agents must be even (pick/delivery pairs)"
    P = (G - A) // 2

    Bt = batch_tile if batch_tile is not None else _pick_batch_tile(B)
    assert B % Bt == 0, f"batch {B} not divisible by batch tile {Bt}"
    grid = (B // Bt,)

    kernel = functools.partial(_hmha_kernel, A=A, P=P, H=n_heads, dk=key_dim,
                               head_stride=head_stride)

    # Explicit VMEM budget: double-buffered in/out activation blocks + resident
    # weights (v5e's default scoped limit is only 16 MiB).
    blk_bytes = Bt * G * E * 4
    w_bytes = (w_big.size + w_out.size) * w_big.dtype.itemsize
    vmem_limit = int(min(96 * 1024 * 1024,
                         max(32 * 1024 * 1024, 8 * blk_bytes + 2 * w_bytes)))

    return pl.pallas_call(
        kernel,
        out_shape=jax.ShapeDtypeStruct((B, G, E), jnp.float32),
        grid=grid,
        in_specs=[
            pl.BlockSpec((Bt, G, E), lambda b: (b, 0, 0)),      # activation tile
            pl.BlockSpec(w_big.shape, lambda b: (0, 0)),        # packed projections
            pl.BlockSpec(w_out.shape, lambda b: (0, 0)),        # packed Wout
        ],
        out_specs=pl.BlockSpec((Bt, G, E), lambda b: (b, 0, 0)),
        compiler_params=pltpu.CompilerParams(
            dimension_semantics=("parallel",),                  # both TCs on v7x
            vmem_limit_bytes=vmem_limit),
    )(h, w_big, w_out)


def hetero_mha(h, mha_params, num_agents, batch_tile=None):
    """Convenience wrapper: packs weights then calls the kernel.  For repeated
    calls, pack once with pack_mha_params() and call hetero_mha_packed()."""
    w_big, w_out, meta = pack_mha_params(mha_params)
    return hetero_mha_packed(h, w_big, w_out, num_agents=num_agents,
                             n_heads=meta["n_heads"], key_dim=meta["key_dim"],
                             head_stride=meta["head_stride"],
                             batch_tile=batch_tile)


# ----------------------------------------------------------------------------
# Pure-JAX reference (mirrors the PyTorch forward literally) for verification
# ----------------------------------------------------------------------------
def hetero_mha_reference(h, p, num_agents):
    B, G, E = h.shape
    H, _, dk = p["Wq"].shape
    A = num_agents
    P = (G - A) // 2
    nf = 1.0 / math.sqrt(dk)
    prec = jax.lax.Precision.HIGHEST
    NEG = -jnp.inf

    def proj(x, W):  # (B,N,E),(H,E,dk) -> (H,B,N,dk)
        return jnp.einsum("bne,hed->hbnd", x, W, precision=prec)

    Q, K, V = proj(h, p["Wq"]), proj(h, p["Wk"]), proj(h, p["Wv"])
    h_pick, h_dlv = h[:, A:A + P, :], h[:, A + P:, :]
    Q1, Q2, Q3 = proj(h_pick, p["W1"]), proj(h_pick, p["W2"]), proj(h_pick, p["W3"])
    Q4, Q5, Q6 = proj(h_dlv, p["W4"]), proj(h_dlv, p["W5"]), proj(h_dlv, p["W6"])
    K_pick, K_dlv = K[:, :, A:A + P, :], K[:, :, A + P:, :]
    V_pick, V_dlv = V[:, :, A:A + P, :], V[:, :, A + P:, :]

    def qk(a, b):
        return nf * jnp.einsum("hbqd,hbkd->hbqk", a, b, precision=prec)

    comp = qk(Q, K)
    c_pd = nf * jnp.sum(Q1 * K_dlv, -1)
    c_dp = nf * jnp.sum(Q4 * K_pick, -1)
    c_pap, c_pad = qk(Q2, K_pick), qk(Q3, K_dlv)
    c_dad, c_dap = qk(Q5, K_dlv), qk(Q6, K_pick)

    def pad_col(x, lead, trail):
        z1 = jnp.full((H, B, lead), NEG, jnp.float32)
        z2 = jnp.full((H, B, trail), NEG, jnp.float32)
        return jnp.concatenate([z1, x, z2], axis=2)[..., None]

    def pad_blk(x, lead, trail):
        z1 = jnp.full((H, B, lead, P), NEG, jnp.float32)
        z2 = jnp.full((H, B, trail, P), NEG, jnp.float32)
        return jnp.concatenate([z1, x, z2], axis=2)

    compat = jnp.concatenate(
        [comp, pad_col(c_pd, A, P), pad_blk(c_pap, A, P), pad_blk(c_pad, A, P),
         pad_col(c_dp, A + P, 0), pad_blk(c_dad, A + P, 0), pad_blk(c_dap, A + P, 0)],
        axis=-1)
    attn = jax.nn.softmax(compat, axis=-1)

    V_add_dlv = jnp.concatenate(
        [jnp.zeros((H, B, A, dk), jnp.float32), V_dlv,
         jnp.zeros((H, B, P, dk), jnp.float32)], axis=2)
    V_add_pick = jnp.concatenate(
        [jnp.zeros((H, B, A + P, dk), jnp.float32), V_pick], axis=2)

    def av(a, v):
        return jnp.einsum("hbqk,hbkd->hbqd", a, v, precision=prec)

    heads = av(attn[..., :G], V)
    heads = heads + attn[..., G:G + 1] * V_add_dlv
    heads = heads + av(attn[..., G + 1:G + 1 + P], V_pick)
    heads = heads + av(attn[..., G + 1 + P:G + 1 + 2 * P], V_dlv)
    heads = heads + attn[..., G + 1 + 2 * P:G + 2 + 2 * P] * V_add_pick
    heads = heads + av(attn[..., G + 2 + 2 * P:G + 2 + 3 * P], V_dlv)
    heads = heads + av(attn[..., G + 2 + 3 * P:], V_pick)

    heads_cat = jnp.transpose(heads, (1, 2, 0, 3)).reshape(B, G, H * dk)
    return jnp.einsum("bgd,de->bge", heads_cat, p["Wout"].reshape(H * dk, E),
                      precision=prec)


# ----------------------------------------------------------------------------
# Deterministic parameter construction (mirrors HeterogeneousMHA.init_parameters)
# ----------------------------------------------------------------------------
def make_mha_params(key, embed_dim, num_heads):
    dk = embed_dim // num_heads
    keys = jax.random.split(key, len(PROJ_NAMES) + 1)
    params = {}
    stdv = 1.0 / math.sqrt(dk)
    for k, name in zip(keys[:-1], PROJ_NAMES):
        params[name] = jax.random.uniform(
            k, (num_heads, embed_dim, dk), jnp.float32, -stdv, stdv)
    stdv_o = 1.0 / math.sqrt(embed_dim)
    params["Wout"] = jax.random.uniform(
        keys[-1], (num_heads, dk, embed_dim), jnp.float32, -stdv_o, stdv_o)
    return params


if __name__ == "__main__":
    BATCH = 8
    NUM_AGENTS = 4
    N_PICK = 6
    GRAPH_SIZE = NUM_AGENTS + 2 * N_PICK    # 16
    EMBED_DIM = 32                          # input_dim == embed_dim
    NUM_HEADS = 4                           # key_dim = val_dim = 8

    root = jax.random.PRNGKey(0)
    k_param, k_x = jax.random.split(root)
    params = make_mha_params(k_param, EMBED_DIM, NUM_HEADS)
    h = jax.random.normal(k_x, (BATCH, GRAPH_SIZE, EMBED_DIM), jnp.float32)

    # Pack weights once (hoisted out of the per-call path), then jit the apply.
    w_big, w_out, meta = pack_mha_params(params)
    run = jax.jit(functools.partial(
        hetero_mha_packed, num_agents=NUM_AGENTS, n_heads=meta["n_heads"],
        key_dim=meta["key_dim"], head_stride=meta["head_stride"]))

    out = run(h, w_big, w_out)
    jax.block_until_ready(out)

    ref = hetero_mha_reference(h, params, NUM_AGENTS)
    jax.block_until_ready(ref)

    assert out.shape == (BATCH, GRAPH_SIZE, EMBED_DIM)
    assert bool(jnp.all(jnp.isfinite(out)))
    max_err = float(jnp.max(jnp.abs(out - ref)))
    # bf16 MXU operands + approx reciprocal: tolerance relaxed vs pure-f32 ref.
    assert max_err < 3e-2, f"max abs err {max_err}"
    print("KERNEL_OK")
</pallas_src>

<mosaic_0001>
module attributes {stable_mosaic.version = 11 : i64} {
  func.func @_hmha_kernel(%arg0: i32, %arg1: memref<4x16x32xf32, #tpu.memory_space<vmem>>, %arg2: memref<32x512xbf16, #tpu.memory_space<vmem>>, %arg3: memref<32x32xbf16, #tpu.memory_space<vmem>>, %arg4: memref<4x16x32xf32, #tpu.memory_space<vmem>>) attributes {dimension_semantics = [#tpu.dimension_semantics<parallel>], iteration_bounds = array<i64: 2>, scalar_prefetch = 0 : i64, scratch_operands = 0 : i64, tpu.core_type = #tpu.core_type<tc>, window_params = [{transform_indices = @transform_0, window_bounds = array<i64: 4, 16, 32>}, {pipeline_mode = #tpu.pipeline_mode<synchronous>, transform_indices = @transform_1, window_bounds = array<i64: 32, 512>}, {pipeline_mode = #tpu.pipeline_mode<synchronous>, transform_indices = @transform_2, window_bounds = array<i64: 32, 32>}, {transform_indices = @transform_3, window_bounds = array<i64: 4, 16, 32>}]} {
    %c0 = arith.constant 0 : index
    %c0_0 = arith.constant 0 : index
    %c0_1 = arith.constant 0 : index
    %0 = vector.load %arg1[%c0, %c0_0, %c0_1] : memref<4x16x32xf32, #tpu.memory_space<vmem>>, vector<4x16x32xf32>
    %1 = arith.truncf %0 : vector<4x16x32xf32> to vector<4x16x32xbf16>
    %2 = vector.shape_cast %1 : vector<4x16x32xbf16> to vector<64x32xbf16>
    %c0_2 = arith.constant 0 : index
    %c0_3 = arith.constant 0 : index
    %3 = vector.load %arg2[%c0_2, %c0_3] : memref<32x512xbf16, #tpu.memory_space<vmem>>, vector<32x512xbf16>
    %cst = arith.constant dense<0.000000e+00> : vector<64x512xf32>
    %4 = tpu.matmul %2, %3, %cst {dimension_numbers = #tpu.dot_dimension_numbers<[1], [0], [0], [1], [0, 0, 1, 1], [], []>} : vector<64x32xbf16>, vector<32x512xbf16>, vector<64x512xf32> -> vector<64x512xf32>
    %5 = vector.shape_cast %4 : vector<64x512xf32> to vector<4x16x512xf32>
    %6 = tpu.iota {dimensions = array<i32: 0>} : vector<16x1xi32>
    %c4_i32 = arith.constant 4 : i32
    %7 = vector.broadcast %c4_i32 : i32 to vector<16x1xi32>
    %8 = arith.cmpi slt, %6, %7 : vector<16x1xi32>
    %c4_i32_4 = arith.constant 4 : i32
    %9 = vector.broadcast %c4_i32_4 : i32 to vector<16x1xi32>
    %10 = arith.cmpi sge, %6, %9 : vector<16x1xi32>
    %c10_i32 = arith.constant 10 : i32
    %11 = vector.broadcast %c10_i32 : i32 to vector<16x1xi32>
    %12 = arith.cmpi slt, %6, %11 : vector<16x1xi32>
    %13 = arith.andi %10, %12 : vector<16x1xi1>
    %14 = tpu.iota {dimensions = array<i32: 0>} : vector<16x16xi32>
    %15 = tpu.iota {dimensions = array<i32: 1>} : vector<16x16xi32>
    %c10_i32_5 = arith.constant 10 : i32
    %16 = vector.broadcast %c10_i32_5 : i32 to vector<16x16xi32>
    %17 = arith.cmpi slt, %14, %16 : vector<16x16xi32>
    %c6_i32 = arith.constant 6 : i32
    %18 = vector.broadcast %c6_i32 : i32 to vector<16x16xi32>
    %19 = arith.addi %14, %18 : vector<16x16xi32>
    %c6_i32_6 = arith.constant 6 : i32
    %20 = vector.broadcast %c6_i32_6 : i32 to vector<16x16xi32>
    %21 = arith.subi %14, %20 : vector<16x16xi32>
    %22 = arith.select %17, %19, %21 : vector<16x16xi1>, vector<16x16xi32>
    %23 = arith.cmpi eq, %15, %22 : vector<16x16xi32>
    %c4_i32_7 = arith.constant 4 : i32
    %24 = vector.broadcast %c4_i32_7 : i32 to vector<16x16xi32>
    %25 = arith.cmpi sge, %14, %24 : vector<16x16xi32>
    %26 = arith.andi %23, %25 : vector<16x16xi1>
    %27 = vector.extract_strided_slice %5 {offsets = [0, 0, 0], sizes = [4, 16, 8], strides = [1, 1, 1]} : vector<4x16x512xf32> to vector<4x16x8xf32>
    %28 = vector.extract_strided_slice %5 {offsets = [0, 0, 8], sizes = [4, 16, 8], strides = [1, 1, 1]} : vector<4x16x512xf32> to vector<4x16x8xf32>
    %29 = vector.extract_strided_slice %5 {offsets = [0, 0, 16], sizes = [4, 16, 8], strides = [1, 1, 1]} : vector<4x16x512xf32> to vector<4x16x8xf32>
    %30 = vector.extract_strided_slice %5 {offsets = [0, 0, 24], sizes = [4, 16, 8], strides = [1, 1, 1]} : vector<4x16x512xf32> to vector<4x16x8xf32>
    %31 = vector.extract_strided_slice %5 {offsets = [0, 0, 32], sizes = [4, 16, 8], strides = [1, 1, 1]} : vector<4x16x512xf32> to vector<4x16x8xf32>
    %32 = vector.extract_strided_slice %5 {offsets = [0, 0, 40], sizes = [4, 16, 8], strides = [1, 1, 1]} : vector<4x16x512xf32> to vector<4x16x8xf32>
    %33 = vector.extract_strided_slice %5 {offsets = [0, 0, 48], sizes = [4, 16, 8], strides = [1, 1, 1]} : vector<4x16x512xf32> to vector<4x16x8xf32>
    %34 = vector.extract_strided_slice %5 {offsets = [0, 0, 56], sizes = [4, 16, 8], strides = [1, 1, 1]} : vector<4x16x512xf32> to vector<4x16x8xf32>
    %35 = vector.extract_strided_slice %5 {offsets = [0, 0, 64], sizes = [4, 16, 8], strides = [1, 1, 1]} : vector<4x16x512xf32> to vector<4x16x8xf32>
    %36 = arith.truncf %27 : vector<4x16x8xf32> to vector<4x16x8xbf16>
    %37 = arith.truncf %28 : vector<4x16x8xf32> to vector<4x16x8xbf16>
    %38 = arith.truncf %29 : vector<4x16x8xf32> to vector<4x16x8xbf16>
    %39 = vector.extract_strided_slice %37 {offsets = [0, 4, 0], sizes = [4, 6, 8], strides = [1, 1, 1]} : vector<4x16x8xbf16> to vector<4x6x8xbf16>
    %40 = vector.extract_strided_slice %37 {offsets = [0, 10, 0], sizes = [4, 6, 8], strides = [1, 1, 1]} : vector<4x16x8xbf16> to vector<4x6x8xbf16>
    "tpu.trace_start"() <{level = 10 : i32, message = "bqd,bkd->bqk"}> : () -> ()
    %cst_8 = arith.constant dense<0.000000e+00> : vector<4x16x16xf32>
    %41 = tpu.matmul %36, %37, %cst_8 {dimension_numbers = #tpu.dot_dimension_numbers<[2], [2], [1], [1], [0, 0, 0, 1, 1, 1], [0], [0]>} : vector<4x16x8xbf16>, vector<4x16x8xbf16>, vector<4x16x16xf32> -> vector<4x16x16xf32>
    "tpu.trace_stop"() : () -> ()
    %42 = vector.extract_strided_slice %28 {offsets = [0, 0, 0], sizes = [4, 4, 8], strides = [1, 1, 1]} : vector<4x16x8xf32> to vector<4x4x8xf32>
    %43 = vector.extract_strided_slice %28 {offsets = [0, 10, 0], sizes = [4, 6, 8], strides = [1, 1, 1]} : vector<4x16x8xf32> to vector<4x6x8xf32>
    %44 = vector.extract_strided_slice %28 {offsets = [0, 4, 0], sizes = [4, 6, 8], strides = [1, 1, 1]} : vector<4x16x8xf32> to vector<4x6x8xf32>
    %45 = tpu.concatenate %42, %43, %44 in 1 : vector<4x4x8xf32>, vector<4x6x8xf32>, vector<4x6x8xf32> -> vector<4x16x8xf32>
    %46 = vector.shape_cast %13 : vector<16x1xi1> to vector<1x16x1xi1>
    %47 = vector.broadcast %46 : vector<1x16x1xi1> to vector<4x16x8xi1>
    %48 = arith.select %47, %30, %33 : vector<4x16x8xi1>, vector<4x16x8xf32>
    %49 = arith.mulf %48, %45 : vector<4x16x8xf32>
    %cst_9 = arith.constant dense<0.000000e+00> : vector<4x16xf32>
    %50 = vector.multi_reduction <add>, %49, %cst_9 [2] : vector<4x16x8xf32> to vector<4x16xf32>
    %51 = vector.shape_cast %50 : vector<4x16xf32> to vector<4x16x1xf32>
    %cst_10 = arith.constant -1.000000e+30 : f32
    %52 = vector.shape_cast %8 : vector<16x1xi1> to vector<1x16x1xi1>
    %53 = vector.broadcast %52 : vector<1x16x1xi1> to vector<4x16x1xi1>
    %54 = vector.broadcast %cst_10 : f32 to vector<4x16x1xf32>
    %55 = arith.select %53, %54, %51 : vector<4x16x1xi1>, vector<4x16x1xf32>
    %56 = vector.shape_cast %13 : vector<16x1xi1> to vector<1x16x1xi1>
    %57 = vector.broadcast %56 : vector<1x16x1xi1> to vector<4x16x8xi1>
    %58 = arith.select %57, %31, %35 : vector<4x16x8xi1>, vector<4x16x8xf32>
    %59 = arith.truncf %58 : vector<4x16x8xf32> to vector<4x16x8xbf16>
    %60 = vector.shape_cast %13 : vector<16x1xi1> to vector<1x16x1xi1>
    %61 = vector.broadcast %60 : vector<1x16x1xi1> to vector<4x16x8xi1>
    %62 = arith.select %61, %32, %34 : vector<4x16x8xi1>, vector<4x16x8xf32>
    %63 = arith.truncf %62 : vector<4x16x8xf32> to vector<4x16x8xbf16>
    "tpu.trace_start"() <{level = 10 : i32, message = "bqd,bkd->bqk"}> : () -> ()
    %cst_11 = arith.constant dense<0.000000e+00> : vector<4x16x6xf32>
    %64 = tpu.matmul %59, %39, %cst_11 {dimension_numbers = #tpu.dot_dimension_numbers<[2], [2], [1], [1], [0, 0, 0, 1, 1, 1], [0], [0]>} : vector<4x16x8xbf16>, vector<4x6x8xbf16>, vector<4x16x6xf32> -> vector<4x16x6xf32>
    %cst_12 = arith.constant -1.000000e+30 : f32
    "tpu.trace_stop"() : () -> ()
    %65 = vector.shape_cast %8 : vector<16x1xi1> to vector<1x16x1xi1>
    %66 = vector.broadcast %65 : vector<1x16x1xi1> to vector<4x16x6xi1>
    %67 = vector.broadcast %cst_12 : f32 to vector<4x16x6xf32>
    %68 = arith.select %66, %67, %64 : vector<4x16x6xi1>, vector<4x16x6xf32>
    "tpu.trace_start"() <{level = 10 : i32, message = "bqd,bkd->bqk"}> : () -> ()
    %cst_13 = arith.constant dense<0.000000e+00> : vector<4x16x6xf32>
    %69 = tpu.matmul %63, %40, %cst_13 {dimension_numbers = #tpu.dot_dimension_numbers<[2], [2], [1], [1], [0, 0, 0, 1, 1, 1], [0], [0]>} : vector<4x16x8xbf16>, vector<4x6x8xbf16>, vector<4x16x6xf32> -> vector<4x16x6xf32>
    %cst_14 = arith.constant -1.000000e+30 : f32
    "tpu.trace_stop"() : () -> ()
    %70 = vector.shape_cast %8 : vector<16x1xi1> to vector<1x16x1xi1>
    %71 = vector.broadcast %70 : vector<1x16x1xi1> to vector<4x16x6xi1>
    %72 = vector.broadcast %cst_14 : f32 to vector<4x16x6xf32>
    %73 = arith.select %71, %72, %69 : vector<4x16x6xi1>, vector<4x16x6xf32>
    %cst_15 = arith.constant dense<0xFF800000> : vector<4x16xf32>
    %74 = vector.multi_reduction <maximumf>, %41, %cst_15 [2] : vector<4x16x16xf32> to vector<4x16xf32>
    %75 = vector.shape_cast %74 : vector<4x16xf32> to vector<4x16x1xf32>
    %76 = arith.maximumf %75, %55 : vector<4x16x1xf32>
    %cst_16 = arith.constant dense<0xFF800000> : vector<4x16xf32>
    %77 = vector.multi_reduction <maximumf>, %68, %cst_16 [2] : vector<4x16x6xf32> to vector<4x16xf32>
    %78 = vector.shape_cast %77 : vector<4x16xf32> to vector<4x16x1xf32>
    %79 = arith.maximumf %76, %78 : vector<4x16x1xf32>
    %cst_17 = arith.constant dense<0xFF800000> : vector<4x16xf32>
    %80 = vector.multi_reduction <maximumf>, %73, %cst_17 [2] : vector<4x16x6xf32> to vector<4x16xf32>
    %81 = vector.shape_cast %80 : vector<4x16xf32> to vector<4x16x1xf32>
    %82 = arith.maximumf %79, %81 : vector<4x16x1xf32>
    %83 = vector.broadcast %82 : vector<4x16x1xf32> to vector<4x16x16xf32>
    %84 = arith.subf %41, %83 : vector<4x16x16xf32>
    %85 = math.exp %84 : vector<4x16x16xf32>
    %86 = arith.subf %55, %82 : vector<4x16x1xf32>
    %87 = math.exp %86 : vector<4x16x1xf32>
    %88 = vector.broadcast %82 : vector<4x16x1xf32> to vector<4x16x6xf32>
    %89 = arith.subf %68, %88 : vector<4x16x6xf32>
    %90 = math.exp %89 : vector<4x16x6xf32>
    %91 = vector.broadcast %82 : vector<4x16x1xf32> to vector<4x16x6xf32>
    %92 = arith.subf %73, %91 : vector<4x16x6xf32>
    %93 = math.exp %92 : vector<4x16x6xf32>
    %cst_18 = arith.constant 0.000000e+00 : f32
    %94 = vector.shape_cast %26 : vector<16x16xi1> to vector<1x16x16xi1>
    %95 = vector.broadcast %94 : vector<1x16x16xi1> to vector<4x16x16xi1>
    %96 = vector.shape_cast %87 : vector<4x16x1xf32> to vector<4x16x1xf32>
    %97 = vector.broadcast %96 : vector<4x16x1xf32> to vector<4x16x16xf32>
    %98 = vector.broadcast %cst_18 : f32 to vector<4x16x16xf32>
    %99 = arith.select %95, %97, %98 : vector<4x16x16xi1>, vector<4x16x16xf32>
    %100 = arith.addf %85, %99 : vector<4x16x16xf32>
    %101 = tpu.concatenate %100, %90, %93 in 2 : vector<4x16x16xf32>, vector<4x16x6xf32>, vector<4x16x6xf32> -> vector<4x16x28xf32>
    %cst_19 = arith.constant dense<0.000000e+00> : vector<4x16xf32>
    %102 = vector.multi_reduction <add>, %101, %cst_19 [2] : vector<4x16x28xf32> to vector<4x16xf32>
    %103 = vector.shape_cast %102 : vector<4x16xf32> to vector<4x16x1xf32>
    %104 = tpu.reciprocal %103 {approx = true} : vector<4x16x1xf32> -> vector<4x16x1xf32>
    %105 = vector.extract_strided_slice %38 {offsets = [0, 4, 0], sizes = [4, 6, 8], strides = [1, 1, 1]} : vector<4x16x8xbf16> to vector<4x6x8xbf16>
    %106 = vector.extract_strided_slice %38 {offsets = [0, 10, 0], sizes = [4, 6, 8], strides = [1, 1, 1]} : vector<4x16x8xbf16> to vector<4x6x8xbf16>
    %107 = tpu.concatenate %38, %105, %106 in 1 : vector<4x16x8xbf16>, vector<4x6x8xbf16>, vector<4x6x8xbf16> -> vector<4x28x8xbf16>
    %108 = arith.truncf %101 : vector<4x16x28xf32> to vector<4x16x28xbf16>
    "tpu.trace_start"() <{level = 10 : i32, message = "bqk,bkd->bqd"}> : () -> ()
    %cst_20 = arith.constant dense<0.000000e+00> : vector<4x16x8xf32>
    %109 = tpu.matmul %108, %107, %cst_20 {dimension_numbers = #tpu.dot_dimension_numbers<[2], [1], [1], [2], [0, 0, 0, 1, 1, 2], [0], [0]>} : vector<4x16x28xbf16>, vector<4x28x8xbf16>, vector<4x16x8xf32> -> vector<4x16x8xf32>
    "tpu.trace_stop"() : () -> ()
    %110 = vector.broadcast %104 : vector<4x16x1xf32> to vector<4x16x8xf32>
    %111 = arith.mulf %109, %110 : vector<4x16x8xf32>
    %112 = vector.extract_strided_slice %5 {offsets = [0, 0, 128], sizes = [4, 16, 8], strides = [1, 1, 1]} : vector<4x16x512xf32> to vector<4x16x8xf32>
    %113 = vector.extract_strided_slice %5 {offsets = [0, 0, 136], sizes = [4, 16, 8], strides = [1, 1, 1]} : vector<4x16x512xf32> to vector<4x16x8xf32>
    %114 = vector.extract_strided_slice %5 {offsets = [0, 0, 144], sizes = [4, 16, 8], strides = [1, 1, 1]} : vector<4x16x512xf32> to vector<4x16x8xf32>
    %115 = vector.extract_strided_slice %5 {offsets = [0, 0, 152], sizes = [4, 16, 8], strides = [1, 1, 1]} : vector<4x16x512xf32> to vector<4x16x8xf32>
    %116 = vector.extract_strided_slice %5 {offsets = [0, 0, 160], sizes = [4, 16, 8], strides = [1, 1, 1]} : vector<4x16x512xf32> to vector<4x16x8xf32>
    %117 = vector.extract_strided_slice %5 {offsets = [0, 0, 168], sizes = [4, 16, 8], strides = [1, 1, 1]} : vector<4x16x512xf32> to vector<4x16x8xf32>
    %118 = vector.extract_strided_slice %5 {offsets = [0, 0, 176], sizes = [4, 16, 8], strides = [1, 1, 1]} : vector<4x16x512xf32> to vector<4x16x8xf32>
    %119 = vector.extract_strided_slice %5 {offsets = [0, 0, 184], sizes = [4, 16, 8], strides = [1, 1, 1]} : vector<4x16x512xf32> to vector<4x16x8xf32>
    %120 = vector.extract_strided_slice %5 {offsets = [0, 0, 192], sizes = [4, 16, 8], strides = [1, 1, 1]} : vector<4x16x512xf32> to vector<4x16x8xf32>
    %121 = arith.truncf %112 : vector<4x16x8xf32> to vector<4x16x8xbf16>
    %122 = arith.truncf %113 : vector<4x16x8xf32> to vector<4x16x8xbf16>
    %123 = arith.truncf %114 : vector<4x16x8xf32> to vector<4x16x8xbf16>
    %124 = vector.extract_strided_slice %122 {offsets = [0, 4, 0], sizes = [4, 6, 8], strides = [1, 1, 1]} : vector<4x16x8xbf16> to vector<4x6x8xbf16>
    %125 = vector.extract_strided_slice %122 {offsets = [0, 10, 0], sizes = [4, 6, 8], strides = [1, 1, 1]} : vector<4x16x8xbf16> to vector<4x6x8xbf16>
    "tpu.trace_start"() <{level = 10 : i32, message = "bqd,bkd->bqk"}> : () -> ()
    %cst_21 = arith.constant dense<0.000000e+00> : vector<4x16x16xf32>
    %126 = tpu.matmul %121, %122, %cst_21 {dimension_numbers = #tpu.dot_dimension_numbers<[2], [2], [1], [1], [0, 0, 0, 1, 1, 1], [0], [0]>} : vector<4x16x8xbf16>, vector<4x16x8xbf16>, vector<4x16x16xf32> -> vector<4x16x16xf32>
    "tpu.trace_stop"() : () -> ()
    %127 = vector.extract_strided_slice %113 {offsets = [0, 0, 0], sizes = [4, 4, 8], strides = [1, 1, 1]} : vector<4x16x8xf32> to vector<4x4x8xf32>
    %128 = vector.extract_strided_slice %113 {offsets = [0, 10, 0], sizes = [4, 6, 8], strides = [1, 1, 1]} : vector<4x16x8xf32> to vector<4x6x8xf32>
    %129 = vector.extract_strided_slice %113 {offsets = [0, 4, 0], sizes = [4, 6, 8], strides = [1, 1, 1]} : vector<4x16x8xf32> to vector<4x6x8xf32>
    %130 = tpu.concatenate %127, %128, %129 in 1 : vector<4x4x8xf32>, vector<4x6x8xf32>, vector<4x6x8xf32> -> vector<4x16x8xf32>
    %131 = vector.shape_cast %13 : vector<16x1xi1> to vector<1x16x1xi1>
    %132 = vector.broadcast %131 : vector<1x16x1xi1> to vector<4x16x8xi1>
    %133 = arith.select %132, %115, %118 : vector<4x16x8xi1>, vector<4x16x8xf32>
    %134 = arith.mulf %133, %130 : vector<4x16x8xf32>
    %cst_22 = arith.constant dense<0.000000e+00> : vector<4x16xf32>
    %135 = vector.multi_reduction <add>, %134, %cst_22 [2] : vector<4x16x8xf32> to vector<4x16xf32>
    %136 = vector.shape_cast %135 : vector<4x16xf32> to vector<4x16x1xf32>
    %cst_23 = arith.constant -1.000000e+30 : f32
    %137 = vector.shape_cast %8 : vector<16x1xi1> to vector<1x16x1xi1>
    %138 = vector.broadcast %137 : vector<1x16x1xi1> to vector<4x16x1xi1>
    %139 = vector.broadcast %cst_23 : f32 to vector<4x16x1xf32>
    %140 = arith.select %138, %139, %136 : vector<4x16x1xi1>, vector<4x16x1xf32>
    %141 = vector.shape_cast %13 : vector<16x1xi1> to vector<1x16x1xi1>
    %142 = vector.broadcast %141 : vector<1x16x1xi1> to vector<4x16x8xi1>
    %143 = arith.select %142, %116, %120 : vector<4x16x8xi1>, vector<4x16x8xf32>
    %144 = arith.truncf %143 : vector<4x16x8xf32> to vector<4x16x8xbf16>
    %145 = vector.shape_cast %13 : vector<16x1xi1> to vector<1x16x1xi1>
    %146 = vector.broadcast %145 : vector<1x16x1xi1> to vector<4x16x8xi1>
    %147 = arith.select %146, %117, %119 : vector<4x16x8xi1>, vector<4x16x8xf32>
    %148 = arith.truncf %147 : vector<4x16x8xf32> to vector<4x16x8xbf16>
    "tpu.trace_start"() <{level = 10 : i32, message = "bqd,bkd->bqk"}> : () -> ()
    %cst_24 = arith.constant dense<0.000000e+00> : vector<4x16x6xf32>
    %149 = tpu.matmul %144, %124, %cst_24 {dimension_numbers = #tpu.dot_dimension_numbers<[2], [2], [1], [1], [0, 0, 0, 1, 1, 1], [0], [0]>} : vector<4x16x8xbf16>, vector<4x6x8xbf16>, vector<4x16x6xf32> -> vector<4x16x6xf32>
    %cst_25 = arith.constant -1.000000e+30 : f32
    "tpu.trace_stop"() : () -> ()
    %150 = vector.shape_cast %8 : vector<16x1xi1> to vector<1x16x1xi1>
    %151 = vector.broadcast %150 : vector<1x16x1xi1> to vector<4x16x6xi1>
    %152 = vector.broadcast %cst_25 : f32 to vector<4x16x6xf32>
    %153 = arith.select %151, %152, %149 : vector<4x16x6xi1>, vector<4x16x6xf32>
    "tpu.trace_start"() <{level = 10 : i32, message = "bqd,bkd->bqk"}> : () -> ()
    %cst_26 = arith.constant dense<0.000000e+00> : vector<4x16x6xf32>
    %154 = tpu.matmul %148, %125, %cst_26 {dimension_numbers = #tpu.dot_dimension_numbers<[2], [2], [1], [1], [0, 0, 0, 1, 1, 1], [0], [0]>} : vector<4x16x8xbf16>, vector<4x6x8xbf16>, vector<4x16x6xf32> -> vector<4x16x6xf32>
    %cst_27 = arith.constant -1.000000e+30 : f32
    "tpu.trace_stop"() : () -> ()
    %155 = vector.shape_cast %8 : vector<16x1xi1> to vector<1x16x1xi1>
    %156 = vector.broadcast %155 : vector<1x16x1xi1> to vector<4x16x6xi1>
    %157 = vector.broadcast %cst_27 : f32 to vector<4x16x6xf32>
    %158 = arith.select %156, %157, %154 : vector<4x16x6xi1>, vector<4x16x6xf32>
    %cst_28 = arith.constant dense<0xFF800000> : vector<4x16xf32>
    %159 = vector.multi_reduction <maximumf>, %126, %cst_28 [2] : vector<4x16x16xf32> to vector<4x16xf32>
    %160 = vector.shape_cast %159 : vector<4x16xf32> to vector<4x16x1xf32>
    %161 = arith.maximumf %160, %140 : vector<4x16x1xf32>
    %cst_29 = arith.constant dense<0xFF800000> : vector<4x16xf32>
    %162 = vector.multi_reduction <maximumf>, %153, %cst_29 [2] : vector<4x16x6xf32> to vector<4x16xf32>
    %163 = vector.shape_cast %162 : vector<4x16xf32> to vector<4x16x1xf32>
    %164 = arith.maximumf %161, %163 : vector<4x16x1xf32>
    %cst_30 = arith.constant dense<0xFF800000> : vector<4x16xf32>
    %165 = vector.multi_reduction <maximumf>, %158, %cst_30 [2] : vector<4x16x6xf32> to vector<4x16xf32>
    %166 = vector.shape_cast %165 : vector<4x16xf32> to vector<4x16x1xf32>
    %167 = arith.maximumf %164, %166 : vector<4x16x1xf32>
    %168 = vector.broadcast %167 : vector<4x16x1xf32> to vector<4x16x16xf32>
    %169 = arith.subf %126, %168 : vector<4x16x16xf32>
    %170 = math.exp %169 : vector<4x16x16xf32>
    %171 = arith.subf %140, %167 : vector<4x16x1xf32>
    %172 = math.exp %171 : vector<4x16x1xf32>
    %173 = vector.broadcast %167 : vector<4x16x1xf32> to vector<4x16x6xf32>
    %174 = arith.subf %153, %173 : vector<4x16x6xf32>
    %175 = math.exp %174 : vector<4x16x6xf32>
    %176 = vector.broadcast %167 : vector<4x16x1xf32> to vector<4x16x6xf32>
    %177 = arith.subf %158, %176 : vector<4x16x6xf32>
    %178 = math.exp %177 : vector<4x16x6xf32>
    %cst_31 = arith.constant 0.000000e+00 : f32
    %179 = vector.shape_cast %26 : vector<16x16xi1> to vector<1x16x16xi1>
    %180 = vector.broadcast %179 : vector<1x16x16xi1> to vector<4x16x16xi1>
    %181 = vector.shape_cast %172 : vector<4x16x1xf32> to vector<4x16x1xf32>
    %182 = vector.broadcast %181 : vector<4x16x1xf32> to vector<4x16x16xf32>
    %183 = vector.broadcast %cst_31 : f32 to vector<4x16x16xf32>
    %184 = arith.select %180, %182, %183 : vector<4x16x16xi1>, vector<4x16x16xf32>
    %185 = arith.addf %170, %184 : vector<4x16x16xf32>
    %186 = tpu.concatenate %185, %175, %178 in 2 : vector<4x16x16xf32>, vector<4x16x6xf32>, vector<4x16x6xf32> -> vector<4x16x28xf32>
    %cst_32 = arith.constant dense<0.000000e+00> : vector<4x16xf32>
    %187 = vector.multi_reduction <add>, %186, %cst_32 [2] : vector<4x16x28xf32> to vector<4x16xf32>
    %188 = vector.shape_cast %187 : vector<4x16xf32> to vector<4x16x1xf32>
    %189 = tpu.reciprocal %188 {approx = true} : vector<4x16x1xf32> -> vector<4x16x1xf32>
    %190 = vector.extract_strided_slice %123 {offsets = [0, 4, 0], sizes = [4, 6, 8], strides = [1, 1, 1]} : vector<4x16x8xbf16> to vector<4x6x8xbf16>
    %191 = vector.extract_strided_slice %123 {offsets = [0, 10, 0], sizes = [4, 6, 8], strides = [1, 1, 1]} : vector<4x16x8xbf16> to vector<4x6x8xbf16>
    %192 = tpu.concatenate %123, %190, %191 in 1 : vector<4x16x8xbf16>, vector<4x6x8xbf16>, vector<4x6x8xbf16> -> vector<4x28x8xbf16>
    %193 = arith.truncf %186 : vector<4x16x28xf32> to vector<4x16x28xbf16>
    "tpu.trace_start"() <{level = 10 : i32, message = "bqk,bkd->bqd"}> : () -> ()
    %cst_33 = arith.constant dense<0.000000e+00> : vector<4x16x8xf32>
    %194 = tpu.matmul %193, %192, %cst_33 {dimension_numbers = #tpu.dot_dimension_numbers<[2], [1], [1], [2], [0, 0, 0, 1, 1, 2], [0], [0]>} : vector<4x16x28xbf16>, vector<4x28x8xbf16>, vector<4x16x8xf32> -> vector<4x16x8xf32>
    "tpu.trace_stop"() : () -> ()
    %195 = vector.broadcast %189 : vector<4x16x1xf32> to vector<4x16x8xf32>
    %196 = arith.mulf %194, %195 : vector<4x16x8xf32>
    %197 = vector.extract_strided_slice %5 {offsets = [0, 0, 256], sizes = [4, 16, 8], strides = [1, 1, 1]} : vector<4x16x512xf32> to vector<4x16x8xf32>
    %198 = vector.extract_strided_slice %5 {offsets = [0, 0, 264], sizes = [4, 16, 8], strides = [1, 1, 1]} : vector<4x16x512xf32> to vector<4x16x8xf32>
    %199 = vector.extract_strided_slice %5 {offsets = [0, 0, 272], sizes = [4, 16, 8], strides = [1, 1, 1]} : vector<4x16x512xf32> to vector<4x16x8xf32>
    %200 = vector.extract_strided_slice %5 {offsets = [0, 0, 280], sizes = [4, 16, 8], strides = [1, 1, 1]} : vector<4x16x512xf32> to vector<4x16x8xf32>
    %201 = vector.extract_strided_slice %5 {offsets = [0, 0, 288], sizes = [4, 16, 8], strides = [1, 1, 1]} : vector<4x16x512xf32> to vector<4x16x8xf32>
    %202 = vector.extract_strided_slice %5 {offsets = [0, 0, 296], sizes = [4, 16, 8], strides = [1, 1, 1]} : vector<4x16x512xf32> to vector<4x16x8xf32>
    %203 = vector.extract_strided_slice %5 {offsets = [0, 0, 304], sizes = [4, 16, 8], strides = [1, 1, 1]} : vector<4x16x512xf32> to vector<4x16x8xf32>
    %204 = vector.extract_strided_slice %5 {offsets = [0, 0, 312], sizes = [4, 16, 8], strides = [1, 1, 1]} : vector<4x16x512xf32> to vector<4x16x8xf32>
    %205 = vector.extract_strided_slice %5 {offsets = [0, 0, 320], sizes = [4, 16, 8], strides = [1, 1, 1]} : vector<4x16x512xf32> to vector<4x16x8xf32>
    %206 = arith.truncf %197 : vector<4x16x8xf32> to vector<4x16x8xbf16>
    %207 = arith.truncf %198 : vector<4x16x8xf32> to vector<4x16x8xbf16>
    %208 = arith.truncf %199 : vector<4x16x8xf32> to vector<4x16x8xbf16>
    %209 = vector.extract_strided_slice %207 {offsets = [0, 4, 0], sizes = [4, 6, 8], strides = [1, 1, 1]} : vector<4x16x8xbf16> to vector<4x6x8xbf16>
    %210 = vector.extract_strided_slice %207 {offsets = [0, 10, 0], sizes = [4, 6, 8], strides = [1, 1, 1]} : vector<4x16x8xbf16> to vector<4x6x8xbf16>
    "tpu.trace_start"() <{level = 10 : i32, message = "bqd,bkd->bqk"}> : () -> ()
    %cst_34 = arith.constant dense<0.000000e+00> : vector<4x16x16xf32>
    %211 = tpu.matmul %206, %207, %cst_34 {dimension_numbers = #tpu.dot_dimension_numbers<[2], [2], [1], [1], [0, 0, 0, 1, 1, 1], [0], [0]>} : vector<4x16x8xbf16>, vector<4x16x8xbf16>, vector<4x16x16xf32> -> vector<4x16x16xf32>
    "tpu.trace_stop"() : () -> ()
    %212 = vector.extract_strided_slice %198 {offsets = [0, 0, 0], sizes = [4, 4, 8], strides = [1, 1, 1]} : vector<4x16x8xf32> to vector<4x4x8xf32>
    %213 = vector.extract_strided_slice %198 {offsets = [0, 10, 0], sizes = [4, 6, 8], strides = [1, 1, 1]} : vector<4x16x8xf32> to vector<4x6x8xf32>
    %214 = vector.extract_strided_slice %198 {offsets = [0, 4, 0], sizes = [4, 6, 8], strides = [1, 1, 1]} : vector<4x16x8xf32> to vector<4x6x8xf32>
    %215 = tpu.concatenate %212, %213, %214 in 1 : vector<4x4x8xf32>, vector<4x6x8xf32>, vector<4x6x8xf32> -> vector<4x16x8xf32>
    %216 = vector.shape_cast %13 : vector<16x1xi1> to vector<1x16x1xi1>
    %217 = vector.broadcast %216 : vector<1x16x1xi1> to vector<4x16x8xi1>
    %218 = arith.select %217, %200, %203 : vector<4x16x8xi1>, vector<4x16x8xf32>
    %219 = arith.mulf %218, %215 : vector<4x16x8xf32>
    %cst_35 = arith.constant dense<0.000000e+00> : vector<4x16xf32>
    %220 = vector.multi_reduction <add>, %219, %cst_35 [2] : vector<4x16x8xf32> to vector<4x16xf32>
    %221 = vector.shape_cast %220 : vector<4x16xf32> to vector<4x16x1xf32>
    %cst_36 = arith.constant -1.000000e+30 : f32
    %222 = vector.shape_cast %8 : vector<16x1xi1> to vector<1x16x1xi1>
    %223 = vector.broadcast %222 : vector<1x16x1xi1> to vector<4x16x1xi1>
    %224 = vector.broadcast %cst_36 : f32 to vector<4x16x1xf32>
    %225 = arith.select %223, %224, %221 : vector<4x16x1xi1>, vector<4x16x1xf32>
    %226 = vector.shape_cast %13 : vector<16x1xi1> to vector<1x16x1xi1>
    %227 = vector.broadcast %226 : vector<1x16x1xi1> to vector<4x16x8xi1>
    %228 = arith.select %227, %201, %205 : vector<4x16x8xi1>, vector<4x16x8xf32>
    %229 = arith.truncf %228 : vector<4x16x8xf32> to vector<4x16x8xbf16>
    %230 = vector.shape_cast %13 : vector<16x1xi1> to vector<1x16x1xi1>
    %231 = vector.broadcast %230 : vector<1x16x1xi1> to vector<4x16x8xi1>
    %232 = arith.select %231, %202, %204 : vector<4x16x8xi1>, vector<4x16x8xf32>
    %233 = arith.truncf %232 : vector<4x16x8xf32> to vector<4x16x8xbf16>
    "tpu.trace_start"() <{level = 10 : i32, message = "bqd,bkd->bqk"}> : () -> ()
    %cst_37 = arith.constant dense<0.000000e+00> : vector<4x16x6xf32>
    %234 = tpu.matmul %229, %209, %cst_37 {dimension_numbers = #tpu.dot_dimension_numbers<[2], [2], [1], [1], [0, 0, 0, 1, 1, 1], [0], [0]>} : vector<4x16x8xbf16>, vector<4x6x8xbf16>, vector<4x16x6xf32> -> vector<4x16x6xf32>
    %cst_38 = arith.constant -1.000000e+30 : f32
    "tpu.trace_stop"() : () -> ()
    %235 = vector.shape_cast %8 : vector<16x1xi1> to vector<1x16x1xi1>
    %236 = vector.broadcast %235 : vector<1x16x1xi1> to vector<4x16x6xi1>
    %237 = vector.broadcast %cst_38 : f32 to vector<4x16x6xf32>
    %238 = arith.select %236, %237, %234 : vector<4x16x6xi1>, vector<4x16x6xf32>
    "tpu.trace_start"() <{level = 10 : i32, message = "bqd,bkd->bqk"}> : () -> ()
    %cst_39 = arith.constant dense<0.000000e+00> : vector<4x16x6xf32>
    %239 = tpu.matmul %233, %210, %cst_39 {dimension_numbers = #tpu.dot_dimension_numbers<[2], [2], [1], [1], [0, 0, 0, 1, 1, 1], [0], [0]>} : vector<4x16x8xbf16>, vector<4x6x8xbf16>, vector<4x16x6xf32> -> vector<4x16x6xf32>
    %cst_40 = arith.constant -1.000000e+30 : f32
    "tpu.trace_stop"() : () -> ()
    %240 = vector.shape_cast %8 : vector<16x1xi1> to vector<1x16x1xi1>
    %241 = vector.broadcast %240 : vector<1x16x1xi1> to vector<4x16x6xi1>
    %242 = vector.broadcast %cst_40 : f32 to vector<4x16x6xf32>
    %243 = arith.select %241, %242, %239 : vector<4x16x6xi1>, vector<4x16x6xf32>
    %cst_41 = arith.constant dense<0xFF800000> : vector<4x16xf32>
    %244 = vector.multi_reduction <maximumf>, %211, %cst_41 [2] : vector<4x16x16xf32> to vector<4x16xf32>
    %245 = vector.shape_cast %244 : vector<4x16xf32> to vector<4x16x1xf32>
    %246 = arith.maximumf %245, %225 : vector<4x16x1xf32>
    %cst_42 = arith.constant dense<0xFF800000> : vector<4x16xf32>
    %247 = vector.multi_reduction <maximumf>, %238, %cst_42 [2] : vector<4x16x6xf32> to vector<4x16xf32>
    %248 = vector.shape_cast %247 : vector<4x16xf32> to vector<4x16x1xf32>
    %249 = arith.maximumf %246, %248 : vector<4x16x1xf32>
    %cst_43 = arith.constant dense<0xFF800000> : vector<4x16xf32>
    %250 = vector.multi_reduction <maximumf>, %243, %cst_43 [2] : vector<4x16x6xf32> to vector<4x16xf32>
    %251 = vector.shape_cast %250 : vector<4x16xf32> to vector<4x16x1xf32>
    %252 = arith.maximumf %249, %251 : vector<4x16x1xf32>
    %253 = vector.broadcast %252 : vector<4x16x1xf32> to vector<4x16x16xf32>
    %254 = arith.subf %211, %253 : vector<4x16x16xf32>
    %255 = math.exp %254 : vector<4x16x16xf32>
    %256 = arith.subf %225, %252 : vector<4x16x1xf32>
    %257 = math.exp %256 : vector<4x16x1xf32>
    %258 = vector.broadcast %252 : vector<4x16x1xf32> to vector<4x16x6xf32>
    %259 = arith.subf %238, %258 : vector<4x16x6xf32>
    %260 = math.exp %259 : vector<4x16x6xf32>
    %261 = vector.broadcast %252 : vector<4x16x1xf32> to vector<4x16x6xf32>
    %262 = arith.subf %243, %261 : vector<4x16x6xf32>
    %263 = math.exp %262 : vector<4x16x6xf32>
    %cst_44 = arith.constant 0.000000e+00 : f32
    %264 = vector.shape_cast %26 : vector<16x16xi1> to vector<1x16x16xi1>
    %265 = vector.broadcast %264 : vector<1x16x16xi1> to vector<4x16x16xi1>
    %266 = vector.shape_cast %257 : vector<4x16x1xf32> to vector<4x16x1xf32>
    %267 = vector.broadcast %266 : vector<4x16x1xf32> to vector<4x16x16xf32>
    %268 = vector.broadcast %cst_44 : f32 to vector<4x16x16xf32>
    %269 = arith.select %265, %267, %268 : vector<4x16x16xi1>, vector<4x16x16xf32>
    %270 = arith.addf %255, %269 : vector<4x16x16xf32>
    %271 = tpu.concatenate %270, %260, %263 in 2 : vector<4x16x16xf32>, vector<4x16x6xf32>, vector<4x16x6xf32> -> vector<4x16x28xf32>
    %cst_45 = arith.constant dense<0.000000e+00> : vector<4x16xf32>
    %272 = vector.multi_reduction <add>, %271, %cst_45 [2] : vector<4x16x28xf32> to vector<4x16xf32>
    %273 = vector.shape_cast %272 : vector<4x16xf32> to vector<4x16x1xf32>
    %274 = tpu.reciprocal %273 {approx = true} : vector<4x16x1xf32> -> vector<4x16x1xf32>
    %275 = vector.extract_strided_slice %208 {offsets = [0, 4, 0], sizes = [4, 6, 8], strides = [1, 1, 1]} : vector<4x16x8xbf16> to vector<4x6x8xbf16>
    %276 = vector.extract_strided_slice %208 {offsets = [0, 10, 0], sizes = [4, 6, 8], strides = [1, 1, 1]} : vector<4x16x8xbf16> to vector<4x6x8xbf16>
    %277 = tpu.concatenate %208, %275, %276 in 1 : vector<4x16x8xbf16>, vector<4x6x8xbf16>, vector<4x6x8xbf16> -> vector<4x28x8xbf16>
    %278 = arith.truncf %271 : vector<4x16x28xf32> to vector<4x16x28xbf16>
    "tpu.trace_start"() <{level = 10 : i32, message = "bqk,bkd->bqd"}> : () -> ()
    %cst_46 = arith.constant dense<0.000000e+00> : vector<4x16x8xf32>
    %279 = tpu.matmul %278, %277, %cst_46 {dimension_numbers = #tpu.dot_dimension_numbers<[2], [1], [1], [2], [0, 0, 0, 1, 1, 2], [0], [0]>} : vector<4x16x28xbf16>, vector<4x28x8xbf16>, vector<4x16x8xf32> -> vector<4x16x8xf32>
    "tpu.trace_stop"() : () -> ()
    %280 = vector.broadcast %274 : vector<4x16x1xf32> to vector<4x16x8xf32>
    %281 = arith.mulf %279, %280 : vector<4x16x8xf32>
    %282 = vector.extract_strided_slice %5 {offsets = [0, 0, 384], sizes = [4, 16, 8], strides = [1, 1, 1]} : vector<4x16x512xf32> to vector<4x16x8xf32>
    %283 = vector.extract_strided_slice %5 {offsets = [0, 0, 392], sizes = [4, 16, 8], strides = [1, 1, 1]} : vector<4x16x512xf32> to vector<4x16x8xf32>
    %284 = vector.extract_strided_slice %5 {offsets = [0, 0, 400], sizes = [4, 16, 8], strides = [1, 1, 1]} : vector<4x16x512xf32> to vector<4x16x8xf32>
    %285 = vector.extract_strided_slice %5 {offsets = [0, 0, 408], sizes = [4, 16, 8], strides = [1, 1, 1]} : vector<4x16x512xf32> to vector<4x16x8xf32>
    %286 = vector.extract_strided_slice %5 {offsets = [0, 0, 416], sizes = [4, 16, 8], strides = [1, 1, 1]} : vector<4x16x512xf32> to vector<4x16x8xf32>
    %287 = vector.extract_strided_slice %5 {offsets = [0, 0, 424], sizes = [4, 16, 8], strides = [1, 1, 1]} : vector<4x16x512xf32> to vector<4x16x8xf32>
    %288 = vector.extract_strided_slice %5 {offsets = [0, 0, 432], sizes = [4, 16, 8], strides = [1, 1, 1]} : vector<4x16x512xf32> to vector<4x16x8xf32>
    %289 = vector.extract_strided_slice %5 {offsets = [0, 0, 440], sizes = [4, 16, 8], strides = [1, 1, 1]} : vector<4x16x512xf32> to vector<4x16x8xf32>
    %290 = vector.extract_strided_slice %5 {offsets = [0, 0, 448], sizes = [4, 16, 8], strides = [1, 1, 1]} : vector<4x16x512xf32> to vector<4x16x8xf32>
    %291 = arith.truncf %282 : vector<4x16x8xf32> to vector<4x16x8xbf16>
    %292 = arith.truncf %283 : vector<4x16x8xf32> to vector<4x16x8xbf16>
    %293 = arith.truncf %284 : vector<4x16x8xf32> to vector<4x16x8xbf16>
    %294 = vector.extract_strided_slice %292 {offsets = [0, 4, 0], sizes = [4, 6, 8], strides = [1, 1, 1]} : vector<4x16x8xbf16> to vector<4x6x8xbf16>
    %295 = vector.extract_strided_slice %292 {offsets = [0, 10, 0], sizes = [4, 6, 8], strides = [1, 1, 1]} : vector<4x16x8xbf16> to vector<4x6x8xbf16>
    "tpu.trace_start"() <{level = 10 : i32, message = "bqd,bkd->bqk"}> : () -> ()
    %cst_47 = arith.constant dense<0.000000e+00> : vector<4x16x16xf32>
    %296 = tpu.matmul %291, %292, %cst_47 {dimension_numbers = #tpu.dot_dimension_numbers<[2], [2], [1], [1], [0, 0, 0, 1, 1, 1], [0], [0]>} : vector<4x16x8xbf16>, vector<4x16x8xbf16>, vector<4x16x16xf32> -> vector<4x16x16xf32>
    "tpu.trace_stop"() : () -> ()
    %297 = vector.extract_strided_slice %283 {offsets = [0, 0, 0], sizes = [4, 4, 8], strides = [1, 1, 1]} : vector<4x16x8xf32> to vector<4x4x8xf32>
    %298 = vector.extract_strided_slice %283 {offsets = [0, 10, 0], sizes = [4, 6, 8], strides = [1, 1, 1]} : vector<4x16x8xf32> to vector<4x6x8xf32>
    %299 = vector.extract_strided_slice %283 {offsets = [0, 4, 0], sizes = [4, 6, 8], strides = [1, 1, 1]} : vector<4x16x8xf32> to vector<4x6x8xf32>
    %300 = tpu.concatenate %297, %298, %299 in 1 : vector<4x4x8xf32>, vector<4x6x8xf32>, vector<4x6x8xf32> -> vector<4x16x8xf32>
    %301 = vector.shape_cast %13 : vector<16x1xi1> to vector<1x16x1xi1>
    %302 = vector.broadcast %301 : vector<1x16x1xi1> to vector<4x16x8xi1>
    %303 = arith.select %302, %285, %288 : vector<4x16x8xi1>, vector<4x16x8xf32>
    %304 = arith.mulf %303, %300 : vector<4x16x8xf32>
    %cst_48 = arith.constant dense<0.000000e+00> : vector<4x16xf32>
    %305 = vector.multi_reduction <add>, %304, %cst_48 [2] : vector<4x16x8xf32> to vector<4x16xf32>
    %306 = vector.shape_cast %305 : vector<4x16xf32> to vector<4x16x1xf32>
    %cst_49 = arith.constant -1.000000e+30 : f32
    %307 = vector.shape_cast %8 : vector<16x1xi1> to vector<1x16x1xi1>
    %308 = vector.broadcast %307 : vector<1x16x1xi1> to vector<4x16x1xi1>
    %309 = vector.broadcast %cst_49 : f32 to vector<4x16x1xf32>
    %310 = arith.select %308, %309, %306 : vector<4x16x1xi1>, vector<4x16x1xf32>
    %311 = vector.shape_cast %13 : vector<16x1xi1> to vector<1x16x1xi1>
    %312 = vector.broadcast %311 : vector<1x16x1xi1> to vector<4x16x8xi1>
    %313 = arith.select %312, %286, %290 : vector<4x16x8xi1>, vector<4x16x8xf32>
    %314 = arith.truncf %313 : vector<4x16x8xf32> to vector<4x16x8xbf16>
    %315 = vector.shape_cast %13 : vector<16x1xi1> to vector<1x16x1xi1>
    %316 = vector.broadcast %315 : vector<1x16x1xi1> to vector<4x16x8xi1>
    %317 = arith.select %316, %287, %289 : vector<4x16x8xi1>, vector<4x16x8xf32>
    %318 = arith.truncf %317 : vector<4x16x8xf32> to vector<4x16x8xbf16>
    "tpu.trace_start"() <{level = 10 : i32, message = "bqd,bkd->bqk"}> : () -> ()
    %cst_50 = arith.constant dense<0.000000e+00> : vector<4x16x6xf32>
    %319 = tpu.matmul %314, %294, %cst_50 {dimension_numbers = #tpu.dot_dimension_numbers<[2], [2], [1], [1], [0, 0, 0, 1, 1, 1], [0], [0]>} : vector<4x16x8xbf16>, vector<4x6x8xbf16>, vector<4x16x6xf32> -> vector<4x16x6xf32>
    %cst_51 = arith.constant -1.000000e+30 : f32
    "tpu.trace_stop"() : () -> ()
    %320 = vector.shape_cast %8 : vector<16x1xi1> to vector<1x16x1xi1>
    %321 = vector.broadcast %320 : vector<1x16x1xi1> to vector<4x16x6xi1>
    %322 = vector.broadcast %cst_51 : f32 to vector<4x16x6xf32>
    %323 = arith.select %321, %322, %319 : vector<4x16x6xi1>, vector<4x16x6xf32>
    "tpu.trace_start"() <{level = 10 : i32, message = "bqd,bkd->bqk"}> : () -> ()
    %cst_52 = arith.constant dense<0.000000e+00> : vector<4x16x6xf32>
    %324 = tpu.matmul %318, %295, %cst_52 {dimension_numbers = #tpu.dot_dimension_numbers<[2], [2], [1], [1], [0, 0, 0, 1, 1, 1], [0], [0]>} : vector<4x16x8xbf16>, vector<4x6x8xbf16>, vector<4x16x6xf32> -> vector<4x16x6xf32>
    %cst_53 = arith.constant -1.000000e+30 : f32
    "tpu.trace_stop"() : () -> ()
    %325 = vector.shape_cast %8 : vector<16x1xi1> to vector<1x16x1xi1>
    %326 = vector.broadcast %325 : vector<1x16x1xi1> to vector<4x16x6xi1>
    %327 = vector.broadcast %cst_53 : f32 to vector<4x16x6xf32>
    %328 = arith.select %326, %327, %324 : vector<4x16x6xi1>, vector<4x16x6xf32>
    %cst_54 = arith.constant dense<0xFF800000> : vector<4x16xf32>
    %329 = vector.multi_reduction <maximumf>, %296, %cst_54 [2] : vector<4x16x16xf32> to vector<4x16xf32>
    %330 = vector.shape_cast %329 : vector<4x16xf32> to vector<4x16x1xf32>
    %331 = arith.maximumf %330, %310 : vector<4x16x1xf32>
    %cst_55 = arith.constant dense<0xFF800000> : vector<4x16xf32>
    %332 = vector.multi_reduction <maximumf>, %323, %cst_55 [2] : vector<4x16x6xf32> to vector<4x16xf32>
    %333 = vector.shape_cast %332 : vector<4x16xf32> to vector<4x16x1xf32>
    %334 = arith.maximumf %331, %333 : vector<4x16x1xf32>
    %cst_56 = arith.constant dense<0xFF800000> : vector<4x16xf32>
    %335 = vector.multi_reduction <maximumf>, %328, %cst_56 [2] : vector<4x16x6xf32> to vector<4x16xf32>
    %336 = vector.shape_cast %335 : vector<4x16xf32> to vector<4x16x1xf32>
    %337 = arith.maximumf %334, %336 : vector<4x16x1xf32>
    %338 = vector.broadcast %337 : vector<4x16x1xf32> to vector<4x16x16xf32>
    %339 = arith.subf %296, %338 : vector<4x16x16xf32>
    %340 = math.exp %339 : vector<4x16x16xf32>
    %341 = arith.subf %310, %337 : vector<4x16x1xf32>
    %342 = math.exp %341 : vector<4x16x1xf32>
    %343 = vector.broadcast %337 : vector<4x16x1xf32> to vector<4x16x6xf32>
    %344 = arith.subf %323, %343 : vector<4x16x6xf32>
    %345 = math.exp %344 : vector<4x16x6xf32>
    %346 = vector.broadcast %337 : vector<4x16x1xf32> to vector<4x16x6xf32>
    %347 = arith.subf %328, %346 : vector<4x16x6xf32>
    %348 = math.exp %347 : vector<4x16x6xf32>
    %cst_57 = arith.constant 0.000000e+00 : f32
    %349 = vector.shape_cast %26 : vector<16x16xi1> to vector<1x16x16xi1>
    %350 = vector.broadcast %349 : vector<1x16x16xi1> to vector<4x16x16xi1>
    %351 = vector.shape_cast %342 : vector<4x16x1xf32> to vector<4x16x1xf32>
    %352 = vector.broadcast %351 : vector<4x16x1xf32> to vector<4x16x16xf32>
    %353 = vector.broadcast %cst_57 : f32 to vector<4x16x16xf32>
    %354 = arith.select %350, %352, %353 : vector<4x16x16xi1>, vector<4x16x16xf32>
    %355 = arith.addf %340, %354 : vector<4x16x16xf32>
    %356 = tpu.concatenate %355, %345, %348 in 2 : vector<4x16x16xf32>, vector<4x16x6xf32>, vector<4x16x6xf32> -> vector<4x16x28xf32>
    %cst_58 = arith.constant dense<0.000000e+00> : vector<4x16xf32>
    %357 = vector.multi_reduction <add>, %356, %cst_58 [2] : vector<4x16x28xf32> to vector<4x16xf32>
    %358 = vector.shape_cast %357 : vector<4x16xf32> to vector<4x16x1xf32>
    %359 = tpu.reciprocal %358 {approx = true} : vector<4x16x1xf32> -> vector<4x16x1xf32>
    %360 = vector.extract_strided_slice %293 {offsets = [0, 4, 0], sizes = [4, 6, 8], strides = [1, 1, 1]} : vector<4x16x8xbf16> to vector<4x6x8xbf16>
    %361 = vector.extract_strided_slice %293 {offsets = [0, 10, 0], sizes = [4, 6, 8], strides = [1, 1, 1]} : vector<4x16x8xbf16> to vector<4x6x8xbf16>
    %362 = tpu.concatenate %293, %360, %361 in 1 : vector<4x16x8xbf16>, vector<4x6x8xbf16>, vector<4x6x8xbf16> -> vector<4x28x8xbf16>
    %363 = arith.truncf %356 : vector<4x16x28xf32> to vector<4x16x28xbf16>
    "tpu.trace_start"() <{level = 10 : i32, message = "bqk,bkd->bqd"}> : () -> ()
    %cst_59 = arith.constant dense<0.000000e+00> : vector<4x16x8xf32>
    %364 = tpu.matmul %363, %362, %cst_59 {dimension_numbers = #tpu.dot_dimension_numbers<[2], [1], [1], [2], [0, 0, 0, 1, 1, 2], [0], [0]>} : vector<4x16x28xbf16>, vector<4x28x8xbf16>, vector<4x16x8xf32> -> vector<4x16x8xf32>
    "tpu.trace_stop"() : () -> ()
    %365 = vector.broadcast %359 : vector<4x16x1xf32> to vector<4x16x8xf32>
    %366 = arith.mulf %364, %365 : vector<4x16x8xf32>
    %367 = tpu.concatenate %111, %196, %281, %366 in 2 : vector<4x16x8xf32>, vector<4x16x8xf32>, vector<4x16x8xf32>, vector<4x16x8xf32> -> vector<4x16x32xf32>
    %368 = arith.truncf %367 : vector<4x16x32xf32> to vector<4x16x32xbf16>
    %369 = vector.shape_cast %368 : vector<4x16x32xbf16> to vector<64x32xbf16>
    %c0_60 = arith.constant 0 : index
    %c0_61 = arith.constant 0 : index
    %370 = vector.load %arg3[%c0_60, %c0_61] : memref<32x32xbf16, #tpu.memory_space<vmem>>, vector<32x32xbf16>
    %cst_62 = arith.constant dense<0.000000e+00> : vector<64x32xf32>
    %371 = tpu.matmul %369, %370, %cst_62 {dimension_numbers = #tpu.dot_dimension_numbers<[1], [0], [0], [1], [0, 0, 1, 1], [], []>} : vector<64x32xbf16>, vector<32x32xbf16>, vector<64x32xf32> -> vector<64x32xf32>
    %372 = vector.shape_cast %371 : vector<64x32xf32> to vector<4x16x32xf32>
    %c0_63 = arith.constant 0 : index
    %c0_64 = arith.constant 0 : index
    %c0_65 = arith.constant 0 : index
    %373 = vector.load %arg4[%c0_63, %c0_64, %c0_65] : memref<4x16x32xf32, #tpu.memory_space<vmem>>, vector<4x16x32xf32>
    tpu.vector_store %arg4[%c0_63, %c0_64, %c0_65], %372 {strides = array<i32>} : memref<4x16x32xf32, #tpu.memory_space<vmem>>, vector<4x16x32xf32>,
    return
  }
  func.func @transform_0(%arg0: i32) -> (i32, i32, i32) {
    %c0_i32 = arith.constant 0 : i32
    %c0_i32_0 = arith.constant 0 : i32
    %c0_i32_1 = arith.constant 0 : i32
    return %arg0, %c0_i32, %c0_i32_0 : i32, i32, i32
  }
  func.func @transform_1(%arg0: i32) -> (i32, i32) {
    %c0_i32 = arith.constant 0 : i32
    %c0_i32_0 = arith.constant 0 : i32
    %c0_i32_1 = arith.constant 0 : i32
    return %c0_i32, %c0_i32_0 : i32, i32
  }
  func.func @transform_2(%arg0: i32) -> (i32, i32) {
    %c0_i32 = arith.constant 0 : i32
    %c0_i32_0 = arith.constant 0 : i32
    %c0_i32_1 = arith.constant 0 : i32
    return %c0_i32, %c0_i32_0 : i32, i32
  }
  func.func @transform_3(%arg0: i32) -> (i32, i32, i32) {
    %c0_i32 = arith.constant 0 : i32
    %c0_i32_0 = arith.constant 0 : i32
    %c0_i32_1 = arith.constant 0 : i32
    return %arg0, %c0_i32, %c0_i32_0 : i32, i32, i32
  }
}

</mosaic_0001>

<bundles_post_ra>
// kernel: hetero_mha_packed.1
= control target key start
LH: loop header
LB: loop body
LE: loop exit
PB: predicated region body
PF: predicated region fallthrough
CT: control target
= control target key end

     0   :  { %8 = vsyncpa [#allocation3], 0  ;;  %s9608_s0 = inlined_call_operand.hbm [shape: f32[8,16,32], index: 0, kind: input, shape index: {}]   ;;  %s9609_s1 = inlined_call_operand.hbm [shape: bf16[32,512], index: 1, kind: input, shape index: {}]   ;;  %s9610_s2 = inlined_call_operand.hbm [shape: bf16[32,32], index: 2, kind: input, shape index: {}]   ;;  %s9611_s3 = inlined_call_operand.hbm [shape: f32[8,16,32], index: 3, kind: output, shape index: {}]  }
   0x1   :  { %10 = vsyncpa [#allocation3 + $0x1], 0 }
   0x2   :  { %11 = vsyncpa [#allocation6], 0 }
   0x3   :  { %12 = vsyncpa [#allocation4], 0 }
   0x4   :  { %14 = vsyncpa [#allocation4 + $0x1], 0  ;;  %s6229_s12 = smov 0   ;;  %s6231_s13 = smov 0  }
   0x5   :  { %s6233_s14 = smov 0   ;;  %s6235_s15 = smov 0  }
   0x6 LB: > { %s6250_s16 = sadd.s32 4294967295, %s6189_s15   ;;  %s5240_s17 = sadd.s32 4294967294, %s6189_s15   ;;  %s6189_s15 = sphi %s6235_s15, %s10030_s15   ;;  %s6185_s14 = sphi %s6233_s14, %s10029_s14   ;;  %s6181_s13 = sphi %s6231_s13, %s10028_s13   ;;  %s6177_s12 = sphi %s6229_s12, %s10027_s12  }
   0x7   : > { %p40_p0 = scmp.ne.s32.totalorder %s6181_s13, %s6177_s12  ;;  %p41_p1 = scmp.eq.s32.totalorder %s6250_s16, 0 }
   0x8   : > { %p106_p2 = scmp.eq.s32.totalorder %s6250_s16, 1  ;;  %p112_p3 = scmp.eq.s32.totalorder %s5240_s17, 1 }
   0x9   : > { %p6259_p4 = por %p41_p1, %p40_p0  ;;  %p5241_p5 = scmp.ge.s32.totalorder %s6189_s15, 1 }
   0xa   : > { %p6264_p6 = por %p112_p3, %p40_p0  ;;  %p119_p7 = scmp.lt.s32.totalorder %s6189_s15, 3 }
   0xb   : > { %s130_s22 = sshll.u32 %s9609_s1, 4  ;;  %s6191_s24 = smov [#allocation5]   ;;  %s131_s22 = int_to_ptr.hbm [resolvable:$true] %s130_s22 }
   0xc   : > { %p6272_p8 = pnand %p5241_p5, %p119_p7  ;;  %s132_s25 = sshll.u32 %s6191_s24, 4  ;;  %s133_s25 = int_to_ptr.vmem [resolvable:$true] %s132_s25 }
   0xd   : > { %s144_s28 = sshll.u32 %s9610_s2, 4  ;;  %s6192_s29 = smov 256   ;;  %s145_s28 = int_to_ptr.hbm [resolvable:$true] %s144_s28 }
   0xe   : > { %p5418_p9 = pneg %p6272_p8  ;;  %s6193_s30 = smov 16  }
   0xf   : > { %s6194_s4 = smov [#allocation7]   ;;  %s6195_s6 = smov 64  }
  0x10   : > { %p5419_p10 = pnand %p5418_p9, %p41_p1  ;;  %s146_s5 = sshll.u32 %s6194_s4, 4  ;;  %s147_s5 = int_to_ptr.vmem [resolvable:$true] %s146_s5 }
  0x11   : > { %s6196_s7 = smov 4   ;;  %s6285_s8 = sadd.s32 1, %s6189_s15  }
  0x12   : > { %5421 = dma.hbm_to_vmem [thread:$0]  (!%p5419_p10), %s131_s22, 1024, %s133_s25, [#allocation6], %s6192_s29, %s6192_s29, %s6193_s30  }
  0x13   : > { %5424 = dma.hbm_to_vmem [thread:$0]  (!%p5419_p10), %s145_s28, 256, %s147_s5, [#allocation6], %s6195_s6, %s6195_s6, %s6196_s7  }
  0x14   : > { %s24_s9 = ssub.s32 %s6189_s15, %s6285_s8  ;;  %s27_s10 = sadd.s32 1, %s6185_s14 }
  0x15   : > { %p25_p12 = scmp.eq.s32.totalorder %s24_s9, 0  ;;  %p34_p13 = scmp.ne.s32.totalorder %s6185_s14, %s6181_s13 }
  0x16   : > { %p35_p0 = scmp.eq.s32.totalorder %s6189_s15, 0  ;;  %p5435_p7 = scmp.lt.s32.totalorder %s6189_s15, 2 }
  0x17   : > { %s6294_s11 = scalar_select %p25_p12, %s6185_s14, %s27_s10  }
  0x18   : > { %p36_p3 = por %p35_p0, %p34_p13  ;;  %p6298_p5 = por %p106_p2, %p34_p13 }
  0x19   : > { %s160_s20 = sand.u32 1, %s6185_s14   ;;  %s5387_s22 = sshll.u32 %s6189_s15, 6 }
  0x1a   : > { %s5245_s21 = sshll.u32 %s160_s20, 6  ;;  %s170_s26 = scalar_lea.hbm %s9608_s0, %s5387_s22 }
  0x1b   : > { %s164_s27 = scalar_lea.vmem [#allocation2], %s5245_s21  ;;  %s171_s29 = sshll.u32 %s170_s26, 4  ;;  %s172_s29 = int_to_ptr.hbm [resolvable:$true] %s171_s29 }
  0x1c   : > { %s173_s28 = sshll.u32 %s164_s27, 4  ;;  %p6308_p9 = pnand %p5435_p7, %p36_p3  ;;  %s174_s28 = int_to_ptr.vmem [resolvable:$true] %s173_s28 }
  0x1d   : > { %s161_s4 = scalar_lea.sflag [#allocation3], %s160_s20  ;;  %s6089_s5 = sshra.s32 %s172_s29, 4  ;;  %s6090_s5 = int_to_ptr.hbm [resolvable:$true] %s6089_s5 }
  0x1e   : > { %s6091_s6 = scalar_lea.hbm %s6090_s5, 64  ;;  %p6093_p10 = pneg %p6308_p9 }
  0x1f   : > { %p6092_p2 = scmp.ne.s32.totalorder %s6090_s5, %s6091_s6  ;;  %s6096_s10 = scalar_lea.hbm %s9608_s0, 128 }
  0x20   : > { %p6097_p0 = scmp.lt.s32.totalorder %s6090_s5, %s9608_s0  ;;  %p6098_p3 = scmp.lt.s32.totalorder %s6096_s10, %s6091_s6 }
  0x21   : > { %p6094_p12 = pnand %p6093_p10, %p6092_p2 }
  0x22   : > { %p6099_p7 = por %p6098_p3, %p6097_p0 }
  0x23   : > { %p6095_p13 = pneg %p6094_p12 }
  0x25   : > { %p6100_p11 = pnand %p6099_p7, %p6095_p13 }
  0x27   : > { %6103 = shalt.err (!%p6100_p11)
}
  0x28   : > { %s6197_s20 = smov 128   ;;  %s6198_s24 = smov 8  }
  0x29   : > { %5428 = dma.hbm_to_vmem [thread:$0]  (!%p6308_p9), %s172_s29, 1024, %s174_s28, %s161_s4, %s6197_s20, %s6197_s20, %s6198_s24  }
  0x2a   : > { %185 = sbr.rel (%p6272_p8) target bundleno = 3327 (0xcff), region = 32 }
  0x2f   : > { %s6325_s25 = sand.u32 1, %s6181_s13  }
  0x30   : > { %s5250_s26 = sshll.u32 %s6325_s25, 6  ;;  %s188_s27 = scalar_lea.sflag [#allocation3], %s6325_s25 }
  0x31   : > { %s191_s5 = scalar_lea.vmem [#allocation2], %s5250_s26 }
  0x32   : > { %6164 = dma.done.wait (%p6259_p4), %s188_s27, 1024  }
  0x33   : > { %6166 = vsyncadd (%p6259_p4), %s188_s27, 4294966272 }
  0x34   : > { %6168 = dma.done.wait (%p41_p1), [#allocation6], 1280  }
  0x35   : > { %6170 = vsyncadd (%p41_p1), [#allocation6], 4294966016  ;;  %v5272_v0 = vld [vmem:[#allocation5 + $0x20] sm:$0xf]  ;;  %v5394_v1 = vld [vmem:[#allocation5 + $0x2c] sm:$0xf0] }
  0x36   : > { %v5256_v2 = vld [vmem:[#allocation5] sm:$0xf]  ;;  %v5273_v3 = vor.u32 %v5394_v1, %v5272_v0  ;;  %v5390_v4 = vld [vmem:[#allocation5 + $0xc] sm:$0xf0]  ;;  %v229_v6 = vld [vmem:[%s191_s5 + $0x8] sm:$0xff]  ;;  %vm312_vm0 = vcmask 261120  }
  0x37   : > { %v228_v5 = vld [vmem:[%s191_s5] sm:$0xff]  ;;  %v5257_v7 = vor.u32 %v5390_v4, %v5256_v2  ;;  %v237_v9 = vpack.c.bf16 %v229_v6, %v229_v6  ;;  %v230_v10 = vld [vmem:[%s191_s5 + $0x10] sm:$0xff]  ;;  %v231_v11 = vld [vmem:[%s191_s5 + $0x18] sm:$0xff]  ;;  %s6199_s18 = smov 104   ;;  %s6200_s23 = smov 96   ;;  %vm614_vm1 = vcmask 1043456  }
  0x38   : > { %v236_v8 = vpack.c.bf16 %v228_v5, %v228_v5  ;;  %v234_v12 = vld [vmem:[%s191_s5 + $0x30] sm:$0xff]  ;;  %331 = vmatpush.bf16.msra.mxu0 %v5273_v3  ;;  %5400 = vmatpush.bf16.msra.mxu1 %v5273_v3  ;;  %v238_v13 = vpack.c.bf16 %v230_v10, %v230_v10  ;;  %v239_v14 = vpack.c.bf16 %v231_v11, %v231_v11  ;;  %v235_v15 = vld [vmem:[%s191_s5 + $0x38] sm:$0xff]  ;;  %v232_v17 = vld [vmem:[%s191_s5 + $0x20] sm:$0xff]  ;;  %s6201_s28 = smov 16   ;;  %vm597_vm2 = vcmask 1045504   ;;  %s6202_s29 = smov 112  }
  0x39   : > { %v242_v16 = vpack.c.bf16 %v234_v12, %v234_v12  ;;  %v233_v18 = vld [vmem:[%s191_s5 + $0x28] sm:$0xff]  ;;  %5402 = vmatpush.bf16.msra.mxu3 %v5273_v3  ;;  %5401 = vmatpush.bf16.msra.mxu2 %v5273_v3  ;;  %v261_v20 = vunpack.c.l.b16 %v237_v9  ;;  %v243_v21 = vpack.c.bf16 %v235_v15, %v235_v15  ;;  %v240_v22 = vpack.c.bf16 %v232_v17, %v232_v17  ;;  %v5392_v23 = vld [vmem:[#allocation5 + $0x24] sm:$0xf]  ;;  %v5274_v24 = vld [vmem:[#allocation5 + $0x30] sm:$0xf0]  ;;  %s6203_s30 = smov 120  }
  0x3a   : > { %v260_v19 = vunpack.c.l.b16 %v236_v8  ;;  %v262_v25 = vunpack.c.l.b16 %v238_v13  ;;  %v263_v26 = vunpack.c.l.b16 %v239_v14  ;;  %v241_v28 = vpack.c.bf16 %v233_v18, %v233_v18  ;;  %v5388_v33 = vld [vmem:[#allocation5 + $0x4] sm:$0xf]  ;;  %v5258_v34 = vld [vmem:[#allocation5 + $0x10] sm:$0xf0]  ;;  %s6204_s4 = smov 88   ;;  %s6205_s6 = smov 22  }
  0x3b   : > { %v266_v27 = vunpack.c.l.b16 %v242_v16  ;;  %v267_v30 = vunpack.c.l.b16 %v243_v21  ;;  %v264_v31 = vunpack.c.l.b16 %v240_v22  ;;  %v5277_v32 = vor.u32 %v5392_v23, %v5274_v24  ;;  %s6206_s7 = smov 8   ;;  %s6207_s9 = smov 24  }
  0x3c   : > { %v6339_v29 = vpack.c.b16 %v261_v20, %v260_v19  ;;  %332 = vmatpush.bf16.msra.mxu0 %v5257_v7  ;;  %5403 = vmatpush.bf16.msra.mxu1 %v5257_v7  ;;  %v6341_v35 = vpack.c.b16 %v263_v26, %v262_v25  ;;  %v265_v36 = vunpack.c.l.b16 %v241_v28  ;;  %v5261_v39 = vor.u32 %v5388_v33, %v5258_v34  ;;  %s224_s10 = scalar_lea.vmem [#allocation8], %s5250_s26  ;;  %s5399_s21 = sshll.u32 %s6250_s16, 6 }
  0x3d   : > { %5405 = vmatpush.bf16.msra.mxu3 %v5257_v7  ;;  %5404 = vmatpush.bf16.msra.mxu2 %v5257_v7  ;;  %v6343_v37 = vpack.c.b16 %v267_v30, %v266_v27  ;;  %vm619_vm3 = vcmask 1041408   ;;  %vm1440_vm4 = vcmask 1042432   ;;  %vm479_vm5 = vcmask 64512   ;;  %s5144_s24 = scalar_lea.hbm %s9611_s3, %s5399_s21  ;;  %s5145_s26 = sshll.u32 %s224_s10, 4  ;;  %s5146_s26 = int_to_ptr.vmem [resolvable:$true] %s5145_s26 }
  0x3e   : > { %v6345_v38 = vpack.c.b16 %v265_v36, %v264_v31  ;;  %vm1108_vm8 = vcmask 130048   ;;  %vm1141_vm10 = vcmask 48128   ;;  %vm1394_vm14 = vcmask 179200   ;;  %s5147_s27 = sshll.u32 %s5144_s24, 4  ;;  %s5132_s5 = scalar_lea.sflag [#allocation4], %s6325_s25  ;;  %s5148_s27 = int_to_ptr.hbm [resolvable:$true] %s5147_s27 }
  0x3f   : > { %5286 = vmatmul.msk.bf16.vlgmr.msra.gmra.mxu0 %vm312_vm0, %v6339_v29  ;;  %5287 = vmatmul.msk.bf16.vlgmr.msra.gmra.mxu1 %vm312_vm0, %v6341_v35  ;;  %vm1403_vm15 = vcmask 228352  }
  0x40   : > { %360 = vmatpush.bf16.msrb.mxu1 %v5277_v32  ;;  %5289 = vmatmul.msk.bf16.vlgmr.msra.gmra.mxu3 %vm312_vm0, %v6343_v37 }
  0x41   : > { %5288 = vmatmul.msk.bf16.vlgmr.msra.gmra.mxu2 %vm312_vm0, %v6345_v38 }
  0x44   : > { %361 = vmatpush.bf16.msrb.mxu1 %v5261_v39 }
  0x4f   : > { %5290 = vmatmul.msk.bf16.vlgmr.msrb.gmra.mxu1 %vm312_vm0, %v6339_v29 }
  0x5f   : > { %5291 = vmatmul.msk.bf16.gmra.mxu1 %vm312_vm0, %v6341_v35 }
  0x6f   : > { %5292 = vmatmul.msk.bf16.gmra.mxu1 %vm312_vm0, %v6345_v38 }
  0x7f   : > { %5293 = vmatmul.msk.bf16.gmra.mxu1 %vm312_vm0, %v6343_v37 }
  0xbc   : > { %v6363_v40 = vpop.f32.mrf.mxu0  ;;  %v6365_v41 = vpop.f32.mrf.mxu1 }
  0xbd   : > { %632 = vrot.lane.b32.xlu0 %v6365_v41, %s6199_s18  ;;  %628 = vrot.lane.b32.xlu2 %v6363_v40, %s6199_s18  ;;  %v601_v50 = vrot.slane %v6365_v41, 2  ;;  %v598_v54 = vrot.slane %v6363_v40, 2  ;;  %v464_v56 = vpack.c.bf16 %v6363_v40, %v6363_v40  ;;  %v466_v2 = vpack.c.bf16 %v6365_v41, %v6365_v41 }
  0xbf   : > { %v474_v60 = vunpack.c.l.b16 %v464_v56  ;;  %v502_v5 = vunpack.c.l.b16 %v466_v2 }
  0xc3   : > { %v6371_v42 = vpop.f32.mrf.mxu3 }
  0xc4   : > { %v6373_v43 = vpop.f32.mrf.mxu2  ;;  %640 = vrot.lane.b32.xlu1 %v6371_v42, %s6199_s18  ;;  %v6377_v44 = vpop.f32.mrf.mxu1 }
  0xc5   : > { %636 = vrot.lane.b32.xlu2 %v6373_v43, %s6199_s18  ;;  %v5494_v45 = vpack.i.bf16 %v6377_v44, %v6365_v41  ;;  %v6384_v46 = vpop.f32.mrf.mxu0  ;;  %v602_v49 = vrot.slane %v6377_v44, 2  ;;  %v586_v51 = vrot.slane %v6377_v44, 6  ;;  %v467_v1 = vpack.c.bf16 %v6377_v44, %v6377_v44 }
  0xc6   : > { %v585_v47 = vrot.slane %v6384_v46, 6  ;;  %v5489_v52 = vpack.i.bf16 %v6384_v46, %v6363_v40  ;;  %v599_v55 = vrot.slane %v6384_v46, 2  ;;  %v465_v57 = vpack.c.bf16 %v6384_v46, %v6384_v46 }
  0xc7   : > { %5495 = vrot.lane.b32.xlu0 %v5494_v45, %s6200_s23  ;;  %v603_v53 = vsel %vm597_vm2, %v601_v50, %v602_v49  ;;  %v503_v4 = vunpack.c.l.b16 %v467_v1  ;;  %v616_v6 = vsel %vm614_vm1, %v6365_v41, %v586_v51  ;;  %v604_v19 = vrot.slane %v6373_v43, 2 }
  0xc8   : > { %v615_v48 = vsel %vm614_vm1, %v6363_v40, %v585_v47  ;;  %v621_v58 = vsel %vm619_vm3, %v586_v51, %v603_v53  ;;  %v600_v59 = vsel %vm597_vm2, %v598_v54, %v599_v55  ;;  %v475_v61 = vunpack.c.l.b16 %v465_v57 }
  0xc9   : > { %v620_v62 = vsel %vm619_vm3, %v585_v47, %v600_v59  ;;  %v6430_v7 = vpack.c.b16 %v503_v4, %v502_v5  ;;  %v1014_v12 = vpack.c.b16 %v503_v4, %v503_v4  ;;  %v468_v23 = vpack.c.bf16 %v6373_v43, %v6373_v43 }
  0xca   : > { %v6416_v0 = vpack.c.b16 %v475_v61, %v474_v60  ;;  %v983_v11 = vpack.c.b16 %v475_v61, %v475_v61  ;;  %v470_v53 = vpack.c.bf16 %v6371_v42, %v6371_v42 }
  0xcb   : > { %v6434_v8 = vpop.f32.mrf.mxu3  ;;  %v885_v9 = vrot.slane %v6430_v7, 2  ;;  %v1015_v14 = vrot.slane %v1014_v12, 1  ;;  %v529_v27 = vunpack.c.l.b16 %v468_v23  ;;  %v1437_v31 = vrot.slane %v1014_v12, 6 }
  0xcc   : > { %634 = vrot.lane.b32.xlu1 %v6377_v44, %s6199_s18  ;;  %v6413_v63 = vpop.f32.mrf.mxu2  ;;  %v5524_v10 = vpack.i.bf16 %v6434_v8, %v6371_v42  ;;  %v984_v13 = vrot.slane %v983_v11, 1  ;;  %v6450_v15 = vpop.f32.mrf.mxu1  ;;  %v855_v16 = vrot.slane %v6416_v0, 2  ;;  %v1436_v17 = vrot.slane %v983_v11, 6 }
  0xcd   : > { %630 = vrot.lane.b32.xlu2 %v6384_v46, %s6199_s18  ;;  %v5509_v3 = vpack.i.bf16 %v6413_v63, %v6373_v43  ;;  %v605_v20 = vrot.slane %v6413_v63, 2  ;;  %v587_v22 = vrot.slane %v6413_v63, 6  ;;  %v469_v24 = vpack.c.bf16 %v6413_v63, %v6413_v63 }
  0xce   : > { %v1443_v18 = vsel %vm1440_vm4, %v855_v16, %v1436_v17  ;;  %v588_v34 = vrot.slane %v6434_v8, 6  ;;  %v1446_v36 = vsel %vm1440_vm4, %v885_v9, %v1437_v31  ;;  %v608_v47 = vrot.slane %v6434_v8, 2 }
  0xcf   : > { %668 = vrot.lane.b32.xlu0 %v615_v48, %s6201_s28  ;;  %v606_v25 = vsel %vm597_vm2, %v604_v19, %v605_v20  ;;  %v617_v26 = vsel %vm614_vm1, %v6373_v43, %v587_v22  ;;  %v530_v28 = vunpack.c.l.b16 %v469_v24  ;;  %v471_v54 = vpack.c.bf16 %v6434_v8, %v6434_v8 }
  0xd0   : > { %v622_v30 = vsel %vm619_vm3, %v587_v22, %v606_v25  ;;  %v618_v49 = vsel %vm614_vm1, %v6371_v42, %v588_v34  ;;  %v1593_v1 = vpack.c.bf16 %v6450_v15, %v6450_v15 }
  0xd1   : > { %v6476_v32 = vpack.c.b16 %v530_v28, %v529_v27  ;;  %v1045_v48 = vpack.c.b16 %v530_v28, %v530_v28  ;;  %v557_v59 = vunpack.c.l.b16 %v471_v54 }
  0xd3   : > { %v915_v39 = vrot.slane %v6476_v32, 2  ;;  %v1046_v12 = vrot.slane %v1045_v48, 1 }
  0xd4   : > { %5505 = vrot.lane.b32.xlu1 %v5494_v45, %s6202_s29  ;;  %v6460_v21 = vpop.f32.mrf.mxu1  ;;  %v607_v45 = vrot.slane %v6371_v42, 2 }
  0xd5   : > { %5490 = vrot.lane.b32.xlu2 %v5489_v52, %s6200_s23  ;;  %v1713_v61 = vrot.slane %v6460_v21, 6  ;;  %v1594_v2 = vpack.c.bf16 %v6460_v21, %v6460_v21 }
  0xd6   : > { %v609_v51 = vsel %vm597_vm2, %v607_v45, %v608_v47  ;;  %v5280_v47 = vld [vmem:[#allocation5 + $0x28] sm:$0xf] }
  0xd7   : > { %674 = vrot.lane.b32.xlu0 %v621_v58, %s6201_s28  ;;  %v623_v56 = vsel %vm619_vm3, %v588_v34, %v609_v51  ;;  %v556_v58 = vunpack.c.l.b16 %v470_v53  ;;  %v1741_v4 = vsel %vm614_vm1, %v6450_v15, %v1713_v61 }
  0xdc   : > { %670 = vrot.lane.b32.xlu1 %v620_v62, %s6201_s28  ;;  %v6478_v33 = vpop.f32.mrf.mxu1  ;;  %v6508_v62 = vpack.c.b16 %v557_v59, %v556_v58 }
  0xdd   : > { %5500 = vrot.lane.b32.xlu2 %v5489_v52, %s6202_s29  ;;  %v1438_v52 = vrot.slane %v1045_v48, 6  ;;  %v1728_v24 = vrot.slane %v6478_v33, 2  ;;  %v5395_v48 = vld [vmem:[#allocation5 + $0x34] sm:$0xf0] }
  0xde   : > { %v945_v5 = vrot.slane %v6508_v62, 2 }
  0xdf   : > { %477 = vrot.lane.b32.xlu0 %v6416_v0, %s6203_s30  ;;  %v1449_v57 = vsel %vm1440_vm4, %v915_v39, %v1438_v52 }
  0xe4   : > { %5510 = vrot.lane.b32.xlu1 %v5509_v3, %s6200_s23  ;;  %v6497_v55 = vpop.f32.mrf.mxu1 }
  0xe5   : > { %672 = vrot.lane.b32.xlu2 %v616_v6, %s6201_s28  ;;  %v1729_v25 = vrot.slane %v6497_v55, 2  ;;  %v1714_v34 = vrot.slane %v6497_v55, 6 }
  0xe7   : > { %505 = vrot.lane.b32.xlu0 %v6430_v7, %s6203_s30  ;;  %v1730_v45 = vsel %vm597_vm2, %v1728_v24, %v1729_v25  ;;  %v1742_v24 = vsel %vm614_vm1, %v6478_v33, %v1714_v34 }
  0xe8   : > { %v1746_v54 = vsel %vm619_vm3, %v1714_v34, %v1730_v45 }
  0xec   : > { %1467 = vrot.lane.b32.xlu1 %v6416_v0, %s6202_s29 }
  0xed   : > { %642 = vrot.lane.b32.xlu2 %v6434_v8, %s6199_s18 }
  0xef   : > { %638 = vrot.lane.b32.xlu0 %v6413_v63, %s6199_s18 }
  0xf4   : > { %886 = vrot.lane.b32.xlu1 %v885_v9, %s6203_s30  ;;  %v1603_v9 = vunpack.c.l.b16 %v1593_v1  ;;  %v5393_v1 = vld [vmem:[#allocation5 + $0x2c] sm:$0xf] }
  0xf5   : > { %5525 = vrot.lane.b32.xlu2 %v5524_v10, %s6202_s29 }
  0xf7   : > { %5515 = vrot.lane.b32.xlu0 %v5524_v10, %s6200_s23  ;;  %v6527_v10 = vunpack.c.l.b16 %v1594_v2  ;;  %v5282_v2 = vld [vmem:[#allocation5 + $0x38] sm:$0xf0] }
  0xf9   : > { %v6530_v11 = vpack.c.b16 %v6527_v10, %v1603_v9 }
  0xfb   : > { %9700 = vst [vmem:[#allocation12_spill] sm:$0xff] %v6530_v11 }
  0xfc   : > { %985 = vrot.lane.b32.xlu1 %v984_v13, %s6203_s30 }
  0xfd   : > { %1016 = vrot.lane.b32.xlu2 %v1015_v14, %s6203_s30  ;;  %v1076_v14 = vpack.c.b16 %v557_v59, %v557_v59 }
  0xff   : > { %5520 = vrot.lane.b32.xlu0 %v5509_v3, %s6202_s29  ;;  %v6514_v3 = vpop.f32.mrf.mxu1  ;;  %v1439_v23 = vrot.slane %v1076_v14, 6  ;;  %v1077_v53 = vrot.slane %v1076_v14, 1  ;;  %v5389_v14 = vld [vmem:[#allocation5 + $0xc] sm:$0xf] }
 0x101   : > { %v1452_v31 = vsel %vm1440_vm4, %v945_v5, %v1439_v23 }
 0x104   : > { %1749 = vrot.lane.b32.xlu1 %v6450_v15, %s6199_s18 }
 0x105   : > { %1469 = vrot.lane.b32.xlu2 %v1443_v18, %s6202_s29 }
 0x107   : > { %1498 = vrot.lane.b32.xlu0 %v6430_v7, %s6202_s29  ;;  %v6536_v13 = vpop.f32.mrf.mxu1 }
 0x108   : > { %v1598_v17 = vpack.c.bf16 %v6536_v13, %v6536_v13  ;;  %v6611_v45 = vpack.i.bf16 %v6536_v13, %v6514_v3 }
 0x10a   : > { %v1658_v22 = vunpack.c.l.b16 %v1598_v17 }
 0x10c   : > { %676 = vrot.lane.b32.xlu1 %v617_v26, %s6201_s28  ;;  %v6551_v27 = vpack.c.b16 %v1658_v22, %v1658_v22 }
 0x10d   : > { %678 = vrot.lane.b32.xlu2 %v622_v30, %s6201_s28 }
 0x10f   : > { %856 = vrot.lane.b32.xlu0 %v855_v16, %s6203_s30  ;;  %v1597_v16 = vpack.c.bf16 %v6514_v3, %v6514_v3  ;;  %v6617_v34 = vpop.f32.mrf.mxu1 }
 0x111   : > { %v1657_v20 = vunpack.c.l.b16 %v1597_v16  ;;  %v5266_v16 = vld [vmem:[#allocation5 + $0x18] sm:$0xf0] }
 0x112   : > { %v5269_v17 = vor.u32 %v5389_v14, %v5266_v16 }
 0x113   : > { %v6549_v26 = vpack.c.b16 %v1658_v22, %v1657_v20  ;;  %v1725_v20 = vrot.slane %v6450_v15, 2  ;;  %v1726_v22 = vrot.slane %v6460_v21, 2 }
 0x114   : > { %1500 = vrot.lane.b32.xlu1 %v1446_v36, %s6202_s29  ;;  %v2547_v36 = vrot.slane %v6551_v27, 6 }
 0x115   : > { %916 = vrot.lane.b32.xlu2 %v915_v39, %s6203_s30  ;;  %9701 = vst [vmem:[#allocation13_spill] sm:$0xff] %v6549_v26  ;;  %v2032_v28 = vrot.slane %v6549_v26, 2 }
 0x117   : > { %v6489_v50 = vpop.permute.xlu2 %628  ;;  %680 = vrot.lane.b32.xlu0 %v618_v49, %s6201_s28  ;;  %v5281_v49 = vor.u32 %v5395_v48, %v5280_v47  ;;  %v6570_v51 = vsel %vm1440_vm4, %v2032_v28, %v2547_v36  ;;  %v6647_v16 = vpop.f32.mrf.mxu1 }
 0x118   : > { %9702 = vst [vmem:[#allocation14_spill] sm:$0xff] %v6570_v51 }
 0x119   : > { %389 = vmatpush.bf16.msrb.mxu2 %v5281_v49  ;;  %v1731_v49 = vrot.slane %v6514_v3, 2 }
 0x11c   : > { %682 = vrot.lane.b32.xlu1 %v623_v56, %s6201_s28  ;;  %v5264_v56 = vld [vmem:[#allocation5 + $0x8] sm:$0xf] }
 0x11d   : > { %1531 = vrot.lane.b32.xlu2 %v1449_v57, %s6202_s29  ;;  %v5391_v57 = vld [vmem:[#allocation5 + $0x14] sm:$0xf0] }
 0x11e   : > { %v5265_v58 = vor.u32 %v5391_v57, %v5264_v56  ;;  %v1595_v56 = vpack.c.bf16 %v6478_v33, %v6478_v33  ;;  %v1596_v57 = vpack.c.bf16 %v6497_v55, %v6497_v55 }
 0x11f   : > { %v6503_v60 = vpop.permute.xlu2 %636  ;;  %1529 = vrot.lane.b32.xlu0 %v6476_v32, %s6202_s29 }
 0x120   : > { %390 = vmatpush.bf16.msrb.mxu2 %v5265_v58  ;;  %v9612_v58 = vrot.slane %v6530_v11, 2 }
 0x123   : > { %5294 = vmatmul.msk.bf16.vlgmr.msrb.gmra.mxu2 %vm312_vm0, %v6339_v29 }
 0x124   : > { %532 = vrot.lane.b32.xlu1 %v6476_v32, %s6203_s30 }
 0x125   : > { %1789 = vrot.lane.b32.xlu2 %v1741_v4, %s6201_s28 }
 0x127   : > { %v6524_v6 = vpop.permute.xlu2 %630  ;;  %946 = vrot.lane.b32.xlu0 %v945_v5, %s6203_s30  ;;  %v5285_v5 = vor.u32 %v5393_v1, %v5282_v2  ;;  %v1715_v2 = vrot.slane %v6536_v13, 6 }
 0x129   : > { %418 = vmatpush.bf16.msrb.mxu3 %v5285_v5 }
 0x12c   : > { %559 = vrot.lane.b32.xlu1 %v6508_v62, %s6203_s30 }
 0x12d   : > { %1606 = vrot.lane.b32.xlu2 %v6530_v11, %s6203_s30  ;;  %419 = vmatpush.bf16.msrb.mxu3 %v5269_v17  ;;  %v1630_v17 = vunpack.c.l.b16 %v1595_v56 }
 0x12f   : > { %v6542_v18 = vpop.permute.xlu2 %5490  ;;  %1047 = vrot.lane.b32.xlu0 %v1046_v12, %s6203_s30  ;;  %v6545_v19 = vpop.permute.xlu0 %632  ;;  %v6589_v12 = vpack.i.bf16 %v6460_v21, %v6450_v15 }
 0x130   : > { %5298 = vmatmul.msk.bf16.vlgmr.msrb.gmra.mxu3 %vm312_vm0, %v6339_v29 }
 0x133   : > { %5295 = vmatmul.msk.bf16.gmra.mxu2 %vm312_vm0, %v6341_v35 }
 0x134   : > { %1560 = vrot.lane.b32.xlu1 %v6508_v62, %s6202_s29 }
 0x135   : > { %1753 = vrot.lane.b32.xlu2 %v6478_v33, %s6199_s18 }
 0x136   : > { %v6558_v30 = vpop.permute.xlu1 %640 }
 0x137   : > { %v6563_v39 = vpop.permute.xlu2 %5500  ;;  %1562 = vrot.lane.b32.xlu0 %v1452_v31, %s6202_s29  ;;  %v1727_v31 = vsel %vm597_vm2, %v1725_v20, %v1726_v22  ;;  %v6649_v20 = vunpack.c.l.b16 %v1596_v57 }
 0x138   : > { %v1745_v47 = vsel %vm619_vm3, %v1713_v61, %v1727_v31  ;;  %v1600_v31 = vpack.c.bf16 %v6647_v16, %v6647_v16 }
 0x139   : > { %v6572_v52 = vpop.permute.xlu0 %5495 }
 0x13a   : > { %v1685_v56 = vunpack.c.l.b16 %v1600_v31  ;;  %v1743_v31 = vsel %vm614_vm1, %v6514_v3, %v1715_v2 }
 0x13c   : > { %1078 = vrot.lane.b32.xlu1 %v1077_v53, %s6203_s30  ;;  %v1732_v53 = vrot.slane %v6536_v13, 2 }
 0x13d   : > { %1795 = vrot.lane.b32.xlu2 %v1746_v54, %s6201_s28 }
 0x13e   : > { %v6577_v59 = vpop.permute.xlu1 %634  ;;  %v1733_v1 = vsel %vm597_vm2, %v1731_v49, %v1732_v53  ;;  %v6660_v49 = vpack.i.bf16 %v6647_v16, %v6617_v34 }
 0x13f   : > { %v6579_v4 = vpop.permute.xlu2 %672  ;;  %1751 = vrot.lane.b32.xlu0 %v6460_v21, %s6199_s18  ;;  %v1747_v14 = vsel %vm619_vm3, %v1715_v2, %v1733_v1  ;;  %v6680_v1 = vpack.c.b16 %v1685_v56, %v1685_v56 }
 0x140   : > { %5299 = vmatmul.msk.bf16.gmra.mxu3 %vm312_vm0, %v6341_v35 }
 0x141   : > { %v6583_v9 = vpop.permute.xlu0 %668 }
 0x143   : > { %5296 = vmatmul.msk.bf16.gmra.mxu2 %vm312_vm0, %v6345_v38 }
 0x144   : > { %5530 = vrot.lane.b32.xlu1 %v6589_v12, %s6200_s23 }
 0x145   : > { %1759 = vrot.lane.b32.xlu2 %v6536_v13, %s6199_s18 }
 0x146   : > { %v6597_v23 = vpop.permute.xlu1 %5505 }
 0x147   : > { %v6601_v25 = vpop.permute.xlu2 %642  ;;  %1793 = vrot.lane.b32.xlu0 %v1742_v24, %s6201_s28  ;;  %v1599_v24 = vpack.c.bf16 %v6617_v34, %v6617_v34 }
 0x149   : > { %v6607_v36 = vpop.permute.xlu0 %674 }
 0x14c   : > { %1791 = vrot.lane.b32.xlu1 %v1745_v47, %s6201_s28 }
 0x14d   : > { %5535 = vrot.lane.b32.xlu2 %v6611_v45, %s6200_s23 }
 0x14e   : > { %v6621_v48 = vpop.permute.xlu1 %670 }
 0x14f   : > { %v6623_v29 = vpop.permute.xlu2 %5525  ;;  %1757 = vrot.lane.b32.xlu0 %v6514_v3, %s6199_s18 }
 0x150   : > { %5300 = vmatmul.msk.bf16.gmra.mxu3 %vm312_vm0, %v6345_v38 }
 0x151   : > { %v478_v61 = vpop.permute.xlu0 %477 }
 0x152   : > { %v484_v54 = vsel %vm479_vm5, %v478_v61, 0  ;;  %v6666_v61 = vpack.c.b16 %v6649_v20, %v1630_v17 }
 0x153   : > { %493 = vmatpush.bf16.xpose.msrb.mxu0 %v484_v54  ;;  %v1684_v54 = vunpack.c.l.b16 %v1599_v24  ;;  %v2548_v24 = vrot.slane %v6680_v1, 6  ;;  %5297 = vmatmul.msk.bf16.gmra.mxu2 %vm312_vm0, %v6343_v37 }
 0x154   : > { %1755 = vrot.lane.b32.xlu1 %v6497_v55, %s6199_s18  ;;  %9703 = vst [vmem:[#allocation15_spill] sm:$0xff] %v6666_v61 }
 0x155   : > { %1973 = vrot.lane.b32.xlu2 %v9612_v58, %s6203_s30  ;;  %v1734_v58 = vrot.slane %v6617_v34, 2 }
 0x156   : > { %v6644_v5 = vpop.permute.xlu1 %5510 }
 0x157   : > { %v1017_v22 = vpop.permute.xlu2 %1016  ;;  %1799 = vrot.lane.b32.xlu0 %v1747_v14, %s6201_s28 }
 0x158   : > { %v1022_v2 = vsel %vm479_vm5, %v1017_v22, 0 }
 0x159   : > { %v506_v47 = vpop.permute.xlu0 %505 }
 0x15a   : > { %v511_v53 = vsel %vm479_vm5, %v506_v47, 0  ;;  %5304 = vmatmul.msk.bf16.vlgmr.msrb.gmra.mxu0 %vm479_vm5, %v6416_v0  ;;  %v6678_v0 = vpack.c.b16 %v1685_v56, %v1684_v54  ;;  %v1716_v54 = vrot.slane %v6647_v16, 6 }
 0x15b   : > { %520 = vmatpush.bf16.xpose.msra.mxu1 %v511_v53 }
 0x15c   : > { %1633 = vrot.lane.b32.xlu1 %v6666_v61, %s6203_s30  ;;  %9704 = vst [vmem:[#allocation16_spill] sm:$0xff] %v6678_v0  ;;  %v2062_v17 = vrot.slane %v6678_v0, 2 }
 0x15d   : > { %5560 = vrot.lane.b32.xlu2 %v6660_v49, %s6200_s23 }
 0x15e   : > { %v6672_v35 = vpop.permute.xlu1 %1467  ;;  %v6694_v47 = vsel %vm1440_vm4, %v2062_v17, %v2548_v24 }
 0x15f   : > { %1660 = vrot.lane.b32.xlu0 %v6549_v26, %s6203_s30  ;;  %v6676_v57 = vpop.permute.xlu2 %1469  ;;  %9705 = vst [vmem:[#allocation17_spill] sm:$0xff] %v6694_v47  ;;  %v1735_v47 = vrot.slane %v6647_v16, 2 }
 0x160   : > { %5301 = vmatmul.msk.bf16.gmra.mxu3 %vm312_vm0, %v6343_v37 }
 0x161   : > { %v6682_v14 = vpop.permute.xlu0 %638  ;;  %v1736_v26 = vsel %vm597_vm2, %v1734_v58, %v1735_v47 }
 0x162   : > { %5305 = vmatmul.msk.bf16.vlgmr.msra.gmra.mxu1 %vm479_vm5, %v6430_v7  ;;  %v1748_v11 = vsel %vm619_vm3, %v1716_v54, %v1736_v26 }
 0x164   : > { %1797 = vrot.lane.b32.xlu1 %v1743_v31, %s6201_s28 }
 0x165   : > { %2033 = vrot.lane.b32.xlu2 %v2032_v28, %s6203_s30  ;;  %v1744_v28 = vsel %vm614_vm1, %v6617_v34, %v1716_v54  ;;  %v5497_v54 = vunpack.i.l.bf16 %v6572_v52 }
 0x166   : > { %v887_v53 = vpop.permute.xlu1 %886 }
 0x167   : > { %v892_v7 = vsel %vm479_vm5, %v887_v53, 0  ;;  %5545 = vrot.lane.b32.xlu0 %v6589_v12, %s6202_s29  ;;  %v6703_v56 = vpop.permute.xlu2 %678  ;;  %v5554_v12 = vpack.i.bf16 %v6497_v55, %v6478_v33 }
 0x168   : > { %901 = vmatpush.bf16.xpose.msrb.mxu1 %v892_v7  ;;  %v9619_v7 = vlaneseq }
 0x169   : > { %v6708_v24 = vpop.permute.xlu0 %5515 }
 0x16c   : > { %1761 = vrot.lane.b32.xlu1 %v6617_v34, %s6199_s18 }
 0x16d   : > { %1801 = vrot.lane.b32.xlu2 %v1744_v28, %s6201_s28  ;;  %v6735_v28 = vpack.c.b16 %v6527_v10, %v6527_v10 }
 0x16e   : > { %v986_v31 = vpop.permute.xlu1 %985 }
 0x16f   : > { %5555 = vrot.lane.b32.xlu0 %v5554_v12, %s6202_s29  ;;  %v6718_v22 = vpop.permute.xlu2 %916  ;;  %9707 = vst [vmem:[#allocation19_spill] sm:$0xff] %v6735_v28  ;;  %v2101_v51 = vrot.slane %v6735_v28, 1  ;;  %v991_v26 = vsel %vm479_vm5, %v986_v31, 0 }
 0x170   : > { %1031 = vmatpush.bf16.xpose.msra.mxu1 %v1022_v2 }
 0x171   : > { %v6720_v38 = vpop.permute.xlu0 %5520 }
 0x174   : > { %5540 = vrot.lane.b32.xlu1 %v5554_v12, %s6200_s23 }
 0x175   : > { %1687 = vrot.lane.b32.xlu2 %v6678_v0, %s6203_s30  ;;  %v6744_v0 = vshrl.u32 %v9619_v7, 7 }
 0x176   : > { %v6727_v53 = vpop.permute.xlu1 %1749 }
 0x177   : > { %1763 = vrot.lane.b32.xlu0 %v6647_v16, %s6199_s18  ;;  %v6731_v2 = vpop.permute.xlu2 %1531  ;;  %vm446_vm6 = vcmp.ge.s32.totalorder %v6744_v0, 4  ;;  %vm444_vm9 = vcmp.lt.s32.totalorder %v6744_v0, 4 }
 0x178   : > { %9706 = vst [vmem:[#allocation18_spill] sm:$0xff] %v6731_v2  ;;  %v652_v58 = vsel %vm446_vm6, %v6363_v40, %v6489_v50  ;;  %v5508_v50 = vunpack.i.h.bf16 %v6597_v23 }
 0x179   : > { %v6741_v12 = vpop.permute.xlu0 %1498  ;;  %v692_v47 = vmul.f32 %v6583_v9, %v652_v58  ;;  %v5493_v58 = vunpack.i.h.bf16 %v6542_v18 }
 0x17c   : > { %5550 = vrot.lane.b32.xlu1 %v6611_v45, %s6202_s29 }
 0x17d   : > { %2102 = vrot.lane.b32.xlu2 %v2101_v51, %s6203_s30  ;;  %v6764_v51 = vadd.s32 8, %v6744_v0 }
 0x17e   : > { %v6751_v10 = vpop.permute.xlu1 %676 }
 0x17f   : > { %1803 = vrot.lane.b32.xlu0 %v1748_v11, %s6201_s28  ;;  %v6756_v37 = vpop.permute.xlu2 %1789  ;;  %9708 = vst [vmem:[#allocation20_spill] sm:$0xff] %v6764_v51  ;;  %v5498_v11 = vunpack.i.h.bf16 %v6572_v52  ;;  %vm449_vm7 = vcmp.lt.s32.totalorder %v6764_v51, 10  ;;  %v794_v52 = vsel %vm446_vm6, %v6365_v41, %v5497_v54 }
 0x180   : > { %v802_v54 = vpack.c.bf16 %v794_v52, %v794_v52  ;;  %v653_v2 = vsel %vm449_vm7, %v6384_v46, %v6524_v6 }
 0x181   : > { %v857_v7 = vpop.permute.xlu0 %856 }
 0x182   : > { %v862_v45 = vsel %vm479_vm5, %v857_v7, 0  ;;  %v5507_v7 = vunpack.i.l.bf16 %v6597_v23  ;;  %v880_v6 = vunpack.c.l.b16 %v802_v54 }
 0x183   : > { %871 = vmatpush.bf16.xpose.msra.mxu0 %v862_v45 }
 0x184   : > { %5565 = vrot.lane.b32.xlu1 %v6660_v49, %s6202_s29  ;;  %v795_v49 = vsel %vm449_vm7, %v6377_v44, %v5498_v11  ;;  %v834_v45 = vsel %vm446_vm6, %v6365_v41, %v5507_v7  ;;  %v9710_v7 = vrot.slane %v6666_v61, 2 }
 0x185   : > { %708 = vrot.lane.b32.xlu2 %v692_v47, %s6199_s18  ;;  %v835_v47 = vsel %vm449_vm7, %v6377_v44, %v5508_v50  ;;  %v803_v23 = vpack.c.bf16 %v795_v49, %v795_v49 }
 0x186   : > { %v6775_v28 = vpop.permute.xlu1 %1500 }
 0x187   : > { %2063 = vrot.lane.b32.xlu0 %v2062_v17, %s6203_s30  ;;  %v6779_v9 = vpop.permute.xlu2 %1606  ;;  %v655_v17 = vsel %vm449_vm7, %v6377_v44, %v6577_v59  ;;  %v5503_v59 = vunpack.i.h.bf16 %v6563_v39  ;;  %v693_v44 = vmul.f32 %v6621_v48, %v653_v2  ;;  %v881_v49 = vunpack.c.l.b16 %v803_v23 }
 0x188   : > { %9709 = vst [vmem:[#allocation21_spill] sm:$0xff] %v6779_v9  ;;  %v695_v11 = vmul.f32 %v6607_v36, %v655_v17  ;;  %v5502_v9 = vunpack.i.l.bf16 %v6563_v39  ;;  %v843_v36 = vpack.c.bf16 %v835_v47, %v835_v47  ;;  %v793_v48 = vsel %vm449_vm7, %v6384_v46, %v5493_v58 }
 0x189   : > { %v6787_v31 = vpop.permute.xlu0 %680  ;;  %v833_v17 = vsel %vm449_vm7, %v6384_v46, %v5503_v59  ;;  %v654_v23 = vsel %vm446_vm6, %v6365_v41, %v6545_v19  ;;  %v801_v54 = vpack.c.bf16 %v793_v48, %v793_v48  ;;  %v5518_v48 = vunpack.i.h.bf16 %v6708_v24 }
 0x18a   : > { %v832_v2 = vsel %vm446_vm6, %v6363_v40, %v5502_v9 }
 0x18b   : > { %1000 = vmatpush.bf16.xpose.msrb.mxu0 %v991_v26  ;;  %v5492_v26 = vunpack.i.l.bf16 %v6542_v18  ;;  %v842_v18 = vpack.c.bf16 %v834_v45, %v834_v45  ;;  %v851_v61 = vunpack.c.l.b16 %v801_v54 }
 0x18c   : > { %2003 = vrot.lane.b32.xlu1 %v9710_v7, %s6203_s30  ;;  %v882_v7 = vpack.c.b16 %v881_v49, %v880_v6  ;;  %v5527_v49 = vunpack.i.l.bf16 %v6623_v29 }
 0x18d   : > { %714 = vrot.lane.b32.xlu2 %v695_v11, %s6199_s18  ;;  %v792_v39 = vsel %vm446_vm6, %v6363_v40, %v5492_v26  ;;  %v1009_v47 = vunpack.c.l.b16 %v842_v18  ;;  %v1010_v26 = vunpack.c.l.b16 %v843_v36  ;;  %v694_v11 = vmul.f32 %v6579_v4, %v654_v23 }
 0x18e   : > { %v6814_v50 = vpop.permute.xlu1 %682  ;;  %v800_v58 = vpack.c.bf16 %v792_v39, %v792_v39  ;;  %v841_v40 = vpack.c.bf16 %v833_v17, %v833_v17  ;;  %v922_v36 = vsel %vm479_vm5, %v6718_v22, 0  ;;  %v656_v23 = vsel %vm446_vm6, %v6373_v43, %v6503_v60 }
 0x18f   : > { %710 = vrot.lane.b32.xlu0 %v693_v44, %s6199_s18  ;;  %v6817_v52 = vpop.permute.xlu2 %1753  ;;  %v840_v44 = vpack.c.bf16 %v832_v2, %v832_v2  ;;  %v1011_v46 = vpack.c.b16 %v1010_v26, %v1009_v47  ;;  %v5517_v2 = vunpack.i.l.bf16 %v6708_v24  ;;  %v5528_v47 = vunpack.i.h.bf16 %v6623_v29 }
 0x190   : > { %v850_v59 = vunpack.c.l.b16 %v800_v58  ;;  %v979_v18 = vunpack.c.l.b16 %v841_v40  ;;  %v5513_v22 = vunpack.i.h.bf16 %v6644_v5  ;;  %v5512_v26 = vunpack.i.l.bf16 %v6644_v5 }
 0x191   : > { %v6835_v45 = vpop.permute.xlu0 %1529  ;;  %v978_v4 = vunpack.c.l.b16 %v840_v44  ;;  %v838_v24 = vsel %vm446_vm6, %v6371_v42, %v5527_v49  ;;  %v798_v29 = vsel %vm446_vm6, %v6371_v42, %v5517_v2  ;;  %v799_v5 = vsel %vm449_vm7, %v6434_v8, %v5518_v48 }
 0x192   : > { %v852_v39 = vpack.c.b16 %v851_v61, %v850_v59  ;;  %v696_v61 = vmul.f32 %v6751_v10, %v656_v23  ;;  %v658_v10 = vsel %vm446_vm6, %v6371_v42, %v6558_v30  ;;  %v846_v40 = vpack.c.bf16 %v838_v24, %v838_v24 }
 0x193   : > { %v980_v17 = vpack.c.b16 %v979_v18, %v978_v4  ;;  %v797_v42 = vsel %vm449_vm7, %v6413_v63, %v5513_v22  ;;  %v806_v59 = vpack.c.bf16 %v798_v29, %v798_v29  ;;  %v5523_v4 = vunpack.i.h.bf16 %v6720_v38 }
 0x194   : > { %712 = vrot.lane.b32.xlu1 %v694_v11, %s6199_s18  ;;  %v698_v18 = vmul.f32 %v6787_v31, %v658_v10  ;;  %v6927_v10 = vpack.c.b16 %v6649_v20, %v6649_v20 }
 0x195   : > { %883 = vrot.lane.b32.xlu2 %v882_v7, %s6200_s23  ;;  %v657_v7 = vsel %vm449_vm7, %v6413_v63, %v6682_v14  ;;  %v5522_v14 = vunpack.i.l.bf16 %v6720_v38  ;;  %v940_v38 = vunpack.c.l.b16 %v806_v59  ;;  %v2163_v59 = vrot.slane %v6551_v27, 1 }
 0x196   : > { %v533_v9 = vpop.permute.xlu1 %532  ;;  %v697_v30 = vmul.f32 %v6703_v56, %v657_v7  ;;  %v2132_v7 = vrot.slane %v6927_v10, 1  ;;  %v1773_v27 = vsel %vm446_vm6, %v6450_v15, %v6727_v53 }
 0x197   : > { %v538_v41 = vsel %vm479_vm5, %v533_v9, 0  ;;  %1012 = vrot.lane.b32.xlu0 %v1011_v46, %s6204_s4  ;;  %v6842_v19 = vpop.permute.xlu2 %1795  ;;  %v796_v46 = vsel %vm446_vm6, %v6373_v43, %v5512_v26 }
 0x198   : > { %547 = vmatpush.bf16.xpose.msra.mxu2 %v538_v41  ;;  %v807_v41 = vpack.c.bf16 %v799_v5, %v799_v5  ;;  %v804_v49 = vpack.c.bf16 %v796_v46, %v796_v46 }
 0x199   : > { %v947_v6 = vpop.permute.xlu0 %946 }
 0x19a   : > { %v952_v54 = vsel %vm479_vm5, %v947_v6, 0  ;;  %v659_v6 = vsel %vm449_vm7, %v6434_v8, %v6601_v25  ;;  %v941_v2 = vunpack.c.l.b16 %v807_v41 }
 0x19b   : > { %v699_v56 = vmul.f32 %v6814_v50, %v659_v6  ;;  %v836_v50 = vsel %vm446_vm6, %v6373_v43, %v5522_v14 }
 0x19c   : > { %853 = vrot.lane.b32.xlu1 %v852_v39, %s6200_s23  ;;  %v805_v39 = vpack.c.bf16 %v797_v42, %v797_v42  ;;  %v942_v26 = vpack.c.b16 %v941_v2, %v940_v38 }
 0x19d   : > { %981 = vrot.lane.b32.xlu2 %v980_v17, %s6204_s4  ;;  %v837_v17 = vsel %vm449_vm7, %v6413_v63, %v5523_v4 }
 0x19e   : > { %v560_v11 = vpop.permute.xlu1 %559  ;;  %v911_v22 = vunpack.c.l.b16 %v805_v39  ;;  %v1813_v39 = vmul.f32 %v6756_v37, %v1773_v27 }
 0x19f   : > { %v565_v58 = vsel %vm479_vm5, %v560_v11, 0  ;;  %5306 = vmatmul.msk.bf16.vlgmr.msra.gmra.mxu2 %vm479_vm5, %v6476_v32  ;;  %716 = vrot.lane.b32.xlu0 %v696_v61, %s6199_s18  ;;  %v6866_v60 = vpop.permute.xlu2 %1759  ;;  %v839_v32 = vsel %vm449_vm7, %v6434_v8, %v5528_v47  ;;  %v1071_v8 = vunpack.c.l.b16 %v846_v40  ;;  %v910_v47 = vunpack.c.l.b16 %v804_v49 }
 0x1a0   : > { %931 = vmatpush.bf16.xpose.msrb.mxu2 %v922_v36  ;;  %574 = vmatpush.bf16.xpose.msra.mxu3 %v565_v58  ;;  %v847_v36 = vpack.c.bf16 %v839_v32, %v839_v32  ;;  %v845_v61 = vpack.c.bf16 %v837_v17, %v837_v17 }
 0x1a1   : > { %v1048_v44 = vpop.permute.xlu0 %1047  ;;  %v912_v24 = vpack.c.b16 %v911_v22, %v910_v47 }
 0x1a2   : > { %v1053_v9 = vsel %vm479_vm5, %v1048_v44, 0  ;;  %v1072_v25 = vunpack.c.l.b16 %v847_v36  ;;  %v1041_v43 = vunpack.c.l.b16 %v845_v61 }
 0x1a4   : > { %718 = vrot.lane.b32.xlu1 %v697_v30, %s6199_s18  ;;  %v1073_v11 = vpack.c.b16 %v1072_v25, %v1071_v8 }
 0x1a5   : > { %720 = vrot.lane.b32.xlu2 %v698_v18, %s6199_s18 }
 0x1a6   : > { %v6904_v48 = vpop.permute.xlu1 %1560 }
 0x1a7   : > { %5307 = vmatmul.msk.bf16.vlgmr.msra.gmra.mxu3 %vm479_vm5, %v6508_v62  ;;  %722 = vrot.lane.b32.xlu0 %v699_v56, %s6199_s18  ;;  %v6909_v31 = vpop.permute.xlu2 %5535  ;;  %v844_v62 = vpack.c.bf16 %v836_v50, %v836_v50 }
 0x1a8   : > { %961 = vmatpush.bf16.xpose.msrb.mxu3 %v952_v54  ;;  %1062 = vmatpush.bf16.xpose.msra.mxu2 %v1053_v9 }
 0x1a9   : > { %v6917_v23 = vpop.permute.xlu0 %1562  ;;  %v1040_v29 = vunpack.c.l.b16 %v844_v62 }
 0x1ab   : > { %v1042_v32 = vpack.c.b16 %v1041_v43, %v1040_v29 }
 0x1ac   : > { %943 = vrot.lane.b32.xlu1 %v942_v26, %s6200_s23 }
 0x1ad   : > { %1074 = vrot.lane.b32.xlu2 %v1073_v11, %s6204_s4 }
 0x1ae   : > { %v1079_v58 = vpop.permute.xlu1 %1078 }
 0x1af   : > { %v1084_v5 = vsel %vm479_vm5, %v1079_v58, 0  ;;  %913 = vrot.lane.b32.xlu0 %v912_v24, %s6200_s23  ;;  %v6923_v63 = vpop.permute.xlu2 %1973 }
 0x1b0   : > { %9711 = vst [vmem:[#allocation22_spill] sm:$0xff] %v6923_v63  ;;  %1093 = vmatpush.bf16.xpose.msra.mxu3 %v1084_v5  ;;  %v9752_v63 = vld [vmem:[#allocation13_spill] sm:$0xff] }
 0x1b1   : > { %v6929_v54 = vpop.permute.xlu0 %1751 }
 0x1b4   : > { %1043 = vrot.lane.b32.xlu1 %v1042_v32, %s6204_s4  ;;  %v5538_v32 = vunpack.i.h.bf16 %v6909_v31 }
 0x1b5   : > { %2133 = vrot.lane.b32.xlu2 %v2132_v7, %s6203_s30  ;;  %v5537_v7 = vunpack.i.l.bf16 %v6909_v31 }
 0x1b6   : > { %v5531_v44 = vpop.permute.xlu1 %5530 }
 0x1b7   : > { %v5533_v40 = vunpack.i.h.bf16 %v5531_v44  ;;  %v5532_v46 = vunpack.i.l.bf16 %v5531_v44  ;;  %v6934_v42 = vpop.permute.xlu2 %5560  ;;  %v1913_v31 = vsel %vm446_vm6, %v6514_v3, %v5537_v7 }
 0x1b8   : > { %v5563_v7 = vunpack.i.h.bf16 %v6934_v42 }
 0x1b9   : > { %v6936_v30 = vpop.permute.xlu0 %1793  ;;  %v1909_v20 = vsel %vm446_vm6, %v6450_v15, %v5532_v46  ;;  %v1910_v9 = vsel %vm449_vm7, %v6460_v21, %v5533_v40 }
 0x1ba   : > { %v1917_v41 = vpack.c.bf16 %v1909_v20, %v1909_v20  ;;  %v1918_v4 = vpack.c.bf16 %v1910_v9, %v1910_v9 }
 0x1bc   : > { %2164 = vrot.lane.b32.xlu1 %v2163_v59, %s6203_s30  ;;  %v1967_v14 = vunpack.c.l.b16 %v1917_v41  ;;  %v1968_v18 = vunpack.c.l.b16 %v1918_v4  ;;  %v1914_v4 = vsel %vm449_vm7, %v6536_v13, %v5538_v32 }
 0x1be   : > { %v6946_v36 = vpop.permute.xlu1 %1791  ;;  %v1969_v6 = vpack.c.b16 %v1968_v18, %v1967_v14 }
 0x1bf   : > { %v6948_v56 = vpop.permute.xlu2 %2033 }
 0x1c0   : > { %9712 = vst [vmem:[#allocation23_spill] sm:$0xff] %v6948_v56  ;;  %1970 = vrot.lane.b32.xlu0 %v1969_v6, %s6200_s23 }
 0x1c1   : > { %v6951_v49 = vpop.permute.xlu0 %1757 }
 0x1c6   : > { %v6958_v38 = vpop.permute.xlu1 %1755 }
 0x1c7   : > { %v6960_v2 = vpop.permute.xlu2 %1801 }
 0x1c8   : > { %1829 = vrot.lane.b32.xlu0 %v1813_v39, %s6199_s18 }
 0x1c9   : > { %v6963_v8 = vpop.permute.xlu0 %1799 }
 0x1ce   : > { %v6965_v25 = vpop.permute.xlu1 %1633 }
 0x1cf   : > { %v6967_v50 = vpop.permute.xlu2 %1687 }
 0x1d1   : > { %v6969_v17 = vpop.permute.xlu0 %1660 }
 0x1d6   : > { %v6971_v47 = vpop.permute.xlu1 %1797 }
 0x1d7   : > { %v6973_v22 = vpop.permute.xlu2 %2102 }
 0x1d8   : > { %9713 = vst [vmem:[#allocation24_spill] sm:$0xff] %v6973_v22 }
 0x1d9   : > { %v5546_v53 = vpop.permute.xlu0 %5545 }
 0x1da   : > { %v5548_v37 = vunpack.i.h.bf16 %v5546_v53  ;;  %v5547_v26 = vunpack.i.l.bf16 %v5546_v53  ;;  %v7000_v53 = vpop.f32.mrf.mxu2 }
 0x1dc   : > { %v1949_v62 = vsel %vm446_vm6, %v6450_v15, %v5547_v26  ;;  %v1950_v61 = vsel %vm449_vm7, %v6460_v21, %v5548_v37  ;;  %v2194_v26 = vrot.slane %v6680_v1, 1 }
 0x1dd   : > { %v1957_v11 = vpack.c.bf16 %v1949_v62, %v1949_v62  ;;  %v1958_v24 = vpack.c.bf16 %v1950_v61, %v1950_v61  ;;  %v1921_v62 = vpack.c.bf16 %v1913_v31, %v1913_v31  ;;  %v1922_v61 = vpack.c.bf16 %v1914_v4, %v1914_v4 }
 0x1de   : > { %v6981_v58 = vpop.permute.xlu1 %1761 }
 0x1df   : > { %v2095_v29 = vunpack.c.l.b16 %v1957_v11  ;;  %v2096_v43 = vunpack.c.l.b16 %v1958_v24  ;;  %v6983_v5 = vpop.permute.xlu2 %708  ;;  %v5562_v11 = vunpack.i.l.bf16 %v6934_v42  ;;  %v1916_v42 = vsel %vm449_vm7, %v6647_v16, %v5563_v7 }
 0x1e1   : > { %v5556_v44 = vpop.permute.xlu0 %5555  ;;  %v2097_v40 = vpack.c.b16 %v2096_v43, %v2095_v29 }
 0x1e2   : > { %v5558_v46 = vunpack.i.h.bf16 %v5556_v44  ;;  %v5557_v15 = vunpack.i.l.bf16 %v5556_v44 }
 0x1e3   : > { %2098 = vrot.lane.b32.xlu2 %v2097_v40, %s6204_s4 }
 0x1e4   : > { %v1951_v20 = vsel %vm446_vm6, %v6478_v33, %v5557_v15  ;;  %v1952_v9 = vsel %vm449_vm7, %v6497_v55, %v5558_v46  ;;  %v2027_v15 = vunpack.c.l.b16 %v1921_v62  ;;  %v7031_v62 = vpop.f32.mrf.mxu3 }
 0x1e5   : > { %v1959_v59 = vpack.c.bf16 %v1951_v20, %v1951_v20  ;;  %v1960_v41 = vpack.c.bf16 %v1952_v9, %v1952_v9  ;;  %v2028_v20 = vunpack.c.l.b16 %v1922_v61  ;;  %v1915_v9 = vsel %vm446_vm6, %v6617_v34, %v5562_v11  ;;  %9714 = vst [vmem:[#allocation25_spill] sm:$0xff] %v7031_v62  ;;  %v7042_v11 = vpop.f32.mrf.mxu2 }
 0x1e6   : > { %v5541_v14 = vpop.permute.xlu1 %5540 }
 0x1e7   : > { %v5543_v18 = vunpack.i.h.bf16 %v5541_v14  ;;  %v5542_v6 = vunpack.i.l.bf16 %v5541_v14  ;;  %v2126_v27 = vunpack.c.l.b16 %v1959_v59  ;;  %v2127_v39 = vunpack.c.l.b16 %v1960_v41  ;;  %v7002_v37 = vpop.permute.xlu2 %714 }
 0x1e8   : > { %v1507_v14 = vsel %vm597_vm2, %v6775_v28, 0 }
 0x1e9   : > { %v7006_v24 = vpop.permute.xlu0 %1763  ;;  %v2128_v29 = vpack.c.b16 %v2127_v39, %v2126_v27  ;;  %v1911_v43 = vsel %vm446_vm6, %v6478_v33, %v5542_v6  ;;  %v1912_v32 = vsel %vm449_vm7, %v6497_v55, %v5543_v18  ;;  %v1774_v18 = vsel %vm449_vm7, %v6460_v21, %v6929_v54 }
 0x1ea   : > { %v1919_v44 = vpack.c.bf16 %v1911_v43, %v1911_v43  ;;  %v1920_v40 = vpack.c.bf16 %v1912_v32, %v1912_v32  ;;  %v2029_v27 = vpack.c.b16 %v2028_v20, %v2027_v15  ;;  %v1923_v39 = vpack.c.bf16 %v1915_v9, %v1915_v9 }
 0x1eb   : > { %2195 = vrot.lane.b32.xlu2 %v2194_v26, %s6203_s30  ;;  %2129 = vrot.lane.b32.xlu0 %v2128_v29, %s6204_s4  ;;  %v1814_v26 = vmul.f32 %v6946_v36, %v1774_v18  ;;  %v1924_v54 = vpack.c.bf16 %v1916_v42, %v1916_v42 }
 0x1ec   : > { %v1997_v1 = vunpack.c.l.b16 %v1919_v44  ;;  %v1998_v46 = vunpack.c.l.b16 %v1920_v40  ;;  %v2057_v7 = vunpack.c.l.b16 %v1923_v39 }
 0x1ed   : > { %v2058_v44 = vunpack.c.l.b16 %v1924_v54 }
 0x1ee   : > { %v5551_v59 = vpop.permute.xlu1 %5550  ;;  %v1999_v41 = vpack.c.b16 %v1998_v46, %v1997_v1 }
 0x1ef   : > { %v5553_v31 = vunpack.i.h.bf16 %v5551_v59  ;;  %v5552_v4 = vunpack.i.l.bf16 %v5551_v59  ;;  %v884_v6 = vpop.permute.xlu2 %883  ;;  %v2059_v9 = vpack.c.b16 %v2058_v44, %v2057_v7 }
 0x1f0   : > { %2000 = vrot.lane.b32.xlu1 %v1999_v41, %s6200_s23  ;;  %5309 = vmatmul.msk.bf16.vlgmr.msrb.gmra.mxu1 %vm479_vm5, %v884_v6 }
 0x1f1   : > { %v7034_v61 = vpop.permute.xlu0 %1803  ;;  %v1953_v28 = vsel %vm446_vm6, %v6514_v3, %v5552_v4  ;;  %v1954_v21 = vsel %vm449_vm7, %v6536_v13, %v5553_v31  ;;  %1515 = vmatpush.bf16.msrb.mxu1 %v1507_v14  ;;  %v7059_v4 = vpop.f32.mrf.mxu2 }
 0x1f2   : > { %v1961_v29 = vpack.c.bf16 %v1953_v28, %v1953_v28  ;;  %v1962_v36 = vpack.c.bf16 %v1954_v21, %v1954_v21 }
 0x1f3   : > { %1831 = vrot.lane.b32.xlu2 %v1814_v26, %s6199_s18  ;;  %2030 = vrot.lane.b32.xlu0 %v2029_v27, %s6200_s23 }
 0x1f4   : > { %v2157_v43 = vunpack.c.l.b16 %v1961_v29  ;;  %v2158_v32 = vunpack.c.l.b16 %v1962_v36  ;;  %v1639_v29 = vsel %vm479_vm5, %v6965_v25, 0 }
 0x1f5   : > { %1516 = vmatpush.bf16.msrb.mxu1 %v6741_v12  ;;  %v7056_v12 = vpop.f32.mrf.mxu3 }
 0x1f6   : > { %v5566_v40 = vpop.permute.xlu1 %5565  ;;  %v2159_v1 = vpack.c.b16 %v2158_v32, %v2157_v43  ;;  %9716 = vst [vmem:[#allocation27_spill] sm:$0xff] %v7056_v12  ;;  %v1476_v43 = vsel %vm597_vm2, %v6676_v57, 0 }
 0x1f7   : > { %v5568_v46 = vunpack.i.h.bf16 %v5566_v40  ;;  %v5567_v15 = vunpack.i.l.bf16 %v5566_v40 }
 0x1f8   : > { %2160 = vrot.lane.b32.xlu1 %v2159_v1, %s6204_s4 }
 0x1f9   : > { %v7048_v20 = vpop.permute.xlu0 %2063  ;;  %v1955_v59 = vsel %vm446_vm6, %v6617_v34, %v5567_v15  ;;  %v1956_v41 = vsel %vm449_vm7, %v6647_v16, %v5568_v46  ;;  %v7066_v28 = vpop.f32.mrf.mxu2 }
 0x1fa   : > { %9715 = vst [vmem:[#allocation26_spill] sm:$0xff] %v7048_v20  ;;  %v1963_v42 = vpack.c.bf16 %v1955_v59, %v1955_v59  ;;  %v1964_v31 = vpack.c.bf16 %v1956_v41, %v1956_v41  ;;  %v982_v46 = vpop.permute.xlu2 %981  ;;  %v9721_v59 = vld [vmem:[#allocation21_spill] sm:$0xff] }
 0x1fb   : > { %2060 = vrot.lane.b32.xlu0 %v2059_v9, %s6200_s23  ;;  %v1612_v41 = vsel %vm479_vm5, %v9721_v59, 0  ;;  %v1666_v59 = vsel %vm479_vm5, %v6969_v17, 0 }
 0x1fc   : > { %v2188_v14 = vunpack.c.l.b16 %v1963_v42  ;;  %v2189_v18 = vunpack.c.l.b16 %v1964_v31  ;;  %v1569_v42 = vsel %vm597_vm2, %v6917_v23, 0  ;;  %v9722_v31 = vld [vmem:[#allocation18_spill] sm:$0xff] }
 0x1fd   : > { %v7064_v26 = vpop.f32.mrf.mxu3 }
 0x1fe   : > { %v7061_v6 = vpop.permute.xlu1 %2003  ;;  %v2190_v27 = vpack.c.b16 %v2189_v18, %v2188_v14  ;;  %9718 = vst [vmem:[#allocation29_spill] sm:$0xff] %v7064_v26  ;;  %v1538_v14 = vsel %vm597_vm2, %v9722_v31, 0 }
 0x1ff   : > { %9717 = vst [vmem:[#allocation28_spill] sm:$0xff] %v7061_v6  ;;  %v2704_v6 = vpack.c.bf16 %v7066_v28, %v7066_v28 }
 0x200   : > { %2191 = vrot.lane.b32.xlu1 %v2190_v27, %s6204_s4  ;;  %v741_v27 = vsel %vm479_vm5, %v7002_v37, 0.0 }
 0x201   : > { %v711_v39 = vpop.permute.xlu0 %710  ;;  %v7076_v7 = vpop.f32.mrf.mxu2 }
 0x202   : > { %v735_v9 = vsel %vm479_vm5, %v711_v39, 0.0  ;;  %v721_v39 = vpop.permute.xlu2 %720 }
 0x203   : > { %v750_v37 = vsel %vm479_vm5, %v721_v39, 0.0 }
 0x205   : > { %v7073_v32 = vpop.f32.mrf.mxu3 }
 0x206   : > { %v713_v21 = vpop.permute.xlu1 %712  ;;  %9719 = vst [vmem:[#allocation30_spill] sm:$0xff] %v7073_v32 }
 0x209   : > { %v1013_v54 = vpop.permute.xlu0 %1012  ;;  %v7081_v15 = vpop.f32.mrf.mxu2 }
 0x20a   : > { %5313 = vmatmul.msk.bf16.vlgmr.msra.gmra.mxu1 %vm479_vm5, %v1013_v54  ;;  %v738_v54 = vsel %vm479_vm5, %v713_v21, 0.0  ;;  %v1693_v21 = vsel %vm479_vm5, %v6967_v50, 0 }
 0x20b   : > { %1648 = vmatpush.bf16.xpose.msra.mxu1 %v1639_v29  ;;  %v7101_v29 = vpop.f32.mrf.mxu0 }
 0x20c   : > { %9724 = vst [vmem:[#allocation18_spill] sm:$0xff] %v7101_v29 }
 0x20d   : > { %v7079_v1 = vpop.f32.mrf.mxu3 }
 0x20e   : > { %v854_v36 = vpop.permute.xlu1 %853  ;;  %9720 = vst [vmem:[#allocation31_spill] sm:$0xff] %v7079_v1 }
 0x20f   : > { %5308 = vmatmul.msk.bf16.vlgmr.msra.gmra.mxu0 %vm479_vm5, %v854_v36  ;;  %v732_v36 = vsel %vm479_vm5, %v6983_v5, 0.0 }
 0x210   : > { %1484 = vmatpush.bf16.msra.mxu0 %v1476_v43 }
 0x211   : > { %v717_v44 = vpop.permute.xlu0 %716  ;;  %v7097_v23 = vpop.f32.mrf.mxu2 }
 0x214   : > { %1485 = vmatpush.bf16.msra.mxu0 %v6672_v35 }
 0x215   : > { %v7093_v18 = vpop.f32.mrf.mxu3 }
 0x216   : > { %v719_v40 = vpop.permute.xlu1 %718  ;;  %9723 = vst [vmem:[#allocation21_spill] sm:$0xff] %v7093_v18  ;;  %v9746_v18 = vld [vmem:[#allocation12_spill] sm:$0xff] }
 0x217   : > { %v747_v43 = vsel %vm479_vm5, %v719_v40, 0.0  ;;  %v744_v40 = vsel %vm479_vm5, %v717_v44, 0.0  ;;  %v9747_v1 = vrot.slane %v9746_v18, 2 }
 0x219   : > { %v723_v25 = vpop.permute.xlu0 %722 }
 0x21a   : > { %v753_v17 = vsel %vm479_vm5, %v723_v25, 0.0  ;;  %v1777_v25 = vsel %vm446_vm6, %v6514_v3, %v6951_v49 }
 0x21c   : > { %736 = vadd.xlane.f32.xlu2 %v735_v9  ;;  %v7110_v9 = vpop.f32.mrf.mxu2 }
 0x21e   : > { %v944_v57 = vpop.permute.xlu1 %943 }
 0x21f   : > { %5311 = vmatmul.msk.bf16.vlgmr.msrb.gmra.mxu3 %vm479_vm5, %v944_v57  ;;  %5312 = vmatmul.msk.bf16.vlgmr.msrb.gmra.mxu0 %vm479_vm5, %v982_v46  ;;  %v7108_v46 = vpop.f32.mrf.mxu3  ;;  %v7114_v57 = vpop.f32.mrf.mxu1 }
 0x220   : > { %1577 = vmatpush.bf16.msrb.mxu3 %v1569_v42  ;;  %1621 = vmatpush.bf16.xpose.msrb.mxu0 %v1612_v41  ;;  %9725 = vst [vmem:[#allocation32_spill] sm:$0xff] %v7108_v46  ;;  %v1109_v41 = vsel %vm1108_vm8, %v7101_v29, -inf  ;;  %v1115_v39 = vsel %vm1108_vm8, %v7114_v57, -inf  ;;  %v9745_v46 = vld [vmem:[#allocation19_spill] sm:$0xff] }
 0x221   : > { %v914_v35 = vpop.permute.xlu0 %913  ;;  %9726 = vst [vmem:[#allocation33_spill] sm:$0xff] %v7114_v57  ;;  %v2545_v32 = vrot.slane %v9745_v46, 6 }
 0x222   : > { %5310 = vmatmul.msk.bf16.vlgmr.msrb.gmra.mxu2 %vm479_vm5, %v914_v35 }
 0x223   : > { %1546 = vmatpush.bf16.msrb.mxu2 %v1538_v14 }
 0x224   : > { %1578 = vmatpush.bf16.msrb.mxu3 %v6904_v48  ;;  %742 = vadd.xlane.f32.xlu2 %v741_v27  ;;  %v1075_v48 = vpop.permute.xlu2 %1074  ;;  %v7129_v35 = vpop.f32.mrf.mxu2 }
 0x225   : > { %739 = vadd.xlane.f32.xlu0 %v738_v54  ;;  %9729 = vst [vmem:[#allocation36_spill] sm:$0xff] %v7129_v35  ;;  %v1121_v31 = vsel %vm1108_vm8, %v7129_v35, -inf }
 0x226   : > { %v1044_v5 = vpop.permute.xlu1 %1043 }
 0x227   : > { %1547 = vmatpush.bf16.msrb.mxu2 %v6835_v45  ;;  %v7117_v45 = vpop.f32.mrf.mxu0  ;;  %v7127_v42 = vpop.f32.mrf.mxu3 }
 0x228   : > { %9727 = vst [vmem:[#allocation34_spill] sm:$0xff] %v7117_v45  ;;  %v1112_v50 = vsel %vm1108_vm8, %v7117_v45, -inf  ;;  %v7131_v44 = vpop.f32.mrf.mxu1 }
 0x229   : > { %9728 = vst [vmem:[#allocation35_spill] sm:$0xff] %v7127_v42  ;;  %v1118_v14 = vsel %vm1108_vm8, %v7131_v44, -inf }
 0x22a   : > { %733 = vadd.xlane.f32.xlu1 %v732_v36  ;;  %9730 = vst [vmem:[#allocation37_spill] sm:$0xff] %v7131_v44  ;;  %v1817_v36 = vmul.f32 %v6971_v47, %v1777_v25 }
 0x22c   : > { %748 = vadd.xlane.f32.xlu2 %v747_v43  ;;  %v1776_v43 = vsel %vm449_vm7, %v6497_v55, %v6958_v38  ;;  %v1779_v55 = vsel %vm446_vm6, %v6617_v34, %v6981_v58 }
 0x22d   : > { %751 = vadd.xlane.f32.xlu0 %v750_v37  ;;  %v1816_v37 = vmul.f32 %v6842_v19, %v1776_v43  ;;  %v1819_v3 = vmul.f32 %v6960_v2, %v1779_v55  ;;  %v7168_v19 = vpop.permute.xlu2 %2133  ;;  %v7182_v2 = vpop.f32.mrf.mxu2 }
 0x22e   : > { %9732 = vst [vmem:[#allocation39_spill] sm:$0xff] %v7168_v19  ;;  %v7184_v58 = vpop.permute.xlu1 %2164 }
 0x22f   : > { %5315 = vmatmul.msk.bf16.vlgmr.msra.gmra.mxu3 %vm479_vm5, %v1075_v48  ;;  %v7138_v27 = vpop.f32.mrf.mxu3  ;;  %v1775_v48 = vsel %vm446_vm6, %v6478_v33, %v6817_v52  ;;  %9738 = vst [vmem:[#allocation45_spill] sm:$0xff] %v7182_v2 }
 0x230   : > { %1702 = vmatpush.bf16.xpose.msra.mxu3 %v1693_v21  ;;  %9731 = vst [vmem:[#allocation38_spill] sm:$0xff] %v7138_v27  ;;  %v1127_v54 = vsel %vm1108_vm8, %v7138_v27, -inf  ;;  %v1815_v21 = vmul.f32 %v6936_v30, %v1775_v48 }
 0x231   : > { %9739 = vst [vmem:[#allocation46_spill] sm:$0xff] %v7184_v58 }
 0x232   : > { %745 = vadd.xlane.f32.xlu1 %v744_v40  ;;  %5314 = vmatmul.msk.bf16.vlgmr.msra.gmra.mxu2 %vm479_vm5, %v1044_v5  ;;  %v7170_v49 = vpop.permute.xlu0 %1970  ;;  %v1124_v5 = vsel %vm1108_vm8, %v7182_v2, -inf }
 0x233   : > { %1675 = vmatpush.bf16.xpose.msra.mxu2 %v1666_v59  ;;  %9733 = vst [vmem:[#allocation40_spill] sm:$0xff] %v7170_v49 }
 0x234   : > { %1113 = vmax.xlane.f32.xlu2 %v1112_v50 }
 0x235   : > { %1110 = vmax.xlane.f32.xlu0 %v1109_v41 }
 0x237   : > { %v7174_v30 = vpop.f32.mrf.mxu3 }
 0x238   : > { %9735 = vst [vmem:[#allocation42_spill] sm:$0xff] %v7174_v30  ;;  %v1130_v38 = vsel %vm1108_vm8, %v7174_v30, -inf  ;;  %v2703_v30 = vpack.c.bf16 %v7059_v4, %v7059_v4 }
 0x23a   : > { %754 = vadd.xlane.f32.xlu1 %v753_v17  ;;  %v1830_v52 = vpop.permute.xlu0 %1829 }
 0x23c   : > { %1122 = vmax.xlane.f32.xlu2 %v1121_v31  ;;  %v1780_v31 = vsel %vm449_vm7, %v6647_v16, %v7006_v24 }
 0x23d   : > { %1119 = vmax.xlane.f32.xlu0 %v1118_v14  ;;  %v7172_v33 = vpop.permute.xlu2 %2098  ;;  %v1820_v14 = vmul.f32 %v7034_v61, %v1780_v31  ;;  %v1853_v31 = vsel %vm479_vm5, %v1830_v52, 0.0  ;;  %v2551_v52 = vsel %vm1440_vm4, %v9747_v1, %v2545_v32 }
 0x23e   : > { %9734 = vst [vmem:[#allocation41_spill] sm:$0xff] %v7172_v33 }
 0x242   : > { %1116 = vmax.xlane.f32.xlu1 %v1115_v39 }
 0x245   : > { %1128 = vmax.xlane.f32.xlu0 %v1127_v54  ;;  %v7178_v47 = vpop.permute.xlu2 %2195 }
 0x246   : > { %9736 = vst [vmem:[#allocation43_spill] sm:$0xff] %v7178_v47 }
 0x24d   : > { %v1832_v40 = vpop.permute.xlu2 %1831 }
 0x24e   : > { %v1856_v50 = vsel %vm479_vm5, %v1832_v40, 0.0 }
 0x254   : > { %1837 = vrot.lane.b32.xlu2 %v1817_v36, %s6199_s18  ;;  %v1778_v36 = vsel %vm449_vm7, %v6536_v13, %v6866_v60 }
 0x259   : > { %1835 = vrot.lane.b32.xlu0 %v1816_v37, %s6199_s18  ;;  %v1818_v37 = vmul.f32 %v6963_v8, %v1778_v36 }
 0x25b   : > { %1833 = vrot.lane.b32.xlu1 %v1815_v21, %s6199_s18 }
 0x25d   : > { %v7180_v34 = vpop.permute.xlu0 %2129 }
 0x25e   : > { %9737 = vst [vmem:[#allocation44_spill] sm:$0xff] %v7180_v34 }
 0x261   : > { %1841 = vrot.lane.b32.xlu0 %v1819_v3, %s6199_s18 }
 0x262   : > { %v7191_v41 = vpop.permute.xlu1 %2000 }
 0x263   : > { %9741 = vst [vmem:[#allocation48_spill] sm:$0xff] %v7191_v41 }
 0x265   : > { %v7188_v59 = vpop.permute.xlu0 %2030 }
 0x266   : > { %9740 = vst [vmem:[#allocation47_spill] sm:$0xff] %v7188_v59 }
 0x26a   : > { %v7202_v54 = vpop.permute.xlu1 %2160 }
 0x26b   : > { %9743 = vst [vmem:[#allocation50_spill] sm:$0xff] %v7202_v54 }
 0x26d   : > { %v7200_v39 = vpop.permute.xlu0 %2060  ;;  %v903_v1 = vpop.f32.mrf.mxu1 }
 0x26e   : > { %9742 = vst [vmem:[#allocation49_spill] sm:$0xff] %v7200_v39 }
 0x272   : > { %v7215_v16 = vpop.permute.xlu1 %2191 }
 0x273   : > { %9744 = vst [vmem:[#allocation51_spill] sm:$0xff] %v7215_v16 }
 0x27d   : > { %1131 = vmax.xlane.f32.xlu2 %v1130_v38 }
 0x285   : > { %1125 = vmax.xlane.f32.xlu1 %v1124_v5 }
 0x28b   : > { %1857 = vadd.xlane.f32.xlu0 %v1856_v50 }
 0x28f   : > { %v7193_v17 = vpop.xlane.xlu2 %736 }
 0x295   : > { %1843 = vrot.lane.b32.xlu2 %v1820_v14, %s6199_s18 }
 0x297   : > { %v7205_v25 = vpop.xlane.xlu2 %742 }
 0x298   : > { %v7211_v43 = vpop.xlane.xlu0 %739 }
 0x29d   : > { %v7221_v48 = vpop.xlane.xlu1 %733 }
 0x29e   : > { %1839 = vrot.lane.b32.xlu1 %v1818_v37, %s6199_s18  ;;  %v7449_v57 = vsel %vm444_vm9, -1e+30, %v7221_v48 }
 0x29f   : > { %v7217_v24 = vpop.xlane.xlu2 %748 }
 0x2a0   : > { %v7219_v61 = vpop.xlane.xlu0 %751 }
 0x2a2   : > { %v963_v62 = vpop.f32.mrf.mxu3 }
 0x2a5   : > { %v7229_v13 = vpop.xlane.xlu1 %745 }
 0x2a7   : > { %v7223_v21 = vpop.xlane.xlu2 %1113 }
 0x2a8   : > { %v7225_v55 = vpop.xlane.xlu0 %1110 }
 0x2aa   : > { %v7294_v39 = vpop.f32.mrf.mxu3 }
 0x2ad   : > { %v7234_v5 = vpop.xlane.xlu1 %754 }
 0x2af   : > { %v7227_v3 = vpop.xlane.xlu2 %1122 }
 0x2b0   : > { %v7232_v38 = vpop.xlane.xlu0 %1119 }
 0x2b2   : > { %v1095_v34 = vpop.f32.mrf.mxu3 }
 0x2b5   : > { %v7238_v50 = vpop.xlane.xlu1 %1116 }
 0x2b7   : > { %v1838_v60 = vpop.permute.xlu2 %1837 }
 0x2b8   : > { %v1865_v8 = vsel %vm479_vm5, %v1838_v60, 0.0  ;;  %v7236_v40 = vpop.xlane.xlu0 %1128 }
 0x2b9   : > { %1866 = vadd.xlane.f32.xlu0 %v1865_v8 }
 0x2ba   : > { %v7320_v58 = vpop.f32.mrf.mxu3 }
 0x2c8   : > { %1854 = vadd.xlane.f32.xlu1 %v1853_v31 }
 0x2cb   : > { %v1836_v14 = vpop.permute.xlu0 %1835 }
 0x2cc   : > { %v1862_v42 = vsel %vm479_vm5, %v1836_v14, 0.0  ;;  %v873_v14 = vpop.f32.mrf.mxu0 }
 0x2cd   : > { %v1834_v36 = vpop.permute.xlu1 %1833 }
 0x2ce   : > { %v1859_v37 = vsel %vm479_vm5, %v1834_v36, 0.0 }
 0x2cf   : > { %1860 = vadd.xlane.f32.xlu2 %v1859_v37  ;;  %v7256_v37 = vpack.i.bf16 %v7042_v11, %v7000_v53 }
 0x2d0   : > { %1863 = vadd.xlane.f32.xlu1 %v1862_v42 }
 0x2d3   : > { %v1842_v60 = vpop.permute.xlu0 %1841 }
 0x2d4   : > { %v1871_v8 = vsel %vm479_vm5, %v1842_v60, 0.0  ;;  %v7260_v60 = vpop.f32.mrf.mxu0 }
 0x2d8   : > { %1872 = vadd.xlane.f32.xlu1 %v1871_v8  ;;  %v7266_v8 = vsel %vm444_vm9, -1e+30, %v903_v1  ;;  %v933_v1 = vpop.f32.mrf.mxu2 }
 0x2e0   : > { %v7288_v54 = vpop.f32.mrf.mxu2 }
 0x2e8   : > { %v1064_v47 = vpop.f32.mrf.mxu2 }
 0x2f0   : > { %v7245_v26 = vpop.xlane.xlu2 %1131 }
 0x2f1   : > { %2577 = vrot.lane.b32.xlu1 %v2551_v52, %s6202_s29  ;;  %v7272_v52 = vsel %vm444_vm9, -1e+30, %v873_v14 }
 0x2f8   : > { %v1844_v31 = vpop.permute.xlu2 %1843  ;;  %v7252_v42 = vpop.xlane.xlu1 %1125 }
 0x2f9   : > { %v1874_v36 = vsel %vm479_vm5, %v1844_v31, 0.0  ;;  %v1148_v31 = vsel %vm1141_vm10, %v7266_v8, -inf }
 0x2fa   : > { %1875 = vadd.xlane.f32.xlu0 %v1874_v36  ;;  %v1142_v36 = vsel %vm1141_vm10, %v7272_v52, -inf }
 0x30e   : > { %5570 = vrot.lane.b32.xlu0 %v7256_v37, %s6200_s23 }
 0x310   : > { %v1840_v46 = vpop.permute.xlu1 %1839 }
 0x311   : > { %v1868_v32 = vsel %vm479_vm5, %v1840_v46, 0.0  ;;  %v1002_v46 = vpop.f32.mrf.mxu0 }
 0x312   : > { %1869 = vadd.xlane.f32.xlu2 %v1868_v32  ;;  %v7278_v32 = vpop.f32.mrf.mxu1  ;;  %v7282_v12 = vsel %vm444_vm9, -1e+30, %v1002_v46  ;;  %v1157_v46 = vsel %vm1141_vm10, %v7288_v54, -inf }
 0x313   : > { %v1174_v14 = vsel %vm1141_vm10, %v7282_v12, -inf }
 0x316   : > { %2575 = vrot.lane.b32.xlu0 %v9746_v18, %s6202_s29  ;;  %v7352_v18 = vpop.f32.mrf.mxu2 }
 0x317   : > { %v1189_v56 = vsel %vm1141_vm10, %v7352_v18, -inf }
 0x31a   : > { %1149 = vmax.xlane.f32.xlu2 %v1148_v31  ;;  %v1151_v31 = vsel %vm1141_vm10, %v7278_v32, -inf  ;;  %v1033_v16 = vpop.f32.mrf.mxu1 }
 0x31b   : > { %1143 = vmax.xlane.f32.xlu1 %v1142_v36  ;;  %v7292_v36 = vsel %vm444_vm9, -1e+30, %v963_v62 }
 0x322   : > { %1175 = vmax.xlane.f32.xlu2 %v1174_v14  ;;  %v1160_v14 = vsel %vm1141_vm10, %v7292_v36, -inf  ;;  %v7300_v33 = vpop.f32.mrf.mxu1 }
 0x323   : > { %1152 = vmax.xlane.f32.xlu1 %v1151_v31  ;;  %v7302_v31 = vpop.f32.mrf.mxu0  ;;  %v1183_v59 = vsel %vm1141_vm10, %v7300_v33, -inf }
 0x324   : > { %v1177_v62 = vsel %vm1141_vm10, %v7302_v31, -inf }
 0x32a   : > { %1158 = vmax.xlane.f32.xlu2 %v1157_v46  ;;  %v7310_v46 = vsel %vm444_vm9, -1e+30, %v1095_v34  ;;  %v1195_v34 = vsel %vm1141_vm10, %v7320_v58, -inf }
 0x32b   : > { %1161 = vmax.xlane.f32.xlu1 %v1160_v14  ;;  %v7314_v14 = vsel %vm444_vm9, -1e+30, %v1064_v47  ;;  %v1192_v49 = vsel %vm1141_vm10, %v7310_v46, -inf  ;;  %v7328_v47 = vsel %vm444_vm9, -1e+30, %v933_v1  ;;  %v2705_v1 = vpack.c.bf16 %v7076_v7, %v7076_v7 }
 0x32c   : > { %v1154_v41 = vsel %vm1141_vm10, %v7328_v47, -inf }
 0x32d   : > { %v2765_v20 = vunpack.c.l.b16 %v2705_v1  ;;  %v2546_v1 = vrot.slane %v6927_v10, 6  ;;  %v2702_v10 = vpack.c.bf16 %v7042_v11, %v7042_v11 }
 0x332   : > { %1184 = vmax.xlane.f32.xlu2 %v1183_v59  ;;  %v1186_v59 = vsel %vm1141_vm10, %v7314_v14, -inf }
 0x333   : > { %1178 = vmax.xlane.f32.xlu1 %v1177_v62  ;;  %v1145_v62 = vsel %vm1141_vm10, %v7260_v60, -inf }
 0x33a   : > { %1193 = vmax.xlane.f32.xlu2 %v1192_v49  ;;  %v7334_v49 = vsel %vm444_vm9, -1e+30, %v1033_v16  ;;  %v5604_v16 = vpack.i.bf16 %v7110_v9, %v7097_v23 }
 0x33b   : > { %1187 = vmax.xlane.f32.xlu1 %v1186_v59  ;;  %v1180_v59 = vsel %vm1141_vm10, %v7334_v49, -inf  ;;  %v7371_v19 = vpop.xlane.xlu1 %1854 }
 0x33c   : > { %9751 = vst [vmem:[#allocation52_spill] sm:$0xff] %v7371_v19  ;;  %v7389_v19 = vpop.xlane.xlu0 %1857 }
 0x340   : > { %1146 = vmax.xlane.f32.xlu0 %v1145_v62  ;;  %v5594_v62 = vpack.i.bf16 %v7081_v15, %v7076_v7 }
 0x343   : > { %1196 = vmax.xlane.f32.xlu1 %v1195_v34  ;;  %v2706_v34 = vpack.c.bf16 %v7081_v15, %v7081_v15 }
 0x348   : > { %1155 = vmax.xlane.f32.xlu0 %v1154_v41  ;;  %v1163_v41 = vsel %vm1141_vm10, %v7294_v39, -inf }
 0x350   : > { %1181 = vmax.xlane.f32.xlu0 %v1180_v59  ;;  %v7349_v59 = vunpack.c.l.b16 %v2706_v34  ;;  %v9749_v34 = vld [vmem:[#allocation15_spill] sm:$0xff] }
 0x352   : > { %5595 = vrot.lane.b32.xlu2 %v5594_v62, %s6202_s29  ;;  %v7356_v22 = vpack.c.b16 %v7349_v59, %v2765_v20 }
 0x354   : > { %9748 = vst [vmem:[#allocation19_spill] sm:$0xff] %v7356_v22 }
 0x358   : > { %1164 = vmax.xlane.f32.xlu0 %v1163_v41  ;;  %v9632_v41 = vrot.slane %v7356_v22, 2 }
 0x35a   : > { %5605 = vrot.lane.b32.xlu2 %v5604_v16, %s6202_s29 }
 0x35c   : > { %5575 = vrot.lane.b32.xlu1 %v5594_v62, %s6200_s23  ;;  %v9750_v62 = vrot.slane %v9749_v34, 2 }
 0x35e   : > { %v2554_v20 = vsel %vm1440_vm4, %v9750_v62, %v2546_v1  ;;  %v9754_v1 = vld [vmem:[#allocation14_spill] sm:$0xff] }
 0x35f   : > { %9755 = vst [vmem:[#allocation14_spill] sm:$0xff] %v7389_v19 }
 0x360   : > { %1190 = vmax.xlane.f32.xlu0 %v1189_v56  ;;  %v5579_v56 = vpack.i.bf16 %v7066_v28, %v7059_v4 }
 0x362   : > { %3141 = vrot.lane.b32.xlu2 %v9632_v41, %s6203_s30  ;;  %v7382_v41 = vpop.xlane.xlu1 %1863 }
 0x363   : > { %9753 = vst [vmem:[#allocation53_spill] sm:$0xff] %v7382_v41  ;;  %v9757_v41 = vld [vmem:[#allocation17_spill] sm:$0xff] }
 0x364   : > { %5585 = vrot.lane.b32.xlu1 %v7256_v37, %s6202_s29  ;;  %v2701_v37 = vpack.c.bf16 %v7000_v53, %v7000_v53 }
 0x366   : > { %v2711_v62 = vunpack.c.l.b16 %v2701_v37 }
 0x36a   : > { %v7404_v37 = vpop.xlane.xlu1 %1872 }
 0x36b   : > { %9759 = vst [vmem:[#allocation55_spill] sm:$0xff] %v7404_v37 }
 0x36c   : > { %2608 = vrot.lane.b32.xlu1 %v2554_v20, %s6202_s29  ;;  %v7387_v20 = vunpack.c.l.b16 %v2702_v10  ;;  %v2738_v10 = vunpack.c.l.b16 %v2703_v30  ;;  %v2708_v30 = vpack.c.bf16 %v7110_v9, %v7110_v9 }
 0x374   : > { %2637 = vrot.lane.b32.xlu1 %v9752_v63, %s6202_s29  ;;  %5580 = vrot.lane.b32.xlu0 %v5579_v56, %s6200_s23  ;;  %v7392_v63 = vpack.c.b16 %v7387_v20, %v2711_v62  ;;  %v7408_v62 = vpop.xlane.xlu0 %1866 }
 0x375   : > { %9761 = vst [vmem:[#allocation57_spill] sm:$0xff] %v7408_v62 }
 0x376   : > { %9756 = vst [vmem:[#allocation54_spill] sm:$0xff] %v7392_v63 }
 0x37c   : > { %5590 = vrot.lane.b32.xlu1 %v5604_v16, %s6200_s23  ;;  %2639 = vrot.lane.b32.xlu0 %v9754_v1, %s6202_s29  ;;  %v7402_v16 = vpop.xlane.xlu2 %1860  ;;  %v7406_v1 = vunpack.c.l.b16 %v2704_v6  ;;  %v2707_v6 = vpack.c.bf16 %v7097_v23, %v7097_v23 }
 0x37d   : > { %9758 = vst [vmem:[#allocation17_spill] sm:$0xff] %v7402_v16  ;;  %v7421_v16 = vpop.xlane.xlu0 %1875 }
 0x37e   : > { %9760 = vst [vmem:[#allocation56_spill] sm:$0xff] %v7406_v1  ;;  %v7411_v19 = vpack.c.b16 %v7406_v1, %v2738_v10  ;;  %v9765_v10 = vld [vmem:[#allocation16_spill] sm:$0xff]  ;;  %v2792_v62 = vunpack.c.l.b16 %v2707_v6 }
 0x37f   : > { %9764 = vst [vmem:[#allocation60_spill] sm:$0xff] %v7421_v16 }
 0x384   : > { %2670 = vrot.lane.b32.xlu1 %v9757_v41, %s6202_s29  ;;  %2714 = vrot.lane.b32.xlu0 %v7392_v63, %s6203_s30  ;;  %v7417_v41 = vpop.permute.xlu1 %2577 }
 0x385   : > { %9762 = vst [vmem:[#allocation58_spill] sm:$0xff] %v7417_v41  ;;  %v7419_v35 = vpop.xlane.xlu2 %1869  ;;  %v5571_v41 = vpop.permute.xlu0 %5570 }
 0x386   : > { %9763 = vst [vmem:[#allocation59_spill] sm:$0xff] %v7419_v35  ;;  %v5573_v16 = vunpack.i.h.bf16 %v5571_v41  ;;  %v5572_v27 = vunpack.i.l.bf16 %v5571_v41  ;;  %v9650_v41 = vrot.slane %v7392_v63, 2  ;;  %v9654_v63 = vrot.slane %v7411_v19, 2 }
 0x388   : > { %v3017_v6 = vsel %vm446_vm6, %v7000_v53, %v5572_v27 }
 0x38c   : > { %2741 = vrot.lane.b32.xlu1 %v7411_v19, %s6203_s30  ;;  %2606 = vrot.lane.b32.xlu0 %v9749_v34, %s6202_s29  ;;  %v7430_v34 = vunpack.c.l.b16 %v2708_v30 }
 0x38d   : > { %v1150_v2 = vpop.xlane.xlu2 %1149 }
 0x38e   : > { %v1144_v37 = vpop.xlane.xlu1 %1143  ;;  %9766 = vst [vmem:[#allocation61_spill] sm:$0xff] %v7430_v34  ;;  %v7433_v35 = vpack.c.b16 %v7430_v34, %v2792_v62  ;;  %v3025_v62 = vpack.c.bf16 %v3017_v6, %v3017_v6  ;;  %v7458_v34 = vpop.permute.xlu0 %2575 }
 0x390   : > { %9767 = vst [vmem:[#allocation62_spill] sm:$0xff] %v7433_v35  ;;  %v3075_v27 = vunpack.c.l.b16 %v3025_v62 }
 0x394   : > { %2668 = vrot.lane.b32.xlu1 %v9765_v10, %s6202_s29  ;;  %5600 = vrot.lane.b32.xlu0 %v5579_v56, %s6202_s29  ;;  %v3018_v56 = vsel %vm449_vm7, %v7042_v11, %v5573_v16  ;;  %v1133_v16 = vmax.f32 %v7225_v55, %v7449_v57 }
 0x395   : > { %v3026_v10 = vpack.c.bf16 %v3018_v56, %v3018_v56  ;;  %v1176_v45 = vpop.xlane.xlu2 %1175 }
 0x396   : > { %v1153_v30 = vpop.xlane.xlu1 %1152  ;;  %v1166_v44 = vmax.f32 %v1133_v16, %v1144_v37 }
 0x398   : > { %v7456_v56 = vmax.f32 %v1166_v44, %v1176_v45 }
 0x39a   : > { %v1254_v48 = vsub.f32 %v7272_v52, %v7456_v56  ;;  %v1278_v45 = vsub.f32 %v7282_v12, %v7456_v56 }
 0x39c   : > { %2795 = vrot.lane.b32.xlu1 %v7433_v35, %s6203_s30  ;;  %2768 = vrot.lane.b32.xlu0 %v7356_v22, %s6203_s30  ;;  %v3076_v22 = vunpack.c.l.b16 %v3026_v10  ;;  %v1286_v37 = vmul.f32 1.442695, %v1278_v45 }
 0x39d   : > { %v7460_v1 = vpop.xlane.xlu2 %1158 }
 0x39e   : > { %v1162_v6 = vpop.xlane.xlu1 %1161  ;;  %v3077_v29 = vpack.c.b16 %v3076_v22, %v3075_v27  ;;  %v1136_v22 = vmax.f32 %v7232_v38, %v7205_v25  ;;  %v7481_v38 = vsel %vm444_vm9, -1e+30, %v7211_v43 }
 0x39f   : > { %v1135_v12 = vmax.f32 %v7238_v50, %v7481_v38 }
 0x3a0   : > { %v1169_v44 = vmax.f32 %v1136_v22, %v1153_v30  ;;  %v1134_v22 = vmax.f32 %v7223_v21, %v7193_v17 }
 0x3a1   : > { %v1168_v45 = vmax.f32 %v1135_v12, %v1150_v2 }
 0x3a4   : > { %3081 = vrot.lane.b32.xlu0 %v9650_v41, %s6203_s30  ;;  %v1262_v41 = vmul.f32 1.442695, %v1254_v48 }
 0x3a6   : > { %v1179_v10 = vpop.xlane.xlu1 %1178  ;;  %5709 = vpow2.f32 %v1262_v41  ;;  %v7488_v41 = vsel %vm444_vm9, -1e+30, %v7219_v61 }
 0x3a7   : > { %5711 = vpow2.f32 %v1286_v37 }
 0x3ac   : > { %3078 = vrot.lane.b32.xlu0 %v3077_v29, %s6200_s23  ;;  %v1185_v29 = vpop.xlane.xlu2 %1184  ;;  %v5710_v62 = vpop.eup %5709 }
 0x3ad   : > { %v7473_v52 = vmax.f32 %v1169_v44, %v1185_v29  ;;  %v1139_v29 = vmax.f32 %v7236_v40, %v7488_v41 }
 0x3ae   : > { %v1188_v48 = vpop.xlane.xlu1 %1187 }
 0x3af   : > { %v1257_v27 = vsub.f32 %v7278_v32, %v7473_v52  ;;  %v5712_v32 = vpop.eup %5711  ;;  %v1281_v43 = vsub.f32 %v7300_v33, %v7473_v52  ;;  %v1172_v61 = vmax.f32 %v1139_v29, %v1162_v6 }
 0x3b1   : > { %v1268_v30 = vmul.f32 1.442695, %v1257_v27  ;;  %v1292_v21 = vmul.f32 1.442695, %v1281_v43 }
 0x3b3   : > { %v1147_v55 = vpop.xlane.xlu0 %1146  ;;  %5713 = vpow2.f32 %v1268_v30 }
 0x3b4   : > { %3111 = vrot.lane.b32.xlu0 %v9654_v63, %s6203_s30  ;;  %v1194_v37 = vpop.xlane.xlu2 %1193  ;;  %v1167_v50 = vmax.f32 %v1134_v22, %v1147_v55  ;;  %v7510_v22 = vsel %vm444_vm9, -1e+30, %v7229_v13  ;;  %5715 = vpow2.f32 %v1292_v21 }
 0x3b5   : > { %v7501_v27 = vmax.f32 %v1172_v61, %v1194_v37  ;;  %v1137_v30 = vmax.f32 %v7227_v3, %v7510_v22  ;;  %v1138_v3 = vmax.f32 %v7252_v42, %v7217_v24 }
 0x3b6   : > { %v7505_v33 = vmax.f32 %v1167_v50, %v1179_v10  ;;  %v1197_v12 = vpop.xlane.xlu1 %1196 }
 0x3b8   : > { %v1255_v13 = vsub.f32 %v7260_v60, %v7505_v33  ;;  %v1260_v60 = vsub.f32 %v7292_v36, %v7501_v27 }
 0x3ba   : > { %v1264_v50 = vmul.f32 1.442695, %v1255_v13  ;;  %v1274_v36 = vmul.f32 1.442695, %v1260_v60 }
 0x3bb   : > { %v1156_v16 = vpop.xlane.xlu0 %1155 }
 0x3bc   : > { %1330 = vrot.lane.b32.xlu0 %v5710_v62, %s6201_s28  ;;  %v1170_v10 = vmax.f32 %v1137_v30, %v1156_v16  ;;  %v1171_v16 = vmax.f32 %v1138_v3, %v7460_v1  ;;  %v5596_v60 = vpop.permute.xlu2 %5595 }
 0x3c3   : > { %v1182_v44 = vpop.xlane.xlu0 %1181 }
 0x3c4   : > { %v7496_v62 = vmax.f32 %v1168_v45, %v1182_v44  ;;  %1362 = vrot.lane.b32.xlu0 %v5712_v32, %s6205_s6  ;;  %v1284_v45 = vsub.f32 %v7310_v46, %v7501_v27  ;;  %v7523_v44 = vmax.f32 %v1170_v10, %v1188_v48 }
 0x3c6   : > { %v1256_v2 = vsub.f32 %v7266_v8, %v7496_v62  ;;  %v1280_v40 = vsub.f32 %v7334_v49, %v7496_v62  ;;  %v5714_v8 = vpop.eup %5713  ;;  %v1279_v49 = vsub.f32 %v7302_v31, %v7505_v33  ;;  %v1298_v29 = vmul.f32 1.442695, %v1284_v45 }
 0x3c7   : > { %v5716_v37 = vpop.eup %5715  ;;  %v1258_v48 = vsub.f32 %v7328_v47, %v7523_v44 }
 0x3c8   : > { %v1266_v55 = vmul.f32 1.442695, %v1256_v2  ;;  %v1290_v6 = vmul.f32 1.442695, %v1280_v40  ;;  %v1288_v43 = vmul.f32 1.442695, %v1279_v49  ;;  %v1140_v2 = vmax.f32 %v7245_v26, %v7234_v5 }
 0x3c9   : > { %v1270_v40 = vmul.f32 1.442695, %v1258_v48 }
 0x3ca   : > { %5717 = vpow2.f32 %v1266_v55 }
 0x3cb   : > { %v1165_v32 = vpop.xlane.xlu0 %1164  ;;  %5719 = vpow2.f32 %v1290_v6 }
 0x3cc   : > { %1336 = vrot.lane.b32.xlu0 %v5714_v8, %s6201_s28  ;;  %5721 = vpow2.f32 %v1298_v29  ;;  %v1173_v1 = vmax.f32 %v1140_v2, %v1165_v32  ;;  %v1282_v32 = vsub.f32 %v7314_v14, %v7523_v44 }
 0x3cd   : > { %5723 = vpow2.f32 %v1288_v43 }
 0x3ce   : > { %v7525_v46 = vpop.permute.xlu1 %5575  ;;  %5725 = vpow2.f32 %v1264_v50  ;;  %v7541_v6 = vmax.f32 %v1173_v1, %v1197_v12  ;;  %v1294_v12 = vmul.f32 1.442695, %v1282_v32 }
 0x3cf   : > { %5727 = vpow2.f32 %v1274_v36 }
 0x3d0   : > { %v5718_v31 = vpop.eup %5717  ;;  %5729 = vpow2.f32 %v1270_v40  ;;  %v1285_v3 = vsub.f32 %v7320_v58, %v7541_v6 }
 0x3d1   : > { %v5720_v61 = vpop.eup %5719  ;;  %1334 = vrot.lane.b32.xlu1 %v5718_v31, %s6201_s28 }
 0x3d2   : > { %1366 = vrot.lane.b32.xlu2 %v5720_v61, %s6205_s6  ;;  %v5722_v55 = vpop.eup %5721  ;;  %v1300_v31 = vmul.f32 1.442695, %v1285_v3 }
 0x3d3   : > { %v1191_v42 = vpop.xlane.xlu0 %1190  ;;  %v5724_v8 = vpop.eup %5723 }
 0x3d4   : > { %v7536_v21 = vmax.f32 %v1171_v16, %v1191_v42  ;;  %1368 = vrot.lane.b32.xlu0 %v5716_v37, %s6205_s6  ;;  %v5726_v47 = vpop.eup %5725 }
 0x3d5   : > { %v5728_v49 = vpop.eup %5727 }
 0x3d6   : > { %v1259_v26 = vsub.f32 %v7288_v54, %v7536_v21  ;;  %v7543_v45 = vpop.permute.xlu1 %5585  ;;  %v1261_v54 = vsub.f32 %v7294_v39, %v7541_v6  ;;  %v5730_v13 = vpop.eup %5729  ;;  %v1283_v39 = vsub.f32 %v7352_v18, %v7536_v21  ;;  %v5578_v18 = vunpack.i.h.bf16 %v7525_v46 }
 0x3d8   : > { %v1272_v30 = vmul.f32 1.442695, %v1259_v26  ;;  %v1276_v10 = vmul.f32 1.442695, %v1261_v54  ;;  %v1296_v16 = vmul.f32 1.442695, %v1283_v39  ;;  %v5577_v26 = vunpack.i.l.bf16 %v7525_v46 }
 0x3d9   : > { %1364 = vrot.lane.b32.xlu1 %v5724_v8, %s6205_s6  ;;  %v3022_v54 = vsel %vm449_vm7, %v7081_v15, %v5578_v18  ;;  %v5588_v39 = vunpack.i.h.bf16 %v7543_v45 }
 0x3da   : > { %1332 = vrot.lane.b32.xlu2 %v5726_v47, %s6201_s28  ;;  %5731 = vpow2.f32 %v1272_v30  ;;  %v5597_v30 = vunpack.i.l.bf16 %v5596_v60  ;;  %v3021_v46 = vsel %vm446_vm6, %v7076_v7, %v5577_v26 }
 0x3db   : > { %5733 = vpow2.f32 %v1294_v12  ;;  %v3029_v3 = vpack.c.bf16 %v3021_v46, %v3021_v46 }
 0x3dc   : > { %1374 = vrot.lane.b32.xlu0 %v5722_v55, %s6205_s6  ;;  %5735 = vpow2.f32 %v1276_v10  ;;  %v5598_v55 = vunpack.i.h.bf16 %v5596_v60  ;;  %v7590_v10 = vpack.c.b16 %v7349_v59, %v7349_v59  ;;  %v7599_v59 = vpack.c.b16 %v7387_v20, %v7387_v20 }
 0x3dd   : > { %5737 = vpow2.f32 %v1300_v31 }
 0x3de   : > { %v7555_v14 = vpop.permute.xlu1 %2608  ;;  %5739 = vpow2.f32 %v1296_v16  ;;  %v3062_v12 = vsel %vm449_vm7, %v7081_v15, %v5598_v55 }
 0x3df   : > { %v3070_v31 = vpack.c.bf16 %v3062_v12, %v3062_v12 }
 0x3e0   : > { %v5732_v29 = vpop.eup %5731 }
 0x3e1   : > { %1342 = vrot.lane.b32.xlu1 %v5728_v49, %s6201_s28  ;;  %v5734_v2 = vpop.eup %5733  ;;  %v3061_v49 = vsel %vm446_vm6, %v7076_v7, %v5597_v30 }
 0x3e2   : > { %1338 = vrot.lane.b32.xlu2 %v5730_v13, %s6201_s28  ;;  %v5736_v1 = vpop.eup %5735  ;;  %v3069_v16 = vpack.c.bf16 %v3061_v49, %v3061_v49 }
 0x3e3   : > { %v5738_v13 = vpop.eup %5737 }
 0x3e4   : > { %1340 = vrot.lane.b32.xlu0 %v5732_v29, %s6201_s28  ;;  %v3030_v29 = vpack.c.bf16 %v3022_v54, %v3022_v54  ;;  %v3265_v55 = vunpack.c.l.b16 %v3069_v16  ;;  %v9653_v16 = vrot.slane %v7433_v35, 2  ;;  %v9847_v35 = vld [vmem:[#allocation57_spill] sm:$0xff] }
 0x3e6   : > { %v5581_v43 = vpop.permute.xlu0 %5580  ;;  %v7571_v8 = vpop.permute.xlu1 %2637 }
 0x3e7   : > { %v5583_v37 = vunpack.i.h.bf16 %v5581_v43  ;;  %v5582_v50 = vunpack.i.l.bf16 %v5581_v43  ;;  %v5587_v43 = vunpack.i.l.bf16 %v7543_v45  ;;  %v3058_v45 = vsel %vm449_vm7, %v7042_v11, %v5588_v39 }
 0x3e8   : > { %v3066_v26 = vpack.c.bf16 %v3058_v45, %v3058_v45 }
 0x3e9   : > { %v3020_v61 = vsel %vm449_vm7, %v7066_v28, %v5583_v37  ;;  %v3019_v58 = vsel %vm446_vm6, %v7059_v4, %v5582_v50  ;;  %1370 = vrot.lane.b32.xlu1 %v5734_v2, %s6205_s6  ;;  %v5740_v37 = vpop.eup %5739  ;;  %v5606_v50 = vpop.permute.xlu2 %5605  ;;  %v3135_v2 = vunpack.c.l.b16 %v3029_v3  ;;  %v3057_v60 = vsel %vm446_vm6, %v7000_v53, %v5587_v43 }
 0x3ea   : > { %v3028_v42 = vpack.c.bf16 %v3020_v61, %v3020_v61  ;;  %v3027_v48 = vpack.c.bf16 %v3019_v58, %v3019_v58  ;;  %1344 = vrot.lane.b32.xlu2 %v5736_v1, %s6201_s28  ;;  %v3271_v61 = vrot.slane %v7590_v10, 1  ;;  %v3136_v58 = vunpack.c.l.b16 %v3030_v29 }
 0x3eb   : > { %v5607_v1 = vunpack.i.l.bf16 %v5606_v50  ;;  %v3065_v20 = vpack.c.bf16 %v3057_v60, %v3057_v60  ;;  %v3204_v49 = vunpack.c.l.b16 %v3066_v26  ;;  %v9768_v60 = vld [vmem:[#allocation56_spill] sm:$0xff] }
 0x3ec   : > { %v3106_v36 = vunpack.c.l.b16 %v3028_v42  ;;  %v3105_v40 = vunpack.c.l.b16 %v3027_v48  ;;  %v5608_v48 = vunpack.i.h.bf16 %v5606_v50  ;;  %v3137_v30 = vpack.c.b16 %v3136_v58, %v3135_v2 }
 0x3ed   : > { %v3063_v54 = vsel %vm446_vm6, %v7097_v23, %v5607_v1 }
 0x3ee   : > { %v7573_v47 = vpop.permute.xlu0 %2639  ;;  %v3107_v32 = vpack.c.b16 %v3106_v36, %v3105_v40  ;;  %v5591_v18 = vpop.permute.xlu1 %5590  ;;  %v3209_v36 = vrot.slane %v7599_v59, 1  ;;  %v3266_v40 = vunpack.c.l.b16 %v3070_v31  ;;  %v3071_v3 = vpack.c.bf16 %v3063_v54, %v3063_v54 }
 0x3ef   : > { %v5593_v46 = vunpack.i.h.bf16 %v5591_v18  ;;  %v5592_v12 = vunpack.i.l.bf16 %v5591_v18 }
 0x3f0   : > { %3108 = vrot.lane.b32.xlu0 %v3107_v32, %s6200_s23  ;;  %v3064_v32 = vsel %vm449_vm7, %v7110_v9, %v5608_v48  ;;  %v3267_v43 = vpack.c.b16 %v3266_v40, %v3265_v55  ;;  %v3296_v58 = vunpack.c.l.b16 %v3071_v3  ;;  %v7635_v48 = vpack.c.b16 %v9768_v60, %v9768_v60 }
 0x3f1   : > { %1376 = vrot.lane.b32.xlu1 %v5738_v13, %s6205_s6  ;;  %v3203_v13 = vunpack.c.l.b16 %v3065_v20  ;;  %v3072_v29 = vpack.c.bf16 %v3064_v32, %v3064_v32  ;;  %v3023_v50 = vsel %vm446_vm6, %v7097_v23, %v5592_v12  ;;  %v2834_v60 = vrot.slane %v7042_v11, 2 }
 0x3f2   : > { %1372 = vrot.lane.b32.xlu2 %v5740_v37, %s6205_s6  ;;  %v3024_v37 = vsel %vm449_vm7, %v7110_v9, %v5593_v46  ;;  %v3031_v45 = vpack.c.bf16 %v3023_v50, %v3023_v50  ;;  %v3240_v32 = vrot.slane %v7635_v48, 1 }
 0x3f3   : > { %v3205_v31 = vpack.c.b16 %v3204_v49, %v3203_v13  ;;  %v3032_v2 = vpack.c.bf16 %v3024_v37, %v3024_v37  ;;  %v2821_v49 = vrot.slane %v7042_v11, 6 }
 0x3f4   : > { %v3165_v18 = vunpack.c.l.b16 %v3031_v45  ;;  %v2833_v45 = vrot.slane %v7000_v53, 2 }
 0x3f5   : > { %v3166_v1 = vunpack.c.l.b16 %v3032_v2  ;;  %v2849_v50 = vsel %vm614_vm1, %v7000_v53, %v2821_v49  ;;  %v2822_v2 = vrot.slane %v7066_v28, 6 }
 0x3f6   : > { %v7607_v42 = vpop.permute.xlu0 %2714 }
 0x3f7   : > { %v3167_v12 = vpack.c.b16 %v3166_v1, %v3165_v18  ;;  %v7673_v18 = vpop.permute.xlu1 %2670 }
 0x3f8   : > { %3272 = vrot.lane.b32.xlu0 %v3271_v61, %s6203_s30  ;;  %v3297_v61 = vunpack.c.l.b16 %v3072_v29 }
 0x3f9   : > { %3210 = vrot.lane.b32.xlu1 %v3209_v36, %s6203_s30 }
 0x3fa   : > { %3138 = vrot.lane.b32.xlu2 %v3137_v30, %s6200_s23  ;;  %v3298_v20 = vpack.c.b16 %v3297_v61, %v3296_v58 }
 0x3fe   : > { %v7619_v39 = vpop.permute.xlu0 %2606 }
 0x400   : > { %3268 = vrot.lane.b32.xlu0 %v3267_v43, %s6204_s4  ;;  %v9769_v43 = vld [vmem:[#allocation61_spill] sm:$0xff] }
 0x401   : > { %3206 = vrot.lane.b32.xlu1 %v3205_v31, %s6204_s4  ;;  %v7652_v37 = vpack.c.b16 %v9769_v43, %v9769_v43  ;;  %v1233_v43 = vsub.f32 %v7205_v25, %v7473_v52  ;;  %v9778_v25 = vld [vmem:[#allocation33_spill] sm:$0xff] }
 0x402   : > { %3171 = vrot.lane.b32.xlu2 %v9653_v16, %s6203_s30 }
 0x403   : > { %9770 = vst [vmem:[#allocation56_spill] sm:$0xff] %v7652_v37  ;;  %v3302_v61 = vrot.slane %v7652_v37, 1  ;;  %v9846_v37 = vld [vmem:[#allocation14_spill] sm:$0xff] }
 0x406   : > { %v5601_v26 = vpop.permute.xlu0 %5600 }
 0x407   : > { %v5603_v36 = vunpack.i.h.bf16 %v5601_v26  ;;  %v5602_v40 = vunpack.i.l.bf16 %v5601_v26  ;;  %v2850_v26 = vsel %vm614_vm1, %v7059_v4, %v2822_v2 }
 0x408   : > { %3299 = vrot.lane.b32.xlu0 %v3298_v20, %s6204_s4  ;;  %v2835_v20 = vsel %vm597_vm2, %v2833_v45, %v2834_v60  ;;  %v9776_v45 = vlaneseq }
 0x409   : > { %v3060_v55 = vsel %vm449_vm7, %v7066_v28, %v5603_v36  ;;  %v3059_v30 = vsel %vm446_vm6, %v7059_v4, %v5602_v40  ;;  %3241 = vrot.lane.b32.xlu1 %v3240_v32, %s6203_s30  ;;  %v2853_v36 = vsel %vm619_vm3, %v2821_v49, %v2835_v20  ;;  %v1230_v32 = vsub.f32 %v7449_v57, %v7456_v56 }
 0x40a   : > { %v3068_v54 = vpack.c.bf16 %v3060_v55, %v3060_v55  ;;  %v3067_v46 = vpack.c.bf16 %v3059_v30, %v3059_v30  ;;  %3168 = vrot.lane.b32.xlu2 %v3167_v12, %s6200_s23  ;;  %v7685_v55 = vpop.permute.xlu2 %3141  ;;  %v7687_v30 = vpop.permute.xlu1 %2741  ;;  %v9775_v12 = vld [vmem:[#allocation18_spill] sm:$0xff]  ;;  %v1232_v57 = vsub.f32 %v7481_v38, %v7496_v62  ;;  %v453_v60 = vand.u32 127, %v9776_v45 }
 0x40b   : > { %9774 = vst [vmem:[#allocation65_spill] sm:$0xff] %v7685_v55  ;;  %v1206_v49 = vsub.f32 %v9775_v12, %v7456_v56  ;;  %v9777_v56 = vld [vmem:[#allocation37_spill] sm:$0xff] }
 0x40c   : > { %v3235_v13 = vunpack.c.l.b16 %v3068_v54  ;;  %v3234_v29 = vunpack.c.l.b16 %v3067_v46  ;;  %v2836_v54 = vrot.slane %v7059_v4, 2  ;;  %v2837_v46 = vrot.slane %v7066_v28, 2 }
 0x40d   : > { %v1209_v20 = vsub.f32 %v9777_v56, %v7473_v52  ;;  %v1242_v38 = vmul.f32 1.442695, %v1232_v57  ;;  %v1231_v52 = vsub.f32 %v7193_v17, %v7505_v33 }
 0x40e   : > { %v7648_v3 = vpop.permute.xlu0 %2768  ;;  %v3236_v31 = vpack.c.b16 %v3235_v13, %v3234_v29  ;;  %v1238_v13 = vmul.f32 1.442695, %v1230_v32  ;;  %v1244_v32 = vmul.f32 1.442695, %v1233_v43 }
 0x40f   : > { %v1220_v12 = vmul.f32 1.442695, %v1209_v20  ;;  %v1240_v56 = vmul.f32 1.442695, %v1231_v52 }
 0x410   : > { %2897 = vrot.lane.b32.xlu0 %v2849_v50, %s6201_s28  ;;  %v2838_v50 = vsel %vm597_vm2, %v2836_v54, %v2837_v46  ;;  %5741 = vpow2.f32 %v1238_v13  ;;  %v1208_v54 = vsub.f32 %v9778_v25, %v7496_v62  ;;  %v5303_v13 = vadd.s32 4294967290, %v6764_v51 }
 0x411   : > { %3237 = vrot.lane.b32.xlu1 %v3236_v31, %s6204_s4  ;;  %v1214_v31 = vmul.f32 1.442695, %v1206_v49  ;;  %v455_v49 = vadd.s32 6, %v6764_v51  ;;  %v9782_v25 = vmov 0 }
 0x412   : > { %3303 = vrot.lane.b32.xlu2 %v3302_v61, %s6203_s30  ;;  %v7711_v46 = vpop.permute.xlu1 %2668 }
 0x413   : > { %5743 = vpow2.f32 %v1214_v31  ;;  %v459_v31 = vsel %vm449_vm7, %v455_v49, %v5303_v13  ;;  %v1236_v49 = vsub.f32 %v7488_v41, %v7501_v27 }
 0x414   : > { %5745 = vpow2.f32 %v1244_v32  ;;  %vm7732_vm13 = vcmp.eq.s32.totalorder %v453_v60, %v459_v31  ;;  %v9785_v31 = vld [vmem:[#allocation38_spill] sm:$0xff] }
 0x415   : > { %5747 = vpow2.f32 %v1242_v38  ;;  %v9783_v25 = vsel %vm7732_vm13, 4294967295, %v9782_v25  ;;  %v1212_v41 = vsub.f32 %v9785_v31, %v7501_v27  ;;  %v9787_v31 = vld [vmem:[#allocation36_spill] sm:$0xff] }
 0x416   : > { %v7660_v58 = vpop.permute.xlu0 %3081  ;;  %v5742_v43 = vpop.eup %5741  ;;  %5749 = vpow2.f32 %v1220_v12  ;;  %9784 = vst [vmem:[#allocation18_spill] sm:$0xff] %v9783_v25 }
 0x417   : > { %9771 = vst [vmem:[#allocation61_spill] sm:$0xff] %v7660_v58 }
 0x418   : > { %2861 = vrot.lane.b32.xlu0 %v7059_v4, %s6199_s18 }
 0x419   : > { %2857 = vrot.lane.b32.xlu1 %v7000_v53, %s6199_s18 }
 0x41a   : > { %2859 = vrot.lane.b32.xlu2 %v7042_v11, %s6199_s18  ;;  %v7730_v32 = vpop.permute.xlu1 %2795 }
 0x41e   : > { %v7671_v1 = vpop.permute.xlu0 %3078 }
 0x41f   : > { %9772 = vst [vmem:[#allocation63_spill] sm:$0xff] %v7671_v1 }
 0x420   : > { %2901 = vrot.lane.b32.xlu0 %v2850_v26, %s6201_s28  ;;  %v454_v26 = vadd.s32 6, %v6744_v0 }
 0x421   : > { %2899 = vrot.lane.b32.xlu1 %v2853_v36, %s6201_s28  ;;  %v2854_v36 = vsel %vm619_vm3, %v2822_v2, %v2838_v50  ;;  %v1218_v2 = vmul.f32 1.442695, %v1208_v54  ;;  %v9781_v50 = vld [vmem:[#allocation34_spill] sm:$0xff] }
 0x422   : > { %vm460_vm11 = vcmp.eq.s32.totalorder %v453_v60, %v454_v26  ;;  %v1207_v57 = vsub.f32 %v9781_v50, %v7505_v33  ;;  %v5744_v26 = vpop.eup %5743  ;;  %v1235_v60 = vsub.f32 %v7217_v24, %v7536_v21 }
 0x423   : > { %vm7720_vm12 = vmand %vm460_vm11, %vm446_vm6  ;;  %5751 = vpow2.f32 %v1218_v2 }
 0x424   : > { %v1306_v17 = vsel %vm7720_vm12, %v5742_v43, 0.0  ;;  %v1216_v38 = vmul.f32 1.442695, %v1207_v57  ;;  %5753 = vpow2.f32 %v1240_v56  ;;  %v1248_v24 = vmul.f32 1.442695, %v1235_v60 }
 0x425   : > { %v1314_v33 = vadd.f32 %v5744_v26, %v1306_v17  ;;  %v1250_v26 = vmul.f32 1.442695, %v1236_v49 }
 0x426   : > { %v7681_v40 = vpop.permute.xlu0 %3111  ;;  %5755 = vpow2.f32 %v1216_v38 }
 0x427   : > { %9773 = vst [vmem:[#allocation64_spill] sm:$0xff] %v7681_v40  ;;  %5757 = vpow2.f32 %v1250_v26  ;;  %v9848_v40 = vld [vmem:[#allocation53_spill] sm:$0xff] }
 0x428   : > { %2865 = vrot.lane.b32.xlu0 %v7076_v7, %s6199_s18  ;;  %5759 = vpow2.f32 %v1248_v24 }
 0x429   : > { %2863 = vrot.lane.b32.xlu1 %v7066_v28, %s6199_s18 }
 0x42c   : > { %v7702_v61 = vpop.permute.xlu2 %1366 }
 0x42e   : > { %v1331_v29 = vpop.permute.xlu0 %1330 }
 0x42f   : > { %v1386_v52 = vsel %vm1108_vm8, %v1314_v33, %v1331_v29  ;;  %v9786_v29 = vld [vmem:[#allocation45_spill] sm:$0xff] }
 0x430   : > { %v1211_v56 = vsub.f32 %v9786_v29, %v7536_v21  ;;  %v1234_v21 = vsub.f32 %v7510_v22, %v7523_v44 }
 0x431   : > { %2903 = vrot.lane.b32.xlu1 %v2854_v36, %s6201_s28  ;;  %v5746_v36 = vpop.eup %5745 }
 0x432   : > { %v5748_v54 = vpop.eup %5747  ;;  %v1309_v2 = vsel %vm7732_vm13, %v5746_v36, 0.0  ;;  %v1246_v29 = vmul.f32 1.442695, %v1234_v21  ;;  %v1237_v21 = vsub.f32 %v7234_v5, %v7541_v6 }
 0x433   : > { %v5750_v13 = vpop.eup %5749  ;;  %v1308_v57 = vsel %vm7720_vm12, %v5748_v54, 0.0 }
 0x434   : > { %v1333_v20 = vpop.permute.xlu2 %1332  ;;  %v5752_v43 = vpop.eup %5751  ;;  %v1317_v17 = vadd.f32 %v5750_v13, %v1309_v2 }
 0x435   : > { %v1316_v33 = vadd.f32 %v5752_v43, %v1308_v57  ;;  %v5754_v16 = vpop.eup %5753  ;;  %v1224_v43 = vmul.f32 1.442695, %v1211_v56 }
 0x436   : > { %v1363_v45 = vpop.permute.xlu0 %1362  ;;  %v5756_v2 = vpop.eup %5755  ;;  %v1307_v60 = vsel %vm7732_vm13, %v5754_v16, 0.0 }
 0x437   : > { %v1395_v50 = vsel %vm1394_vm14, %v1386_v52, %v1363_v45  ;;  %v1226_v52 = vmul.f32 1.442695, %v1212_v41  ;;  %v1210_v41 = vsub.f32 %v9787_v31, %v7523_v44  ;;  %v9789_v31 = vld [vmem:[#allocation42_spill] sm:$0xff] }
 0x438   : > { %v1404_v36 = vsel %vm1403_vm15, %v1395_v50, 0.0 }
 0x439   : > { %5761 = vpow2.f32 %v1226_v52 }
 0x43a   : > { %5763 = vpow2.f32 %v1224_v43 }
 0x43b   : > { %5765 = vpow2.f32 %v1246_v29 }
 0x43c   : > { %v7751_v63 = vpop.permute.xlu2 %1338 }
 0x43e   : > { %v1337_v12 = vpop.permute.xlu0 %1336 }
 0x43f   : > { %v1389_v54 = vsel %vm1108_vm8, %v1317_v17, %v1337_v12  ;;  %v1315_v17 = vadd.f32 %v5756_v2, %v1307_v60 }
 0x441   : > { %v1387_v16 = vsel %vm1108_vm8, %v1315_v17, %v1333_v20  ;;  %v9790_v17 = vld [vmem:[#allocation22_spill] sm:$0xff] }
 0x443   : > { %1405 = vadd.xlane.f32.xlu2 %v1404_v36  ;;  %v1335_v45 = vpop.permute.xlu1 %1334  ;;  %v5758_v36 = vpop.eup %5757 }
 0x444   : > { %v1388_v27 = vsel %vm1108_vm8, %v1316_v33, %v1335_v45  ;;  %v1453_v33 = vpack.c.bf16 %v1395_v50, %v1395_v50  ;;  %v5760_v52 = vpop.eup %5759 }
 0x445   : > { %v7759_v49 = vsel %vm1394_vm14, %v1388_v27, %v7702_v61  ;;  %v1222_v27 = vmul.f32 1.442695, %v1210_v41  ;;  %v5762_v20 = vpop.eup %5761  ;;  %v1213_v41 = vsub.f32 %v9789_v31, %v7541_v6  ;;  %v1311_v5 = vsel %vm7732_vm13, %v5760_v52, 0.0 }
 0x446   : > { %v1369_v38 = vpop.permute.xlu0 %1368  ;;  %v1455_v12 = vpack.c.bf16 %v7759_v49, %v7759_v49  ;;  %v1463_v50 = vunpack.c.l.b16 %v1453_v33 }
 0x447   : > { %v1398_v13 = vsel %vm1394_vm14, %v1389_v54, %v1369_v38  ;;  %v9788_v54 = vld [vmem:[#allocation28_spill] sm:$0xff]  ;;  %5767 = vpow2.f32 %v1222_v27  ;;  %v1228_v33 = vmul.f32 1.442695, %v1213_v41 }
 0x448   : > { %v1456_v57 = vpack.c.bf16 %v1398_v13, %v1398_v13  ;;  %v1494_v22 = vunpack.c.l.b16 %v1455_v12  ;;  %v1413_v61 = vsel %vm1403_vm15, %v1398_v13, 0.0  ;;  %v2009_v24 = vsel %vm479_vm5, %v9788_v54, 0  ;;  %v1345_v13 = vpop.permute.xlu2 %1344 }
 0x449   : > { %v1312_v12 = vsel %vm7720_vm12, %v5758_v36, 0.0 }
 0x44a   : > { %v1495_v26 = vunpack.c.l.b16 %v1456_v57  ;;  %v5764_v57 = vpop.eup %5763 }
 0x44b   : > { %1414 = vadd.xlane.f32.xlu2 %v1413_v61  ;;  %v1365_v45 = vpop.permute.xlu1 %1364  ;;  %v1320_v61 = vadd.f32 %v5762_v20, %v1312_v12  ;;  %v5766_v29 = vpop.eup %5765  ;;  %v1319_v36 = vadd.f32 %v5764_v57, %v1311_v5  ;;  %v9791_v57 = vld [vmem:[#allocation39_spill] sm:$0xff] }
 0x44c   : > { %v1496_v56 = vpack.c.b16 %v1495_v26, %v1494_v22  ;;  %v1396_v44 = vsel %vm1394_vm14, %v1387_v16, %v1365_v45  ;;  %v1252_v22 = vmul.f32 1.442695, %v1237_v21  ;;  %v2139_v31 = vsel %vm479_vm5, %v9791_v57, 0  ;;  %v9792_v5 = vld [vmem:[#allocation15_spill] sm:$0xff] }
 0x44d   : > { %v1454_v2 = vpack.c.bf16 %v1396_v44, %v1396_v44  ;;  %v1407_v60 = vsel %vm1403_vm15, %v1396_v44, 0.0  ;;  %v5768_v27 = vpop.eup %5767  ;;  %v1310_v44 = vsel %vm7720_vm12, %v5766_v29, 0.0 }
 0x44e   : > { %5317 = vmatmul.msk.bf16.vlgmr.msrb.gmra.mxu1 %vm1403_vm15, %v1496_v56  ;;  %v1375_v38 = vpop.permute.xlu0 %1374  ;;  %v1979_v56 = vsel %vm479_vm5, %v9790_v17, 0  ;;  %5769 = vpow2.f32 %v1252_v22  ;;  %v1318_v20 = vadd.f32 %v5768_v27, %v1310_v44  ;;  %v9795_v44 = vld [vmem:[#allocation12_spill] sm:$0xff] }
 0x44f   : > { %2018 = vmatpush.bf16.xpose.msrb.mxu1 %v2009_v24  ;;  %v1464_v43 = vunpack.c.l.b16 %v1454_v2  ;;  %5771 = vpow2.f32 %v1228_v33  ;;  %v9794_v33 = vld [vmem:[#allocation24_spill] sm:$0xff] }
 0x450   : > { %v1373_v21 = vpop.permute.xlu2 %1372 }
 0x451   : > { %v1465_v26 = vpack.c.b16 %v1464_v43, %v1463_v50  ;;  %v1410_v50 = vsel %vm1403_vm15, %v7759_v49, 0.0 }
 0x452   : > { %1408 = vadd.xlane.f32.xlu0 %v1407_v60 }
 0x453   : > { %v1343_v16 = vpop.permute.xlu1 %1342  ;;  %5316 = vmatmul.msk.bf16.vlgmr.msra.gmra.mxu0 %vm1403_vm15, %v1465_v26 }
 0x454   : > { %v1392_v45 = vsel %vm1108_vm8, %v1320_v61, %v1343_v16  ;;  %1988 = vmatpush.bf16.xpose.msra.mxu0 %v1979_v56  ;;  %v5770_v43 = vpop.eup %5769  ;;  %v9793_v16 = vld [vmem:[#allocation23_spill] sm:$0xff] }
 0x455   : > { %v1401_v24 = vsel %vm1394_vm14, %v1392_v45, %v1375_v38  ;;  %v1390_v38 = vsel %vm1108_vm8, %v1318_v20, %v7751_v63  ;;  %v5772_v26 = vpop.eup %5771  ;;  %v1313_v63 = vsel %vm7732_vm13, %v5770_v43, 0.0  ;;  %v2108_v45 = vsel %vm479_vm5, %v9794_v33, 0 }
 0x456   : > { %v1341_v6 = vpop.permute.xlu0 %1340  ;;  %v1422_v52 = vsel %vm1403_vm15, %v1401_v24, 0.0  ;;  %v1321_v17 = vadd.f32 %v5772_v26, %v1313_v63  ;;  %v9802_v63 = vld [vmem:[#allocation58_spill] sm:$0xff] }
 0x457   : > { %v1391_v54 = vsel %vm1108_vm8, %v1319_v36, %v1341_v6  ;;  %1423 = vadd.xlane.f32.xlu2 %v1422_v52  ;;  %v2039_v36 = vsel %vm479_vm5, %v9793_v16, 0  ;;  %v9806_v16 = vld [vmem:[#allocation43_spill] sm:$0xff] }
 0x458   : > { %v7793_v2 = vsel %vm1394_vm14, %v1391_v54, %v1373_v21  ;;  %v1393_v6 = vsel %vm1108_vm8, %v1321_v17, %v1345_v13  ;;  %v1459_v54 = vpack.c.bf16 %v1401_v24, %v1401_v24  ;;  %v2824_v24 = vrot.slane %v7110_v9, 6  ;;  %v9805_v17 = vld [vmem:[#allocation40_spill] sm:$0xff] }
 0x459   : > { %v1458_v60 = vpack.c.bf16 %v7793_v2, %v7793_v2 }
 0x45b   : > { %v1371_v12 = vpop.permute.xlu1 %1370  ;;  %1411 = vadd.xlane.f32.xlu1 %v1410_v50  ;;  %v1526_v61 = vunpack.c.l.b16 %v1458_v60  ;;  %v1556_v50 = vunpack.c.l.b16 %v1459_v54  ;;  %v9797_v60 = vld [vmem:[#allocation26_spill] sm:$0xff] }
 0x45c   : > { %v1399_v41 = vsel %vm1394_vm14, %v1390_v38, %v1371_v12  ;;  %v7819_v38 = vpop.permute.xlu2 %3138  ;;  %v2069_v12 = vsel %vm479_vm5, %v9797_v60, 0 }
 0x45d   : > { %v1457_v22 = vpack.c.bf16 %v1399_v41, %v1399_v41  ;;  %v1416_v49 = vsel %vm1403_vm15, %v1399_v41, 0.0  ;;  %9796 = vst [vmem:[#allocation37_spill] sm:$0xff] %v7819_v38  ;;  %v9799_v41 = vld [vmem:[#allocation48_spill] sm:$0xff] }
 0x45e   : > { %5321 = vmatmul.msk.bf16.vlgmr.msra.gmra.mxu1 %vm479_vm5, %v9792_v5  ;;  %1417 = vadd.xlane.f32.xlu0 %v1416_v49  ;;  %v2852_v5 = vsel %vm614_vm1, %v7097_v23, %v2824_v24  ;;  %v9801_v49 = vld [vmem:[#allocation46_spill] sm:$0xff] }
 0x45f   : > { %2148 = vmatpush.bf16.xpose.msra.mxu1 %v2139_v31  ;;  %v1525_v29 = vunpack.c.l.b16 %v1457_v22  ;;  %v2615_v31 = vsel %vm597_vm2, %v7555_v14, 0  ;;  %v2170_v26 = vsel %vm479_vm5, %v9801_v49, 0  ;;  %v2584_v14 = vsel %vm597_vm2, %v9802_v63, 0 }
 0x461   : > { %v1527_v56 = vpack.c.b16 %v1526_v61, %v1525_v29  ;;  %v9804_v29 = vld [vmem:[#allocation13_spill] sm:$0xff] }
 0x463   : > { %v1377_v27 = vpop.permute.xlu1 %1376  ;;  %5318 = vmatmul.msk.bf16.vlgmr.msrb.gmra.mxu2 %vm1403_vm15, %v1527_v56  ;;  %5320 = vmatmul.msk.bf16.vlgmr.msrb.gmra.mxu0 %vm479_vm5, %v9795_v44  ;;  %v2843_v44 = vrot.slane %v7110_v9, 2 }
 0x464   : > { %v1402_v52 = vsel %vm1394_vm14, %v1393_v6, %v1377_v27  ;;  %2048 = vmatpush.bf16.xpose.msrb.mxu2 %v2039_v36  ;;  %2117 = vmatpush.bf16.xpose.msrb.mxu0 %v2108_v45  ;;  %v7835_v22 = vpop.permute.xlu2 %3171  ;;  %v2201_v36 = vsel %vm479_vm5, %v9806_v16, 0  ;;  %v9808_v45 = vld [vmem:[#allocation16_spill] sm:$0xff]  ;;  %v2747_v6 = vsel %vm479_vm5, %v7687_v30, 0  ;;  %v2842_v27 = vrot.slane %v7097_v23, 2 }
 0x465   : > { %v1460_v21 = vpack.c.bf16 %v1402_v52, %v1402_v52  ;;  %v1425_v20 = vsel %vm1403_vm15, %v1402_v52, 0.0  ;;  %9800 = vst [vmem:[#allocation34_spill] sm:$0xff] %v7835_v22  ;;  %v2646_v52 = vsel %vm597_vm2, %v7573_v47, 0  ;;  %v2720_v30 = vsel %vm479_vm5, %v7607_v42, 0  ;;  %v9844_v22 = vld [vmem:[#allocation17_spill] sm:$0xff] }
 0x466   : > { %1426 = vadd.xlane.f32.xlu0 %v1425_v20  ;;  %v9812_v20 = vld [vmem:[#allocation47_spill] sm:$0xff]  ;;  %v2844_v60 = vsel %vm597_vm2, %v2842_v27, %v2843_v44  ;;  %v2677_v42 = vsel %vm597_vm2, %v7673_v18, 0 }
 0x467   : > { %v1557_v43 = vunpack.c.l.b16 %v1460_v21  ;;  %v2856_v47 = vsel %vm619_vm3, %v2824_v24, %v2844_v60 }
 0x469   : > { %v1558_v13 = vpack.c.b16 %v1557_v43, %v1556_v50  ;;  %v9813_v50 = vld [vmem:[#allocation41_spill] sm:$0xff]  ;;  %v7880_v43 = vpop.permute.xlu0 %3108 }
 0x46a   : > { %9814 = vst [vmem:[#allocation42_spill] sm:$0xff] %v7880_v43 }
 0x46b   : > { %v7824_v57 = vpop.permute.xlu1 %3210  ;;  %5319 = vmatmul.msk.bf16.vlgmr.msrb.gmra.mxu3 %vm1403_vm15, %v1558_v13 }
 0x46c   : > { %9798 = vst [vmem:[#allocation33_spill] sm:$0xff] %v7824_v57  ;;  %2078 = vmatpush.bf16.xpose.msrb.mxu3 %v2069_v12  ;;  %v7862_v54 = vpop.permute.xlu2 %3168 }
 0x46d   : > { %9809 = vst [vmem:[#allocation36_spill] sm:$0xff] %v7862_v54 }
 0x46e   : > { %5325 = vmatmul.msk.bf16.vlgmr.msrb.gmra.mxu1 %vm479_vm5, %v9799_v41 }
 0x46f   : > { %2623 = vmatpush.bf16.msrb.mxu1 %v2615_v31  ;;  %2909 = vrot.lane.b32.xlu2 %v2852_v5, %s6201_s28  ;;  %v9816_v31 = vld [vmem:[#allocation49_spill] sm:$0xff] }
 0x471   : > { %v7892_v41 = vpop.permute.xlu0 %3272 }
 0x472   : > { %9817 = vst [vmem:[#allocation39_spill] sm:$0xff] %v7892_v41 }
 0x473   : > { %2624 = vmatpush.bf16.msrb.mxu1 %v7619_v39  ;;  %v7841_v61 = vpop.permute.xlu1 %3206  ;;  %5322 = vmatmul.msk.bf16.vlgmr.msra.gmra.mxu2 %vm479_vm5, %v9804_v29  ;;  %v2823_v39 = vrot.slane %v7081_v15, 6  ;;  %v9820_v29 = vld [vmem:[#allocation51_spill] sm:$0xff] }
 0x474   : > { %9803 = vst [vmem:[#allocation38_spill] sm:$0xff] %v7841_v61  ;;  %5324 = vmatmul.msk.bf16.vlgmr.msra.gmra.mxu0 %vm479_vm5, %v9805_v17  ;;  %2179 = vmatpush.bf16.xpose.msra.mxu2 %v2170_v26  ;;  %v7882_v13 = vpop.permute.xlu2 %3303  ;;  %v9818_v26 = vld [vmem:[#allocation50_spill] sm:$0xff] }
 0x475   : > { %2592 = vmatpush.bf16.msra.mxu0 %v2584_v14  ;;  %2867 = vrot.lane.b32.xlu1 %v7081_v15, %s6199_s18  ;;  %v2851_v56 = vsel %vm614_vm1, %v7076_v7, %v2823_v39  ;;  %9815 = vst [vmem:[#allocation22_spill] sm:$0xff] %v7882_v13 }
 0x479   : > { %2593 = vmatpush.bf16.msra.mxu0 %v7458_v34  ;;  %v9810_v34 = vld [vmem:[#allocation44_spill] sm:$0xff]  ;;  %v7903_v63 = vpop.permute.xlu0 %3268 }
 0x47a   : > { %2905 = vrot.lane.b32.xlu0 %v2851_v56, %s6201_s28  ;;  %9819 = vst [vmem:[#allocation15_spill] sm:$0xff] %v7903_v63 }
 0x47b   : > { %v7856_v33 = vpop.permute.xlu1 %3241  ;;  %5323 = vmatmul.msk.bf16.vlgmr.msra.gmra.mxu3 %vm479_vm5, %v9808_v45  ;;  %v2840_v45 = vrot.slane %v7081_v15, 2 }
 0x47c   : > { %9807 = vst [vmem:[#allocation45_spill] sm:$0xff] %v7856_v33  ;;  %2210 = vmatpush.bf16.xpose.msra.mxu3 %v2201_v36  ;;  %v2860_v5 = vpop.permute.xlu2 %2859  ;;  %v2839_v36 = vrot.slane %v7076_v7, 2 }
 0x47d   : > { %v2882_v24 = vsel %vm449_vm7, %v7042_v11, %v2860_v5  ;;  %v1419_v11 = vsel %vm1403_vm15, %v7793_v2, 0.0 }
 0x47e   : > { %5329 = vmatmul.msk.bf16.vlgmr.msra.gmra.mxu1 %vm479_vm5, %v9810_v34 }
 0x47f   : > { %2756 = vmatpush.bf16.xpose.msra.mxu1 %v2747_v6  ;;  %v2841_v6 = vsel %vm597_vm2, %v2839_v36, %v2840_v45 }
 0x480   : > { %v2855_v2 = vsel %vm619_vm3, %v2823_v39, %v2841_v6 }
 0x482   : > { %2869 = vrot.lane.b32.xlu0 %v7097_v23, %s6199_s18 }
 0x483   : > { %v7874_v21 = vpop.permute.xlu1 %3237  ;;  %5326 = vmatmul.msk.bf16.vlgmr.msrb.gmra.mxu2 %vm479_vm5, %v9812_v20 }
 0x484   : > { %9811 = vst [vmem:[#allocation28_spill] sm:$0xff] %v7874_v21  ;;  %5328 = vmatmul.msk.bf16.vlgmr.msrb.gmra.mxu0 %vm479_vm5, %v9813_v50  ;;  %2654 = vmatpush.bf16.msrb.mxu2 %v2646_v52 }
 0x485   : > { %2729 = vmatpush.bf16.xpose.msrb.mxu0 %v2720_v30 }
 0x488   : > { %2655 = vmatpush.bf16.msrb.mxu2 %v7571_v8  ;;  %v2774_v8 = vsel %vm479_vm5, %v7648_v3, 0  ;;  %v7911_v3 = vpop.permute.xlu0 %3299 }
 0x489   : > { %9821 = vst [vmem:[#allocation23_spill] sm:$0xff] %v7911_v3 }
 0x48a   : > { %2911 = vrot.lane.b32.xlu0 %v2856_v47, %s6201_s28 }
 0x48b   : > { %v2858_v12 = vpop.permute.xlu1 %2857  ;;  %5327 = vmatmul.msk.bf16.vlgmr.msrb.gmra.mxu3 %vm479_vm5, %v9816_v31 }
 0x48c   : > { %2685 = vmatpush.bf16.msrb.mxu3 %v2677_v42 }
 0x490   : > { %2686 = vmatpush.bf16.msrb.mxu3 %v7711_v46  ;;  %v2801_v46 = vsel %vm479_vm5, %v7730_v32, 0  ;;  %v2898_v32 = vpop.permute.xlu0 %2897 }
 0x493   : > { %v2900_v49 = vpop.permute.xlu1 %2899  ;;  %5330 = vmatmul.msk.bf16.vlgmr.msra.gmra.mxu2 %vm479_vm5, %v9818_v26 }
 0x494   : > { %v2922_v18 = vmul.f32 %v2900_v49, %v2882_v24  ;;  %2783 = vmatpush.bf16.xpose.msra.mxu2 %v2774_v8 }
 0x496   : > { %2939 = vrot.lane.b32.xlu0 %v2922_v18, %s6199_s18 }
 0x498   : > { %v2862_v34 = vpop.permute.xlu0 %2861 }
 0x499   : > { %v2883_v30 = vsel %vm446_vm6, %v7059_v4, %v2862_v34 }
 0x49b   : > { %v2864_v14 = vpop.permute.xlu1 %2863  ;;  %5331 = vmatmul.msk.bf16.vlgmr.msra.gmra.mxu3 %vm479_vm5, %v9820_v29 }
 0x49c   : > { %2810 = vmatpush.bf16.xpose.msra.mxu3 %v2801_v46  ;;  %v2884_v17 = vsel %vm449_vm7, %v7066_v28, %v2864_v14  ;;  %v2881_v28 = vsel %vm446_vm6, %v7000_v53, %v2858_v12 }
 0x49d   : > { %v2921_v44 = vmul.f32 %v2898_v32, %v2881_v28 }
 0x49f   : > { %1420 = vadd.xlane.f32.xlu1 %v1419_v11 }
 0x4a0   : > { %v2902_v27 = vpop.permute.xlu0 %2901 }
 0x4a1   : > { %v2923_v20 = vmul.f32 %v2902_v27, %v2883_v30 }
 0x4a3   : > { %v2904_v56 = vpop.permute.xlu1 %2903 }
 0x4a4   : > { %v2924_v16 = vmul.f32 %v2904_v56, %v2884_v17 }
 0x4a6   : > { %2943 = vrot.lane.b32.xlu0 %v2924_v16, %s6199_s18 }
 0x4a8   : > { %v2866_v52 = vpop.permute.xlu0 %2865 }
 0x4a9   : > { %v2885_v12 = vsel %vm446_vm6, %v7076_v7, %v2866_v52 }
 0x4b6   : > { %v7934_v50 = vpop.xlane.xlu2 %1405 }
 0x4b7   : > { %9823 = vst [vmem:[#allocation12_spill] sm:$0xff] %v7934_v50 }
 0x4b8   : > { %2907 = vrot.lane.b32.xlu1 %v2855_v2, %s6201_s28 }
 0x4be   : > { %v7938_v47 = vpop.xlane.xlu2 %1414 }
 0x4bf   : > { %9825 = vst [vmem:[#allocation48_spill] sm:$0xff] %v7938_v47 }
 0x4c0   : > { %2871 = vrot.lane.b32.xlu1 %v7110_v9, %s6199_s18 }
 0x4c5   : > { %v7932_v39 = vpop.xlane.xlu0 %1408 }
 0x4c6   : > { %9822 = vst [vmem:[#allocation24_spill] sm:$0xff] %v7932_v39 }
 0x4c8   : > { %2937 = vrot.lane.b32.xlu1 %v2921_v44, %s6199_s18 }
 0x4ca   : > { %v7942_v42 = vpop.xlane.xlu2 %1423 }
 0x4cb   : > { %9827 = vst [vmem:[#allocation58_spill] sm:$0xff] %v7942_v42  ;;  %v7952_v26 = vpop.f32.mrf.mxu1 }
 0x4cc   : > { %9828 = vst [vmem:[#allocation13_spill] sm:$0xff] %v7952_v26 }
 0x4ce   : > { %v7960_v14 = vpop.xlane.xlu1 %1411 }
 0x4cf   : > { %9832 = vst [vmem:[#allocation44_spill] sm:$0xff] %v7960_v14 }
 0x4d0   : > { %2941 = vrot.lane.b32.xlu1 %v2923_v20, %s6199_s18  ;;  %v7954_v18 = vpop.f32.mrf.mxu0 }
 0x4d1   : > { %v7936_v60 = vpop.xlane.xlu0 %1417  ;;  %9829 = vst [vmem:[#allocation40_spill] sm:$0xff] %v7954_v18 }
 0x4d2   : > { %9824 = vst [vmem:[#allocation26_spill] sm:$0xff] %v7936_v60  ;;  %v2910_v8 = vpop.permute.xlu2 %2909 }
 0x4d3   : > { %v7956_v46 = vpop.f32.mrf.mxu1 }
 0x4d4   : > { %9830 = vst [vmem:[#allocation43_spill] sm:$0xff] %v7956_v46 }
 0x4d8   : > { %v7958_v7 = vpop.f32.mrf.mxu0 }
 0x4d9   : > { %v7940_v53 = vpop.xlane.xlu0 %1426  ;;  %9831 = vst [vmem:[#allocation16_spill] sm:$0xff] %v7958_v7 }
 0x4da   : > { %9826 = vst [vmem:[#allocation46_spill] sm:$0xff] %v7940_v53 }
 0x4db   : > { %v7962_v29 = vpop.f32.mrf.mxu1 }
 0x4dc   : > { %v2231_v28 = vsel %vm1108_vm8, %v7962_v29, -inf }
 0x4e0   : > { %v7964_v17 = vpop.f32.mrf.mxu0 }
 0x4e3   : > { %v7970_v36 = vpop.f32.mrf.mxu1 }
 0x4e6   : > { %v7966_v56 = vpop.f32.mrf.mxu2 }
 0x4e7   : > { %9833 = vst [vmem:[#allocation47_spill] sm:$0xff] %v7966_v56  ;;  %v2868_v16 = vpop.permute.xlu1 %2867 }
 0x4e8   : > { %v7972_v45 = vpop.f32.mrf.mxu0  ;;  %v2886_v44 = vsel %vm449_vm7, %v7081_v15, %v2868_v16 }
 0x4ec   : > { %v2906_v4 = vpop.permute.xlu0 %2905 }
 0x4ed   : > { %v2925_v31 = vmul.f32 %v2906_v4, %v2885_v12  ;;  %v2020_v4 = vpop.f32.mrf.mxu1 }
 0x4ee   : > { %v7974_v6 = vpop.f32.mrf.mxu2 }
 0x4ef   : > { %2945 = vrot.lane.b32.xlu1 %v2925_v31, %s6199_s18  ;;  %9835 = vst [vmem:[#allocation49_spill] sm:$0xff] %v7974_v6 }
 0x4f1   : > { %v1990_v30 = vpop.f32.mrf.mxu0 }
 0x4f4   : > { %v2870_v5 = vpop.permute.xlu0 %2869 }
 0x4f5   : > { %v2887_v24 = vsel %vm446_vm6, %v7097_v23, %v2870_v5  ;;  %v7968_v23 = vpop.f32.mrf.mxu3  ;;  %v7993_v5 = vsel %vm444_vm9, -1e+30, %v1990_v30 }
 0x4f6   : > { %v2927_v49 = vmul.f32 %v2910_v8, %v2887_v24  ;;  %9834 = vst [vmem:[#allocation41_spill] sm:$0xff] %v7968_v23  ;;  %v7986_v20 = vpop.f32.mrf.mxu2  ;;  %v2257_v8 = vsel %vm1141_vm10, %v7993_v5, -inf }
 0x4f8   : > { %2949 = vrot.lane.b32.xlu0 %v2927_v49, %s6199_s18 }
 0x4fc   : > { %v2912_v11 = vpop.permute.xlu0 %2911 }
 0x4fd   : > { %v7977_v2 = vpop.f32.mrf.mxu3 }
 0x4fe   : > { %9836 = vst [vmem:[#allocation50_spill] sm:$0xff] %v7977_v2  ;;  %v8000_v16 = vpop.f32.mrf.mxu2 }
 0x4ff   : > { %9838 = vst [vmem:[#allocation66_spill] sm:$0xff] %v8000_v16 }
 0x505   : > { %v7988_v31 = vpop.f32.mrf.mxu3 }
 0x508   : > { %v2940_v32 = vpop.permute.xlu0 %2939 }
 0x509   : > { %v2964_v34 = vsel %vm479_vm5, %v2940_v32, 0.0  ;;  %v8002_v32 = vpop.f32.mrf.mxu1 }
 0x512   : > { %v7979_v27 = vpop.xlane.xlu1 %1420 }
 0x513   : > { %9837 = vst [vmem:[#allocation51_spill] sm:$0xff] %v7979_v27 }
 0x522   : > { %2965 = vadd.xlane.f32.xlu0 %v2964_v34  ;;  %v8004_v34 = vpop.f32.mrf.mxu3 }
 0x523   : > { %9839 = vst [vmem:[#allocation67_spill] sm:$0xff] %v8004_v34 }
 0x52a   : > { %v2908_v52 = vpop.permute.xlu1 %2907  ;;  %2232 = vmax.xlane.f32.xlu0 %v2231_v28  ;;  %v2266_v28 = vsel %vm1141_vm10, %v8002_v32, -inf  ;;  %v2080_v30 = vpop.f32.mrf.mxu3 }
 0x52b   : > { %v2926_v12 = vmul.f32 %v2908_v52, %v2886_v44  ;;  %v8009_v44 = vpop.f32.mrf.mxu0  ;;  %v2050_v52 = vpop.f32.mrf.mxu2 }
 0x52d   : > { %2947 = vrot.lane.b32.xlu2 %v2926_v12, %s6199_s18  ;;  %v8015_v12 = vsel %vm444_vm9, -1e+30, %v2080_v30 }
 0x532   : > { %v2872_v24 = vpop.permute.xlu1 %2871  ;;  %2258 = vmax.xlane.f32.xlu0 %v2257_v8 }
 0x533   : > { %v2888_v15 = vsel %vm449_vm7, %v7110_v9, %v2872_v24  ;;  %v2240_v9 = vsel %vm1108_vm8, %v8000_v16, -inf  ;;  %v8017_v8 = vpop.f32.mrf.mxu2  ;;  %v2275_v24 = vsel %vm1141_vm10, %v8015_v12, -inf }
 0x534   : > { %v2928_v49 = vmul.f32 %v2912_v11, %v2888_v15  ;;  %v2119_v11 = vpop.f32.mrf.mxu0  ;;  %v8021_v15 = vpop.f32.mrf.mxu3 }
 0x536   : > { %2951 = vrot.lane.b32.xlu1 %v2928_v49, %s6199_s18 }
 0x53a   : > { %2267 = vmax.xlane.f32.xlu0 %v2266_v28  ;;  %v2938_v2 = vpop.permute.xlu1 %2937 }
 0x53b   : > { %v2961_v30 = vsel %vm479_vm5, %v2938_v2, 0.0 }
 0x53c   : > { %v8023_v49 = vpop.f32.mrf.mxu0  ;;  %v2212_v23 = vpop.f32.mrf.mxu3 }
 0x53d   : > { %v2292_v28 = vsel %vm1141_vm10, %v8023_v49, -inf }
 0x542   : > { %2241 = vmax.xlane.f32.xlu0 %v2240_v9  ;;  %v2181_v9 = vpop.f32.mrf.mxu2  ;;  %v2942_v56 = vpop.permute.xlu1 %2941 }
 0x543   : > { %v8030_v53 = vsel %vm444_vm9, -1e+30, %v2181_v9  ;;  %v2225_v9 = vsel %vm1108_vm8, %v7964_v17, -inf }
 0x544   : > { %v2301_v6 = vsel %vm1141_vm10, %v8030_v53, -inf  ;;  %v8035_v60 = vpop.f32.mrf.mxu3 }
 0x545   : > { %v2310_v2 = vsel %vm1141_vm10, %v8035_v60, -inf }
 0x54a   : > { %2276 = vmax.xlane.f32.xlu0 %v2275_v24  ;;  %v2944_v24 = vpop.permute.xlu0 %2943 }
 0x54b   : > { %v2970_v42 = vsel %vm479_vm5, %v2944_v24, 0.0  ;;  %v2243_v24 = vsel %vm1108_vm8, %v7988_v31, -inf }
 0x552   : > { %2293 = vmax.xlane.f32.xlu0 %v2292_v28  ;;  %v2967_v28 = vsel %vm479_vm5, %v2942_v56, 0.0 }
 0x556   : > { %2962 = vadd.xlane.f32.xlu2 %v2961_v30  ;;  %v8046_v30 = vsel %vm444_vm9, -1e+30, %v2020_v4  ;;  %v2260_v4 = vsel %vm1141_vm10, %v8009_v44, -inf }
 0x557   : > { %v2263_v56 = vsel %vm1141_vm10, %v8046_v30, -inf }
 0x55a   : > { %2302 = vmax.xlane.f32.xlu0 %v2301_v6  ;;  %v2228_v6 = vsel %vm1108_vm8, %v7972_v45, -inf }
 0x55e   : > { %2971 = vadd.xlane.f32.xlu2 %v2970_v42  ;;  %v2234_v42 = vsel %vm1108_vm8, %v7970_v36, -inf }
 0x560   : > { %2968 = vadd.xlane.f32.xlu1 %v2967_v28  ;;  %v2237_v28 = vsel %vm1108_vm8, %v7986_v20, -inf }
 0x562   : > { %2311 = vmax.xlane.f32.xlu0 %v2310_v2  ;;  %v2150_v2 = vpop.f32.mrf.mxu1 }
 0x566   : > { %2226 = vmax.xlane.f32.xlu2 %v2225_v9  ;;  %v2246_v9 = vsel %vm1108_vm8, %v8004_v34, -inf }
 0x568   : > { %2229 = vmax.xlane.f32.xlu1 %v2228_v6  ;;  %v8062_v6 = vsel %vm444_vm9, -1e+30, %v2150_v2 }
 0x56a   : > { %v8096_v27 = vpop.permute.xlu0 %2949 }
 0x56e   : > { %2235 = vmax.xlane.f32.xlu2 %v2234_v42  ;;  %v8066_v42 = vsel %vm444_vm9, -1e+30, %v2119_v11 }
 0x570   : > { %2264 = vmax.xlane.f32.xlu1 %v2263_v56  ;;  %v2295_v56 = vsel %vm1141_vm10, %v8062_v6, -inf }
 0x576   : > { %2244 = vmax.xlane.f32.xlu2 %v2243_v24  ;;  %v2289_v24 = vsel %vm1141_vm10, %v8066_v42, -inf }
 0x578   : > { %2238 = vmax.xlane.f32.xlu1 %v2237_v28  ;;  %v8074_v28 = vsel %vm444_vm9, -1e+30, %v2050_v52  ;;  %v8086_v52 = vpop.f32.mrf.mxu2 }
 0x579   : > { %v2269_v2 = vsel %vm1141_vm10, %v8074_v28, -inf }
 0x57e   : > { %2261 = vmax.xlane.f32.xlu2 %v2260_v4  ;;  %v8076_v4 = vpop.f32.mrf.mxu1 }
 0x57f   : > { %v2298_v11 = vsel %vm1141_vm10, %v8076_v4, -inf }
 0x580   : > { %2247 = vmax.xlane.f32.xlu1 %v2246_v9  ;;  %v2278_v9 = vsel %vm1141_vm10, %v8021_v15, -inf }
 0x586   : > { %2296 = vmax.xlane.f32.xlu2 %v2295_v56  ;;  %v2272_v56 = vsel %vm1141_vm10, %v8017_v8, -inf }
 0x587   : > { %v8100_v46 = vpop.permute.xlu2 %2947 }
 0x588   : > { %2290 = vmax.xlane.f32.xlu1 %v2289_v24  ;;  %v8090_v24 = vsel %vm444_vm9, -1e+30, %v2212_v23 }
 0x58e   : > { %2270 = vmax.xlane.f32.xlu2 %v2269_v2  ;;  %v2304_v2 = vsel %vm1141_vm10, %v8086_v52, -inf }
 0x590   : > { %2299 = vmax.xlane.f32.xlu1 %v2298_v11  ;;  %v2307_v11 = vsel %vm1141_vm10, %v8090_v24, -inf }
 0x596   : > { %2279 = vmax.xlane.f32.xlu2 %v2278_v9  ;;  %v8098_v9 = vpop.xlane.xlu0 %2965 }
 0x597   : > { %9840 = vst [vmem:[#allocation68_spill] sm:$0xff] %v8098_v9 }
 0x598   : > { %2273 = vmax.xlane.f32.xlu1 %v2272_v56  ;;  %v8102_v56 = vpop.permute.xlu1 %2945 }
 0x59e   : > { %2305 = vmax.xlane.f32.xlu2 %v2304_v2  ;;  %v2233_v26 = vpop.xlane.xlu0 %2232 }
 0x5a0   : > { %2308 = vmax.xlane.f32.xlu1 %v2307_v11 }
 0x5a6   : > { %v2259_v14 = vpop.xlane.xlu0 %2258 }
 0x5a8   : > { %v8106_v23 = vpop.permute.xlu1 %2951 }
 0x5ae   : > { %v2268_v11 = vpop.xlane.xlu0 %2267 }
 0x5b6   : > { %v8112_v9 = vpop.xlane.xlu0 %2241 }
 0x5be   : > { %v8116_v13 = vpop.xlane.xlu0 %2276 }
 0x5c6   : > { %v2294_v21 = vpop.xlane.xlu0 %2293 }
 0x5c9   : > { %v8104_v47 = vpop.xlane.xlu2 %2962 }
 0x5ca   : > { %9841 = vst [vmem:[#allocation69_spill] sm:$0xff] %v8104_v47 }
 0x5d1   : > { %v8108_v7 = vpop.xlane.xlu2 %2971 }
 0x5d2   : > { %9842 = vst [vmem:[#allocation70_spill] sm:$0xff] %v8108_v7  ;;  %v8123_v7 = vsel %vm444_vm9, -1e+30, %v9844_v22 }
 0x5d3   : > { %v8110_v2 = vpop.xlane.xlu1 %2968  ;;  %v2251_v55 = vmax.f32 %v2233_v26, %v8123_v7 }
 0x5d4   : > { %9843 = vst [vmem:[#allocation71_spill] sm:$0xff] %v8110_v2  ;;  %v9845_v2 = vld [vmem:[#allocation52_spill] sm:$0xff] }
 0x5d5   : > { %v1877_v41 = vsel %vm444_vm9, -1e+30, %v9845_v2  ;;  %v1881_v2 = vsel %vm444_vm9, -1e+30, %v9847_v35 }
 0x5d9   : > { %v2227_v39 = vpop.xlane.xlu2 %2226 }
 0x5da   : > { %v2249_v34 = vmax.f32 %v2227_v39, %v1877_v41 }
 0x5db   : > { %v2230_v18 = vpop.xlane.xlu1 %2229 }
 0x5dc   : > { %v2281_v1 = vmax.f32 %v2249_v34, %v2259_v14  ;;  %v2250_v22 = vmax.f32 %v2230_v18, %v9846_v37 }
 0x5e1   : > { %v2236_v50 = vpop.xlane.xlu2 %2235 }
 0x5e2   : > { %v2252_v26 = vmax.f32 %v2236_v50, %v9848_v40 }
 0x5e3   : > { %v2265_v3 = vpop.xlane.xlu1 %2264 }
 0x5e4   : > { %v2283_v51 = vmax.f32 %v2251_v55, %v2265_v3  ;;  %v2284_v50 = vmax.f32 %v2252_v26, %v2268_v11 }
 0x5e9   : > { %v8114_v54 = vpop.xlane.xlu2 %2244 }
 0x5eb   : > { %v2239_v63 = vpop.xlane.xlu1 %2238 }
 0x5ec   : > { %v2253_v14 = vmax.f32 %v2239_v63, %v1881_v2 }
 0x5f1   : > { %v2262_v47 = vpop.xlane.xlu2 %2261 }
 0x5f2   : > { %v2282_v55 = vmax.f32 %v2250_v22, %v2262_v47 }
 0x5f3   : > { %v8118_v38 = vpop.xlane.xlu1 %2247 }
 0x5f4   : > { %v8143_v47 = vmax.f32 %v2282_v55, %v2294_v21 }
 0x5f6   : > { %v2370_v11 = vsub.f32 %v8009_v44, %v8143_v47 }
 0x5f9   : > { %v2297_v16 = vpop.xlane.xlu2 %2296 }
 0x5fa   : > { %v8129_v61 = vmax.f32 %v2283_v51, %v2297_v16 }
 0x5fb   : > { %v2291_v43 = vpop.xlane.xlu1 %2290 }
 0x5fc   : > { %v2371_v33 = vsub.f32 %v8046_v30, %v8129_v61  ;;  %v2313_v57 = vmax.f32 %v2281_v1, %v2291_v43  ;;  %v2395_v18 = vsub.f32 %v8062_v6, %v8129_v61 }
 0x5fe   : > { %v2381_v39 = vmul.f32 1.442695, %v2371_v33  ;;  %v2321_v3 = vsub.f32 %v7964_v17, %v2313_v57  ;;  %v2345_v51 = vsub.f32 %v1877_v41, %v2313_v57  ;;  %v2369_v16 = vsub.f32 %v7993_v5, %v2313_v57  ;;  %v2303_v33 = vpop.xlane.xlu0 %2302 }
 0x5ff   : > { %v2393_v34 = vsub.f32 %v8066_v42, %v2313_v57  ;;  %v2405_v57 = vmul.f32 1.442695, %v2395_v18 }
 0x600   : > { %v2329_v1 = vmul.f32 1.442695, %v2321_v3  ;;  %v2353_v43 = vmul.f32 1.442695, %v2345_v51  ;;  %5773 = vpow2.f32 %v2381_v39  ;;  %v2377_v35 = vmul.f32 1.442695, %v2369_v16 }
 0x601   : > { %v2271_v30 = vpop.xlane.xlu2 %2270  ;;  %v2401_v17 = vmul.f32 1.442695, %v2393_v34  ;;  %v9849_v34 = vld [vmem:[#allocation55_spill] sm:$0xff] }
 0x602   : > { %v2285_v58 = vmax.f32 %v2253_v14, %v2271_v30  ;;  %5775 = vpow2.f32 %v2329_v1  ;;  %v1883_v18 = vsel %vm444_vm9, -1e+30, %v9849_v34 }
 0x603   : > { %v2300_v41 = vpop.xlane.xlu1 %2299  ;;  %5777 = vpow2.f32 %v2353_v43  ;;  %v2255_v30 = vmax.f32 %v8114_v54, %v1883_v18 }
 0x604   : > { %v8145_v5 = vmax.f32 %v2285_v58, %v2303_v33  ;;  %v8147_v63 = vmax.f32 %v2284_v50, %v2300_v41  ;;  %5779 = vpow2.f32 %v2377_v35  ;;  %v2394_v33 = vsub.f32 %v8023_v49, %v8143_v47 }
 0x605   : > { %5781 = vpow2.f32 %v2401_v17  ;;  %v2287_v54 = vmax.f32 %v2255_v30, %v8116_v13 }
 0x606   : > { %v2325_v6 = vsub.f32 %v7986_v20, %v8145_v5  ;;  %v2349_v42 = vsub.f32 %v1881_v2, %v8145_v5  ;;  %v5774_v21 = vpop.eup %5773  ;;  %v2372_v58 = vsub.f32 %v8002_v32, %v8147_v63  ;;  %5783 = vpow2.f32 %v2405_v57 }
 0x607   : > { %2445 = vrot.lane.b32.xlu0 %v5774_v21, %s6201_s28  ;;  %v2373_v20 = vsub.f32 %v8074_v28, %v8145_v5  ;;  %v2379_v2 = vmul.f32 1.442695, %v2370_v11  ;;  %v2396_v35 = vsub.f32 %v8076_v4, %v8147_v63  ;;  %v2403_v11 = vmul.f32 1.442695, %v2394_v33 }
 0x608   : > { %v2337_v22 = vmul.f32 1.442695, %v2325_v6  ;;  %v2361_v26 = vmul.f32 1.442695, %v2349_v42  ;;  %v5776_v39 = vpop.eup %5775  ;;  %v2383_v51 = vmul.f32 1.442695, %v2372_v58 }
 0x609   : > { %v5778_v55 = vpop.eup %5777  ;;  %v2385_v1 = vmul.f32 1.442695, %v2373_v20  ;;  %v8167_v28 = vpop.xlane.xlu2 %2279  ;;  %v2407_v57 = vmul.f32 1.442695, %v2396_v35 }
 0x60a   : > { %5785 = vpow2.f32 %v2337_v22  ;;  %v5780_v44 = vpop.eup %5779  ;;  %v2417_v16 = vsel %vm7720_vm12, %v5778_v55, 0.0 }
 0x60b   : > { %5787 = vpow2.f32 %v2361_v26  ;;  %v2274_v3 = vpop.xlane.xlu1 %2273  ;;  %v5782_v14 = vpop.eup %5781  ;;  %2441 = vrot.lane.b32.xlu2 %v5780_v44, %s6201_s28  ;;  %v8162_v32 = vadd.f32 %v5776_v39, %v2417_v16  ;;  %v9850_v26 = vld [vmem:[#allocation59_spill] sm:$0xff] }
 0x60c   : > { %2473 = vrot.lane.b32.xlu1 %v5782_v14, %s6205_s6  ;;  %v5784_v43 = vpop.eup %5783  ;;  %5789 = vpow2.f32 %v2379_v2  ;;  %v2254_v49 = vmax.f32 %v8112_v9, %v9850_v26 }
 0x60d   : > { %5791 = vpow2.f32 %v2383_v51 }
 0x60e   : > { %5793 = vpow2.f32 %v2385_v1  ;;  %v2286_v44 = vmax.f32 %v2254_v49, %v2274_v3  ;;  %v9852_v49 = vld [vmem:[#allocation54_spill] sm:$0xff] }
 0x60f   : > { %2477 = vrot.lane.b32.xlu0 %v5784_v43, %s6205_s6  ;;  %5795 = vpow2.f32 %v2407_v57 }
 0x610   : > { %v5786_v50 = vpop.eup %5785  ;;  %5797 = vpow2.f32 %v2403_v11 }
 0x611   : > { %v5788_v17 = vpop.eup %5787  ;;  %v2306_v55 = vpop.xlane.xlu2 %2305 }
 0x612   : > { %v2421_v41 = vsel %vm7720_vm12, %v5788_v17, 0.0  ;;  %v5790_v4 = vpop.eup %5789  ;;  %v8189_v14 = vmax.f32 %v2286_v44, %v2306_v55  ;;  %v9856_v44 = vld [vmem:[#allocation31_spill] sm:$0xff] }
 0x613   : > { %v2309_v6 = vpop.xlane.xlu1 %2308  ;;  %v8179_v42 = vadd.f32 %v5786_v50, %v2421_v41  ;;  %v5792_v22 = vpop.eup %5791 }
 0x614   : > { %v2319_v21 = vmax.f32 %v2287_v54, %v2309_v6  ;;  %2443 = vrot.lane.b32.xlu1 %v5790_v4, %s6201_s28  ;;  %2447 = vrot.lane.b32.xlu2 %v5792_v22, %s6201_s28  ;;  %v5794_v13 = vpop.eup %5793  ;;  %v2312_v54 = vpop.xlane.xlu0 %2311 }
 0x615   : > { %v5796_v1 = vpop.eup %5795 }
 0x616   : > { %v2327_v58 = vsub.f32 %v7988_v31, %v2319_v21  ;;  %v2351_v39 = vsub.f32 %v1883_v18, %v2319_v21  ;;  %v2375_v20 = vsub.f32 %v8015_v12, %v2319_v21  ;;  %v2399_v2 = vsub.f32 %v8090_v24, %v2319_v21  ;;  %v5798_v31 = vpop.eup %5797 }
 0x617   : > { %2449 = vrot.lane.b32.xlu0 %v5794_v13, %s6201_s28  ;;  %v2374_v12 = vsub.f32 %v8017_v8, %v8189_v14  ;;  %v2397_v24 = vsub.f32 %v8030_v53, %v8145_v5  ;;  %v2982_v53 = vsel %vm479_vm5, %v8106_v23, 0.0  ;;  %v9851_v5 = vld [vmem:[#allocation60_spill] sm:$0xff]  ;;  %v3653_v21 = vrot.slane %v7599_v59, 6  ;;  %v9855_v13 = vld [vmem:[#allocation27_spill] sm:$0xff] }
 0x618   : > { %v2341_v51 = vmul.f32 1.442695, %v2327_v58  ;;  %v2365_v16 = vmul.f32 1.442695, %v2351_v39  ;;  %v2389_v9 = vmul.f32 1.442695, %v2375_v20  ;;  %v2256_v57 = vmax.f32 %v8118_v38, %v9851_v5 }
 0x619   : > { %v2413_v34 = vmul.f32 1.442695, %v2399_v2  ;;  %v2387_v43 = vmul.f32 1.442695, %v2374_v12  ;;  %v2409_v35 = vmul.f32 1.442695, %v2397_v24 }
 0x61a   : > { %5799 = vpow2.f32 %v2341_v51  ;;  %v2288_v6 = vmax.f32 %v2256_v57, %v8167_v28  ;;  %v9853_v58 = vrot.slane %v9852_v49, 2  ;;  %v2976_v23 = vsel %vm479_vm5, %v8100_v46, 0.0  ;;  %v9857_v51 = vld [vmem:[#allocation21_spill] sm:$0xff] }
 0x61b   : > { %5801 = vpow2.f32 %v2365_v16  ;;  %v2973_v38 = vsel %vm479_vm5, %v8102_v56, 0.0  ;;  %v2398_v28 = vsub.f32 %v8086_v52, %v8189_v14  ;;  %v2979_v20 = vsel %vm479_vm5, %v8096_v27, 0.0  ;;  %v9854_v56 = vld [vmem:[#allocation25_spill] sm:$0xff] }
 0x61c   : > { %5803 = vpow2.f32 %v2389_v9  ;;  %2479 = vrot.lane.b32.xlu1 %v5796_v1, %s6205_s6  ;;  %2475 = vrot.lane.b32.xlu2 %v5798_v31, %s6205_s6  ;;  %v8210_v11 = vmax.f32 %v2288_v6, %v2312_v54  ;;  %v3659_v39 = vsel %vm1440_vm4, %v9853_v58, %v3653_v21  ;;  %v5609_v55 = vpack.i.bf16 %v9855_v13, %v9854_v56  ;;  %v9858_v1 = vld [vmem:[#allocation29_spill] sm:$0xff]  ;;  %v9859_v31 = vld [vmem:[#allocation30_spill] sm:$0xff] }
 0x61d   : > { %5805 = vpow2.f32 %v2413_v34  ;;  %v2411_v59 = vmul.f32 1.442695, %v2398_v28  ;;  %v2346_v52 = vsub.f32 %v9846_v37, %v8143_v47  ;;  %v2322_v27 = vsub.f32 %v7972_v45, %v8143_v47 }
 0x61e   : > { %5807 = vpow2.f32 %v2387_v43  ;;  %v2376_v4 = vsub.f32 %v8021_v15, %v8210_v11  ;;  %v8240_v16 = vpack.i.bf16 %v9857_v51, %v9856_v44  ;;  %v2347_v9 = vsub.f32 %v8123_v7, %v8129_v61 }
 0x61f   : > { %5809 = vpow2.f32 %v2409_v35  ;;  %v2355_v34 = vmul.f32 1.442695, %v2346_v52  ;;  %v5614_v12 = vpack.i.bf16 %v9859_v31, %v9858_v1  ;;  %v3809_v37 = vpack.c.bf16 %v9854_v56, %v9854_v56 }
 0x620   : > { %v5800_v3 = vpop.eup %5799  ;;  %v2391_v22 = vmul.f32 1.442695, %v2376_v4  ;;  %v3810_v45 = vpack.c.bf16 %v9855_v13, %v9855_v13  ;;  %v3654_v47 = vrot.slane %v7635_v48, 6  ;;  %v2331_v24 = vmul.f32 1.442695, %v2322_v27 }
 0x621   : > { %v5802_v18 = vpop.eup %5801  ;;  %v2323_v7 = vsub.f32 %v7962_v29, %v8129_v61  ;;  %v3819_v43 = vunpack.c.l.b16 %v3809_v37  ;;  %v9860_v35 = vrot.slane %v7411_v19, 2  ;;  %v3811_v29 = vpack.c.bf16 %v9858_v1, %v9858_v1 }
 0x622   : > { %v5804_v30 = vpop.eup %5803  ;;  %v2423_v50 = vsel %vm7720_vm12, %v5802_v18, 0.0  ;;  %5811 = vpow2.f32 %v2391_v22  ;;  %v2348_v18 = vsub.f32 %v9848_v40, %v8147_v63  ;;  %v3812_v40 = vpack.c.bf16 %v9859_v31, %v9859_v31 }
 0x623   : > { %v5806_v33 = vpop.eup %5805  ;;  %v8199_v17 = vadd.f32 %v5800_v3, %v2423_v50  ;;  %5813 = vpow2.f32 %v2411_v59  ;;  %v2357_v3 = vmul.f32 1.442695, %v2347_v9  ;;  %v3662_v50 = vsel %vm1440_vm4, %v9860_v35, %v3654_v47  ;;  %v9863_v59 = vld [vmem:[#allocation19_spill] sm:$0xff] }
 0x624   : > { %2485 = vrot.lane.b32.xlu1 %v5806_v33, %s6205_s6  ;;  %2453 = vrot.lane.b32.xlu2 %v5804_v30, %s6201_s28  ;;  %v5808_v8 = vpop.eup %5807  ;;  %5815 = vpow2.f32 %v2355_v34  ;;  %v8259_v30 = vunpack.c.l.b16 %v3810_v45  ;;  %v2333_v48 = vmul.f32 1.442695, %v2323_v7  ;;  %v2324_v33 = vsub.f32 %v7970_v36, %v8147_v63 }
 0x625   : > { %v5810_v41 = vpop.eup %5809  ;;  %5817 = vpow2.f32 %v2331_v24  ;;  %v2359_v61 = vmul.f32 1.442695, %v2348_v18  ;;  %v2400_v63 = vsub.f32 %v8035_v60, %v8210_v11  ;;  %v3846_v54 = vunpack.c.l.b16 %v3811_v29 }
 0x626   : > { %5819 = vpow2.f32 %v2357_v3  ;;  %v2335_v36 = vmul.f32 1.442695, %v2324_v33  ;;  %v8279_v4 = vunpack.c.l.b16 %v3812_v40  ;;  %v3655_v21 = vrot.slane %v7590_v10, 6 }
 0x627   : > { %5821 = vpow2.f32 %v2333_v48  ;;  %v3813_v33 = vpack.c.bf16 %v9856_v44, %v9856_v44 }
 0x628   : > { %v5812_v15 = vpop.eup %5811  ;;  %5823 = vpow2.f32 %v2359_v61  ;;  %v8290_v28 = vpack.c.b16 %v8279_v4, %v3846_v54  ;;  %v3814_v61 = vpack.c.bf16 %v9857_v51, %v9857_v51 }
 0x629   : > { %v5814_v46 = vpop.eup %5813  ;;  %5825 = vpow2.f32 %v2335_v36 }
 0x62a   : > { %v5816_v6 = vpop.eup %5815  ;;  %9862 = vst [vmem:[#allocation52_spill] sm:$0xff] %v8290_v28  ;;  %v8336_v54 = vunpack.c.l.b16 %v3814_v61  ;;  %v2350_v61 = vsub.f32 %v9850_v26, %v8189_v14 }
 0x62b   : > { %v5818_v22 = vpop.eup %5817 }
 0x62c   : > { %2451 = vrot.lane.b32.xlu1 %v5808_v8, %s6201_s28  ;;  %2481 = vrot.lane.b32.xlu2 %v5810_v41, %s6205_s6  ;;  %v8271_v41 = vpack.c.b16 %v8259_v30, %v3819_v43  ;;  %v5820_v58 = vpop.eup %5819 }
 0x62e   : > { %9861 = vst [vmem:[#allocation17_spill] sm:$0xff] %v8271_v41 }
 0x641   : > { %2983 = vadd.xlane.f32.xlu0 %v2982_v53 }
 0x655   : > { %3685 = vrot.lane.b32.xlu0 %v3659_v39, %s6202_s29  ;;  %2977 = vadd.xlane.f32.xlu2 %v2976_v23  ;;  %v2418_v39 = vsel %vm7732_vm13, %v5816_v6, 0.0  ;;  %v2415_v23 = vmul.f32 1.442695, %v2400_v63  ;;  %v3873_v63 = vunpack.c.l.b16 %v3813_v33  ;;  %v9881_v33 = vld [vmem:[#allocation38_spill] sm:$0xff] }
 0x656   : > { %2974 = vadd.xlane.f32.xlu1 %v2973_v38 }
 0x657   : > { %5827 = vpow2.f32 %v2415_v23 }
 0x65d   : > { %2455 = vrot.lane.b32.xlu0 %v5812_v15, %s6201_s28  ;;  %2980 = vadd.xlane.f32.xlu2 %v2979_v20  ;;  %v9864_v15 = vrot.slane %v9863_v59, 2  ;;  %v5822_v20 = vpop.eup %5821 }
 0x65e   : > { %v5824_v52 = vpop.eup %5823 }
 0x65f   : > { %v3665_v10 = vsel %vm1440_vm4, %v9864_v15, %v3655_v21  ;;  %v5826_v45 = vpop.eup %5825  ;;  %v2420_v47 = vsel %vm7732_vm13, %v5824_v52, 0.0  ;;  %v8341_v15 = vpack.c.b16 %v8336_v54, %v3873_v63 }
 0x660   : > { %v2428_v35 = vadd.f32 %v5826_v45, %v2420_v47 }
 0x661   : > { %9870 = vst [vmem:[#allocation53_spill] sm:$0xff] %v8341_v15 }
 0x665   : > { %2483 = vrot.lane.b32.xlu0 %v5814_v46, %s6205_s6  ;;  %v2442_v2 = vpop.permute.xlu2 %2441  ;;  %v2419_v46 = vsel %vm7720_vm12, %v5820_v58, 0.0  ;;  %v9868_v58 = vld [vmem:[#allocation32_spill] sm:$0xff] }
 0x666   : > { %v2497_v38 = vsel %vm1108_vm8, %v8162_v32, %v2442_v2  ;;  %v2427_v34 = vadd.f32 %v5822_v20, %v2419_v46  ;;  %v9872_v20 = vld [vmem:[#allocation62_spill] sm:$0xff]  ;;  %v8353_v46 = vpack.c.b16 %v8259_v30, %v8259_v30  ;;  %v3815_v47 = vpack.c.bf16 %v9868_v58, %v9868_v58 }
 0x668   : > { %9873 = vst [vmem:[#allocation55_spill] sm:$0xff] %v8353_v46  ;;  %v4317_v52 = vrot.slane %v8353_v46, 1 }
 0x66d   : > { %3683 = vrot.lane.b32.xlu0 %v9852_v49, %s6202_s29 }
 0x66e   : > { %v2448_v8 = vpop.permute.xlu2 %2447 }
 0x66f   : > { %5610 = vrot.lane.b32.xlu1 %v5609_v55, %s6200_s23  ;;  %v2500_v29 = vsel %vm1108_vm8, %v2428_v35, %v2448_v8 }
 0x675   : > { %5625 = vrot.lane.b32.xlu0 %v8240_v16, %s6200_s23  ;;  %5620 = vrot.lane.b32.xlu2 %v5609_v55, %s6202_s29  ;;  %v2426_v55 = vadd.f32 %v5818_v22, %v2418_v39  ;;  %v9869_v39 = vld [vmem:[#allocation35_spill] sm:$0xff] }
 0x676   : > { %v2476_v27 = vpop.permute.xlu2 %2475  ;;  %v5634_v23 = vpack.i.bf16 %v9869_v39, %v9868_v58 }
 0x677   : > { %5615 = vrot.lane.b32.xlu1 %v5614_v12, %s6200_s23 }
 0x679   : > { %v2446_v53 = vpop.permute.xlu0 %2445 }
 0x67a   : > { %v2499_v7 = vsel %vm1108_vm8, %v2427_v34, %v2446_v53 }
 0x67d   : > { %3716 = vrot.lane.b32.xlu0 %v3662_v50, %s6202_s29  ;;  %5630 = vrot.lane.b32.xlu2 %v5614_v12, %s6202_s29  ;;  %v5828_v50 = vpop.eup %5827 }
 0x67e   : > { %v2474_v57 = vpop.permute.xlu1 %2473  ;;  %v8390_v35 = vpop.permute.xlu2 %2453 }
 0x67f   : > { %3822 = vrot.lane.b32.xlu1 %v8271_v41, %s6203_s30  ;;  %v8287_v60 = vsel %vm1394_vm14, %v2497_v38, %v2474_v57  ;;  %v9866_v57 = vld [vmem:[#allocation61_spill] sm:$0xff] }
 0x680   : > { %v2561_v2 = vpack.c.bf16 %v8287_v60, %v8287_v60  ;;  %v3087_v6 = vsel %vm479_vm5, %v9866_v57, 0  ;;  %v2363_v57 = vmul.f32 1.442695, %v2350_v61 }
 0x681   : > { %v2478_v12 = vpop.permute.xlu0 %2477 }
 0x682   : > { %v2571_v3 = vunpack.c.l.b16 %v2561_v2  ;;  %v8314_v18 = vsel %vm1394_vm14, %v2499_v7, %v2478_v12  ;;  %v9875_v2 = vld [vmem:[#allocation56_spill] sm:$0xff]  ;;  %v9877_v12 = vld [vmem:[#allocation45_spill] sm:$0xff]  ;;  %v3900_v7 = vunpack.c.l.b16 %v3815_v47  ;;  %5829 = vpow2.f32 %v2363_v57 }
 0x683   : > { %9865 = vst [vmem:[#allocation14_spill] sm:$0xff] %v8314_v18  ;;  %v2563_v40 = vpack.c.bf16 %v8314_v18, %v8314_v18  ;;  %v3656_v30 = vrot.slane %v9875_v2, 6  ;;  %v3247_v45 = vsel %vm479_vm5, %v9877_v12, 0 }
 0x685   : > { %3747 = vrot.lane.b32.xlu0 %v3665_v10, %s6202_s29  ;;  %3849 = vrot.lane.b32.xlu2 %v8290_v28, %s6203_s30  ;;  %v2602_v21 = vunpack.c.l.b16 %v2563_v40  ;;  %v9882_v40 = vld [vmem:[#allocation66_spill] sm:$0xff] }
 0x686   : > { %v2444_v32 = vpop.permute.xlu1 %2443 }
 0x687   : > { %v2498_v9 = vsel %vm1108_vm8, %v2426_v55, %v2444_v32  ;;  %3745 = vrot.lane.b32.xlu1 %v9863_v59, %s6202_s29  ;;  %v9666_v55 = vrot.slane %v8271_v41, 2  ;;  %v9874_v32 = vld [vmem:[#allocation33_spill] sm:$0xff] }
 0x688   : > { %v8306_v37 = vsel %vm1394_vm14, %v2498_v9, %v2476_v27  ;;  %v3216_v27 = vsel %vm479_vm5, %v9874_v32, 0  ;;  %v9876_v9 = vrot.slane %v9872_v20, 2  ;;  %v5830_v26 = vpop.eup %5829 }
 0x689   : > { %v2562_v24 = vpack.c.bf16 %v8306_v37, %v8306_v37  ;;  %v2422_v32 = vsel %vm7732_vm13, %v5830_v26, 0.0 }
 0x68a   : > { %v3668_v34 = vsel %vm1440_vm4, %v9876_v9, %v3656_v30 }
 0x68b   : > { %v2572_v43 = vunpack.c.l.b16 %v2562_v24  ;;  %v9878_v24 = vld [vmem:[#allocation63_spill] sm:$0xff] }
 0x68d   : > { %v2573_v48 = vpack.c.b16 %v2572_v43, %v2571_v3  ;;  %3714 = vrot.lane.b32.xlu0 %v7411_v19, %s6202_s29  ;;  %2487 = vrot.lane.b32.xlu2 %v5828_v50, %s6205_s6  ;;  %v2450_v50 = vpop.permute.xlu0 %2449 }
 0x68e   : > { %v2480_v53 = vpop.permute.xlu1 %2479 }
 0x68f   : > { %v8329_v36 = vsel %vm1394_vm14, %v2500_v29, %v2480_v53  ;;  %5640 = vrot.lane.b32.xlu1 %v8240_v16, %s6202_s29  ;;  %5332 = vmatmul.msk.bf16.vlgmr.msra.gmra.mxu0 %vm1403_vm15, %v2573_v48  ;;  %v9871_v16 = vld [vmem:[#allocation64_spill] sm:$0xff]  ;;  %v2482_v29 = vpop.permute.xlu2 %2481  ;;  %v2326_v53 = vsub.f32 %v9882_v40, %v8189_v14  ;;  %v2501_v14 = vsel %vm1108_vm8, %v8179_v42, %v2450_v50 }
 0x690   : > { %9867 = vst [vmem:[#allocation57_spill] sm:$0xff] %v8329_v36  ;;  %v2564_v8 = vpack.c.bf16 %v8329_v36, %v8329_v36  ;;  %3096 = vmatpush.bf16.xpose.msra.mxu0 %v3087_v6  ;;  %v3117_v10 = vsel %vm479_vm5, %v9871_v16, 0  ;;  %v9883_v6 = vld [vmem:[#allocation28_spill] sm:$0xff] }
 0x692   : > { %v2603_v22 = vunpack.c.l.b16 %v2564_v8 }
 0x694   : > { %v2604_v38 = vpack.c.b16 %v2603_v22, %v2602_v21  ;;  %v2339_v21 = vmul.f32 1.442695, %v2326_v53 }
 0x695   : > { %5635 = vrot.lane.b32.xlu0 %v5634_v23, %s6200_s23  ;;  %3776 = vrot.lane.b32.xlu2 %v9872_v20, %s6202_s29 }
 0x696   : > { %5333 = vmatmul.msk.bf16.vlgmr.msrb.gmra.mxu1 %vm1403_vm15, %v2604_v38  ;;  %v8402_v8 = vpop.permute.xlu1 %2485  ;;  %5831 = vpow2.f32 %v2339_v21  ;;  %v9888_v21 = vld [vmem:[#allocation65_spill] sm:$0xff] }
 0x697   : > { %3126 = vmatpush.bf16.xpose.msrb.mxu1 %v3117_v10  ;;  %3876 = vrot.lane.b32.xlu1 %v8341_v15, %s6203_s30 }
 0x69d   : > { %4189 = vrot.lane.b32.xlu0 %v9666_v55, %s6203_s30  ;;  %4318 = vrot.lane.b32.xlu2 %v4317_v52, %s6203_s30  ;;  %v5832_v52 = vpop.eup %5831 }
 0x69e   : > { %v2452_v16 = vpop.permute.xlu1 %2451  ;;  %v2430_v2 = vadd.f32 %v5832_v52, %v2422_v32 }
 0x69f   : > { %5336 = vmatmul.msk.bf16.vlgmr.msrb.gmra.mxu0 %vm479_vm5, %v9852_v49  ;;  %v3816_v49 = vpack.c.bf16 %v9869_v39, %v9869_v39 }
 0x6a0   : > { %3225 = vmatpush.bf16.xpose.msrb.mxu0 %v3216_v27  ;;  %v8416_v27 = vsel %vm1394_vm14, %v2501_v14, %v2482_v29  ;;  %v2502_v9 = vsel %vm1108_vm8, %v2430_v2, %v2452_v16 }
 0x6a1   : > { %v8381_v3 = vunpack.c.l.b16 %v3816_v49  ;;  %9884 = vst [vmem:[#allocation60_spill] sm:$0xff] %v8416_v27  ;;  %v2565_v30 = vpack.c.bf16 %v8416_v27, %v8416_v27 }
 0x6a3   : > { %v8384_v43 = vpack.c.b16 %v8381_v3, %v3900_v7  ;;  %v2352_v7 = vsub.f32 %v9851_v5, %v8210_v11 }
 0x6a5   : > { %3778 = vrot.lane.b32.xlu0 %v3668_v34, %s6202_s29  ;;  %9879 = vst [vmem:[#allocation59_spill] sm:$0xff] %v8384_v43  ;;  %v2367_v5 = vmul.f32 1.442695, %v2352_v7 }
 0x6a6   : > { %5337 = vmatmul.msk.bf16.vlgmr.msra.gmra.mxu1 %vm479_vm5, %v7411_v19  ;;  %v9880_v19 = vld [vmem:[#allocation42_spill] sm:$0xff] }
 0x6a7   : > { %3256 = vmatpush.bf16.xpose.msra.mxu1 %v3247_v45  ;;  %5833 = vpow2.f32 %v2367_v5 }
 0x6ad   : > { %5645 = vrot.lane.b32.xlu0 %v5634_v23, %s6202_s29 }
 0x6af   : > { %5340 = vmatmul.msk.bf16.vlgmr.msra.gmra.mxu0 %vm479_vm5, %v9878_v24 }
 0x6b4   : > { %v8392_v48 = vpop.xlane.xlu0 %2983 }
 0x6b5   : > { %3903 = vrot.lane.b32.xlu0 %v8384_v43, %s6203_s30 }
 0x6b6   : > { %5341 = vmatmul.msk.bf16.vlgmr.msrb.gmra.mxu1 %vm479_vm5, %v9880_v19  ;;  %v2633_v19 = vunpack.c.l.b16 %v2565_v30 }
 0x6bf   : > { %5344 = vmatmul.msk.bf16.vlgmr.msrb.gmra.mxu0 %vm479_vm5, %v9881_v33 }
 0x6c6   : > { %5345 = vmatmul.msk.bf16.vlgmr.msra.gmra.mxu1 %vm479_vm5, %v9883_v6  ;;  %v9887_v6 = vld [vmem:[#allocation67_spill] sm:$0xff] }
 0x6c7   : > { %v3686_v63 = vpop.permute.xlu0 %3685 }
 0x6c8   : > { %v3692_v22 = vsel %vm597_vm2, %v3686_v63, 0  ;;  %v8405_v23 = vpop.xlane.xlu2 %2977  ;;  %v2328_v63 = vsub.f32 %v9887_v6, %v8210_v11 }
 0x6c9   : > { %3700 = vmatpush.bf16.msra.mxu0 %v3692_v22  ;;  %v8424_v42 = vpop.xlane.xlu1 %2974  ;;  %v3147_v22 = vsel %vm479_vm5, %v9888_v21, 0  ;;  %v2503_v21 = vsel %vm1108_vm8, %v8199_v17, %v8390_v35 }
 0x6ca   : > { %v2343_v30 = vmul.f32 1.442695, %v2328_v63 }
 0x6cc   : > { %5835 = vpow2.f32 %v2343_v30 }
 0x6cf   : > { %v8407_v38 = vpop.permute.xlu0 %2455 }
 0x6d0   : > { %v8411_v10 = vpop.xlane.xlu2 %2980 }
 0x6d7   : > { %v2484_v34 = vpop.permute.xlu0 %2483 }
 0x6d8   : > { %v8422_v12 = vsel %vm1394_vm14, %v2502_v9, %v2484_v34  ;;  %v5621_v45 = vpop.permute.xlu2 %5620 }
 0x6d9   : > { %9885 = vst [vmem:[#allocation54_spill] sm:$0xff] %v8422_v12  ;;  %v2566_v47 = vpack.c.bf16 %v8422_v12, %v8422_v12  ;;  %v5623_v49 = vunpack.i.h.bf16 %v5621_v45  ;;  %v5622_v24 = vunpack.i.l.bf16 %v5621_v45 }
 0x6db   : > { %v2634_v50 = vunpack.c.l.b16 %v2566_v47  ;;  %v4166_v61 = vsel %vm449_vm7, %v9855_v13, %v5623_v49  ;;  %v4165_v29 = vsel %vm446_vm6, %v9854_v56, %v5622_v24 }
 0x6dc   : > { %v4174_v40 = vpack.c.bf16 %v4166_v61, %v4166_v61  ;;  %v4173_v53 = vpack.c.bf16 %v4165_v29, %v4165_v29 }
 0x6dd   : > { %v2635_v57 = vpack.c.b16 %v2634_v50, %v2633_v19  ;;  %v5834_v50 = vpop.eup %5833 }
 0x6de   : > { %v4312_v26 = vunpack.c.l.b16 %v4174_v40  ;;  %v4311_v14 = vunpack.c.l.b16 %v4173_v53  ;;  %v9664_v40 = vrot.slane %v8384_v43, 2  ;;  %v5836_v63 = vpop.eup %5835 }
 0x6df   : > { %5334 = vmatmul.msk.bf16.vlgmr.msrb.gmra.mxu2 %vm1403_vm15, %v2635_v57  ;;  %v3684_v16 = vpop.permute.xlu0 %3683 }
 0x6e0   : > { %3156 = vmatpush.bf16.xpose.msrb.mxu2 %v3147_v22  ;;  %3701 = vmatpush.bf16.msra.mxu0 %v3684_v16  ;;  %v8441_v52 = vpop.permute.xlu2 %5630  ;;  %v4313_v2 = vpack.c.b16 %v4312_v26, %v4311_v14  ;;  %v2424_v22 = vsel %vm7732_vm13, %v5834_v50, 0.0  ;;  %v8470_v14 = vsel %vm1394_vm14, %v2503_v21, %v8402_v8  ;;  %v9667_v8 = vrot.slane %v8290_v28, 2 }
 0x6e1   : > { %v5611_v32 = vpop.permute.xlu1 %5610  ;;  %9889 = vst [vmem:[#allocation25_spill] sm:$0xff] %v8470_v14  ;;  %v2432_v35 = vadd.f32 %v5836_v63, %v2424_v22 }
 0x6e2   : > { %v5613_v9 = vunpack.i.h.bf16 %v5611_v32  ;;  %v5612_v34 = vunpack.i.l.bf16 %v5611_v32  ;;  %4314 = vrot.lane.b32.xlu0 %v4313_v2, %s6204_s4  ;;  %v9890_v2 = vld [vmem:[#allocation39_spill] sm:$0xff] }
 0x6e3   : > { %v3278_v17 = vsel %vm479_vm5, %v9890_v2, 0 }
 0x6e4   : > { %v4126_v11 = vsel %vm449_vm7, %v9855_v13, %v5613_v9  ;;  %v4125_v45 = vsel %vm446_vm6, %v9854_v56, %v5612_v34 }
 0x6e5   : > { %v4134_v47 = vpack.c.bf16 %v4126_v11, %v4126_v11  ;;  %v4133_v49 = vpack.c.bf16 %v4125_v45, %v4125_v45  ;;  %v2567_v11 = vpack.c.bf16 %v8470_v14, %v8470_v14 }
 0x6e7   : > { %v4184_v24 = vunpack.c.l.b16 %v4134_v47  ;;  %v4183_v7 = vunpack.c.l.b16 %v4133_v49  ;;  %v5626_v19 = vpop.permute.xlu0 %5625  ;;  %v2504_v47 = vsel %vm1108_vm8, %v2432_v35, %v8407_v38  ;;  %v5633_v49 = vunpack.i.h.bf16 %v8441_v52 }
 0x6e8   : > { %v8450_v61 = vpop.permute.xlu2 %3849  ;;  %v8496_v38 = vpack.c.b16 %v8279_v4, %v8279_v4 }
 0x6e9   : > { %v5616_v29 = vpop.permute.xlu1 %5615  ;;  %v4185_v53 = vpack.c.b16 %v4184_v24, %v4183_v7  ;;  %v5632_v24 = vunpack.i.l.bf16 %v8441_v52  ;;  %v2664_v52 = vunpack.c.l.b16 %v2567_v11  ;;  %v4168_v21 = vsel %vm449_vm7, %v9859_v31, %v5633_v49 }
 0x6ea   : > { %v5618_v57 = vunpack.i.h.bf16 %v5616_v29  ;;  %v5617_v6 = vunpack.i.l.bf16 %v5616_v29  ;;  %4279 = vrot.lane.b32.xlu0 %v9664_v40, %s6203_s30  ;;  %9892 = vst [vmem:[#allocation31_spill] sm:$0xff] %v8496_v38  ;;  %v4348_v35 = vrot.slane %v8496_v38, 1 }
 0x6eb   : > { %4186 = vrot.lane.b32.xlu1 %v4185_v53, %s6200_s23  ;;  %v5627_v53 = vunpack.i.l.bf16 %v5626_v19  ;;  %v4167_v22 = vsel %vm446_vm6, %v9858_v1, %v5632_v24 }
 0x6ec   : > { %v4128_v5 = vsel %vm449_vm7, %v9859_v31, %v5618_v57  ;;  %v4127_v26 = vsel %vm446_vm6, %v9858_v1, %v5617_v6 }
 0x6ed   : > { %v4136_v16 = vpack.c.bf16 %v4128_v5, %v4128_v5  ;;  %v4135_v32 = vpack.c.bf16 %v4127_v26, %v4127_v26  ;;  %v4129_v26 = vsel %vm446_vm6, %v9856_v44, %v5627_v53  ;;  %v3855_v53 = vsel %vm479_vm5, %v8450_v61, 0 }
 0x6ee   : > { %v4137_v11 = vpack.c.bf16 %v4129_v26, %v4129_v26  ;;  %v8532_v61 = vpack.c.b16 %v8381_v3, %v8381_v3 }
 0x6ef   : > { %v4214_v30 = vunpack.c.l.b16 %v4136_v16  ;;  %v4213_v9 = vunpack.c.l.b16 %v4135_v32  ;;  %5338 = vmatmul.msk.bf16.vlgmr.msra.gmra.mxu2 %vm479_vm5, %v9863_v59  ;;  %v3717_v34 = vpop.permute.xlu0 %3716  ;;  %v5628_v59 = vunpack.i.h.bf16 %v5626_v19  ;;  %v9893_v32 = vld [vmem:[#allocation34_spill] sm:$0xff] }
 0x6f0   : > { %3287 = vmatpush.bf16.xpose.msra.mxu2 %v3278_v17  ;;  %v3723_v45 = vsel %vm597_vm2, %v3717_v34, 0  ;;  %v2488_v7 = vpop.permute.xlu2 %2487  ;;  %v3177_v2 = vsel %vm479_vm5, %v9893_v32, 0  ;;  %v9665_v17 = vrot.slane %v8341_v15, 2  ;;  %9896 = vst [vmem:[#allocation29_spill] sm:$0xff] %v8532_v61  ;;  %v4410_v3 = vrot.slane %v8532_v61, 1 }
 0x6f1   : > { %v3823_v50 = vpop.permute.xlu1 %3822  ;;  %v4215_v29 = vpack.c.b16 %v4214_v30, %v4213_v9  ;;  %3731 = vmatpush.bf16.msrb.mxu1 %v3723_v45  ;;  %v8485_v57 = vsel %vm1394_vm14, %v2504_v47, %v2488_v7  ;;  %v4130_v5 = vsel %vm449_vm7, %v9857_v51, %v5628_v59  ;;  %v4176_v30 = vpack.c.bf16 %v4168_v21, %v4168_v21 }
 0x6f2   : > { %9891 = vst [vmem:[#allocation27_spill] sm:$0xff] %v8485_v57  ;;  %v3828_v6 = vsel %vm479_vm5, %v3823_v50, 0  ;;  %v2568_v63 = vpack.c.bf16 %v8485_v57, %v8485_v57  ;;  %v4175_v9 = vpack.c.bf16 %v4167_v22, %v4167_v22  ;;  %v4138_v34 = vpack.c.bf16 %v4130_v5, %v4130_v5 }
 0x6f3   : > { %4219 = vrot.lane.b32.xlu1 %v9667_v8, %s6203_s30  ;;  %4216 = vrot.lane.b32.xlu2 %v4215_v29, %s6200_s23  ;;  %v4343_v47 = vunpack.c.l.b16 %v4176_v30  ;;  %v4243_v7 = vunpack.c.l.b16 %v4137_v11  ;;  %v9894_v29 = vld [vmem:[#allocation37_spill] sm:$0xff]  ;;  %v8528_v22 = vpack.c.b16 %v8336_v54, %v8336_v54 }
 0x6f4   : > { %3837 = vmatpush.bf16.xpose.msrb.mxu0 %v3828_v6  ;;  %v2665_v19 = vunpack.c.l.b16 %v2568_v63  ;;  %v4342_v49 = vunpack.c.l.b16 %v4175_v9  ;;  %v4244_v24 = vunpack.c.l.b16 %v4138_v34 }
 0x6f5   : > { %9895 = vst [vmem:[#allocation21_spill] sm:$0xff] %v8528_v22 }
 0x6f6   : > { %v2666_v4 = vpack.c.b16 %v2665_v19, %v2664_v52  ;;  %v4344_v63 = vpack.c.b16 %v4343_v47, %v4342_v49  ;;  %v4245_v52 = vpack.c.b16 %v4244_v24, %v4243_v7 }
 0x6f7   : > { %v3748_v16 = vpop.permute.xlu0 %3747 }
 0x6f8   : > { %5335 = vmatmul.msk.bf16.vlgmr.msrb.gmra.mxu3 %vm1403_vm15, %v2666_v4  ;;  %v3754_v50 = vsel %vm597_vm2, %v3748_v16, 0 }
 0x6f9   : > { %v3746_v45 = vpop.permute.xlu1 %3745  ;;  %3186 = vmatpush.bf16.xpose.msrb.mxu3 %v3177_v2  ;;  %v4379_v2 = vrot.slane %v8528_v22, 1 }
 0x6fb   : > { %4249 = vrot.lane.b32.xlu1 %v9665_v17, %s6203_s30  ;;  %4349 = vrot.lane.b32.xlu2 %v4348_v35, %s6203_s30  ;;  %v9897_v35 = vld [vmem:[#allocation22_spill] sm:$0xff] }
 0x6fc   : > { %v3309_v54 = vsel %vm479_vm5, %v9897_v35, 0 }
 0x6ff   : > { %5342 = vmatmul.msk.bf16.vlgmr.msrb.gmra.mxu2 %vm479_vm5, %v9894_v29  ;;  %v3715_v59 = vpop.permute.xlu0 %3714 }
 0x700   : > { %3762 = vmatpush.bf16.msrb.mxu2 %v3754_v50  ;;  %3732 = vmatpush.bf16.msrb.mxu1 %v3715_v59  ;;  %v9898_v59 = vld [vmem:[#allocation15_spill] sm:$0xff] }
 0x701   : > { %v5641_v6 = vpop.permute.xlu1 %5640 }
 0x702   : > { %v5643_v19 = vunpack.i.h.bf16 %v5641_v6  ;;  %v5642_v21 = vunpack.i.l.bf16 %v5641_v6 }
 0x703   : > { %4345 = vrot.lane.b32.xlu2 %v4344_v63, %s6204_s4  ;;  %4246 = vrot.lane.b32.xlu1 %v4245_v52, %s6200_s23 }
 0x704   : > { %3864 = vmatpush.bf16.xpose.msra.mxu1 %v3855_v53  ;;  %3763 = vmatpush.bf16.msrb.mxu2 %v3746_v45  ;;  %v4170_v5 = vsel %vm449_vm7, %v9857_v51, %v5643_v19  ;;  %v4169_v26 = vsel %vm446_vm6, %v9856_v44, %v5642_v21  ;;  %v9900_v21 = vld [vmem:[#allocation36_spill] sm:$0xff] }
 0x705   : > { %v4178_v30 = vpack.c.bf16 %v4170_v5, %v4170_v5  ;;  %v4177_v9 = vpack.c.bf16 %v4169_v26, %v4169_v26  ;;  %v3941_v5 = vrot.slane %v9854_v56, 2  ;;  %v3942_v26 = vrot.slane %v9855_v13, 2 }
 0x707   : > { %v5636_v4 = vpop.permute.xlu0 %5635  ;;  %v4374_v24 = vunpack.c.l.b16 %v4178_v30 }
 0x708   : > { %v5638_v16 = vunpack.i.h.bf16 %v5636_v4  ;;  %v5637_v32 = vunpack.i.l.bf16 %v5636_v4  ;;  %5339 = vmatmul.msk.bf16.vlgmr.msra.gmra.mxu3 %vm479_vm5, %v9872_v20  ;;  %v4373_v20 = vunpack.c.l.b16 %v4177_v9  ;;  %v3777_v4 = vpop.permute.xlu2 %3776 }
 0x709   : > { %3318 = vmatpush.bf16.xpose.msra.mxu3 %v3309_v54  ;;  %v3877_v49 = vpop.permute.xlu1 %3876  ;;  %v3929_v54 = vrot.slane %v9855_v13, 6 }
 0x70a   : > { %v4132_v34 = vsel %vm449_vm7, %v9869_v39, %v5638_v16  ;;  %v4131_v11 = vsel %vm446_vm6, %v9868_v58, %v5637_v32  ;;  %v3882_v29 = vsel %vm479_vm5, %v3877_v49, 0  ;;  %v4375_v63 = vpack.c.b16 %v4374_v24, %v4373_v20 }
 0x70b   : > { %v4140_v45 = vpack.c.bf16 %v4132_v34, %v4132_v34  ;;  %v4139_v47 = vpack.c.bf16 %v4131_v11, %v4131_v11  ;;  %4411 = vrot.lane.b32.xlu2 %v4410_v3, %s6203_s30  ;;  %4380 = vrot.lane.b32.xlu1 %v4379_v2, %s6203_s30  ;;  %v3943_v32 = vsel %vm597_vm2, %v3941_v5, %v3942_v26 }
 0x70c   : > { %v3961_v3 = vsel %vm619_vm3, %v3929_v54, %v3943_v32  ;;  %v8582_v49 = vpop.f32.mrf.mxu0 }
 0x70d   : > { %v4274_v7 = vunpack.c.l.b16 %v4140_v45  ;;  %v4273_v50 = vunpack.c.l.b16 %v4139_v47  ;;  %9901 = vst [vmem:[#allocation19_spill] sm:$0xff] %v8582_v49 }
 0x70f   : > { %5346 = vmatmul.msk.bf16.vlgmr.msra.gmra.mxu2 %vm479_vm5, %v9898_v59  ;;  %v8557_v53 = vpop.permute.xlu0 %4189  ;;  %v4275_v6 = vpack.c.b16 %v4274_v7, %v4273_v50  ;;  %v9902_v50 = vld [vmem:[#allocation23_spill] sm:$0xff]  ;;  %v3957_v59 = vsel %vm614_vm1, %v9854_v56, %v3929_v54 }
 0x710   : > { %9899 = vst [vmem:[#allocation30_spill] sm:$0xff] %v8557_v53  ;;  %3891 = vmatpush.bf16.xpose.msra.mxu2 %v3882_v29 }
 0x711   : > { %4276 = vrot.lane.b32.xlu0 %v4275_v6, %s6200_s23 }
 0x713   : > { %3967 = vrot.lane.b32.xlu2 %v9855_v13, %s6199_s18  ;;  %4376 = vrot.lane.b32.xlu1 %v4375_v63, %s6204_s4  ;;  %v8588_v29 = vpop.f32.mrf.mxu1 }
 0x714   : > { %9903 = vst [vmem:[#allocation61_spill] sm:$0xff] %v8588_v29  ;;  %v8592_v6 = vpop.f32.mrf.mxu0 }
 0x715   : > { %9904 = vst [vmem:[#allocation32_spill] sm:$0xff] %v8592_v6 }
 0x717   : > { %v3779_v52 = vpop.permute.xlu0 %3778 }
 0x718   : > { %v3785_v19 = vsel %vm597_vm2, %v3779_v52, 0  ;;  %5343 = vmatmul.msk.bf16.vlgmr.msrb.gmra.mxu3 %vm479_vm5, %v9900_v21  ;;  %v2513_v21 = vsel %vm1403_vm15, %v8287_v60, 0.0 }
 0x719   : > { %3793 = vmatpush.bf16.msrb.mxu3 %v3785_v19 }
 0x71b   : > { %3969 = vrot.lane.b32.xlu2 %v9858_v1, %s6199_s18  ;;  %3965 = vrot.lane.b32.xlu1 %v9854_v56, %s6199_s18  ;;  %v8595_v63 = vpop.f32.mrf.mxu1 }
 0x71c   : > { %9905 = vst [vmem:[#allocation35_spill] sm:$0xff] %v8595_v63  ;;  %v8599_v52 = vpop.f32.mrf.mxu0 }
 0x71d   : > { %3794 = vmatpush.bf16.msrb.mxu3 %v3777_v4  ;;  %v2516_v4 = vsel %vm1403_vm15, %v8306_v37, 0.0 }
 0x71f   : > { %v5646_v16 = vpop.permute.xlu0 %5645 }
 0x720   : > { %v5648_v2 = vunpack.i.h.bf16 %v5646_v16  ;;  %v5647_v35 = vunpack.i.l.bf16 %v5646_v16  ;;  %v3333_v16 = vsel %vm1108_vm8, %v8599_v52, -inf }
 0x722   : > { %v4172_v30 = vsel %vm449_vm7, %v9869_v39, %v5648_v2  ;;  %v4171_v9 = vsel %vm446_vm6, %v9868_v58, %v5647_v35 }
 0x723   : > { %v4180_v34 = vpack.c.bf16 %v4172_v30, %v4172_v30  ;;  %v4179_v11 = vpack.c.bf16 %v4171_v9, %v4171_v9  ;;  %4007 = vrot.lane.b32.xlu1 %v3961_v3, %s6201_s28  ;;  %v8601_v19 = vpop.f32.mrf.mxu1 }
 0x724   : > { %9906 = vst [vmem:[#allocation64_spill] sm:$0xff] %v8601_v19  ;;  %v8605_v5 = vpop.f32.mrf.mxu0  ;;  %v3339_v3 = vsel %vm1108_vm8, %v8601_v19, -inf }
 0x725   : > { %v4405_v45 = vunpack.c.l.b16 %v4180_v34  ;;  %v4404_v47 = vunpack.c.l.b16 %v4179_v11  ;;  %v3336_v2 = vsel %vm1108_vm8, %v8605_v5, -inf }
 0x727   : > { %v3904_v24 = vpop.permute.xlu0 %3903  ;;  %v4406_v20 = vpack.c.b16 %v4405_v45, %v4404_v47 }
 0x728   : > { %v3909_v7 = vsel %vm479_vm5, %v3904_v24, 0  ;;  %5347 = vmatmul.msk.bf16.vlgmr.msra.gmra.mxu3 %vm479_vm5, %v9902_v50 }
 0x729   : > { %4407 = vrot.lane.b32.xlu0 %v4406_v20, %s6204_s4  ;;  %3918 = vmatpush.bf16.xpose.msra.mxu3 %v3909_v7 }
 0x72b   : > { %v8607_v26 = vpop.f32.mrf.mxu1 }
 0x72c   : > { %v3098_v32 = vpop.f32.mrf.mxu0  ;;  %v3342_v60 = vsel %vm1108_vm8, %v8607_v26, -inf }
 0x72d   : > { %v8633_v11 = vsel %vm444_vm9, -1e+30, %v3098_v32 }
 0x72e   : > { %v3365_v45 = vsel %vm1141_vm10, %v8633_v11, -inf }
 0x731   : > { %4005 = vrot.lane.b32.xlu0 %v3957_v59, %s6201_s28 }
 0x733   : > { %v3128_v35 = vpop.f32.mrf.mxu1 }
 0x734   : > { %v8619_v54 = vsel %vm444_vm9, -1e+30, %v3128_v35  ;;  %v8621_v37 = vpop.f32.mrf.mxu0 }
 0x735   : > { %v3371_v30 = vsel %vm1141_vm10, %v8619_v54, -inf  ;;  %v3368_v9 = vsel %vm1141_vm10, %v8621_v37, -inf }
 0x739   : > { %3971 = vrot.lane.b32.xlu0 %v9859_v31, %s6199_s18 }
 0x73b   : > { %v8639_v24 = vpop.f32.mrf.mxu1 }
 0x73c   : > { %v3374_v20 = vsel %vm1141_vm10, %v8639_v24, -inf  ;;  %v3227_v7 = vpop.f32.mrf.mxu0 }
 0x73d   : > { %v8679_v55 = vsel %vm444_vm9, -1e+30, %v3227_v7 }
 0x744   : > { %2514 = vadd.xlane.f32.xlu2 %v2513_v21 }
 0x74c   : > { %2517 = vadd.xlane.f32.xlu2 %v2516_v4  ;;  %v3258_v4 = vpop.f32.mrf.mxu1 }
 0x74d   : > { %3334 = vmax.xlane.f32.xlu1 %v3333_v16  ;;  %v8649_v16 = vpop.f32.mrf.mxu0 }
 0x754   : > { %3337 = vmax.xlane.f32.xlu2 %v3336_v2  ;;  %v3400_v2 = vsel %vm1141_vm10, %v8649_v16, -inf  ;;  %v8657_v35 = vpop.f32.mrf.mxu1 }
 0x755   : > { %3343 = vmax.xlane.f32.xlu1 %v3342_v60 }
 0x75c   : > { %3372 = vmax.xlane.f32.xlu2 %v3371_v30  ;;  %v3406_v30 = vsel %vm1141_vm10, %v8657_v35, -inf }
 0x75d   : > { %3369 = vmax.xlane.f32.xlu1 %v3368_v9 }
 0x762   : > { %v8629_v34 = vpop.f32.mrf.mxu2 }
 0x763   : > { %9907 = vst [vmem:[#allocation62_spill] sm:$0xff] %v8629_v34  ;;  %3340 = vmax.xlane.f32.xlu0 %v3339_v3  ;;  %v8697_v34 = vpop.permute.xlu0 %4314 }
 0x764   : > { %9916 = vst [vmem:[#allocation20_spill] sm:$0xff] %v8697_v34  ;;  %v9934_v34 = vld [vmem:[#allocation68_spill] sm:$0xff] }
 0x76a   : > { %v8637_v47 = vpop.f32.mrf.mxu2 }
 0x76b   : > { %3366 = vmax.xlane.f32.xlu0 %v3365_v45  ;;  %9908 = vst [vmem:[#allocation33_spill] sm:$0xff] %v8637_v47  ;;  %v8701_v47 = vsel %vm444_vm9, -1e+30, %v3258_v4 }
 0x772   : > { %v8643_v50 = vpop.f32.mrf.mxu2 }
 0x773   : > { %3375 = vmax.xlane.f32.xlu0 %v3374_v20  ;;  %v3345_v59 = vsel %vm1108_vm8, %v8643_v50, -inf  ;;  %v8665_v20 = vpop.permute.xlu1 %4186 }
 0x774   : > { %9912 = vst [vmem:[#allocation42_spill] sm:$0xff] %v8665_v20 }
 0x77a   : > { %v8651_v32 = vpop.f32.mrf.mxu2 }
 0x77b   : > { %3346 = vmax.xlane.f32.xlu0 %v3345_v59  ;;  %v8647_v21 = vpop.f32.mrf.mxu3  ;;  %9910 = vst [vmem:[#allocation45_spill] sm:$0xff] %v8651_v32  ;;  %v3348_v40 = vsel %vm1108_vm8, %v8651_v32, -inf }
 0x77c   : > { %9909 = vst [vmem:[#allocation56_spill] sm:$0xff] %v8647_v21 }
 0x782   : > { %v3158_v9 = vpop.f32.mrf.mxu2 }
 0x783   : > { %3401 = vmax.xlane.f32.xlu0 %v3400_v2  ;;  %v8655_v60 = vpop.f32.mrf.mxu3  ;;  %v8685_v8 = vsel %vm444_vm9, -1e+30, %v3158_v9 }
 0x784   : > { %9911 = vst [vmem:[#allocation63_spill] sm:$0xff] %v8655_v60  ;;  %v3397_v60 = vsel %vm1141_vm10, %v8679_v55, -inf }
 0x78a   : > { %v8673_v17 = vpop.f32.mrf.mxu2 }
 0x78b   : > { %3407 = vmax.xlane.f32.xlu0 %v3406_v30  ;;  %v8661_v3 = vpop.f32.mrf.mxu3  ;;  %v8675_v30 = vpop.permute.xlu2 %4318  ;;  %v3380_v49 = vsel %vm1141_vm10, %v8673_v17, -inf }
 0x78c   : > { %v3351_v45 = vsel %vm1108_vm8, %v8661_v3, -inf  ;;  %9914 = vst [vmem:[#allocation66_spill] sm:$0xff] %v8675_v30 }
 0x78d   : > { %3352 = vmax.xlane.f32.xlu1 %v3351_v45  ;;  %v8681_v45 = vpop.permute.xlu1 %4219 }
 0x78e   : > { %9915 = vst [vmem:[#allocation28_spill] sm:$0xff] %v8681_v45 }
 0x792   : > { %v3289_v9 = vpop.f32.mrf.mxu2 }
 0x793   : > { %v8667_v59 = vpop.f32.mrf.mxu3  ;;  %v8703_v29 = vpop.permute.xlu2 %4216  ;;  %v8707_v63 = vsel %vm444_vm9, -1e+30, %v3289_v9 }
 0x794   : > { %9913 = vst [vmem:[#allocation38_spill] sm:$0xff] %v8667_v59  ;;  %v3354_v2 = vsel %vm1108_vm8, %v8667_v59, -inf  ;;  %v3409_v4 = vsel %vm1141_vm10, %v8707_v63, -inf }
 0x795   : > { %3355 = vmax.xlane.f32.xlu2 %v3354_v2  ;;  %3349 = vmax.xlane.f32.xlu1 %v3348_v40  ;;  %v3377_v2 = vsel %vm1141_vm10, %v8685_v8, -inf  ;;  %9917 = vst [vmem:[#allocation67_spill] sm:$0xff] %v8703_v29 }
 0x79a   : > { %v8721_v9 = vpop.f32.mrf.mxu2 }
 0x79b   : > { %v3188_v21 = vpop.f32.mrf.mxu3  ;;  %v8723_v27 = vpop.permute.xlu2 %4349  ;;  %v3412_v6 = vsel %vm1141_vm10, %v8721_v9, -inf }
 0x79c   : > { %v8693_v40 = vsel %vm444_vm9, -1e+30, %v3188_v21  ;;  %v8709_v21 = vpop.permute.xlu1 %4249  ;;  %9921 = vst [vmem:[#allocation37_spill] sm:$0xff] %v8723_v27 }
 0x79d   : > { %v3383_v7 = vsel %vm1141_vm10, %v8693_v40, -inf  ;;  %3398 = vmax.xlane.f32.xlu2 %v3397_v60  ;;  %3378 = vmax.xlane.f32.xlu1 %v3377_v2  ;;  %9918 = vst [vmem:[#allocation65_spill] sm:$0xff] %v8709_v21  ;;  %v3403_v60 = vsel %vm1141_vm10, %v8701_v47, -inf }
 0x79e   : > { %3384 = vmax.xlane.f32.xlu0 %v3383_v7  ;;  %v8719_v7 = vpop.permute.xlu0 %4279 }
 0x79f   : > { %9920 = vst [vmem:[#allocation34_spill] sm:$0xff] %v8719_v7 }
 0x7a3   : > { %v8711_v14 = vpop.f32.mrf.mxu3  ;;  %v8743_v61 = vpop.permute.xlu2 %4345 }
 0x7a4   : > { %9919 = vst [vmem:[#allocation39_spill] sm:$0xff] %v8711_v14  ;;  %v3386_v2 = vsel %vm1141_vm10, %v8711_v14, -inf  ;;  %v8729_v57 = vpop.permute.xlu1 %4246 }
 0x7a5   : > { %3404 = vmax.xlane.f32.xlu2 %v3403_v60  ;;  %3387 = vmax.xlane.f32.xlu1 %v3386_v2  ;;  %9922 = vst [vmem:[#allocation22_spill] sm:$0xff] %v8729_v57 }
 0x7a6   : > { %3410 = vmax.xlane.f32.xlu0 %v3409_v4  ;;  %v8731_v60 = vpop.permute.xlu0 %4276  ;;  %9925 = vst [vmem:[#allocation23_spill] sm:$0xff] %v8743_v61 }
 0x7a7   : > { %9923 = vst [vmem:[#allocation15_spill] sm:$0xff] %v8731_v60 }
 0x7ab   : > { %v3320_v18 = vpop.f32.mrf.mxu3  ;;  %v8749_v22 = vpop.permute.xlu2 %4411 }
 0x7ac   : > { %v8735_v2 = vsel %vm444_vm9, -1e+30, %v3320_v18  ;;  %9928 = vst [vmem:[#allocation74_spill] sm:$0xff] %v8749_v22 }
 0x7ad   : > { %3381 = vmax.xlane.f32.xlu2 %v3380_v49  ;;  %3413 = vmax.xlane.f32.xlu1 %v3412_v6  ;;  %v3415_v12 = vsel %vm1141_vm10, %v8735_v2, -inf  ;;  %v8745_v49 = vpop.permute.xlu1 %4380 }
 0x7ae   : > { %9926 = vst [vmem:[#allocation72_spill] sm:$0xff] %v8745_v49  ;;  %v8747_v6 = vpop.permute.xlu0 %4407 }
 0x7af   : > { %9927 = vst [vmem:[#allocation73_spill] sm:$0xff] %v8747_v6 }
 0x7b3   : > { %v8737_v4 = vpop.f32.mrf.mxu3  ;;  %v8755_v38 = vpop.permute.xlu2 %3967 }
 0x7b4   : > { %9924 = vst [vmem:[#allocation36_spill] sm:$0xff] %v8737_v4  ;;  %v3418_v36 = vsel %vm1141_vm10, %v8737_v4, -inf }
 0x7b5   : > { %3416 = vmax.xlane.f32.xlu2 %v3415_v12  ;;  %3419 = vmax.xlane.f32.xlu0 %v3418_v36  ;;  %v8751_v18 = vpop.permute.xlu1 %4376 }
 0x7b6   : > { %9929 = vst [vmem:[#allocation75_spill] sm:$0xff] %v8751_v18  ;;  %v8753_v46 = vpop.permute.xlu0 %4005 }
 0x7bb   : > { %v8761_v7 = vpop.permute.xlu2 %3969 }
 0x7bc   : > { %9931 = vst [vmem:[#allocation77_spill] sm:$0xff] %v8761_v7  ;;  %v9935_v7 = vld [vmem:[#allocation70_spill] sm:$0xff] }
 0x7bd   : > { %v8757_v60 = vpop.permute.xlu1 %3965 }
 0x7be   : > { %v8759_v43 = vpop.permute.xlu0 %3971 }
 0x7bf   : > { %9930 = vst [vmem:[#allocation76_spill] sm:$0xff] %v8759_v43 }
 0x7c3   : > { %v8765_v59 = vpop.xlane.xlu2 %2514 }
 0x7c4   : > { %9932 = vst [vmem:[#allocation78_spill] sm:$0xff] %v8765_v59 }
 0x7c5   : > { %v8763_v12 = vpop.permute.xlu1 %4007 }
 0x7cb   : > { %v8767_v22 = vpop.xlane.xlu2 %2517 }
 0x7cc   : > { %9933 = vst [vmem:[#allocation79_spill] sm:$0xff] %v8767_v22 }
 0x7cd   : > { %v3335_v6 = vpop.xlane.xlu1 %3334 }
 0x7d3   : > { %v3338_v61 = vpop.xlane.xlu2 %3337 }
 0x7d4   : > { %v3358_v29 = vmax.f32 %v3338_v61, %v9934_v34 }
 0x7d5   : > { %v3344_v15 = vpop.xlane.xlu1 %3343 }
 0x7d6   : > { %v3341_v36 = vpop.xlane.xlu0 %3340  ;;  %v3360_v59 = vmax.f32 %v3344_v15, %v9935_v7  ;;  %v9936_v15 = vld [vmem:[#allocation69_spill] sm:$0xff] }
 0x7db   : > { %v3373_v4 = vpop.xlane.xlu2 %3372 }
 0x7dd   : > { %v3370_v21 = vpop.xlane.xlu1 %3369 }
 0x7de   : > { %v3367_v57 = vpop.xlane.xlu0 %3366  ;;  %v3390_v20 = vmax.f32 %v3358_v29, %v3370_v21 }
 0x7e6   : > { %v3376_v18 = vpop.xlane.xlu0 %3375 }
 0x7e7   : > { %v3392_v30 = vmax.f32 %v3360_v59, %v3376_v18 }
 0x7ee   : > { %v3347_v49 = vpop.xlane.xlu0 %3346 }
 0x7f6   : > { %v3402_v32 = vpop.xlane.xlu0 %3401 }
 0x7f7   : > { %v8770_v28 = vmax.f32 %v3390_v20, %v3402_v32 }
 0x7f9   : > { %v3478_v27 = vsub.f32 %v8621_v37, %v8770_v28 }
 0x7fb   : > { %v3487_v41 = vmul.f32 1.442695, %v3478_v27 }
 0x7fd   : > { %5837 = vpow2.f32 %v3487_v41  ;;  %v8787_v41 = vsel %vm444_vm9, -1e+30, %v9936_v15 }
 0x7fe   : > { %v3408_v45 = vpop.xlane.xlu0 %3407  ;;  %v3357_v59 = vmax.f32 %v3335_v6, %v8787_v41 }
 0x7ff   : > { %v8775_v22 = vmax.f32 %v3392_v30, %v3408_v45 }
 0x800   : > { %v8777_v43 = vpop.xlane.xlu1 %3352  ;;  %v3389_v30 = vmax.f32 %v3357_v59, %v3367_v57  ;;  %v2989_v57 = vsel %vm444_vm9, -1e+30, %v8424_v42 }
 0x801   : > { %v3504_v61 = vsub.f32 %v8657_v35, %v8775_v22  ;;  %v3361_v59 = vmax.f32 %v3347_v49, %v2989_v57 }
 0x803   : > { %v3515_v29 = vmul.f32 1.442695, %v3504_v61  ;;  %v5838_v32 = vpop.eup %5837  ;;  %v9937_v61 = vld [vmem:[#allocation71_spill] sm:$0xff] }
 0x804   : > { %3551 = vrot.lane.b32.xlu0 %v5838_v32, %s6201_s28 }
 0x805   : > { %5839 = vpow2.f32 %v3515_v29  ;;  %v8796_v29 = vsel %vm444_vm9, -1e+30, %v9937_v61 }
 0x806   : > { %v3359_v32 = vmax.f32 %v3341_v36, %v8796_v29  ;;  %v3948_v36 = vrot.slane %v9857_v51, 2 }
 0x808   : > { %v3356_v37 = vpop.xlane.xlu2 %3355  ;;  %v8782_v20 = vpop.xlane.xlu1 %3349 }
 0x809   : > { %v3364_v61 = vmax.f32 %v3356_v37, %v8392_v48 }
 0x80b   : > { %v5840_v27 = vpop.eup %5839 }
 0x80c   : > { %3587 = vrot.lane.b32.xlu0 %v5840_v27, %s6205_s6 }
 0x810   : > { %v3399_v35 = vpop.xlane.xlu2 %3398  ;;  %v3379_v45 = vpop.xlane.xlu1 %3378 }
 0x811   : > { %v8791_v21 = vmax.f32 %v3389_v30, %v3399_v35  ;;  %v3385_v18 = vpop.xlane.xlu0 %3384  ;;  %v3947_v35 = vrot.slane %v9856_v44, 2  ;;  %v3393_v53 = vmax.f32 %v3361_v59, %v3379_v45 }
 0x813   : > { %v3477_v15 = vsub.f32 %v8633_v11, %v8791_v21  ;;  %v3501_v6 = vsub.f32 %v8679_v55, %v8791_v21  ;;  %v3391_v11 = vmax.f32 %v3359_v32, %v3373_v4  ;;  %v3931_v4 = vrot.slane %v9857_v51, 6 }
 0x814   : > { %3973 = vrot.lane.b32.xlu0 %v9856_v44, %s6199_s18 }
 0x815   : > { %v3485_v27 = vmul.f32 1.442695, %v3477_v15  ;;  %v3509_v30 = vmul.f32 1.442695, %v3501_v6  ;;  %v3949_v6 = vsel %vm597_vm2, %v3947_v35, %v3948_v36 }
 0x817   : > { %5841 = vpow2.f32 %v3485_v27 }
 0x818   : > { %v3405_v14 = vpop.xlane.xlu2 %3404  ;;  %v3388_v55 = vpop.xlane.xlu1 %3387  ;;  %5843 = vpow2.f32 %v3509_v30 }
 0x819   : > { %v8811_v25 = vmax.f32 %v3391_v11, %v3405_v14  ;;  %v8813_v42 = vmax.f32 %v3364_v61, %v3388_v55  ;;  %v3411_v49 = vpop.xlane.xlu0 %3410  ;;  %v3963_v14 = vsel %vm619_vm3, %v3931_v4, %v3949_v6  ;;  %v3951_v55 = vrot.slane %v9869_v39, 2 }
 0x81a   : > { %v3425_v15 = vmax.f32 %v3393_v53, %v3411_v49 }
 0x81b   : > { %v3479_v19 = vsub.f32 %v8619_v54, %v8811_v25  ;;  %v3503_v37 = vsub.f32 %v8701_v47, %v8811_v25  ;;  %v3502_v47 = vsub.f32 %v8649_v16, %v8770_v28  ;;  %v3950_v16 = vrot.slane %v9868_v58, 2 }
 0x81c   : > { %v3457_v45 = vsub.f32 %v2989_v57, %v3425_v15  ;;  %4015 = vrot.lane.b32.xlu0 %v3963_v14, %s6201_s28  ;;  %v3433_v59 = vsub.f32 %v8643_v50, %v3425_v15  ;;  %v3481_v57 = vsub.f32 %v8685_v8, %v3425_v15  ;;  %v2991_v50 = vsel %vm444_vm9, -1e+30, %v8411_v10 }
 0x81d   : > { %v3489_v32 = vmul.f32 1.442695, %v3479_v19  ;;  %v3513_v27 = vmul.f32 1.442695, %v3503_v37  ;;  %v5842_v53 = vpop.eup %5841  ;;  %v3511_v36 = vmul.f32 1.442695, %v3502_v47  ;;  %v3363_v61 = vmax.f32 %v8777_v43, %v2991_v50 }
 0x81e   : > { %v5844_v30 = vpop.eup %5843  ;;  %3549 = vrot.lane.b32.xlu2 %v5842_v53, %s6201_s28  ;;  %v3469_v19 = vmul.f32 1.442695, %v3457_v45  ;;  %v3445_v35 = vmul.f32 1.442695, %v3433_v59  ;;  %v3493_v11 = vmul.f32 1.442695, %v3481_v57  ;;  %v3480_v10 = vsub.f32 %v8639_v24, %v8775_v22 }
 0x81f   : > { %5845 = vpow2.f32 %v3489_v32  ;;  %3581 = vrot.lane.b32.xlu1 %v5844_v30, %s6205_s6  ;;  %v3395_v6 = vmax.f32 %v3363_v61, %v3385_v18  ;;  %v3505_v45 = vsub.f32 %v8707_v63, %v3425_v15  ;;  %v3952_v32 = vsel %vm597_vm2, %v3950_v16, %v3951_v55 }
 0x820   : > { %v8827_v54 = vpop.xlane.xlu2 %3381  ;;  %5847 = vpow2.f32 %v3513_v27  ;;  %v3932_v27 = vrot.slane %v9869_v39, 6  ;;  %v3491_v30 = vmul.f32 1.442695, %v3480_v10 }
 0x821   : > { %5849 = vpow2.f32 %v3469_v19  ;;  %v3517_v57 = vmul.f32 1.442695, %v3505_v45 }
 0x822   : > { %5851 = vpow2.f32 %v3445_v35  ;;  %v3964_v19 = vsel %vm619_vm3, %v3932_v27, %v3952_v32 }
 0x823   : > { %5853 = vpow2.f32 %v3511_v36 }
 0x824   : > { %3979 = vrot.lane.b32.xlu0 %v9869_v39, %s6199_s18  ;;  %5855 = vpow2.f32 %v3493_v11 }
 0x825   : > { %v5846_v49 = vpop.eup %5845 }
 0x826   : > { %v5848_v8 = vpop.eup %5847 }
 0x827   : > { %3553 = vrot.lane.b32.xlu1 %v5846_v49, %s6201_s28  ;;  %3585 = vrot.lane.b32.xlu2 %v5848_v8, %s6205_s6  ;;  %v5850_v53 = vpop.eup %5849  ;;  %v3944_v49 = vrot.slane %v9858_v1, 2 }
 0x828   : > { %v3417_v37 = vpop.xlane.xlu2 %3416  ;;  %v5852_v59 = vpop.eup %5851  ;;  %v3529_v63 = vsel %vm7720_vm12, %v5850_v53, 0.0  ;;  %v3989_v53 = vsel %vm446_vm6, %v9854_v56, %v8757_v60  ;;  %v3990_v56 = vsel %vm449_vm7, %v9855_v13, %v8755_v38 }
 0x829   : > { %v3427_v43 = vmax.f32 %v3395_v6, %v3417_v37  ;;  %v5854_v35 = vpop.eup %5853  ;;  %v3945_v6 = vrot.slane %v9859_v31, 2  ;;  %v3930_v37 = vrot.slane %v9859_v31, 6 }
 0x82a   : > { %v5856_v15 = vpop.eup %5855 }
 0x82b   : > { %v3435_v14 = vsub.f32 %v8661_v3, %v3427_v43  ;;  %v3459_v18 = vsub.f32 %v2991_v50, %v3427_v43  ;;  %v8853_v3 = vadd.f32 %v5852_v59, %v3529_v63  ;;  %v3483_v8 = vsub.f32 %v8693_v40, %v3427_v43 }
 0x82c   : > { %4019 = vrot.lane.b32.xlu0 %v3964_v19, %s6201_s28  ;;  %v3946_v10 = vsel %vm597_vm2, %v3944_v49, %v3945_v6  ;;  %v3959_v40 = vsel %vm614_vm1, %v9856_v44, %v3931_v4  ;;  %v4029_v59 = vmul.f32 %v8753_v46, %v3989_v53  ;;  %v3960_v19 = vsel %vm614_vm1, %v9868_v58, %v3932_v27 }
 0x82d   : > { %v3449_v47 = vmul.f32 1.442695, %v3435_v14  ;;  %v3473_v24 = vmul.f32 1.442695, %v3459_v18  ;;  %v3497_v45 = vmul.f32 1.442695, %v3483_v8  ;;  %v3962_v32 = vsel %vm619_vm3, %v3930_v37, %v3946_v10 }
 0x82e   : > { %v3958_v14 = vsel %vm614_vm1, %v9858_v1, %v3930_v37  ;;  %vm5029_vm1 = vcmask 195584  }
 0x82f   : > { %5857 = vpow2.f32 %v3449_v47  ;;  %3583 = vrot.lane.b32.xlu2 %v5854_v35, %s6205_s6  ;;  %3557 = vrot.lane.b32.xlu1 %v5856_v15, %s6201_s28  ;;  %v3507_v47 = vsub.f32 %v8735_v2, %v3427_v43  ;;  %v3430_v35 = vsub.f32 %v8605_v5, %v8770_v28  ;;  %v3453_v15 = vsub.f32 %v8787_v41, %v8791_v21  ;;  %v3420_v5 = vpop.xlane.xlu0 %3419 }
 0x830   : > { %5859 = vpow2.f32 %v3473_v24  ;;  %v3414_v24 = vpop.xlane.xlu1 %3413  ;;  %v3455_v41 = vsub.f32 %v8796_v29, %v8811_v25 }
 0x831   : > { %5861 = vpow2.f32 %v3491_v30  ;;  %v3362_v30 = vmax.f32 %v8782_v20, %v8405_v23  ;;  %v3521_v46 = vmul.f32 1.442695, %v3507_v47  ;;  %v4030_v20 = vmul.f32 %v8763_v12, %v3990_v56 }
 0x832   : > { %5863 = vpow2.f32 %v3517_v57  ;;  %v3454_v57 = vsub.f32 %v9934_v34, %v8770_v28  ;;  %v3432_v34 = vsub.f32 %v8607_v26, %v8775_v22  ;;  %v3465_v8 = vmul.f32 1.442695, %v3455_v41 }
 0x833   : > { %5865 = vpow2.f32 %v3497_v45  ;;  %v3394_v4 = vmax.f32 %v3362_v30, %v8827_v54  ;;  %v8938_v47 = vmax.f32 %v8813_v42, %v3420_v5 }
 0x834   : > { %5867 = vpow2.f32 %v3521_v46  ;;  %v3463_v63 = vmul.f32 1.442695, %v3454_v57 }
 0x835   : > { %v5858_v50 = vpop.eup %5857  ;;  %v8895_v60 = vmax.f32 %v3394_v4, %v3414_v24  ;;  %v3460_v33 = vsub.f32 %v8392_v48, %v8938_v47 }
 0x836   : > { %v5860_v36 = vpop.eup %5859 }
 0x837   : > { %v5862_v61 = vpop.eup %5861  ;;  %v3531_v11 = vsel %vm7720_vm12, %v5860_v36, 0.0  ;;  %v3482_v54 = vsub.f32 %v8673_v17, %v8895_v60  ;;  %v3506_v13 = vsub.f32 %v8721_v9, %v8895_v60  ;;  %v3456_v9 = vsub.f32 %v9935_v7, %v8775_v22 }
 0x838   : > { %v5864_v16 = vpop.eup %5863  ;;  %v8859_v55 = vadd.f32 %v5858_v50, %v3531_v11  ;;  %3555 = vrot.lane.b32.xlu2 %v5862_v61, %s6201_s28  ;;  %v3439_v50 = vmul.f32 1.442695, %v3430_v35  ;;  %v3429_v36 = vsub.f32 %v8599_v52, %v8791_v21  ;;  %v3461_v61 = vmul.f32 1.442695, %v3453_v15  ;;  %v9938_v52 = vld [vmem:[#allocation64_spill] sm:$0xff] }
 0x839   : > { %3589 = vrot.lane.b32.xlu1 %v5864_v16, %s6205_s6  ;;  %v5866_v18 = vpop.eup %5865  ;;  %v3495_v2 = vmul.f32 1.442695, %v3482_v54  ;;  %v3519_v38 = vmul.f32 1.442695, %v3506_v13  ;;  %v3467_v11 = vmul.f32 1.442695, %v3456_v9  ;;  %v3431_v21 = vsub.f32 %v9938_v52, %v8811_v25 }
 0x83a   : > { %v5868_v43 = vpop.eup %5867  ;;  %v3437_v28 = vmul.f32 1.442695, %v3429_v36  ;;  %v3443_v7 = vmul.f32 1.442695, %v3432_v34  ;;  %v9942_v34 = vld [vmem:[#allocation76_spill] sm:$0xff] }
 0x83b   : > { %5869 = vpow2.f32 %v3495_v2 }
 0x83c   : > { %5871 = vpow2.f32 %v3519_v38 }
 0x83d   : > { %5873 = vpow2.f32 %v3463_v63 }
 0x83e   : > { %5875 = vpow2.f32 %v3439_v50  ;;  %v9941_v50 = vld [vmem:[#allocation30_spill] sm:$0xff] }
 0x83f   : > { %5877 = vpow2.f32 %v3461_v61  ;;  %v4195_v36 = vsel %vm479_vm5, %v9941_v50, 0 }
 0x840   : > { %4011 = vrot.lane.b32.xlu2 %v3962_v32, %s6201_s28  ;;  %5879 = vpow2.f32 %v3467_v11  ;;  %v3992_v11 = vsel %vm449_vm7, %v9859_v31, %v9942_v34  ;;  %v9943_v31 = vld [vmem:[#allocation36_spill] sm:$0xff] }
 0x841   : > { %4009 = vrot.lane.b32.xlu1 %v3958_v14, %s6201_s28  ;;  %v5870_v12 = vpop.eup %5869  ;;  %5881 = vpow2.f32 %v3437_v28  ;;  %v3441_v14 = vmul.f32 1.442695, %v3431_v21 }
 0x842   : > { %v5872_v17 = vpop.eup %5871  ;;  %5883 = vpow2.f32 %v3443_v7 }
 0x843   : > { %v5874_v49 = vpop.eup %5873  ;;  %5885 = vpow2.f32 %v3465_v8 }
 0x844   : > { %v5876_v6 = vpop.eup %5875  ;;  %v3526_v22 = vsel %vm7732_vm13, %v5874_v49, 0.0  ;;  %5887 = vpow2.f32 %v3441_v14 }
 0x845   : > { %v5878_v26 = vpop.eup %5877 }
 0x846   : > { %v5880_v32 = vpop.eup %5879 }
 0x847   : > { %v5882_v29 = vpop.eup %5881  ;;  %v3528_v4 = vsel %vm7732_vm13, %v5880_v32, 0.0 }
 0x848   : > { %4013 = vrot.lane.b32.xlu2 %v3959_v40, %s6201_s28  ;;  %v3525_v40 = vsel %vm7720_vm12, %v5878_v26, 0.0 }
 0x849   : > { %3561 = vrot.lane.b32.xlu1 %v5866_v18, %s6201_s28  ;;  %v3534_v18 = vadd.f32 %v5876_v6, %v3526_v22  ;;  %v3533_v30 = vadd.f32 %v5882_v29, %v3525_v40  ;;  %v3508_v6 = vsub.f32 %v9943_v31, %v8938_v47 }
 0x850   : > { %4045 = vrot.lane.b32.xlu2 %v4029_v59, %s6199_s18  ;;  %v5884_v59 = vpop.eup %5883 }
 0x851   : > { %3975 = vrot.lane.b32.xlu1 %v9857_v51, %s6199_s18  ;;  %v5886_v54 = vpop.eup %5885  ;;  %v3536_v2 = vadd.f32 %v5884_v59, %v3528_v4  ;;  %v9945_v59 = vld [vmem:[#allocation66_spill] sm:$0xff] }
 0x852   : > { %v5888_v42 = vpop.eup %5887  ;;  %v3527_v35 = vsel %vm7720_vm12, %v5886_v54, 0.0 }
 0x853   : > { %v3535_v9 = vadd.f32 %v5888_v42, %v3527_v35  ;;  %v9949_v42 = vld [vmem:[#allocation52_spill] sm:$0xff] }
 0x858   : > { %4047 = vrot.lane.b32.xlu2 %v4030_v20, %s6199_s18 }
 0x859   : > { %3977 = vrot.lane.b32.xlu1 %v9868_v58, %s6199_s18 }
 0x860   : > { %3593 = vrot.lane.b32.xlu2 %v5868_v43, %s6205_s6 }
 0x861   : > { %4017 = vrot.lane.b32.xlu1 %v3960_v19, %s6201_s28 }
 0x868   : > { %3559 = vrot.lane.b32.xlu2 %v5870_v12, %s6201_s28  ;;  %v9940_v12 = vld [vmem:[#allocation39_spill] sm:$0xff] }
 0x870   : > { %3591 = vrot.lane.b32.xlu2 %v5872_v17, %s6205_s6  ;;  %v3484_v17 = vsub.f32 %v9940_v12, %v8938_v47  ;;  %v3458_v12 = vsub.f32 %v8405_v23, %v8895_v60 }
 0x872   : > { %v3499_v61 = vmul.f32 1.442695, %v3484_v17  ;;  %v9950_v17 = vld [vmem:[#allocation45_spill] sm:$0xff] }
 0x874   : > { %5889 = vpow2.f32 %v3499_v61 }
 0x876   : > { %v3552_v45 = vpop.permute.xlu0 %3551 }
 0x877   : > { %v3606_v53 = vsel %vm1108_vm8, %v3534_v18, %v3552_v45  ;;  %v3523_v45 = vmul.f32 1.442695, %v3508_v6  ;;  %v9944_v18 = vld [vmem:[#allocation28_spill] sm:$0xff] }
 0x878   : > { %v3550_v27 = vpop.permute.xlu2 %3549  ;;  %v4225_v29 = vsel %vm479_vm5, %v9944_v18, 0  ;;  %v9955_v18 = vld [vmem:[#allocation23_spill] sm:$0xff] }
 0x879   : > { %v3605_v24 = vsel %vm1108_vm8, %v3533_v30, %v3550_v27  ;;  %5891 = vpow2.f32 %v3523_v45  ;;  %v4324_v30 = vsel %vm479_vm5, %v9945_v59, 0 }
 0x87e   : > { %v3588_v13 = vpop.permute.xlu0 %3587 }
 0x881   : > { %v3586_v16 = vpop.permute.xlu2 %3585 }
 0x886   : > { %v3974_v8 = vpop.permute.xlu0 %3973 }
 0x889   : > { %v3584_v10 = vpop.permute.xlu2 %3583 }
 0x88a   : > { %v8933_v25 = vsel %vm1394_vm14, %v3606_v53, %v3584_v10  ;;  %v5890_v53 = vpop.eup %5889 }
 0x88b   : > { %v3670_v56 = vpack.c.bf16 %v8933_v25, %v8933_v25 }
 0x88d   : > { %v3680_v57 = vunpack.c.l.b16 %v3670_v56  ;;  %v5892_v56 = vpop.eup %5891 }
 0x891   : > { %v3582_v20 = vpop.permute.xlu1 %3581 }
 0x892   : > { %v3556_v46 = vpop.permute.xlu2 %3555  ;;  %v8944_v43 = vsel %vm1394_vm14, %v3605_v24, %v3582_v20  ;;  %v9946_v24 = vld [vmem:[#allocation17_spill] sm:$0xff] }
 0x893   : > { %v3669_v19 = vpack.c.bf16 %v8944_v43, %v8944_v43  ;;  %v3608_v38 = vsel %vm1108_vm8, %v3536_v2, %v3556_v46  ;;  %v9947_v20 = vld [vmem:[#allocation77_spill] sm:$0xff] }
 0x894   : > { %v8954_v63 = vsel %vm1394_vm14, %v3608_v38, %v3588_v13  ;;  %v3991_v54 = vsel %vm446_vm6, %v9858_v1, %v9947_v20  ;;  %v9951_v1 = vld [vmem:[#allocation42_spill] sm:$0xff] }
 0x895   : > { %v3679_v27 = vunpack.c.l.b16 %v3669_v19  ;;  %v3672_v41 = vpack.c.bf16 %v8954_v63, %v8954_v63  ;;  %v9948_v19 = vld [vmem:[#allocation37_spill] sm:$0xff] }
 0x896   : > { %v4355_v13 = vsel %vm479_vm5, %v9948_v19, 0  ;;  %v9958_v19 = vld [vmem:[#allocation22_spill] sm:$0xff] }
 0x897   : > { %v3681_v15 = vpack.c.b16 %v3680_v57, %v3679_v27  ;;  %v3711_v22 = vunpack.c.l.b16 %v3672_v41  ;;  %v3434_v57 = vsub.f32 %v9950_v17, %v8895_v60  ;;  %v3471_v27 = vmul.f32 1.442695, %v3458_v12  ;;  %v9960_v12 = vld [vmem:[#allocation38_spill] sm:$0xff] }
 0x898   : > { %v3436_v17 = vsub.f32 %v9960_v12, %v8938_v47 }
 0x899   : > { %5348 = vmatmul.msk.bf16.vlgmr.msra.gmra.mxu0 %vm1403_vm15, %v3681_v15  ;;  %v3554_v5 = vpop.permute.xlu1 %3553  ;;  %5893 = vpow2.f32 %v3471_v27 }
 0x89a   : > { %v4012_v28 = vpop.permute.xlu2 %4011  ;;  %4204 = vmatpush.bf16.xpose.msra.mxu0 %v4195_v36  ;;  %v3607_v7 = vsel %vm1108_vm8, %v3535_v9, %v3554_v5  ;;  %v3447_v9 = vmul.f32 1.442695, %v3434_v57  ;;  %v3451_v57 = vmul.f32 1.442695, %v3436_v17 }
 0x89b   : > { %v4032_v49 = vmul.f32 %v4012_v28, %v3992_v11  ;;  %v8967_v52 = vsel %vm1394_vm14, %v3607_v7, %v3586_v16  ;;  %v3993_v16 = vsel %vm446_vm6, %v9856_v44, %v3974_v8  ;;  %v4016_v11 = vpop.permute.xlu0 %4015  ;;  %v9952_v28 = vld [vmem:[#allocation67_spill] sm:$0xff]  ;;  %v9953_v8 = vld [vmem:[#allocation20_spill] sm:$0xff] }
 0x89c   : > { %v3671_v21 = vpack.c.bf16 %v8967_v52, %v8967_v52  ;;  %5895 = vpow2.f32 %v3447_v9 }
 0x89d   : > { %4051 = vrot.lane.b32.xlu2 %v4032_v49, %s6199_s18 }
 0x89e   : > { %v3710_v26 = vunpack.c.l.b16 %v3671_v21 }
 0x89f   : > { %v5894_v23 = vpop.eup %5893 }
 0x8a0   : > { %v3712_v10 = vpack.c.b16 %v3711_v22, %v3710_v26 }
 0x8a1   : > { %v3558_v14 = vpop.permute.xlu1 %3557 }
 0x8a2   : > { %v4014_v32 = vpop.permute.xlu2 %4013  ;;  %5349 = vmatmul.msk.bf16.vlgmr.msrb.gmra.mxu1 %vm1403_vm15, %v3712_v10  ;;  %v5896_v41 = vpop.eup %5895  ;;  %v3609_v49 = vsel %vm1108_vm8, %v8853_v3, %v3558_v14 }
 0x8a3   : > { %v4033_v40 = vmul.f32 %v4014_v32, %v3993_v16  ;;  %4234 = vmatpush.bf16.xpose.msrb.mxu1 %v4225_v29  ;;  %v9954_v16 = vld [vmem:[#allocation65_spill] sm:$0xff] }
 0x8a4   : > { %v4255_v14 = vsel %vm479_vm5, %v9954_v16, 0 }
 0x8a5   : > { %4053 = vrot.lane.b32.xlu0 %v4033_v40, %s6199_s18  ;;  %3563 = vrot.lane.b32.xlu2 %v5890_v53, %s6201_s28  ;;  %v3980_v40 = vpop.permute.xlu0 %3979 }
 0x8a9   : > { %5352 = vmatmul.msk.bf16.vlgmr.msrb.gmra.mxu0 %vm479_vm5, %v9946_v24 }
 0x8aa   : > { %v4046_v4 = vpop.permute.xlu2 %4045  ;;  %4333 = vmatpush.bf16.xpose.msrb.mxu0 %v4324_v30  ;;  %v9956_v30 = vld [vmem:[#allocation72_spill] sm:$0xff] }
 0x8ab   : > { %v3590_v44 = vpop.permute.xlu1 %3589  ;;  %v4069_v26 = vsel %vm479_vm5, %v4046_v4, 0.0  ;;  %v4386_v4 = vsel %vm479_vm5, %v9956_v30, 0  ;;  %v9970_v30 = vld [vmem:[#allocation73_spill] sm:$0xff] }
 0x8ac   : > { %v9018_v7 = vsel %vm1394_vm14, %v3609_v49, %v3590_v44  ;;  %v9957_v44 = vld [vmem:[#allocation53_spill] sm:$0xff] }
 0x8ad   : > { %3595 = vrot.lane.b32.xlu0 %v5892_v56, %s6205_s6  ;;  %v4020_v59 = vpop.permute.xlu0 %4019  ;;  %v3996_v56 = vsel %vm449_vm7, %v9869_v39, %v3980_v40  ;;  %v9959_v39 = vld [vmem:[#allocation75_spill] sm:$0xff] }
 0x8ae   : > { %v4036_v20 = vmul.f32 %v4020_v59, %v3996_v56 }
 0x8b2   : > { %v4048_v46 = vpop.permute.xlu2 %4047  ;;  %5353 = vmatmul.msk.bf16.vlgmr.msra.gmra.mxu1 %vm479_vm5, %v9949_v42 }
 0x8b3   : > { %v4010_v2 = vpop.permute.xlu1 %4009  ;;  %4364 = vmatpush.bf16.xpose.msra.mxu1 %v4355_v13  ;;  %v4072_v29 = vsel %vm479_vm5, %v4048_v46, 0.0 }
 0x8b4   : > { %v4031_v38 = vmul.f32 %v4010_v2, %v3991_v54 }
 0x8b6   : > { %4049 = vrot.lane.b32.xlu1 %v4031_v38, %s6199_s18 }
 0x8b9   : > { %5356 = vmatmul.msk.bf16.vlgmr.msra.gmra.mxu0 %vm479_vm5, %v9951_v1 }
 0x8ba   : > { %v3594_v35 = vpop.permute.xlu2 %3593 }
 0x8bb   : > { %v3562_v15 = vpop.permute.xlu1 %3561 }
 0x8bc   : > { %v3611_v50 = vsel %vm1108_vm8, %v8859_v55, %v3562_v15  ;;  %v3530_v55 = vsel %vm7732_vm13, %v5894_v23, 0.0 }
 0x8bd   : > { %v9005_v36 = vsel %vm1394_vm14, %v3611_v50, %v3594_v35  ;;  %v3538_v21 = vadd.f32 %v5896_v41, %v3530_v55 }
 0x8be   : > { %v3675_v23 = vpack.c.bf16 %v9005_v36, %v9005_v36 }
 0x8c2   : > { %v3560_v61 = vpop.permute.xlu2 %3559  ;;  %5357 = vmatmul.msk.bf16.vlgmr.msrb.gmra.mxu1 %vm479_vm5, %v9952_v28 }
 0x8c3   : > { %v3976_v34 = vpop.permute.xlu1 %3975  ;;  %v3610_v31 = vsel %vm1108_vm8, %v3538_v21, %v3560_v61 }
 0x8c4   : > { %v3994_v60 = vsel %vm449_vm7, %v9857_v51, %v3976_v34  ;;  %v3673_v51 = vpack.c.bf16 %v9018_v7, %v9018_v7 }
 0x8c5   : > { %v4034_v5 = vmul.f32 %v4016_v11, %v3994_v60  ;;  %v3772_v11 = vunpack.c.l.b16 %v3675_v23 }
 0x8c6   : > { %v3741_v10 = vunpack.c.l.b16 %v3673_v51  ;;  %v9963_v51 = vld [vmem:[#allocation74_spill] sm:$0xff] }
 0x8c7   : > { %4055 = vrot.lane.b32.xlu1 %v4034_v5, %s6199_s18  ;;  %v9962_v5 = vld [vmem:[#allocation34_spill] sm:$0xff] }
 0x8c8   : > { %v4285_v41 = vsel %vm479_vm5, %v9962_v5, 0 }
 0x8c9   : > { %5360 = vmatmul.msk.bf16.vlgmr.msrb.gmra.mxu0 %vm479_vm5, %v9953_v8 }
 0x8ca   : > { %v3592_v6 = vpop.permute.xlu2 %3591 }
 0x8cb   : > { %v9026_v22 = vsel %vm1394_vm14, %v3610_v31, %v3592_v6  ;;  %v3978_v53 = vpop.permute.xlu1 %3977  ;;  %v4417_v31 = vsel %vm479_vm5, %v9963_v51, 0  ;;  %v9964_v6 = vld [vmem:[#allocation59_spill] sm:$0xff] }
 0x8cc   : > { %v3674_v3 = vpack.c.bf16 %v9026_v22, %v9026_v22  ;;  %v3995_v46 = vsel %vm446_vm6, %v9868_v58, %v3978_v53  ;;  %v3475_v58 = vmul.f32 1.442695, %v3460_v33  ;;  %v9969_v53 = vrot.slane %v9949_v42, 2 }
 0x8ce   : > { %v3742_v45 = vunpack.c.l.b16 %v3674_v3  ;;  %4070 = vadd.xlane.f32.xlu2 %v4069_v26  ;;  %5897 = vpow2.f32 %v3475_v58 }
 0x8cf   : > { %5899 = vpow2.f32 %v3451_v57 }
 0x8d0   : > { %v3743_v32 = vpack.c.b16 %v3742_v45, %v3741_v10  ;;  %v9965_v10 = vld [vmem:[#allocation15_spill] sm:$0xff] }
 0x8d2   : > { %5350 = vmatmul.msk.bf16.vlgmr.msrb.gmra.mxu2 %vm1403_vm15, %v3743_v32  ;;  %5361 = vmatmul.msk.bf16.vlgmr.msra.gmra.mxu1 %vm479_vm5, %v9955_v18 }
 0x8d3   : > { %4264 = vmatpush.bf16.xpose.msrb.mxu2 %v4255_v14  ;;  %v4018_v54 = vpop.permute.xlu1 %4017  ;;  %v9967_v14 = vld [vmem:[#allocation31_spill] sm:$0xff] }
 0x8d4   : > { %v4035_v2 = vmul.f32 %v4018_v54, %v3995_v46  ;;  %v5898_v27 = vpop.eup %5897  ;;  %v4762_v18 = vrot.slane %v9967_v14, 6  ;;  %v9972_v54 = vld [vmem:[#allocation55_spill] sm:$0xff] }
 0x8d5   : > { %v5900_v1 = vpop.eup %5899  ;;  %v3532_v15 = vsel %vm7732_vm13, %v5898_v27, 0.0  ;;  %v4761_v46 = vrot.slane %v9972_v54, 6 }
 0x8d6   : > { %v3540_v50 = vadd.f32 %v5900_v1, %v3532_v15  ;;  %v4770_v59 = vsel %vm1440_vm4, %v9969_v53, %v4762_v18 }
 0x8d7   : > { %4073 = vadd.xlane.f32.xlu0 %v4072_v29 }
 0x8e2   : > { %5354 = vmatmul.msk.bf16.vlgmr.msra.gmra.mxu2 %vm479_vm5, %v9957_v44 }
 0x8e3   : > { %4395 = vmatpush.bf16.xpose.msra.mxu2 %v4386_v4 }
 0x8e6   : > { %4059 = vrot.lane.b32.xlu2 %v4036_v20, %s6199_s18 }
 0x8eb   : > { %4057 = vrot.lane.b32.xlu0 %v4035_v2, %s6199_s18  ;;  %s6133_s18 = sshra.s32 %s5148_s27, 4  ;;  %s6134_s18 = int_to_ptr.hbm [resolvable:$true] %s6133_s18 }
 0x8ec   : > { %s6135_s23 = scalar_lea.hbm %s6134_s18, 64  ;;  %p6140_p11 = scmp.lt.s32.totalorder %s6134_s18, %s9611_s3 }
 0x8ed   : > { %p6136_p1 = scmp.ne.s32.totalorder %s6134_s18, %s6135_s23 }
 0x8ef   : > { %p6137_p4 = pnand %p6136_p1, %p6298_p5 }
 0x8f1   : > { %p6138_p8 = pneg %p6137_p4 }
 0x8f2   : > { %5358 = vmatmul.msk.bf16.vlgmr.msrb.gmra.mxu2 %vm479_vm5, %v9958_v19  ;;  %v9974_v19 = vrot.slane %v9946_v24, 2 }
 0x8f7   : > { %v4052_v13 = vpop.permute.xlu2 %4051 }
 0x8f8   : > { %v4078_v38 = vsel %vm479_vm5, %v4052_v13, 0.0  ;;  %v4767_v13 = vsel %vm1440_vm4, %v9974_v19, %v4761_v46 }
 0x8f9   : > { %4079 = vadd.xlane.f32.xlu1 %v4078_v38 }
 0x8ff   : > { %v3564_v9 = vpop.permute.xlu2 %3563 }
 0x900   : > { %v3612_v48 = vsel %vm1108_vm8, %v3540_v50, %v3564_v9 }
 0x902   : > { %5362 = vmatmul.msk.bf16.vlgmr.msra.gmra.mxu2 %vm479_vm5, %v9959_v39 }
 0x916   : > { %v9085_v16 = vpop.f32.mrf.mxu0 }
 0x917   : > { %v4054_v35 = vpop.permute.xlu0 %4053  ;;  %9966 = vst [vmem:[#allocation70_spill] sm:$0xff] %v9085_v16 }
 0x918   : > { %v4081_v21 = vsel %vm479_vm5, %v4054_v35, 0.0 }
 0x91e   : > { %v9098_v4 = vpop.f32.mrf.mxu0 }
 0x91f   : > { %v3596_v61 = vpop.permute.xlu0 %3595  ;;  %v9088_v29 = vpop.f32.mrf.mxu1  ;;  %9971 = vst [vmem:[#allocation71_spill] sm:$0xff] %v9098_v4 }
 0x920   : > { %v9064_v47 = vsel %vm1394_vm14, %v3612_v48, %v3596_v61  ;;  %9968 = vst [vmem:[#allocation69_spill] sm:$0xff] %v9088_v29 }
 0x921   : > { %9961 = vst [vmem:[#allocation68_spill] sm:$0xff] %v9064_v47  ;;  %v3676_v34 = vpack.c.bf16 %v9064_v47, %v9064_v47 }
 0x923   : > { %v3773_v60 = vunpack.c.l.b16 %v3676_v34 }
 0x925   : > { %v3774_v28 = vpack.c.b16 %v3773_v60, %v3772_v11 }
 0x926   : > { %v9107_v38 = vpop.f32.mrf.mxu0 }
 0x927   : > { %5351 = vmatmul.msk.bf16.vlgmr.msrb.gmra.mxu3 %vm1403_vm15, %v3774_v28  ;;  %v9102_v2 = vpop.f32.mrf.mxu1  ;;  %v4441_v39 = vsel %vm1108_vm8, %v9107_v38, -inf }
 0x928   : > { %v4050_v55 = vpop.permute.xlu1 %4049  ;;  %4294 = vmatpush.bf16.xpose.msrb.mxu3 %v4285_v41  ;;  %9973 = vst [vmem:[#allocation64_spill] sm:$0xff] %v9102_v2 }
 0x929   : > { %v4075_v49 = vsel %vm479_vm5, %v4050_v55, 0.0 }
 0x92a   : > { %4076 = vadd.xlane.f32.xlu2 %v4075_v49 }
 0x92e   : > { %v9114_v12 = vpop.f32.mrf.mxu0 }
 0x92f   : > { %v9112_v33 = vpop.f32.mrf.mxu1  ;;  %v4444_v34 = vsel %vm1108_vm8, %v9114_v12, -inf }
 0x930   : > { %v4447_v17 = vsel %vm1108_vm8, %v9112_v33, -inf }
 0x932   : > { %4082 = vadd.xlane.f32.xlu2 %v4081_v21 }
 0x936   : > { %v4206_v27 = vpop.f32.mrf.mxu0 }
 0x937   : > { %5355 = vmatmul.msk.bf16.vlgmr.msra.gmra.mxu3 %vm479_vm5, %v9964_v6  ;;  %v9126_v35 = vsel %vm444_vm9, -1e+30, %v4206_v27 }
 0x938   : > { %4426 = vmatpush.bf16.xpose.msra.mxu3 %v4417_v31  ;;  %v4473_v15 = vsel %vm1141_vm10, %v9126_v35, -inf }
 0x939   : > { %v4056_v8 = vpop.permute.xlu1 %4055 }
 0x93a   : > { %v4084_v3 = vsel %vm479_vm5, %v4056_v8, 0.0 }
 0x93b   : > { %4085 = vadd.xlane.f32.xlu0 %v4084_v3 }
 0x93e   : > { %v9140_v61 = vpop.f32.mrf.mxu0 }
 0x93f   : > { %v4476_v11 = vsel %vm1141_vm10, %v9140_v61, -inf }
 0x941   : > { %v9078_v26 = vpop.xlane.xlu2 %4070 }
 0x946   : > { %v4335_v49 = vpop.f32.mrf.mxu0 }
 0x947   : > { %5359 = vmatmul.msk.bf16.vlgmr.msrb.gmra.mxu3 %vm479_vm5, %v9965_v10  ;;  %v9158_v21 = vsel %vm444_vm9, -1e+30, %v4335_v49 }
 0x948   : > { %v4505_v51 = vsel %vm1141_vm10, %v9158_v21, -inf }
 0x949   : > { %v4060_v45 = vpop.permute.xlu2 %4059 }
 0x94a   : > { %v4090_v32 = vsel %vm479_vm5, %v4060_v45, 0.0  ;;  %v9090_v40 = vpop.xlane.xlu0 %4073 }
 0x94b   : > { %4091 = vadd.xlane.f32.xlu2 %v4090_v32 }
 0x94f   : > { %4791 = vrot.lane.b32.xlu0 %v9946_v24, %s6202_s29  ;;  %v9120_v24 = vpop.f32.mrf.mxu1 }
 0x950   : > { %v4450_v57 = vsel %vm1108_vm8, %v9120_v24, -inf }
 0x955   : > { %v9118_v58 = vpop.f32.mrf.mxu2 }
 0x956   : > { %9975 = vst [vmem:[#allocation18_spill] sm:$0xff] %v9118_v58 }
 0x957   : > { %4824 = vrot.lane.b32.xlu0 %v4770_v59, %s6202_s29  ;;  %5363 = vmatmul.msk.bf16.vlgmr.msra.gmra.mxu3 %vm479_vm5, %v9970_v30  ;;  %v4236_v9 = vpop.f32.mrf.mxu1 }
 0x958   : > { %v9134_v50 = vsel %vm444_vm9, -1e+30, %v4236_v9 }
 0x959   : > { %v4479_v23 = vsel %vm1141_vm10, %v9134_v50, -inf }
 0x95d   : > { %v4058_v56 = vpop.permute.xlu0 %4057  ;;  %v9128_v1 = vpop.f32.mrf.mxu2 }
 0x95e   : > { %v4087_v20 = vsel %vm479_vm5, %v4058_v56, 0.0  ;;  %9976 = vst [vmem:[#allocation39_spill] sm:$0xff] %v9128_v1 }
 0x95f   : > { %4088 = vadd.xlane.f32.xlu1 %v4087_v20  ;;  %v9148_v28 = vpop.f32.mrf.mxu1 }
 0x960   : > { %v4482_v41 = vsel %vm1141_vm10, %v9148_v28, -inf }
 0x963   : > { %4793 = vrot.lane.b32.xlu2 %v4767_v13, %s6202_s29 }
 0x965   : > { %v9138_v48 = vpop.f32.mrf.mxu2 }
 0x966   : > { %v4453_v55 = vsel %vm1108_vm8, %v9138_v48, -inf }
 0x967   : > { %4442 = vmax.xlane.f32.xlu1 %v4441_v39  ;;  %v4366_v53 = vpop.f32.mrf.mxu1  ;;  %v9190_v39 = vpop.f32.mrf.mxu0 }
 0x968   : > { %v9180_v30 = vsel %vm444_vm9, -1e+30, %v4366_v53 }
 0x969   : > { %v4511_v54 = vsel %vm1141_vm10, %v9180_v30, -inf }
 0x96c   : > { %v9196_v9 = vpop.xlane.xlu1 %4079 }
 0x96d   : > { %v9146_v60 = vpop.f32.mrf.mxu2 }
 0x96e   : > { %v4456_v5 = vsel %vm1108_vm8, %v9146_v60, -inf }
 0x96f   : > { %4448 = vmax.xlane.f32.xlu1 %v4447_v17 }
 0x975   : > { %v4266_v32 = vpop.f32.mrf.mxu2 }
 0x976   : > { %v9210_v49 = vsel %vm444_vm9, -1e+30, %v4266_v32 }
 0x977   : > { %4451 = vmax.xlane.f32.xlu1 %v4450_v57  ;;  %v9193_v57 = vpop.f32.mrf.mxu1 }
 0x97d   : > { %v9188_v19 = vpop.f32.mrf.mxu2 }
 0x97f   : > { %4474 = vmax.xlane.f32.xlu1 %v4473_v15 }
 0x987   : > { %4480 = vmax.xlane.f32.xlu1 %v4479_v23 }
 0x98c   : > { %4445 = vmax.xlane.f32.xlu2 %v4444_v34 }
 0x98f   : > { %4477 = vmax.xlane.f32.xlu1 %v4476_v11  ;;  %v4514_v11 = vsel %vm1141_vm10, %v9193_v57, -inf }
 0x994   : > { %4457 = vmax.xlane.f32.xlu2 %v4456_v5  ;;  %v4508_v5 = vsel %vm1141_vm10, %v9190_v39, -inf }
 0x997   : > { %4483 = vmax.xlane.f32.xlu1 %v4482_v41 }
 0x99d   : > { %v9164_v8 = vpop.xlane.xlu2 %4076 }
 0x99f   : > { %4454 = vmax.xlane.f32.xlu1 %v4453_v55  ;;  %v4397_v55 = vpop.f32.mrf.mxu2 }
 0x9a5   : > { %v9168_v10 = vpop.xlane.xlu2 %4082 }
 0x9a7   : > { %4506 = vmax.xlane.f32.xlu1 %v4505_v51  ;;  %v9214_v51 = vsel %vm444_vm9, -1e+30, %v4397_v55 }
 0x9aa   : > { %v9162_v31 = vpop.f32.mrf.mxu3 }
 0x9ab   : > { %9977 = vst [vmem:[#allocation30_spill] sm:$0xff] %v9162_v31 }
 0x9ae   : > { %v9170_v45 = vpop.xlane.xlu0 %4085 }
 0x9b2   : > { %v9166_v3 = vpop.f32.mrf.mxu3 }
 0x9b3   : > { %9978 = vst [vmem:[#allocation76_spill] sm:$0xff] %v9166_v3 }
 0x9ba   : > { %v9172_v14 = vpop.f32.mrf.mxu3 }
 0x9bb   : > { %v4459_v18 = vsel %vm1108_vm8, %v9172_v14, -inf }
 0x9bc   : > { %4460 = vmax.xlane.f32.xlu0 %v4459_v18 }
 0x9be   : > { %v9176_v59 = vpop.xlane.xlu2 %4091 }
 0x9c1   : > { %v4792_v56 = vpop.permute.xlu0 %4791 }
 0x9c2   : > { %v9182_v20 = vpop.f32.mrf.mxu3 }
 0x9c3   : > { %9979 = vst [vmem:[#allocation36_spill] sm:$0xff] %v9182_v20  ;;  %v4462_v46 = vsel %vm1108_vm8, %v9182_v20, -inf }
 0x9c4   : > { %4463 = vmax.xlane.f32.xlu1 %v4462_v46  ;;  %4512 = vmax.xlane.f32.xlu0 %v4511_v54  ;;  %v4485_v54 = vsel %vm1141_vm10, %v9210_v49, -inf  ;;  %v4517_v46 = vsel %vm1141_vm10, %v9214_v51, -inf }
 0x9c6   : > { %v4794_v13 = vpop.permute.xlu2 %4793 }
 0x9c7   : > { %v4800_v17 = vsel %vm597_vm2, %v4794_v13, 0 }
 0x9c8   : > { %4808 = vmatpush.bf16.msra.mxu0 %v4800_v17 }
 0x9c9   : > { %v4825_v27 = vpop.permute.xlu0 %4824 }
 0x9ca   : > { %v4831_v15 = vsel %vm597_vm2, %v4825_v27, 0  ;;  %v4296_v23 = vpop.f32.mrf.mxu3 }
 0x9cb   : > { %4839 = vmatpush.bf16.msrb.mxu1 %v4831_v15  ;;  %v9200_v34 = vsel %vm444_vm9, -1e+30, %v4296_v23  ;;  %v9234_v23 = vpop.f32.mrf.mxu2 }
 0x9cc   : > { %v4491_v41 = vsel %vm1141_vm10, %v9200_v34, -inf  ;;  %4515 = vmax.xlane.f32.xlu1 %v4514_v11  ;;  %4509 = vmax.xlane.f32.xlu0 %v4508_v5  ;;  %v4520_v55 = vsel %vm1141_vm10, %v9234_v23, -inf }
 0x9cd   : > { %4809 = vmatpush.bf16.msra.mxu0 %v4792_v56  ;;  %4492 = vmax.xlane.f32.xlu2 %v4491_v41  ;;  %v4488_v56 = vsel %vm1141_vm10, %v9188_v19, -inf }
 0x9d2   : > { %v9216_v18 = vpop.f32.mrf.mxu3  ;;  %v9218_v53 = vpop.xlane.xlu1 %4088 }
 0x9d3   : > { %v4494_v27 = vsel %vm1141_vm10, %v9216_v18, -inf }
 0x9d4   : > { %4489 = vmax.xlane.f32.xlu1 %v4488_v56  ;;  %4486 = vmax.xlane.f32.xlu0 %v4485_v54 }
 0x9d5   : > { %4518 = vmax.xlane.f32.xlu2 %v4517_v46 }
 0x9da   : > { %v4428_v32 = vpop.f32.mrf.mxu3  ;;  %v4443_v13 = vpop.xlane.xlu1 %4442 }
 0x9db   : > { %v9228_v17 = vsel %vm444_vm9, -1e+30, %v4428_v32 }
 0x9dc   : > { %v4523_v15 = vsel %vm1141_vm10, %v9228_v17, -inf  ;;  %4495 = vmax.xlane.f32.xlu0 %v4494_v27 }
 0x9dd   : > { %4524 = vmax.xlane.f32.xlu1 %v4523_v15  ;;  %v9245_v15 = vsel %vm444_vm9, -1e+30, %v9078_v26 }
 0x9de   : > { %v4465_v3 = vmax.f32 %v4443_v13, %v9245_v15 }
 0x9e2   : > { %v9236_v11 = vpop.f32.mrf.mxu3  ;;  %v4449_v5 = vpop.xlane.xlu1 %4448 }
 0x9e3   : > { %v4526_v41 = vsel %vm1141_vm10, %v9236_v11, -inf }
 0x9e4   : > { %4527 = vmax.xlane.f32.xlu2 %v4526_v41  ;;  %4521 = vmax.xlane.f32.xlu0 %v4520_v55 }
 0x9ea   : > { %v4452_v54 = vpop.xlane.xlu1 %4451 }
 0x9f2   : > { %v4475_v56 = vpop.xlane.xlu1 %4474 }
 0x9f3   : > { %v4497_v58 = vmax.f32 %v4465_v3, %v4475_v56 }
 0x9fa   : > { %v4481_v46 = vpop.xlane.xlu1 %4480 }
 0x9ff   : > { %v4446_v26 = vpop.xlane.xlu2 %4445 }
 0xa02   : > { %v4478_v32 = vpop.xlane.xlu1 %4477 }
 0xa0a   : > { %v4484_v31 = vpop.xlane.xlu1 %4483 }
 0xa12   : > { %v4455_v27 = vpop.xlane.xlu1 %4454 }
 0xa1a   : > { %v4507_v1 = vpop.xlane.xlu1 %4506 }
 0xa1b   : > { %v9248_v2 = vmax.f32 %v4497_v58, %v4507_v1  ;;  %v9259_v58 = vsel %vm444_vm9, -1e+30, %v9164_v8 }
 0xa1d   : > { %v4585_v41 = vsub.f32 %v9126_v35, %v9248_v2  ;;  %v4609_v29 = vsub.f32 %v9158_v21, %v9248_v2  ;;  %v4467_v35 = vmax.f32 %v4449_v5, %v9259_v58 }
 0xa1f   : > { %v4593_v55 = vmul.f32 1.442695, %v4585_v41  ;;  %v4617_v4 = vmul.f32 1.442695, %v4609_v29  ;;  %v4499_v1 = vmax.f32 %v4467_v35, %v4481_v46  ;;  %v9264_v29 = vpop.xlane.xlu2 %4457  ;;  %v9980_v41 = vld [vmem:[#allocation21_spill] sm:$0xff]  ;;  %v4468_v46 = vmax.f32 %v4452_v54, %v9196_v9 }
 0xa21   : > { %5901 = vpow2.f32 %v4593_v55  ;;  %v4763_v55 = vrot.slane %v9980_v41, 6  ;;  %v4500_v20 = vmax.f32 %v4468_v46, %v4484_v31 }
 0xa22   : > { %5903 = vpow2.f32 %v4617_v4  ;;  %v4466_v4 = vmax.f32 %v4446_v26, %v9090_v40 }
 0xa24   : > { %v4498_v5 = vmax.f32 %v4466_v4, %v4478_v32 }
 0xa27   : > { %v5902_v16 = vpop.eup %5901 }
 0xa28   : > { %4657 = vrot.lane.b32.xlu0 %v5902_v16, %s6201_s28  ;;  %v5904_v13 = vpop.eup %5903 }
 0xa2f   : > { %v4461_v47 = vpop.xlane.xlu0 %4460 }
 0xa30   : > { %4689 = vrot.lane.b32.xlu0 %v5904_v13, %s6205_s6 }
 0xa37   : > { %v4513_v3 = vpop.xlane.xlu0 %4512  ;;  %v9262_v21 = vpop.xlane.xlu1 %4463 }
 0xa38   : > { %v9266_v16 = vmax.f32 %v4499_v1, %v4513_v3  ;;  %4822 = vrot.lane.b32.xlu0 %v9949_v42, %s6202_s29 }
 0xa3a   : > { %v4587_v56 = vsub.f32 %v9134_v50, %v9266_v16  ;;  %v4611_v1 = vsub.f32 %v9180_v30, %v9266_v16  ;;  %v9981_v50 = vrot.slane %v9957_v44, 2  ;;  %v4097_v30 = vsel %vm444_vm9, -1e+30, %v9168_v10 }
 0xa3b   : > { %v4469_v41 = vmax.f32 %v4455_v27, %v4097_v30 }
 0xa3c   : > { %v4597_v8 = vmul.f32 1.442695, %v4587_v56  ;;  %v4773_v42 = vsel %vm1440_vm4, %v9981_v50, %v4763_v55  ;;  %v4621_v32 = vmul.f32 1.442695, %v4611_v1  ;;  %v9982_v50 = vld [vmem:[#allocation29_spill] sm:$0xff] }
 0xa3e   : > { %5905 = vpow2.f32 %v4597_v8 }
 0xa3f   : > { %v4510_v13 = vpop.xlane.xlu0 %4509  ;;  %v4516_v35 = vpop.xlane.xlu1 %4515  ;;  %5907 = vpow2.f32 %v4621_v32 }
 0xa40   : > { %v9277_v3 = vmax.f32 %v4498_v5, %v4510_v13  ;;  %v4493_v26 = vpop.xlane.xlu2 %4492  ;;  %4855 = vrot.lane.b32.xlu0 %v4773_v42, %s6202_s29  ;;  %v9285_v54 = vmax.f32 %v4500_v20, %v4516_v35  ;;  %v4764_v42 = vrot.slane %v9982_v50, 6 }
 0xa42   : > { %v4610_v56 = vsub.f32 %v9190_v39, %v9277_v3  ;;  %v4586_v31 = vsub.f32 %v9140_v61, %v9277_v3  ;;  %v4588_v55 = vsub.f32 %v9148_v28, %v9285_v54  ;;  %v4099_v61 = vsel %vm444_vm9, -1e+30, %v9218_v53 }
 0xa43   : > { %v4471_v1 = vmax.f32 %v4461_v47, %v4099_v61  ;;  %v4612_v47 = vsub.f32 %v9193_v57, %v9285_v54 }
 0xa44   : > { %v4619_v4 = vmul.f32 1.442695, %v4610_v56  ;;  %v5906_v8 = vpop.eup %5905  ;;  %v4595_v13 = vmul.f32 1.442695, %v4586_v31  ;;  %v4599_v10 = vmul.f32 1.442695, %v4588_v55 }
 0xa45   : > { %4661 = vrot.lane.b32.xlu1 %v5906_v8, %s6201_s28  ;;  %v5908_v56 = vpop.eup %5907 }
 0xa46   : > { %5909 = vpow2.f32 %v4619_v4 }
 0xa47   : > { %v4487_v39 = vpop.xlane.xlu0 %4486  ;;  %v4490_v5 = vpop.xlane.xlu1 %4489  ;;  %5911 = vpow2.f32 %v4595_v13  ;;  %v4623_v13 = vmul.f32 1.442695, %v4612_v47 }
 0xa48   : > { %v4501_v20 = vmax.f32 %v4469_v41, %v4487_v39  ;;  %v4519_v46 = vpop.xlane.xlu2 %4518  ;;  %4853 = vrot.lane.b32.xlu0 %v9957_v44, %s6202_s29  ;;  %5913 = vpow2.f32 %v4599_v10  ;;  %v4503_v44 = vmax.f32 %v4471_v1, %v4493_v26 }
 0xa4a   : > { %v4533_v35 = vmax.f32 %v4501_v20, %v4519_v46  ;;  %v4470_v20 = vmax.f32 %v9264_v29, %v9170_v45 }
 0xa4c   : > { %v4541_v28 = vsub.f32 %v9138_v48, %v4533_v35  ;;  %v4565_v27 = vsub.f32 %v4097_v30, %v4533_v35  ;;  %v4589_v8 = vsub.f32 %v9210_v49, %v4533_v35  ;;  %v5910_v41 = vpop.eup %5909  ;;  %v9983_v48 = vrot.slane %v9964_v6, 2 }
 0xa4d   : > { %4693 = vrot.lane.b32.xlu1 %v5908_v56, %s6205_s6  ;;  %4691 = vrot.lane.b32.xlu2 %v5910_v41, %s6205_s6  ;;  %v5912_v39 = vpop.eup %5911 }
 0xa4e   : > { %v4553_v32 = vmul.f32 1.442695, %v4541_v28  ;;  %v4577_v4 = vmul.f32 1.442695, %v4565_v27  ;;  %v4776_v53 = vsel %vm1440_vm4, %v9983_v48, %v4764_v42  ;;  %v4601_v49 = vmul.f32 1.442695, %v4589_v8  ;;  %v5914_v46 = vpop.eup %5913 }
 0xa4f   : > { %v4496_v31 = vpop.xlane.xlu0 %4495  ;;  %v4502_v27 = vmax.f32 %v4470_v20, %v4490_v5  ;;  %v4613_v42 = vsub.f32 %v9214_v51, %v4533_v35 }
 0xa50   : > { %5915 = vpow2.f32 %v4553_v32  ;;  %v4525_v0 = vpop.xlane.xlu1 %4524  ;;  %4886 = vrot.lane.b32.xlu0 %v4776_v53, %s6202_s29 }
 0xa51   : > { %5917 = vpow2.f32 %v4577_v4  ;;  %v4535_v30 = vmax.f32 %v4503_v44, %v4525_v0  ;;  %v4625_v56 = vmul.f32 1.442695, %v4613_v42  ;;  %v4472_v0 = vmax.f32 %v9262_v21, %v9176_v59  ;;  %v9987_v42 = vld [vmem:[#allocation79_spill] sm:$0xff] }
 0xa52   : > { %5919 = vpow2.f32 %v4601_v49 }
 0xa53   : > { %v4543_v26 = vsub.f32 %v9172_v14, %v4535_v30  ;;  %v4567_v55 = vsub.f32 %v4099_v61, %v4535_v30  ;;  %v4591_v41 = vsub.f32 %v9200_v34, %v4535_v30  ;;  %v4504_v49 = vmax.f32 %v4472_v0, %v4496_v31 }
 0xa54   : > { %v4615_v34 = vsub.f32 %v9228_v17, %v4535_v30 }
 0xa55   : > { %v4557_v10 = vmul.f32 1.442695, %v4543_v26  ;;  %v4581_v57 = vmul.f32 1.442695, %v4567_v55  ;;  %4659 = vrot.lane.b32.xlu1 %v5912_v39, %s6201_s28  ;;  %4663 = vrot.lane.b32.xlu2 %v5914_v46, %s6201_s28 }
 0xa56   : > { %v5916_v28 = vpop.eup %5915  ;;  %v4629_v21 = vmul.f32 1.442695, %v4615_v34  ;;  %v3624_v34 = vsel %vm1403_vm15, %v8933_v25, 0.0  ;;  %v4537_v25 = vsub.f32 %v9107_v38, %v9248_v2 }
 0xa57   : > { %v5918_v1 = vpop.eup %5917  ;;  %5921 = vpow2.f32 %v4557_v10  ;;  %v4522_v50 = vpop.xlane.xlu0 %4521 }
 0xa58   : > { %5923 = vpow2.f32 %v4581_v57  ;;  %v9317_v14 = vmax.f32 %v4502_v27, %v4522_v50  ;;  %v4637_v29 = vsel %vm7720_vm12, %v5918_v1, 0.0  ;;  %4884 = vrot.lane.b32.xlu0 %v9964_v6, %s6202_s29  ;;  %v5920_v5 = vpop.eup %5919  ;;  %v4528_v48 = vpop.xlane.xlu2 %4527  ;;  %v9984_v57 = vld [vmem:[#allocation57_spill] sm:$0xff]  ;;  %v9985_v27 = vld [vmem:[#allocation54_spill] sm:$0xff]  ;;  %s6139_s29 = scalar_lea.hbm %s9611_s3, 128 }
 0xa59   : > { %5925 = vpow2.f32 %v4623_v13  ;;  %v9321_v61 = vadd.f32 %v5916_v28, %v4637_v29  ;;  %v9340_v26 = vmax.f32 %v4504_v49, %v4528_v48  ;;  %v2522_v28 = vsel %vm1403_vm15, %v9984_v57, 0.0  ;;  %v9988_v29 = vld [vmem:[#allocation78_spill] sm:$0xff]  ;;  %p6141_p9 = scmp.lt.s32.totalorder %s6139_s29, %s6135_s23 }
 0xa5a   : > { %v4590_v32 = vsub.f32 %v9188_v19, %v9317_v14  ;;  %5927 = vpow2.f32 %v4625_v56  ;;  %v4605_v19 = vmul.f32 1.442695, %v4591_v41  ;;  %v4614_v47 = vsub.f32 %v9234_v23, %v9317_v14 }
 0xa5b   : > { %v4592_v20 = vsub.f32 %v9216_v18, %v9340_v26  ;;  %v4616_v17 = vsub.f32 %v9236_v11, %v9340_v26  ;;  %v2528_v1 = vsel %vm1403_vm15, %v9985_v27, 0.0  ;;  %v9986_v11 = vld [vmem:[#allocation27_spill] sm:$0xff]  ;;  %p6142_p2 = por %p6141_p9, %p6140_p11 }
 0xa5c   : > { %v4603_v44 = vmul.f32 1.442695, %v4590_v32  ;;  %v4627_v55 = vmul.f32 1.442695, %v4614_v47  ;;  %v2534_v50 = vsel %vm1403_vm15, %v9986_v11, 0.0  ;;  %v3621_v32 = vsel %vm1403_vm15, %v8944_v43, 0.0 }
 0xa5d   : > { %v5922_v51 = vpop.eup %5921  ;;  %4665 = vrot.lane.b32.xlu1 %v5920_v5, %s6201_s28  ;;  %v4607_v31 = vmul.f32 1.442695, %v4592_v20  ;;  %v4631_v13 = vmul.f32 1.442695, %v4616_v17  ;;  %v3627_v47 = vsel %vm1403_vm15, %v8967_v52, 0.0  ;;  %v4540_v43 = vsub.f32 %v9120_v24, %v9285_v54  ;;  %v9991_v20 = vld [vmem:[#allocation14_spill] sm:$0xff]  ;;  %p6143_p10 = pnand %p6142_p2, %p6138_p8 }
 0xa5e   : > { %v5924_v35 = vpop.eup %5923  ;;  %5929 = vpow2.f32 %v4603_v44  ;;  %v4561_v24 = vsub.f32 %v9245_v15, %v9248_v2  ;;  %v4538_v17 = vsub.f32 %v9114_v12, %v9277_v3 }
 0xa5f   : > { %v5926_v4 = vpop.eup %5925  ;;  %v4639_v8 = vsel %vm7720_vm12, %v5924_v35, 0.0  ;;  %5931 = vpow2.f32 %v4605_v19  ;;  %v9989_v35 = vld [vmem:[#allocation32_spill] sm:$0xff]  ;;  %v4564_v19 = vsub.f32 %v9196_v9, %v9285_v54  ;;  %v4551_v52 = vmul.f32 1.442695, %v4540_v43 }
 0xa60   : > { %4695 = vrot.lane.b32.xlu2 %v5926_v4, %s6205_s6  ;;  %v9332_v6 = vadd.f32 %v5922_v51, %v4639_v8  ;;  %v5928_v53 = vpop.eup %5927  ;;  %5933 = vpow2.f32 %v4627_v55  ;;  %v9990_v8 = vld [vmem:[#allocation19_spill] sm:$0xff]  ;;  %v4539_v55 = vsub.f32 %v9112_v33, %v9266_v16  ;;  %v3633_v54 = vsel %vm1403_vm15, %v9018_v7, 0.0 }
 0xa61   : > { %5935 = vpow2.f32 %v4629_v21  ;;  %v4575_v49 = vmul.f32 1.442695, %v4564_v19  ;;  %v2519_v33 = vsel %vm1403_vm15, %v9991_v20, 0.0  ;;  %v9992_v19 = vld [vmem:[#allocation60_spill] sm:$0xff] }
 0xa62   : > { %5937 = vpow2.f32 %v4607_v31 }
 0xa63   : > { %5939 = vpow2.f32 %v4631_v13 }
 0xa64   : > { %v5930_v39 = vpop.eup %5929  ;;  %5941 = vrcp.f32 %v9987_v42  ;;  %v4566_v42 = vsub.f32 %v9170_v45, %v9317_v14  ;;  %v2525_v45 = vsel %vm1403_vm15, %v9992_v19, 0.0 }
 0xa65   : > { %4697 = vrot.lane.b32.xlu1 %v5928_v53, %s6205_s6  ;;  %v5932_v23 = vpop.eup %5931  ;;  %5943 = vrcp.f32 %v9988_v29  ;;  %v4563_v53 = vsub.f32 %v9259_v58, %v9266_v16  ;;  %v4549_v58 = vmul.f32 1.442695, %v4539_v55  ;;  %v4569_v16 = vmul.f32 1.442695, %v4561_v24 }
 0xa66   : > { %v5934_v46 = vpop.eup %5933  ;;  %5945 = vpow2.f32 %v4575_v49 }
 0xa67   : > { %v5936_v30 = vpop.eup %5935  ;;  %5947 = vpow2.f32 %v4551_v52 }
 0xa68   : > { %4667 = vrot.lane.b32.xlu2 %v5930_v39, %s6201_s28  ;;  %v5938_v10 = vpop.eup %5937  ;;  %v4573_v39 = vmul.f32 1.442695, %v4563_v53 }
 0xa69   : > { %v5940_v18 = vpop.eup %5939 }
 0xa6a   : > { %v5942_v56 = vpop.eup %5941  ;;  %5949 = vpow2.f32 %v4573_v39 }
 0xa6b   : > { %v5944_v51 = vpop.eup %5943  ;;  %v2694_v4 = vmul.f32 %v5942_v56, %v9989_v35  ;;  %5951 = vpow2.f32 %v4549_v58  ;;  %v4568_v58 = vsub.f32 %v9176_v59, %v9340_v26 }
 0xa6c   : > { %v2693_v41 = vmul.f32 %v5944_v51, %v9990_v8  ;;  %v5946_v31 = vpop.eup %5945  ;;  %5953 = vpow2.f32 %v4569_v16  ;;  %v4542_v8 = vsub.f32 %v9146_v60, %v9317_v14 }
 0xa6d   : > { %4669 = vrot.lane.b32.xlu1 %v5932_v23, %s6201_s28  ;;  %v4562_v23 = vsub.f32 %v9090_v40, %v9277_v3  ;;  %v5948_v2 = vpop.eup %5947  ;;  %v3639_v40 = vsel %vm1403_vm15, %v9005_v36, 0.0 }
 0xa6e   : > { %v5649_v0 = vpack.i.bf16 %v2694_v4, %v2693_v41  ;;  %v4555_v60 = vmul.f32 1.442695, %v4542_v8 }
 0xa6f   : > { %v4571_v38 = vmul.f32 1.442695, %v4562_v23 }
 0xa70   : > { %4699 = vrot.lane.b32.xlu2 %v5934_v46, %s6205_s6  ;;  %v4545_v46 = vmul.f32 1.442695, %v4537_v25  ;;  %v5950_v13 = vpop.eup %5949 }
 0xa71   : > { %v5952_v12 = vpop.eup %5951  ;;  %v4635_v3 = vsel %vm7720_vm12, %v5950_v13, 0.0  ;;  %v9994_v13 = vld [vmem:[#allocation25_spill] sm:$0xff] }
 0xa72   : > { %5955 = vpow2.f32 %v4545_v46  ;;  %v5954_v36 = vpop.eup %5953 }
 0xa73   : > { %5957 = vpow2.f32 %v4571_v38  ;;  %v4633_v56 = vsel %vm7720_vm12, %v5954_v36, 0.0 }
 0xa75   : > { %4701 = vrot.lane.b32.xlu1 %v5936_v30, %s6205_s6  ;;  %v4636_v30 = vsel %vm7732_vm13, %v5946_v31, 0.0  ;;  %v4583_v31 = vmul.f32 1.442695, %v4568_v58 }
 0xa76   : > { %v4644_v57 = vadd.f32 %v5948_v2, %v4636_v30 }
 0xa78   : > { %4671 = vrot.lane.b32.xlu2 %v5938_v10, %s6201_s28  ;;  %v5956_v29 = vpop.eup %5955 }
 0xa79   : > { %v5958_v4 = vpop.eup %5957  ;;  %v4641_v43 = vadd.f32 %v5956_v29, %v4633_v56  ;;  %v9995_v29 = vld [vmem:[#allocation68_spill] sm:$0xff] }
 0xa7a   : > { %v4634_v52 = vsel %vm7732_vm13, %v5958_v4, 0.0  ;;  %v3642_v56 = vsel %vm1403_vm15, %v9995_v29, 0.0 }
 0xa80   : > { %4703 = vrot.lane.b32.xlu2 %v5940_v18, %s6205_s6  ;;  %v4547_v18 = vmul.f32 1.442695, %v4538_v17 }
 0xa82   : > { %2523 = vadd.xlane.f32.xlu0 %v2522_v28  ;;  %v3630_v28 = vsel %vm1403_vm15, %v8954_v63, 0.0  ;;  %5959 = vpow2.f32 %v4547_v18  ;;  %v4643_v63 = vadd.f32 %v5952_v12, %v4635_v3 }
 0xa88   : > { %v5960_v53 = vpop.eup %5959 }
 0xa8a   : > { %2529 = vadd.xlane.f32.xlu0 %v2528_v1 }
 0xa92   : > { %2535 = vadd.xlane.f32.xlu0 %v2534_v50 }
 0xa9a   : > { %v9360_v5 = vpop.permute.xlu0 %4657 }
 0xa9b   : > { %v4713_v14 = vsel %vm1108_vm8, %v4641_v43, %v9360_v5  ;;  %v3636_v5 = vsel %vm1403_vm15, %v9026_v22, 0.0 }
 0xa9f   : > { %3622 = vadd.xlane.f32.xlu1 %v3621_v32 }
 0xaa2   : > { %v9366_v44 = vpop.permute.xlu0 %4689 }
 0xaa3   : > { %v4721_v39 = vsel %vm1394_vm14, %v4713_v14, %v9366_v44  ;;  %v9993_v44 = vld [vmem:[#allocation36_spill] sm:$0xff] }
 0xaa4   : > { %v4777_v25 = vpack.c.bf16 %v4721_v39, %v4721_v39  ;;  %v4544_v16 = vsub.f32 %v9993_v44, %v9340_v26  ;;  %v4729_v26 = vsel %vm1403_vm15, %v4721_v39, 0.0  ;;  %v9996_v39 = vld [vmem:[#allocation12_spill] sm:$0xff] }
 0xaa6   : > { %5650 = vrot.lane.b32.xlu0 %v5649_v0, %s6206_s7  ;;  %v4579_v0 = vmul.f32 1.442695, %v4566_v42  ;;  %v4787_v46 = vunpack.c.l.b16 %v4777_v25  ;;  %v4559_v22 = vmul.f32 1.442695, %v4544_v16 }
 0xaa7   : > { %3628 = vadd.xlane.f32.xlu1 %v3627_v47  ;;  %v9375_v48 = vpop.permute.xlu2 %4691 }
 0xaa8   : > { %5961 = vpow2.f32 %v4579_v0 }
 0xaa9   : > { %3625 = vadd.xlane.f32.xlu2 %v3624_v34  ;;  %5963 = vpow2.f32 %v4555_v60 }
 0xaaa   : > { %v4823_v9 = vpop.permute.xlu0 %4822  ;;  %5965 = vpow2.f32 %v4583_v31 }
 0xaab   : > { %4840 = vmatpush.bf16.msrb.mxu1 %v4823_v9  ;;  %5967 = vpow2.f32 %v4559_v22 }
 0xaac   : > { %5969 = vrcp.f32 %v9996_v39 }
 0xaaf   : > { %3634 = vadd.xlane.f32.xlu1 %v3633_v54  ;;  %v4664_v21 = vpop.permute.xlu2 %4663  ;;  %v4642_v54 = vadd.f32 %v5960_v53, %v4634_v52 }
 0xab0   : > { %v4716_v11 = vsel %vm1108_vm8, %v4644_v57, %v4664_v21 }
 0xab1   : > { %2520 = vadd.xlane.f32.xlu2 %v2519_v33 }
 0xab2   : > { %v4856_v15 = vpop.permute.xlu0 %4855 }
 0xab3   : > { %v4862_v7 = vsel %vm597_vm2, %v4856_v15, 0  ;;  %v5962_v15 = vpop.eup %5961 }
 0xab4   : > { %4870 = vmatpush.bf16.msrb.mxu2 %v4862_v7  ;;  %v5964_v2 = vpop.eup %5963 }
 0xab7   : > { %3640 = vadd.xlane.f32.xlu1 %v3639_v40  ;;  %v4662_v10 = vpop.permute.xlu1 %4661 }
 0xab8   : > { %v4715_v51 = vsel %vm1108_vm8, %v4643_v63, %v4662_v10  ;;  %v2531_v10 = vsel %vm1403_vm15, %v9994_v13, 0.0 }
 0xab9   : > { %3631 = vadd.xlane.f32.xlu2 %v3630_v28 }
 0xaba   : > { %v4696_v27 = vpop.permute.xlu2 %4695  ;;  %v4854_v1 = vpop.permute.xlu0 %4853 }
 0xabb   : > { %4871 = vmatpush.bf16.msrb.mxu2 %v4854_v1  ;;  %v9406_v50 = vsel %vm1394_vm14, %v4716_v11, %v4696_v27  ;;  %v5966_v27 = vpop.eup %5965 }
 0xabc   : > { %v4780_v32 = vpack.c.bf16 %v9406_v50, %v9406_v50  ;;  %v5968_v36 = vpop.eup %5967  ;;  %v4640_v42 = vsel %vm7732_vm13, %v5966_v27, 0.0 }
 0xabe   : > { %v4819_v49 = vunpack.c.l.b16 %v4780_v32 }
 0xabf   : > { %v4694_v35 = vpop.permute.xlu1 %4693 }
 0xac0   : > { %v4723_v41 = vsel %vm1394_vm14, %v4715_v51, %v4694_v35  ;;  %v4648_v35 = vadd.f32 %v5968_v36, %v4640_v42 }
 0xac1   : > { %v4779_v47 = vpack.c.bf16 %v4723_v41, %v4723_v41  ;;  %2526 = vadd.xlane.f32.xlu2 %v2525_v45  ;;  %v4735_v11 = vsel %vm1403_vm15, %v4723_v41, 0.0 }
 0xac2   : > { %v4887_v62 = vpop.permute.xlu0 %4886  ;;  %v4668_v34 = vpop.permute.xlu2 %4667 }
 0xac3   : > { %v4818_v9 = vunpack.c.l.b16 %v4779_v47  ;;  %v4893_v55 = vsel %vm597_vm2, %v4887_v62, 0 }
 0xac4   : > { %4901 = vmatpush.bf16.msrb.mxu3 %v4893_v55 }
 0xac5   : > { %v4820_v24 = vpack.c.b16 %v4819_v49, %v4818_v9 }
 0xac7   : > { %5365 = vmatmul.msk.bf16.vlgmr.msrb.gmra.mxu1 %vm1403_vm15, %v4820_v24  ;;  %v4660_v21 = vpop.permute.xlu1 %4659  ;;  %v5970_v24 = vpop.eup %5969 }
 0xac8   : > { %v4714_v20 = vsel %vm1108_vm8, %v4642_v54, %v4660_v21 }
 0xac9   : > { %v9435_v33 = vsel %vm1394_vm14, %v4714_v20, %v9375_v48  ;;  %3637 = vadd.xlane.f32.xlu2 %v3636_v5  ;;  %v4638_v48 = vsel %vm7732_vm13, %v5962_v15, 0.0  ;;  %v9999_v15 = vld [vmem:[#allocation71_spill] sm:$0xff] }
 0xaca   : > { %v4778_v59 = vpack.c.bf16 %v9435_v33, %v9435_v33  ;;  %v4885_v23 = vpop.permute.xlu0 %4884  ;;  %v4700_v7 = vpop.permute.xlu2 %4699  ;;  %v4646_v40 = vadd.f32 %v5964_v2, %v4638_v48  ;;  %v10000_v48 = vld [vmem:[#allocation35_spill] sm:$0xff] }
 0xacb   : > { %4902 = vmatpush.bf16.msrb.mxu3 %v4885_v23 }
 0xacc   : > { %v4788_v17 = vunpack.c.l.b16 %v4778_v59  ;;  %v4718_v18 = vsel %vm1108_vm8, %v4646_v40, %v4668_v34  ;;  %v9998_v59 = vld [vmem:[#allocation70_spill] sm:$0xff] }
 0xacd   : > { %v9449_v28 = vsel %vm1394_vm14, %v4718_v18, %v4700_v7 }
 0xace   : > { %v4789_v38 = vpack.c.b16 %v4788_v17, %v4787_v46  ;;  %v4782_v12 = vpack.c.bf16 %v9449_v28, %v9449_v28 }
 0xacf   : > { %v4666_v30 = vpop.permute.xlu1 %4665 }
 0xad0   : > { %4730 = vadd.xlane.f32.xlu0 %v4729_v26  ;;  %5364 = vmatmul.msk.bf16.vlgmr.msra.gmra.mxu0 %vm1403_vm15, %v4789_v38  ;;  %v4717_v3 = vsel %vm1108_vm8, %v9321_v61, %v4666_v30  ;;  %v4850_v51 = vunpack.c.l.b16 %v4782_v12  ;;  %v10001_v30 = vld [vmem:[#allocation61_spill] sm:$0xff]  ;;  %v10003_v12 = vld [vmem:[#allocation64_spill] sm:$0xff] }
 0xad1   : > { %2532 = vadd.xlane.f32.xlu2 %v2531_v10 }
 0xad2   : > { %v4672_v57 = vpop.permute.xlu2 %4671 }
 0xad3   : > { %v4720_v61 = vsel %vm1108_vm8, %v4648_v35, %v4672_v57  ;;  %v10002_v57 = vld [vmem:[#allocation69_spill] sm:$0xff] }
 0xad7   : > { %v4698_v1 = vpop.permute.xlu1 %4697 }
 0xad8   : > { %v4725_v63 = vsel %vm1394_vm14, %v4717_v3, %v4698_v1  ;;  %4736 = vadd.xlane.f32.xlu0 %v4735_v11 }
 0xad9   : > { %v4781_v32 = vpack.c.bf16 %v4725_v63, %v4725_v63  ;;  %3643 = vadd.xlane.f32.xlu2 %v3642_v56  ;;  %v4741_v19 = vsel %vm1403_vm15, %v4725_v63, 0.0  ;;  %v10004_v63 = vld [vmem:[#allocation33_spill] sm:$0xff]  ;;  %v10005_v56 = vld [vmem:[#allocation62_spill] sm:$0xff] }
 0xada   : > { %v4704_v4 = vpop.permute.xlu2 %4703 }
 0xadb   : > { %v4849_v8 = vunpack.c.l.b16 %v4781_v32  ;;  %v4728_v41 = vsel %vm1394_vm14, %v4720_v61, %v4704_v4 }
 0xadc   : > { %v4750_v45 = vsel %vm1403_vm15, %v4728_v41, 0.0  ;;  %v4784_v47 = vpack.c.bf16 %v4728_v41, %v4728_v41 }
 0xadd   : > { %v4851_v0 = vpack.c.b16 %v4850_v51, %v4849_v8 }
 0xade   : > { %v4881_v34 = vunpack.c.l.b16 %v4784_v47  ;;  %v4732_v47 = vsel %vm1403_vm15, %v9435_v33, 0.0 }
 0xadf   : > { %5366 = vmatmul.msk.bf16.vlgmr.msrb.gmra.mxu2 %vm1403_vm15, %v4851_v0  ;;  %v4670_v37 = vpop.permute.xlu1 %4669  ;;  %v10006_v0 = vld [vmem:[#allocation63_spill] sm:$0xff] }
 0xae0   : > { %4742 = vadd.xlane.f32.xlu0 %v4741_v19  ;;  %v4719_v43 = vsel %vm1108_vm8, %v9332_v6, %v4670_v37  ;;  %v9997_v6 = vld [vmem:[#allocation40_spill] sm:$0xff] }
 0xae1   : > { %4751 = vadd.xlane.f32.xlu2 %v4750_v45  ;;  %v1585_v58 = vmul.f32 %v5970_v24, %v9997_v6  ;;  %v10007_v37 = vld [vmem:[#allocation56_spill] sm:$0xff] }
 0xae7   : > { %v4702_v62 = vpop.permute.xlu1 %4701 }
 0xae8   : > { %v9469_v53 = vsel %vm1394_vm14, %v4719_v43, %v4702_v62  ;;  %v4738_v43 = vsel %vm1403_vm15, %v9406_v50, 0.0 }
 0xae9   : > { %v4783_v49 = vpack.c.bf16 %v9469_v53, %v9469_v53  ;;  %v4747_v62 = vsel %vm1403_vm15, %v9469_v53, 0.0 }
 0xaeb   : > { %v4880_v9 = vunpack.c.l.b16 %v4783_v49  ;;  %v4744_v49 = vsel %vm1403_vm15, %v9449_v28, 0.0 }
 0xaed   : > { %v4882_v55 = vpack.c.b16 %v4881_v34, %v4880_v9 }
 0xaef   : > { %5367 = vmatmul.msk.bf16.vlgmr.msrb.gmra.mxu3 %vm1403_vm15, %v4882_v55  ;;  %v10008_v55 = vld [vmem:[#allocation24_spill] sm:$0xff] }
 0xaf5   : > { %v2524_v52 = vpop.xlane.xlu0 %2523 }
 0xafd   : > { %v2530_v60 = vpop.xlane.xlu0 %2529 }
 0xb05   : > { %v2536_v14 = vpop.xlane.xlu0 %2535 }
 0xb12   : > { %v3623_v21 = vpop.xlane.xlu1 %3622 }
 0xb13   : > { %5971 = vrcp.f32 %v3623_v21 }
 0xb18   : > { %v9475_v54 = vpop.permute.xlu0 %5650 }
 0xb19   : > { %v5652_v25 = vunpack.i.l.bf16 %v9475_v54  ;;  %v5972_v44 = vpop.eup %5971 }
 0xb1a   : > { %v3801_v23 = vmul.f32 %v5972_v44, %v9998_v59  ;;  %v3629_v17 = vpop.xlane.xlu1 %3628 }
 0xb1b   : > { %v9480_v20 = vsel %vm479_vm5, %v1585_v58, %v5652_v25 }
 0xb1c   : > { %v3626_v5 = vpop.xlane.xlu2 %3625 }
 0xb1d   : > { %5973 = vrcp.f32 %v3626_v5 }
 0xb1e   : > { %5975 = vrcp.f32 %v2524_v52  ;;  %v5653_v52 = vunpack.i.h.bf16 %v9475_v54 }
 0xb22   : > { %v3635_v34 = vpop.xlane.xlu1 %3634 }
 0xb23   : > { %v5974_v16 = vpop.eup %5973 }
 0xb24   : > { %v3802_v31 = vmul.f32 %v5974_v16, %v9999_v15  ;;  %v2521_v7 = vpop.xlane.xlu2 %2520  ;;  %v5976_v2 = vpop.eup %5975 }
 0xb25   : > { %5977 = vrcp.f32 %v2521_v7  ;;  %v2696_v38 = vmul.f32 %v5976_v2, %v10000_v48 }
 0xb26   : > { %v5654_v46 = vpack.i.bf16 %v3802_v31, %v3801_v23  ;;  %5979 = vrcp.f32 %v3629_v17 }
 0xb28   : > { %5655 = vrot.lane.b32.xlu1 %v5654_v46, %s6201_s28 }
 0xb2a   : > { %v3641_v9 = vpop.xlane.xlu1 %3640 }
 0xb2b   : > { %v5978_v22 = vpop.eup %5977 }
 0xb2c   : > { %v2695_v26 = vmul.f32 %v5978_v22, %v10001_v30  ;;  %v3632_v40 = vpop.xlane.xlu2 %3631  ;;  %v5980_v10 = vpop.eup %5979  ;;  %v10010_v22 = vld [vmem:[#allocation39_spill] sm:$0xff] }
 0xb2d   : > { %5981 = vrcp.f32 %v3632_v40  ;;  %v3803_v27 = vmul.f32 %v5980_v10, %v10002_v57 }
 0xb2e   : > { %v5664_v13 = vpack.i.bf16 %v2696_v38, %v2695_v26  ;;  %5983 = vrcp.f32 %v2530_v60  ;;  %v10009_v60 = vld [vmem:[#allocation16_spill] sm:$0xff]  ;;  %v10011_v26 = vld [vmem:[#allocation18_spill] sm:$0xff] }
 0xb30   : > { %5665 = vrot.lane.b32.xlu0 %v5664_v13, %s6206_s7 }
 0xb33   : > { %v5982_v18 = vpop.eup %5981 }
 0xb34   : > { %v3804_v3 = vmul.f32 %v5982_v18, %v10003_v12  ;;  %v2527_v1 = vpop.xlane.xlu2 %2526  ;;  %v5984_v36 = vpop.eup %5983 }
 0xb35   : > { %5985 = vrcp.f32 %v2527_v1  ;;  %v2698_v29 = vmul.f32 %v5984_v36, %v10004_v63  ;;  %v10012_v36 = vld [vmem:[#allocation76_spill] sm:$0xff]  ;;  %v10013_v63 = vld [vmem:[#allocation30_spill] sm:$0xff] }
 0xb36   : > { %v5669_v11 = vpack.i.bf16 %v3804_v3, %v3803_v27  ;;  %5987 = vrcp.f32 %v2536_v14 }
 0xb38   : > { %5670 = vrot.lane.b32.xlu0 %v5669_v11, %s6201_s28 }
 0xb3b   : > { %v5986_v42 = vpop.eup %5985 }
 0xb3c   : > { %v2697_v32 = vmul.f32 %v5986_v42, %v10005_v56  ;;  %v3638_v51 = vpop.xlane.xlu2 %3637  ;;  %v5988_v8 = vpop.eup %5987 }
 0xb3d   : > { %v2700_v41 = vmul.f32 %v5988_v8, %v10006_v0 }
 0xb3e   : > { %v5679_v35 = vpack.i.bf16 %v2698_v29, %v2697_v32 }
 0xb40   : > { %5680 = vrot.lane.b32.xlu0 %v5679_v35, %s6206_s7 }
 0xb43   : > { %v4731_v58 = vpop.xlane.xlu0 %4730 }
 0xb44   : > { %v2533_v4 = vpop.xlane.xlu2 %2532  ;;  %v4842_v5 = vpop.f32.mrf.mxu1 }
 0xb45   : > { %5989 = vrcp.f32 %v2533_v4 }
 0xb46   : > { %5991 = vrcp.f32 %v10008_v55 }
 0xb47   : > { %5993 = vrcp.f32 %v4731_v58 }
 0xb4b   : > { %v5990_v61 = vpop.eup %5989  ;;  %v4737_v54 = vpop.xlane.xlu0 %4736 }
 0xb4c   : > { %v2699_v19 = vmul.f32 %v5990_v61, %v10007_v37  ;;  %v5992_v33 = vpop.eup %5991  ;;  %v3644_v7 = vpop.xlane.xlu2 %3643 }
 0xb4d   : > { %v1586_v14 = vmul.f32 %v5992_v33, %v10009_v60  ;;  %v4811_v21 = vpop.f32.mrf.mxu0  ;;  %v5994_v44 = vpop.eup %5993 }
 0xb4e   : > { %v5694_v45 = vpack.i.bf16 %v2700_v41, %v2699_v19  ;;  %v4909_v23 = vmul.f32 %v5994_v44, %v4811_v21  ;;  %v4844_v30 = vpop.f32.mrf.mxu1 }
 0xb4f   : > { %v5014_v6 = vsel %vm479_vm5, %v1586_v14, %v5653_v52 }
 0xb50   : > { %5695 = vrot.lane.b32.xlu0 %v5694_v45, %s6206_s7 }
 0xb52   : > { %4733 = vadd.xlane.f32.xlu1 %v4732_v47 }
 0xb53   : > { %v4743_v1 = vpop.xlane.xlu0 %4742 }
 0xb54   : > { %v4752_v4 = vpop.xlane.xlu2 %4751 }
 0xb55   : > { %v4813_v59 = vpop.f32.mrf.mxu0 }
 0xb5a   : > { %4739 = vadd.xlane.f32.xlu1 %v4738_v43 }
 0xb62   : > { %4748 = vadd.xlane.f32.xlu1 %v4747_v62  ;;  %v4873_v11 = vpop.f32.mrf.mxu2 }
 0xb6a   : > { %4745 = vadd.xlane.f32.xlu1 %v4744_v49  ;;  %v4875_v61 = vpop.f32.mrf.mxu2 }
 0xb9a   : > { %v5656_v39 = vpop.permute.xlu1 %5655 }
 0xb9b   : > { %v5658_v50 = vunpack.i.h.bf16 %v5656_v39  ;;  %v5657_v24 = vunpack.i.l.bf16 %v5656_v39 }
 0xb9d   : > { %v9510_v53 = vsel %vm1108_vm8, %v5014_v6, %v5658_v50  ;;  %v9514_v28 = vsel %vm1108_vm8, %v9480_v20, %v5657_v24 }
 0xba2   : > { %v5666_v21 = vpop.permute.xlu0 %5665 }
 0xbc5   : > { %v4734_v25 = vpop.xlane.xlu1 %4733 }
 0xbc6   : > { %5995 = vrcp.f32 %v4734_v25  ;;  %v10014_v25 = vld [vmem:[#allocation44_spill] sm:$0xff] }
 0xbc7   : > { %5997 = vrcp.f32 %v3638_v51  ;;  %v4904_v51 = vpop.f32.mrf.mxu3 }
 0xbc8   : > { %5999 = vrcp.f32 %v3635_v34  ;;  %v5397_v34 = vld [vmem:[#allocation7 + $0x8] sm:$0xff] }
 0xbc9   : > { %6001 = vrcp.f32 %v4737_v54  ;;  %5100 = vmatpush.bf16.msrb.mxu0 %v5397_v34  ;;  %v10015_v54 = vld [vmem:[#allocation48_spill] sm:$0xff] }
 0xbcc   : > { %v5996_v16 = vpop.eup %5995 }
 0xbcd   : > { %v4910_v15 = vmul.f32 %v5996_v16, %v4813_v59  ;;  %v4740_v31 = vpop.xlane.xlu1 %4739  ;;  %v5998_v46 = vpop.eup %5997  ;;  %v5668_v16 = vunpack.i.h.bf16 %v5666_v21  ;;  %v5667_v59 = vunpack.i.l.bf16 %v5666_v21 }
 0xbce   : > { %6003 = vrcp.f32 %v4740_v31  ;;  %v6000_v17 = vpop.eup %5999  ;;  %v3806_v48 = vmul.f32 %v5998_v46, %v10010_v22 }
 0xbcf   : > { %v5659_v20 = vpack.i.bf16 %v4910_v15, %v4909_v23  ;;  %v6002_v2 = vpop.eup %6001  ;;  %6005 = vrcp.f32 %v3644_v7  ;;  %v3805_v40 = vmul.f32 %v6000_v17, %v10011_v26  ;;  %v4906_v45 = vpop.f32.mrf.mxu3  ;;  %v10017_v7 = vld [vmem:[#allocation43_spill] sm:$0xff] }
 0xbd0   : > { %6007 = vrcp.f32 %v3641_v9  ;;  %v4911_v13 = vmul.f32 %v6002_v2, %v4842_v5  ;;  %v5396_v9 = vld [vmem:[#allocation7] sm:$0xff]  ;;  %v5671_v5 = vpop.permute.xlu0 %5670 }
 0xbd1   : > { %5660 = vrot.lane.b32.xlu2 %v5659_v20, %s6207_s9  ;;  %v5684_v57 = vpack.i.bf16 %v3806_v48, %v3805_v40  ;;  %6009 = vrcp.f32 %v4743_v1  ;;  %5101 = vmatpush.bf16.msrb.mxu0 %v5396_v9  ;;  %v5673_v23 = vunpack.i.h.bf16 %v5671_v5  ;;  %v5672_v15 = vunpack.i.l.bf16 %v5671_v5  ;;  %v10025_v5 = vld [vmem:[#allocation50_spill] sm:$0xff] }
 0xbd4   : > { %v6004_v38 = vpop.eup %6003 }
 0xbd5   : > { %v4912_v10 = vmul.f32 %v6004_v38, %v4844_v30  ;;  %v4749_v18 = vpop.xlane.xlu1 %4748  ;;  %v6006_v12 = vpop.eup %6005 }
 0xbd6   : > { %v6008_v3 = vpop.eup %6007  ;;  %v3808_v42 = vmul.f32 %v6006_v12, %v10012_v36  ;;  %v10019_v12 = vld [vmem:[#allocation26_spill] sm:$0xff] }
 0xbd7   : > { %v5674_v27 = vpack.i.bf16 %v4912_v10, %v4911_v13  ;;  %v3807_v29 = vmul.f32 %v6008_v3, %v10013_v63  ;;  %v6010_v35 = vpop.eup %6009 }
 0xbd8   : > { %v4913_v0 = vmul.f32 %v6010_v35, %v4873_v11  ;;  %v5681_v11 = vpop.permute.xlu0 %5680  ;;  %v10021_v35 = vld [vmem:[#allocation47_spill] sm:$0xff] }
 0xbd9   : > { %5685 = vrot.lane.b32.xlu2 %v5684_v57, %s6201_s28  ;;  %5675 = vrot.lane.b32.xlu1 %v5674_v27, %s6207_s9  ;;  %v5699_v32 = vpack.i.bf16 %v3808_v42, %v3807_v29  ;;  %v5683_v42 = vunpack.i.h.bf16 %v5681_v11  ;;  %v5682_v63 = vunpack.i.l.bf16 %v5681_v11 }
 0xbdd   : > { %v4746_v56 = vpop.xlane.xlu1 %4745 }
 0xbde   : > { %6011 = vrcp.f32 %v4746_v56 }
 0xbdf   : > { %6013 = vrcp.f32 %v4749_v18  ;;  %v10018_v18 = vld [vmem:[#allocation51_spill] sm:$0xff] }
 0xbe0   : > { %6015 = vrcp.f32 %v4752_v4 }
 0xbe1   : > { %5700 = vrot.lane.b32.xlu2 %v5699_v32, %s6201_s28  ;;  %6017 = vrcp.f32 %v10014_v25  ;;  %v10024_v25 = vld [vmem:[#allocation41_spill] sm:$0xff] }
 0xbe2   : > { %6019 = vrcp.f32 %v10015_v54 }
 0xbe3   : > { %6021 = vrcp.f32 %v10018_v18 }
 0xbe4   : > { %v6012_v8 = vpop.eup %6011  ;;  %6023 = vrcp.f32 %v10019_v12 }
 0xbe5   : > { %v4914_v41 = vmul.f32 %v6012_v8, %v4875_v61  ;;  %v6014_v19 = vpop.eup %6013  ;;  %v10022_v8 = vld [vmem:[#allocation49_spill] sm:$0xff] }
 0xbe6   : > { %v4915_v47 = vmul.f32 %v6014_v19, %v4904_v51  ;;  %v6016_v43 = vpop.eup %6015  ;;  %v10020_v51 = vld [vmem:[#allocation58_spill] sm:$0xff] }
 0xbe7   : > { %v5689_v37 = vpack.i.bf16 %v4914_v41, %v4913_v0  ;;  %v4916_v62 = vmul.f32 %v6016_v43, %v4906_v45  ;;  %v6018_v44 = vpop.eup %6017  ;;  %6025 = vrcp.f32 %v10020_v51  ;;  %v10023_v0 = vld [vmem:[#allocation46_spill] sm:$0xff]  ;;  %v5696_v43 = vpop.permute.xlu0 %5695 }
 0xbe8   : > { %6027 = vrcp.f32 %v10023_v0 }
 0xbe9   : > { %5690 = vrot.lane.b32.xlu1 %v5689_v37, %s6207_s9  ;;  %v5704_v49 = vpack.i.bf16 %v4916_v62, %v4915_v47 }
 0xbf1   : > { %5705 = vrot.lane.b32.xlu1 %v5704_v49, %s6207_s9 }
 0xc2b   : > { %v5661_v55 = vpop.permute.xlu2 %5660 }
 0xc2c   : > { %v5663_v52 = vunpack.i.h.bf16 %v5661_v55  ;;  %v5662_v33 = vunpack.i.l.bf16 %v5661_v55 }
 0xc2e   : > { %v5030_v60 = vsel %vm5029_vm1, %v9514_v28, %v5662_v33  ;;  %v5031_v14 = vsel %vm5029_vm1, %v9510_v53, %v5663_v52  ;;  %v6020_v28 = vpop.eup %6019  ;;  %v10016_v53 = vld [vmem:[#allocation13_spill] sm:$0xff] }
 0xc2f   : > { %v5038_v39 = vpack.c.bf16 %v5030_v60, %v5030_v60  ;;  %v5039_v50 = vpack.c.bf16 %v5031_v14, %v5031_v14  ;;  %v1587_v31 = vmul.f32 %v6018_v44, %v10016_v53  ;;  %v1588_v20 = vmul.f32 %v6020_v28, %v10017_v7  ;;  %v6022_v36 = vpop.eup %6021 }
 0xc30   : > { %v6024_v29 = vpop.eup %6023  ;;  %v1590_v61 = vmul.f32 %v6022_v36, %v10022_v8  ;;  %v5698_v14 = vunpack.i.h.bf16 %v5696_v43 }
 0xc31   : > { %v5058_v24 = vunpack.c.l.b16 %v5038_v39  ;;  %v5059_v6 = vunpack.c.l.b16 %v5039_v50  ;;  %v5016_v17 = vsel %vm479_vm5, %v1588_v20, %v5668_v16  ;;  %v5015_v2 = vsel %vm479_vm5, %v1587_v31, %v5667_v59  ;;  %v6026_v60 = vpop.eup %6025 }
 0xc32   : > { %v5024_v38 = vsel %vm1108_vm8, %v5016_v17, %v5673_v23  ;;  %v5023_v30 = vsel %vm1108_vm8, %v5015_v2, %v5672_v15  ;;  %v1589_v4 = vmul.f32 %v6024_v29, %v10021_v35  ;;  %v5018_v37 = vsel %vm479_vm5, %v1590_v61, %v5683_v42  ;;  %v6028_v50 = vpop.eup %6027 }
 0xc33   : > { %v5066_v58 = vpack.c.b16 %v5059_v6, %v5058_v24  ;;  %v5686_v1 = vpop.permute.xlu2 %5685  ;;  %v5697_v39 = vunpack.i.l.bf16 %v5696_v43  ;;  %v1591_v54 = vmul.f32 %v6026_v60, %v10024_v25  ;;  %v1592_v44 = vmul.f32 %v6028_v50, %v10025_v5 }
 0xc34   : > { %v5688_v56 = vunpack.i.h.bf16 %v5686_v1  ;;  %v5687_v32 = vunpack.i.l.bf16 %v5686_v1  ;;  %v5017_v19 = vsel %vm479_vm5, %v1589_v4, %v5682_v63 }
 0xc35   : > { %5376 = vmatmul.msk.bf16.vlgmr.msrb.gmra.mxu0 %vm312_vm0, %v5066_v58  ;;  %v5020_v28 = vsel %vm479_vm5, %v1592_v44, %v5698_v14  ;;  %v5019_v23 = vsel %vm479_vm5, %v1591_v54, %v5697_v39 }
 0xc36   : > { %v5026_v62 = vsel %vm1108_vm8, %v5018_v37, %v5688_v56  ;;  %v5025_v49 = vsel %vm1108_vm8, %v5017_v19, %v5687_v32 }
 0xc3b   : > { %v5701_v34 = vpop.permute.xlu2 %5700 }
 0xc3c   : > { %v5703_v24 = vunpack.i.h.bf16 %v5701_v34  ;;  %v5702_v6 = vunpack.i.l.bf16 %v5701_v34 }
 0xc3e   : > { %v5028_v31 = vsel %vm1108_vm8, %v5020_v28, %v5703_v24  ;;  %v5027_v7 = vsel %vm1108_vm8, %v5019_v23, %v5702_v6 }
 0xc4b   : > { %v5676_v46 = vpop.permute.xlu1 %5675 }
 0xc4c   : > { %v5678_v22 = vunpack.i.h.bf16 %v5676_v46  ;;  %v5677_v48 = vunpack.i.l.bf16 %v5676_v46 }
 0xc4e   : > { %v5033_v26 = vsel %vm5029_vm1, %v5024_v38, %v5678_v22  ;;  %v5032_v40 = vsel %vm5029_vm1, %v5023_v30, %v5677_v48 }
 0xc4f   : > { %v5041_v13 = vpack.c.bf16 %v5033_v26, %v5033_v26  ;;  %v5040_v10 = vpack.c.bf16 %v5032_v40, %v5032_v40 }
 0xc51   : > { %v5061_v57 = vunpack.c.l.b16 %v5041_v13  ;;  %v5060_v27 = vunpack.c.l.b16 %v5040_v10 }
 0xc53   : > { %v5067_v3 = vpack.c.b16 %v5061_v57, %v5060_v27 }
 0xc55   : > { %5377 = vmatmul.msk.bf16.gmra.mxu0 %vm312_vm0, %v5067_v3 }
 0xc5b   : > { %v5691_v41 = vpop.permute.xlu1 %5690 }
 0xc5c   : > { %v5693_v45 = vunpack.i.h.bf16 %v5691_v41  ;;  %v5692_v47 = vunpack.i.l.bf16 %v5691_v41 }
 0xc5e   : > { %v5035_v9 = vsel %vm5029_vm1, %v5026_v62, %v5693_v45  ;;  %v5034_v55 = vsel %vm5029_vm1, %v5025_v49, %v5692_v47 }
 0xc5f   : > { %v5043_v52 = vpack.c.bf16 %v5035_v9, %v5035_v9  ;;  %v5042_v33 = vpack.c.bf16 %v5034_v55, %v5034_v55 }
 0xc61   : > { %v5063_v58 = vunpack.c.l.b16 %v5043_v52  ;;  %v5062_v21 = vunpack.c.l.b16 %v5042_v33 }
 0xc63   : > { %v5706_v16 = vpop.permute.xlu1 %5705  ;;  %v5068_v59 = vpack.c.b16 %v5063_v58, %v5062_v21 }
 0xc64   : > { %v5708_v15 = vunpack.i.h.bf16 %v5706_v16  ;;  %v5707_v53 = vunpack.i.l.bf16 %v5706_v16 }
 0xc65   : > { %5378 = vmatmul.msk.bf16.gmra.mxu0 %vm312_vm0, %v5068_v59 }
 0xc66   : > { %v5037_v20 = vsel %vm5029_vm1, %v5028_v31, %v5708_v15  ;;  %v5036_v46 = vsel %vm5029_vm1, %v5027_v7, %v5707_v53 }
 0xc67   : > { %v5045_v17 = vpack.c.bf16 %v5037_v20, %v5037_v20  ;;  %v5044_v2 = vpack.c.bf16 %v5036_v46, %v5036_v46 }
 0xc69   : > { %v5065_v22 = vunpack.c.l.b16 %v5045_v17  ;;  %v5064_v48 = vunpack.c.l.b16 %v5044_v2 }
 0xc6b   : > { %v5069_v38 = vpack.c.b16 %v5065_v22, %v5064_v48 }
 0xc75   : > { %5379 = vmatmul.msk.bf16.gmra.mxu0 %vm312_vm0, %v5069_v38 }
 0xcb2   : > { %v5103_v30 = vpop.f32.mrf.mxu0 }
 0xcb3   : > { %5123 = vst.msk [vmem:[%s224_s10] sm:$0xff] %vm312_vm0, %v5103_v30 }
 0xcba   : > { %v5105_v26 = vpop.f32.mrf.mxu0 }
 0xcbb   : > { %5124 = vst.msk [vmem:[%s224_s10 + $0x8] sm:$0xff] %vm312_vm0, %v5105_v26 }
 0xcd2   : > { %v5108_v40 = vpop.f32.mrf.mxu0 }
 0xcd3   : > { %5125 = vst.msk [vmem:[%s224_s10 + $0x10] sm:$0xff] %vm312_vm0, %v5108_v40 }
 0xcda   : > { %v5110_v13 = vpop.f32.mrf.mxu0 }
 0xcdb   : > { %5126 = vst.msk [vmem:[%s224_s10 + $0x18] sm:$0xff] %vm312_vm0, %v5110_v13 }
 0xce2   : > { %v5113_v10 = vpop.f32.mrf.mxu0 }
 0xce3   : > { %5127 = vst.msk [vmem:[%s224_s10 + $0x20] sm:$0xff] %vm312_vm0, %v5113_v10 }
 0xcea   : > { %v5115_v18 = vpop.f32.mrf.mxu0 }
 0xceb   : > { %5128 = vst.msk [vmem:[%s224_s10 + $0x28] sm:$0xff] %vm312_vm0, %v5115_v18 }
 0xcf2   : > { %v5118_v57 = vpop.f32.mrf.mxu0 }
 0xcf3   : > { %5129 = vst.msk [vmem:[%s224_s10 + $0x30] sm:$0xff] %vm312_vm0, %v5118_v57 }
 0xcfa   : > { %v5120_v27 = vpop.f32.mrf.mxu0 }
 0xcfb   : > { %5130 = vst.msk [vmem:[%s224_s10 + $0x38] sm:$0xff] %vm312_vm0, %v5120_v27 }
 0xcfc   : > { %6146 = shalt.err (!%p6143_p10)
}
 0xcfd   : > { %s6208_s25 = smov 128  }
 0xcfe   : > { %5416 = dma.vmem_to_hbm [thread:$0]  (%p6298_p5), %s5146_s26, 1024, %s5148_s27, %s5132_s5, %s6208_s25, %s6208_s25, %s6206_s7  }
 0xcff PF: > { %s5162_s6 = sand.u32 1, %s6177_s12   ;;  %p10026_p12 = scmp.ge.s32.totalorder %s6189_s15, 2 }
 0xd00   : > { %s5163_s9 = scalar_lea.sflag [#allocation4], %s5162_s6 }
 0xd01   : > { %p5430_p13 = pnand %p10026_p12, %p6264_p6 }
 0xd03   : > { %p5431_p0 = pneg %p5430_p13 }
 0xd05   : > { %6172 = dma.done.wait (%p5431_p0), %s5163_s9, 1024  }
 0xd06   : > { %6174 = vsyncadd (%p5431_p0), %s5163_s9, 4294966272  ;;  %p17_p3 = scmp.ge.s32.totalorder %s6285_s8, 4   ;;  %s10027_s12 = smov %s6181_s13 }
 0xd07   : > { %s10028_s13 = smov %s6185_s14  ;;  %s10029_s14 = smov %s6294_s11 }
 0xd08   : > { %s10030_s15 = smov %s6285_s8  ;;  %19 = sbr.rel (!%p17_p3) target bundleno = 6 (0x6), region = 85 }
 0xd0d   :  { %5169 = vsyncpa [#allocation3], 1 }
 0xd0e   :  { %5171 = vsyncpa [#allocation3 + $0x1], 1 }
 0xd0f   :  { %5172 = vsyncpa [#allocation6], 1 }
 0xd10   :  { %5173 = vsyncpa [#allocation4], 1 }
 0xd11   :  { %5175 = vsyncpa [#allocation4 + $0x1], 1 }

</bundles_post_ra>
